<compile_context>
chip_gen: v7x
topology: tpu7x:2x2x1
jax: 0.10.0
libtpu: 0.0.40
codegen_flags: <defaults>
</compile_context>

<pallas_src>
import jax
import jax.numpy as jnp
from jax import lax
from jax.experimental import pallas as pl
from jax.experimental.pallas import tpu as pltpu


# ----------------------------------------------------------------------------
# Fused Pallas kernel: `bt` batch elements per grid step
# ----------------------------------------------------------------------------
def _multitask_fused_kernel(a1_ref, w1_ref, b1_ref, scale_ref, shift_ref,
                            w2_ref, b2_ref, w3_ref, b3_ref,
                            wq_ref, fcb_ref, fc1w_ref, fc1b_ref,
                            hw_ref, hb_ref,
                            o_ref,
                            y1_ref, lhs2_ref, y2_ref, lhs3_ref):
    f32 = jnp.float32
    bt = y1_ref.shape[0]

    def mm(a, b):
        return jnp.dot(a, b, preferred_element_type=f32)

    # ---- conv1: ONE (bt*128, 60)@(60, 256) matmul covering all four stride-4
    # phases of every element; then ReLU and the eval-mode BatchNorm affine
    # (forward() order is conv -> relu -> bn -> pool; pool == subsample,
    # already folded into the stride-2 im2col rows).
    z1 = mm(a1_ref[...], w1_ref[...]) + b1_ref[...]
    y1 = jnp.maximum(z1, 0.0) * scale_ref[...] + shift_ref[...]       # (bt*128, 256)
    for b in range(bt):
        y1_ref[b] = y1[b * 128:(b + 1) * 128, :]

    # ---- conv2 (pool folded): one K-concatenated matmul covering BOTH output
    # parities. Per element the LHS rows are 0..31 = even outputs e (pooled
    # index 2e), 32..63 = odd outputs o (pooled index 2o+1). Tap k of the even
    # parity reads pooled-conv1 row 4e+k, the odd parity reads 4o+2+k; in the
    # phase-major (r*32+q) layout of y1 these are the 32-row windows below
    # (rows e=31 / o>=30 are garbage and never feed a valid conv3 row).
    EVEN_OFF = (0, 32, 64, 96, 1)     # ph0, ph1, ph2, ph3, ph0 shifted by +1
    ODD_OFF = (64, 96, 1, 33, 65)     # ph2, ph3, ph0+1, ph1+1, ph2+1
    for b in range(bt):
        r0 = b * 64
        for k in range(5):
            c0 = k * 256
            lhs2_ref[r0:r0 + 32, c0:c0 + 256] = \
                y1_ref[b, EVEN_OFF[k]:EVEN_OFF[k] + 32, :]
            lhs2_ref[r0 + 32:r0 + 64, c0:c0 + 256] = \
                y1_ref[b, ODD_OFF[k]:ODD_OFF[k] + 32, :]
    z2 = mm(lhs2_ref[...], w2_ref[...]) + b2_ref[...]                 # (bt*64, 256)
    y2 = jnp.maximum(z2, 0.0)                                         # lanes >=196 are 0
    for b in range(bt):
        y2_ref[b, 0:64, :] = y2[b * 64:(b + 1) * 64, :]
    y2_ref[:, 64:72, :] = jnp.zeros((bt, 8, 256), f32)                # pad rows for tap 3

    # ---- conv3 (pool folded): one K-concatenated matmul, 32 rows per element
    # (valid pooled positions q = 0..28; rows q >= 29 are finite garbage and
    # get killed by the all-zero fc-weight columns below).
    C3_OFF = (0, 32, 1, 33, 2)        # y2e[q], y2o[q], y2e[q+1], y2o[q+1], y2e[q+2]
    for b in range(bt):
        r0 = b * 32
        for k in range(5):
            c0 = k * 256
            lhs3_ref[r0:r0 + 32, c0:c0 + 256] = \
                y2_ref[b, C3_OFF[k]:C3_OFF[k] + 32, :]
    z3 = mm(lhs3_ref[...], w3_ref[...]) + b3_ref[...]
    y3 = jnp.maximum(z3, 0.0)                                         # (bt*32, 128)

    # ---- fc with NO flatten and NO transposed operand:
    #   h[b, n] = sum_{l,c} y3[b*32+l, c] * fc_w[n, c*29+l]
    # Contract over c against wq[c, l'*32+n], keep the l == l' diagonal blocks,
    # fold the 32 lane-groups with a 0/1 matmul, and sum each element's 32 rows
    # with a 0/1 selection matmul. Everything is aligned MXU/VPU work.
    rows = bt * 32
    q_full = mm(y3, wq_ref[...])                                      # (rows, 1024)
    l_of_row = lax.broadcasted_iota(jnp.int32, (rows, 1024), 0) & 31
    l_of_col = lax.broadcasted_iota(jnp.int32, (rows, 1024), 1) >> 5
    q_diag = jnp.where(l_of_row == l_of_col, q_full, 0.0)
    fold = jnp.where(
        (lax.broadcasted_iota(jnp.int32, (1024, 32), 0) & 31) ==
        lax.broadcasted_iota(jnp.int32, (1024, 32), 1), 1.0, 0.0).astype(f32)
    h_rows = mm(q_diag, fold)                                         # (rows, 32)
    pick = jnp.where(
        (lax.broadcasted_iota(jnp.int32, (bt, rows), 1) >> 5) ==
        lax.broadcasted_iota(jnp.int32, (bt, rows), 0), 1.0, 0.0).astype(f32)
    h = jnp.tanh(mm(pick, h_rows) + fcb_ref[...])                     # (bt, 32)
    h = jnp.tanh(mm(h, fc1w_ref[...]) + fc1b_ref[...])                # (bt, 16)
    logits = mm(h, hw_ref[...]) + hb_ref[...]                         # (bt, 4)
    o_ref[0] = jax.nn.sigmoid(logits)


# ----------------------------------------------------------------------------
# Wrapper: im2col prep (tiny, on the 24 KiB input) + single pallas_call
# ----------------------------------------------------------------------------
def _conv1_im2col_rows(x):
    """x: (B, 12, 256) -> (B, 128, 60) stride-2 conv1 im2col, phase-major rows.

    Row r*32 + q is the im2col row of pooled conv1 output position 4q + r
    (column k*12 + c = x[b, c, 2*(4q+r) + k]); positions 126/127 are zero pad.
    """
    B = x.shape[0]
    cols = jnp.stack([x[:, :, k:k + 2 * 126:2] for k in range(5)], axis=1)  # (B,5,12,126)
    a = cols.transpose(0, 3, 1, 2).reshape(B, 126, 60)                      # (B,126,60)
    a = jnp.pad(a, ((0, 0), (0, 2), (0, 0)))                                # (B,128,60)
    return a.reshape(B, 32, 4, 60).transpose(0, 2, 1, 3).reshape(B, 128, 60)


@jax.jit
def multitask_forward(x, kp):
    x = jnp.reshape(x, (-1, 12, 256)).astype(jnp.float32)
    B = x.shape[0]
    # Elements per grid step: fill the MXU M dimension while keeping the grid
    # length >= 2 so both v7x TensorCores get a step even for small batches.
    bt = min(8, pl.cdiv(B, 2)) if B > 1 else 1
    g = pl.cdiv(B, bt)
    bpad = g * bt

    a1 = _conv1_im2col_rows(x)
    if bpad != B:
        a1 = jnp.pad(a1, ((0, bpad - B), (0, 0), (0, 0)))
    a1 = a1.reshape(bpad * 128, 60)

    cst = lambda i: (0, 0)
    out = pl.pallas_call(
        _multitask_fused_kernel,
        out_shape=jax.ShapeDtypeStruct((g, bt, 4), jnp.float32),
        grid=(g,),
        in_specs=[
            pl.BlockSpec((bt * 128, 60), lambda i: (i, 0)),   # conv1 im2col rows
            pl.BlockSpec((60, 256), cst),                     # w1
            pl.BlockSpec((1, 256), cst),                      # b1
            pl.BlockSpec((1, 256), cst),                      # BN scale (post-ReLU)
            pl.BlockSpec((1, 256), cst),                      # BN shift
            pl.BlockSpec((1280, 256), cst),                   # w2 (K-concat, N padded)
            pl.BlockSpec((1, 256), cst),                      # b2 (padded)
            pl.BlockSpec((1280, 128), cst),                   # w3 (K-concat, padded rows)
            pl.BlockSpec((1, 128), cst),                      # b3
            pl.BlockSpec((128, 1024), cst),                   # fc weight wq[c, l*32+n]
            pl.BlockSpec((1, 32), cst),                       # fc bias
            pl.BlockSpec((32, 16), cst),                      # fc_1 weight
            pl.BlockSpec((1, 16), cst),                       # fc_1 bias
            pl.BlockSpec((16, 4), cst),                       # 4 heads, stacked
            pl.BlockSpec((1, 4), cst),                        # head biases
        ],
        out_specs=pl.BlockSpec((1, bt, 4), lambda i: (i, 0, 0)),
        scratch_shapes=[
            pltpu.VMEM((bt, 128, 256), jnp.float32),          # pooled conv1 (phase-major)
            pltpu.VMEM((bt * 64, 1280), jnp.float32),         # conv2 K-concat LHS
            pltpu.VMEM((bt, 72, 256), jnp.float32),           # pooled conv2 (+pad rows)
            pltpu.VMEM((bt * 32, 1280), jnp.float32),         # conv3 K-concat LHS
        ],
        compiler_params=pltpu.CompilerParams(
            dimension_semantics=("parallel",),
            vmem_limit_bytes=32 * 1024 * 1024),
    )(a1, kp["w1"], kp["b1"], kp["bn_scale"], kp["bn_shift"],
      kp["w2c"], kp["b2"], kp["w3c"], kp["b3"],
      kp["wq"], kp["fc_b"], kp["fc1_w"], kp["fc1_b"],
      kp["heads_w"], kp["heads_b"])

    probs = out.reshape(bpad, 4)[:B]
    return [probs[:, 0:1], probs[:, 1:2], probs[:, 2:3], probs[:, 3:4]]


# ----------------------------------------------------------------------------
# Parameters: synthetic weights in PyTorch layouts + conversion to kernel layouts
# ----------------------------------------------------------------------------
def init_torch_params(key):
    ks = jax.random.split(key, 16)

    def nrm(k, shape, scale=0.05):
        return (scale * jax.random.normal(k, shape)).astype(jnp.float32)

    tp = {}
    tp["w1"] = nrm(ks[0], (256, 12, 5))        # Conv1d weight (Cout, Cin, K)
    tp["b1"] = nrm(ks[1], (256,))
    tp["w2"] = nrm(ks[2], (196, 256, 5))
    tp["b2"] = nrm(ks[3], (196,))
    tp["w3"] = nrm(ks[4], (128, 196, 5))
    tp["b3"] = nrm(ks[5], (128,))
    tp["gamma"] = 1.0 + nrm(ks[6], (256,), 0.1)   # BatchNorm1d(256), eval mode
    tp["beta"] = nrm(ks[7], (256,), 0.1)
    tp["mean"] = nrm(ks[8], (256,), 0.1)
    tp["var"] = 1.0 + jnp.abs(nrm(ks[9], (256,), 0.1))
    tp["fc_w"] = nrm(ks[10], (32, 3712))       # Linear (out, in); in index = c*29 + l
    tp["fc_b"] = nrm(ks[11], (32,))
    tp["fc1_w"] = nrm(ks[12], (16, 32))
    tp["fc1_b"] = nrm(ks[13], (16,))
    tp["heads_w"] = nrm(ks[14], (4, 16))       # fc1..fc4 stacked: (4, 16)
    tp["heads_b"] = nrm(ks[15], (4,))
    return tp


def prepare_kernel_params(tp, eps=1e-5):
    scale = tp["gamma"] / jnp.sqrt(tp["var"] + eps)
    shift = tp["beta"] - tp["mean"] * scale

    kp = {}
    # conv1: (Cout, Cin, K) -> im2col layout (K*Cin, Cout); im2col column k*12+c.
    kp["w1"] = jnp.transpose(tp["w1"], (2, 1, 0)).reshape(60, 256)
    kp["b1"] = tp["b1"].reshape(1, 256)
    # Eval-mode BatchNorm as a post-ReLU affine; works for any gamma sign.
    kp["bn_scale"] = scale.reshape(1, 256)
    kp["bn_shift"] = shift.reshape(1, 256)
    # conv2: taps concatenated along K (row = k*256 + c_in); N padded 196->256.
    w2 = jnp.transpose(tp["w2"], (2, 1, 0)).reshape(5 * 256, 196)
    kp["w2c"] = jnp.pad(w2, ((0, 0), (0, 60)))
    kp["b2"] = jnp.pad(tp["b2"], (0, 60)).reshape(1, 256)
    # conv3: taps concatenated along K; each tap's c_in padded 196->256 with
    # zero rows (matches the zero lanes of the padded conv2 output).
    w3 = jnp.pad(jnp.transpose(tp["w3"], (2, 1, 0)), ((0, 0), (0, 60), (0, 0)))
    kp["w3c"] = w3.reshape(5 * 256, 128)
    kp["b3"] = tp["b3"].reshape(1, 128)
    # fc: wq[c, l*32 + n] = fc_w[n, c*29 + l]; positions l = 29..31 are zero so
    # the kernel's garbage conv3 rows contribute nothing.
    wq = jnp.transpose(tp["fc_w"].reshape(32, 128, 29), (1, 2, 0))   # (c, l, n)
    wq = jnp.pad(wq, ((0, 0), (0, 3), (0, 0)))                       # (128, 32, 32)
    kp["wq"] = wq.reshape(128, 1024)
    kp["fc_b"] = tp["fc_b"].reshape(1, 32)
    kp["fc1_w"] = tp["fc1_w"].T                 # (32, 16)
    kp["fc1_b"] = tp["fc1_b"].reshape(1, 16)
    kp["heads_w"] = tp["heads_w"].T             # (16, 4)
    kp["heads_b"] = tp["heads_b"].reshape(1, 4)
    return kp


# ----------------------------------------------------------------------------
# Pure-JAX reference (PyTorch layouts / op order) for correctness check
# ----------------------------------------------------------------------------
def ref_forward(x, tp, eps=1e-5):
    x = jnp.reshape(x, (-1, 12, 256)).astype(jnp.float32)

    def conv1d(x, w, b):                       # x (B,C,L), w (O,C,K)
        K = w.shape[2]
        Lout = x.shape[2] - K + 1
        acc = b[None, :, None]
        for k in range(K):
            acc = acc + jnp.einsum("oc,bcl->bol", w[:, :, k], x[:, :, k:k + Lout])
        return acc

    scale = tp["gamma"] / jnp.sqrt(tp["var"] + eps)
    shift = tp["beta"] - tp["mean"] * scale

    y = jnp.maximum(conv1d(x, tp["w1"], tp["b1"]), 0.0)
    y = y * scale[None, :, None] + shift[None, :, None]
    y = y[:, :, ::2]                           # MaxPool1d(1, stride=2) == subsample
    y = jnp.maximum(conv1d(y, tp["w2"], tp["b2"]), 0.0)[:, :, ::2]
    y = jnp.maximum(conv1d(y, tp["w3"], tp["b3"]), 0.0)[:, :, ::2]
    feats = y.reshape(y.shape[0], -1)          # channel-major flatten (PyTorch .view)
    h = jnp.tanh(feats @ tp["fc_w"].T + tp["fc_b"])
    h = jnp.tanh(h @ tp["fc1_w"].T + tp["fc1_b"])
    p = jax.nn.sigmoid(h @ tp["heads_w"].T + tp["heads_b"])
    return [p[:, 0:1], p[:, 1:2], p[:, 2:3], p[:, 3:4]]


if __name__ == "__main__":
    key = jax.random.PRNGKey(0)
    k_params, k_x = jax.random.split(key)
    torch_params = init_torch_params(k_params)
    kernel_params = prepare_kernel_params(torch_params)

    for B in (8, 3):                            # batched path + batch-padding path
        x = jax.random.normal(jax.random.fold_in(k_x, B), (B, 12, 256),
                              dtype=jnp.float32)
        outs = jax.block_until_ready(multitask_forward(x, kernel_params))
        refs = jax.block_until_ready(ref_forward(x, torch_params))
        for o, r in zip(outs, refs):
            assert o.shape == (B, 1), o.shape
            err = float(jnp.max(jnp.abs(o - r)))
            assert err < 5e-4, err

    print("KERNEL_OK")
</pallas_src>

<mosaic_0001>
module attributes {stable_mosaic.version = 11 : i64} {
  func.func @_multitask_fused_kernel(%arg0: i32, %arg1: memref<512x60xf32, #tpu.memory_space<vmem>>, %arg2: memref<60x256xf32, #tpu.memory_space<vmem>>, %arg3: memref<1x256xf32, #tpu.memory_space<vmem>>, %arg4: memref<1x256xf32, #tpu.memory_space<vmem>>, %arg5: memref<1x256xf32, #tpu.memory_space<vmem>>, %arg6: memref<1280x256xf32, #tpu.memory_space<vmem>>, %arg7: memref<1x256xf32, #tpu.memory_space<vmem>>, %arg8: memref<1280x128xf32, #tpu.memory_space<vmem>>, %arg9: memref<1x128xf32, #tpu.memory_space<vmem>>, %arg10: memref<128x1024xf32, #tpu.memory_space<vmem>>, %arg11: memref<1x32xf32, #tpu.memory_space<vmem>>, %arg12: memref<32x16xf32, #tpu.memory_space<vmem>>, %arg13: memref<1x16xf32, #tpu.memory_space<vmem>>, %arg14: memref<16x4xf32, #tpu.memory_space<vmem>>, %arg15: memref<1x4xf32, #tpu.memory_space<vmem>>, %arg16: memref<1x4x4xf32, #tpu.memory_space<vmem>>, %arg17: memref<4x128x256xf32, #tpu.memory_space<vmem>>, %arg18: memref<256x1280xf32, #tpu.memory_space<vmem>>, %arg19: memref<4x72x256xf32, #tpu.memory_space<vmem>>, %arg20: memref<128x1280xf32, #tpu.memory_space<vmem>>) attributes {dimension_semantics = [#tpu.dimension_semantics<parallel>], iteration_bounds = array<i64: 2>, scalar_prefetch = 0 : i64, scratch_operands = 4 : i64, tpu.core_type = #tpu.core_type<tc>, window_params = [{transform_indices = @transform_0, window_bounds = array<i64: 512, 60>}, {pipeline_mode = #tpu.pipeline_mode<synchronous>, transform_indices = @transform_1, window_bounds = array<i64: 60, 256>}, {pipeline_mode = #tpu.pipeline_mode<synchronous>, transform_indices = @transform_2, window_bounds = array<i64: 1, 256>}, {pipeline_mode = #tpu.pipeline_mode<synchronous>, transform_indices = @transform_3, window_bounds = array<i64: 1, 256>}, {pipeline_mode = #tpu.pipeline_mode<synchronous>, transform_indices = @transform_4, window_bounds = array<i64: 1, 256>}, {pipeline_mode = #tpu.pipeline_mode<synchronous>, transform_indices = @transform_5, window_bounds = array<i64: 1280, 256>}, {pipeline_mode = #tpu.pipeline_mode<synchronous>, transform_indices = @transform_6, window_bounds = array<i64: 1, 256>}, {pipeline_mode = #tpu.pipeline_mode<synchronous>, transform_indices = @transform_7, window_bounds = array<i64: 1280, 128>}, {pipeline_mode = #tpu.pipeline_mode<synchronous>, transform_indices = @transform_8, window_bounds = array<i64: 1, 128>}, {pipeline_mode = #tpu.pipeline_mode<synchronous>, transform_indices = @transform_9, window_bounds = array<i64: 128, 1024>}, {pipeline_mode = #tpu.pipeline_mode<synchronous>, transform_indices = @transform_10, window_bounds = array<i64: 1, 32>}, {pipeline_mode = #tpu.pipeline_mode<synchronous>, transform_indices = @transform_11, window_bounds = array<i64: 32, 16>}, {pipeline_mode = #tpu.pipeline_mode<synchronous>, transform_indices = @transform_12, window_bounds = array<i64: 1, 16>}, {pipeline_mode = #tpu.pipeline_mode<synchronous>, transform_indices = @transform_13, window_bounds = array<i64: 16, 4>}, {pipeline_mode = #tpu.pipeline_mode<synchronous>, transform_indices = @transform_14, window_bounds = array<i64: 1, 4>}, {transform_indices = @transform_15, window_bounds = array<i64: 1, 4, 4>}]} {
    %c0 = arith.constant 0 : index
    %c0_0 = arith.constant 0 : index
    %0 = vector.load %arg1[%c0, %c0_0] : memref<512x60xf32, #tpu.memory_space<vmem>>, vector<512x60xf32>
    %c0_1 = arith.constant 0 : index
    %c0_2 = arith.constant 0 : index
    %1 = vector.load %arg2[%c0_1, %c0_2] : memref<60x256xf32, #tpu.memory_space<vmem>>, vector<60x256xf32>
    %cst = arith.constant dense<0.000000e+00> : vector<512x256xf32>
    %2 = tpu.matmul %0, %1, %cst {dimension_numbers = #tpu.dot_dimension_numbers<[1], [0], [0], [1], [0, 0, 1, 1], [], []>} : vector<512x60xf32>, vector<60x256xf32>, vector<512x256xf32> -> vector<512x256xf32>
    %c0_3 = arith.constant 0 : index
    %c0_4 = arith.constant 0 : index
    %3 = vector.load %arg3[%c0_3, %c0_4] : memref<1x256xf32, #tpu.memory_space<vmem>>, vector<1x256xf32>
    %4 = vector.broadcast %3 : vector<1x256xf32> to vector<512x256xf32>
    %5 = arith.addf %2, %4 : vector<512x256xf32>
    %cst_5 = arith.constant 0.000000e+00 : f32
    %6 = vector.broadcast %cst_5 : f32 to vector<512x256xf32>
    %7 = arith.maximumf %5, %6 : vector<512x256xf32>
    %c0_6 = arith.constant 0 : index
    %c0_7 = arith.constant 0 : index
    %8 = vector.load %arg4[%c0_6, %c0_7] : memref<1x256xf32, #tpu.memory_space<vmem>>, vector<1x256xf32>
    %9 = vector.broadcast %8 : vector<1x256xf32> to vector<512x256xf32>
    %10 = arith.mulf %7, %9 : vector<512x256xf32>
    %c0_8 = arith.constant 0 : index
    %c0_9 = arith.constant 0 : index
    %11 = vector.load %arg5[%c0_8, %c0_9] : memref<1x256xf32, #tpu.memory_space<vmem>>, vector<1x256xf32>
    %12 = vector.broadcast %11 : vector<1x256xf32> to vector<512x256xf32>
    %13 = arith.addf %10, %12 : vector<512x256xf32>
    %14 = vector.extract_strided_slice %13 {offsets = [0, 0], sizes = [128, 256], strides = [1, 1]} : vector<512x256xf32> to vector<128x256xf32>
    %c0_10 = arith.constant 0 : index
    %c0_11 = arith.constant 0 : index
    %c0_12 = arith.constant 0 : index
    %15 = vector.load %arg17[%c0_10, %c0_11, %c0_12] : memref<4x128x256xf32, #tpu.memory_space<vmem>>, vector<1x128x256xf32>
    %16 = vector.shape_cast %15 : vector<1x128x256xf32> to vector<128x256xf32>
    %17 = vector.shape_cast %14 : vector<128x256xf32> to vector<1x128x256xf32>
    tpu.vector_store %arg17[%c0_10, %c0_11, %c0_12], %17 {strides = array<i32>} : memref<4x128x256xf32, #tpu.memory_space<vmem>>, vector<1x128x256xf32>,
    %18 = vector.extract_strided_slice %13 {offsets = [128, 0], sizes = [128, 256], strides = [1, 1]} : vector<512x256xf32> to vector<128x256xf32>
    %c1 = arith.constant 1 : index
    %c0_13 = arith.constant 0 : index
    %c0_14 = arith.constant 0 : index
    %19 = vector.load %arg17[%c1, %c0_13, %c0_14] : memref<4x128x256xf32, #tpu.memory_space<vmem>>, vector<1x128x256xf32>
    %20 = vector.shape_cast %19 : vector<1x128x256xf32> to vector<128x256xf32>
    %21 = vector.shape_cast %18 : vector<128x256xf32> to vector<1x128x256xf32>
    tpu.vector_store %arg17[%c1, %c0_13, %c0_14], %21 {strides = array<i32>} : memref<4x128x256xf32, #tpu.memory_space<vmem>>, vector<1x128x256xf32>,
    %22 = vector.extract_strided_slice %13 {offsets = [256, 0], sizes = [128, 256], strides = [1, 1]} : vector<512x256xf32> to vector<128x256xf32>
    %c2 = arith.constant 2 : index
    %c0_15 = arith.constant 0 : index
    %c0_16 = arith.constant 0 : index
    %23 = vector.load %arg17[%c2, %c0_15, %c0_16] : memref<4x128x256xf32, #tpu.memory_space<vmem>>, vector<1x128x256xf32>
    %24 = vector.shape_cast %23 : vector<1x128x256xf32> to vector<128x256xf32>
    %25 = vector.shape_cast %22 : vector<128x256xf32> to vector<1x128x256xf32>
    tpu.vector_store %arg17[%c2, %c0_15, %c0_16], %25 {strides = array<i32>} : memref<4x128x256xf32, #tpu.memory_space<vmem>>, vector<1x128x256xf32>,
    %26 = vector.extract_strided_slice %13 {offsets = [384, 0], sizes = [128, 256], strides = [1, 1]} : vector<512x256xf32> to vector<128x256xf32>
    %c3 = arith.constant 3 : index
    %c0_17 = arith.constant 0 : index
    %c0_18 = arith.constant 0 : index
    %27 = vector.load %arg17[%c3, %c0_17, %c0_18] : memref<4x128x256xf32, #tpu.memory_space<vmem>>, vector<1x128x256xf32>
    %28 = vector.shape_cast %27 : vector<1x128x256xf32> to vector<128x256xf32>
    %29 = vector.shape_cast %26 : vector<128x256xf32> to vector<1x128x256xf32>
    tpu.vector_store %arg17[%c3, %c0_17, %c0_18], %29 {strides = array<i32>} : memref<4x128x256xf32, #tpu.memory_space<vmem>>, vector<1x128x256xf32>,
    %c0_19 = arith.constant 0 : index
    %c0_20 = arith.constant 0 : index
    %c0_21 = arith.constant 0 : index
    %30 = vector.load %arg17[%c0_19, %c0_20, %c0_21] : memref<4x128x256xf32, #tpu.memory_space<vmem>>, vector<1x32x256xf32>
    %31 = vector.shape_cast %30 : vector<1x32x256xf32> to vector<32x256xf32>
    %c0_22 = arith.constant 0 : index
    %c0_23 = arith.constant 0 : index
    %32 = vector.load %arg18[%c0_22, %c0_23] : memref<256x1280xf32, #tpu.memory_space<vmem>>, vector<32x256xf32>
    tpu.vector_store %arg18[%c0_22, %c0_23], %31 {strides = array<i32>} : memref<256x1280xf32, #tpu.memory_space<vmem>>, vector<32x256xf32>,
    %c0_24 = arith.constant 0 : index
    %c64 = arith.constant 64 : index
    %c0_25 = arith.constant 0 : index
    %33 = vector.load %arg17[%c0_24, %c64, %c0_25] : memref<4x128x256xf32, #tpu.memory_space<vmem>>, vector<1x32x256xf32>
    %34 = vector.shape_cast %33 : vector<1x32x256xf32> to vector<32x256xf32>
    %c32 = arith.constant 32 : index
    %c0_26 = arith.constant 0 : index
    %35 = vector.load %arg18[%c32, %c0_26] : memref<256x1280xf32, #tpu.memory_space<vmem>>, vector<32x256xf32>
    tpu.vector_store %arg18[%c32, %c0_26], %34 {strides = array<i32>} : memref<256x1280xf32, #tpu.memory_space<vmem>>, vector<32x256xf32>,
    %c0_27 = arith.constant 0 : index
    %c32_28 = arith.constant 32 : index
    %c0_29 = arith.constant 0 : index
    %36 = vector.load %arg17[%c0_27, %c32_28, %c0_29] : memref<4x128x256xf32, #tpu.memory_space<vmem>>, vector<1x32x256xf32>
    %37 = vector.shape_cast %36 : vector<1x32x256xf32> to vector<32x256xf32>
    %c0_30 = arith.constant 0 : index
    %c256 = arith.constant 256 : index
    %38 = vector.load %arg18[%c0_30, %c256] : memref<256x1280xf32, #tpu.memory_space<vmem>>, vector<32x256xf32>
    tpu.vector_store %arg18[%c0_30, %c256], %37 {strides = array<i32>} : memref<256x1280xf32, #tpu.memory_space<vmem>>, vector<32x256xf32>,
    %c0_31 = arith.constant 0 : index
    %c96 = arith.constant 96 : index
    %c0_32 = arith.constant 0 : index
    %39 = vector.load %arg17[%c0_31, %c96, %c0_32] : memref<4x128x256xf32, #tpu.memory_space<vmem>>, vector<1x32x256xf32>
    %40 = vector.shape_cast %39 : vector<1x32x256xf32> to vector<32x256xf32>
    %c32_33 = arith.constant 32 : index
    %c256_34 = arith.constant 256 : index
    %41 = vector.load %arg18[%c32_33, %c256_34] : memref<256x1280xf32, #tpu.memory_space<vmem>>, vector<32x256xf32>
    tpu.vector_store %arg18[%c32_33, %c256_34], %40 {strides = array<i32>} : memref<256x1280xf32, #tpu.memory_space<vmem>>, vector<32x256xf32>,
    %c0_35 = arith.constant 0 : index
    %c64_36 = arith.constant 64 : index
    %c0_37 = arith.constant 0 : index
    %42 = vector.load %arg17[%c0_35, %c64_36, %c0_37] : memref<4x128x256xf32, #tpu.memory_space<vmem>>, vector<1x32x256xf32>
    %43 = vector.shape_cast %42 : vector<1x32x256xf32> to vector<32x256xf32>
    %c0_38 = arith.constant 0 : index
    %c512 = arith.constant 512 : index
    %44 = vector.load %arg18[%c0_38, %c512] : memref<256x1280xf32, #tpu.memory_space<vmem>>, vector<32x256xf32>
    tpu.vector_store %arg18[%c0_38, %c512], %43 {strides = array<i32>} : memref<256x1280xf32, #tpu.memory_space<vmem>>, vector<32x256xf32>,
    %c0_39 = arith.constant 0 : index
    %c1_40 = arith.constant 1 : index
    %c0_41 = arith.constant 0 : index
    %45 = vector.load %arg17[%c0_39, %c1_40, %c0_41] : memref<4x128x256xf32, #tpu.memory_space<vmem>>, vector<1x32x256xf32>
    %46 = vector.shape_cast %45 : vector<1x32x256xf32> to vector<32x256xf32>
    %c32_42 = arith.constant 32 : index
    %c512_43 = arith.constant 512 : index
    %47 = vector.load %arg18[%c32_42, %c512_43] : memref<256x1280xf32, #tpu.memory_space<vmem>>, vector<32x256xf32>
    tpu.vector_store %arg18[%c32_42, %c512_43], %46 {strides = array<i32>} : memref<256x1280xf32, #tpu.memory_space<vmem>>, vector<32x256xf32>,
    %c0_44 = arith.constant 0 : index
    %c96_45 = arith.constant 96 : index
    %c0_46 = arith.constant 0 : index
    %48 = vector.load %arg17[%c0_44, %c96_45, %c0_46] : memref<4x128x256xf32, #tpu.memory_space<vmem>>, vector<1x32x256xf32>
    %49 = vector.shape_cast %48 : vector<1x32x256xf32> to vector<32x256xf32>
    %c0_47 = arith.constant 0 : index
    %c768 = arith.constant 768 : index
    %50 = vector.load %arg18[%c0_47, %c768] : memref<256x1280xf32, #tpu.memory_space<vmem>>, vector<32x256xf32>
    tpu.vector_store %arg18[%c0_47, %c768], %49 {strides = array<i32>} : memref<256x1280xf32, #tpu.memory_space<vmem>>, vector<32x256xf32>,
    %c0_48 = arith.constant 0 : index
    %c33 = arith.constant 33 : index
    %c0_49 = arith.constant 0 : index
    %51 = vector.load %arg17[%c0_48, %c33, %c0_49] : memref<4x128x256xf32, #tpu.memory_space<vmem>>, vector<1x32x256xf32>
    %52 = vector.shape_cast %51 : vector<1x32x256xf32> to vector<32x256xf32>
    %c32_50 = arith.constant 32 : index
    %c768_51 = arith.constant 768 : index
    %53 = vector.load %arg18[%c32_50, %c768_51] : memref<256x1280xf32, #tpu.memory_space<vmem>>, vector<32x256xf32>
    tpu.vector_store %arg18[%c32_50, %c768_51], %52 {strides = array<i32>} : memref<256x1280xf32, #tpu.memory_space<vmem>>, vector<32x256xf32>,
    %c0_52 = arith.constant 0 : index
    %c1_53 = arith.constant 1 : index
    %c0_54 = arith.constant 0 : index
    %54 = vector.load %arg17[%c0_52, %c1_53, %c0_54] : memref<4x128x256xf32, #tpu.memory_space<vmem>>, vector<1x32x256xf32>
    %55 = vector.shape_cast %54 : vector<1x32x256xf32> to vector<32x256xf32>
    %c0_55 = arith.constant 0 : index
    %c1024 = arith.constant 1024 : index
    %56 = vector.load %arg18[%c0_55, %c1024] : memref<256x1280xf32, #tpu.memory_space<vmem>>, vector<32x256xf32>
    tpu.vector_store %arg18[%c0_55, %c1024], %55 {strides = array<i32>} : memref<256x1280xf32, #tpu.memory_space<vmem>>, vector<32x256xf32>,
    %c0_56 = arith.constant 0 : index
    %c65 = arith.constant 65 : index
    %c0_57 = arith.constant 0 : index
    %57 = vector.load %arg17[%c0_56, %c65, %c0_57] : memref<4x128x256xf32, #tpu.memory_space<vmem>>, vector<1x32x256xf32>
    %58 = vector.shape_cast %57 : vector<1x32x256xf32> to vector<32x256xf32>
    %c32_58 = arith.constant 32 : index
    %c1024_59 = arith.constant 1024 : index
    %59 = vector.load %arg18[%c32_58, %c1024_59] : memref<256x1280xf32, #tpu.memory_space<vmem>>, vector<32x256xf32>
    tpu.vector_store %arg18[%c32_58, %c1024_59], %58 {strides = array<i32>} : memref<256x1280xf32, #tpu.memory_space<vmem>>, vector<32x256xf32>,
    %c1_60 = arith.constant 1 : index
    %c0_61 = arith.constant 0 : index
    %c0_62 = arith.constant 0 : index
    %60 = vector.load %arg17[%c1_60, %c0_61, %c0_62] : memref<4x128x256xf32, #tpu.memory_space<vmem>>, vector<1x32x256xf32>
    %61 = vector.shape_cast %60 : vector<1x32x256xf32> to vector<32x256xf32>
    %c64_63 = arith.constant 64 : index
    %c0_64 = arith.constant 0 : index
    %62 = vector.load %arg18[%c64_63, %c0_64] : memref<256x1280xf32, #tpu.memory_space<vmem>>, vector<32x256xf32>
    tpu.vector_store %arg18[%c64_63, %c0_64], %61 {strides = array<i32>} : memref<256x1280xf32, #tpu.memory_space<vmem>>, vector<32x256xf32>,
    %c1_65 = arith.constant 1 : index
    %c64_66 = arith.constant 64 : index
    %c0_67 = arith.constant 0 : index
    %63 = vector.load %arg17[%c1_65, %c64_66, %c0_67] : memref<4x128x256xf32, #tpu.memory_space<vmem>>, vector<1x32x256xf32>
    %64 = vector.shape_cast %63 : vector<1x32x256xf32> to vector<32x256xf32>
    %c96_68 = arith.constant 96 : index
    %c0_69 = arith.constant 0 : index
    %65 = vector.load %arg18[%c96_68, %c0_69] : memref<256x1280xf32, #tpu.memory_space<vmem>>, vector<32x256xf32>
    tpu.vector_store %arg18[%c96_68, %c0_69], %64 {strides = array<i32>} : memref<256x1280xf32, #tpu.memory_space<vmem>>, vector<32x256xf32>,
    %c1_70 = arith.constant 1 : index
    %c32_71 = arith.constant 32 : index
    %c0_72 = arith.constant 0 : index
    %66 = vector.load %arg17[%c1_70, %c32_71, %c0_72] : memref<4x128x256xf32, #tpu.memory_space<vmem>>, vector<1x32x256xf32>
    %67 = vector.shape_cast %66 : vector<1x32x256xf32> to vector<32x256xf32>
    %c64_73 = arith.constant 64 : index
    %c256_74 = arith.constant 256 : index
    %68 = vector.load %arg18[%c64_73, %c256_74] : memref<256x1280xf32, #tpu.memory_space<vmem>>, vector<32x256xf32>
    tpu.vector_store %arg18[%c64_73, %c256_74], %67 {strides = array<i32>} : memref<256x1280xf32, #tpu.memory_space<vmem>>, vector<32x256xf32>,
    %c1_75 = arith.constant 1 : index
    %c96_76 = arith.constant 96 : index
    %c0_77 = arith.constant 0 : index
    %69 = vector.load %arg17[%c1_75, %c96_76, %c0_77] : memref<4x128x256xf32, #tpu.memory_space<vmem>>, vector<1x32x256xf32>
    %70 = vector.shape_cast %69 : vector<1x32x256xf32> to vector<32x256xf32>
    %c96_78 = arith.constant 96 : index
    %c256_79 = arith.constant 256 : index
    %71 = vector.load %arg18[%c96_78, %c256_79] : memref<256x1280xf32, #tpu.memory_space<vmem>>, vector<32x256xf32>
    tpu.vector_store %arg18[%c96_78, %c256_79], %70 {strides = array<i32>} : memref<256x1280xf32, #tpu.memory_space<vmem>>, vector<32x256xf32>,
    %c1_80 = arith.constant 1 : index
    %c64_81 = arith.constant 64 : index
    %c0_82 = arith.constant 0 : index
    %72 = vector.load %arg17[%c1_80, %c64_81, %c0_82] : memref<4x128x256xf32, #tpu.memory_space<vmem>>, vector<1x32x256xf32>
    %73 = vector.shape_cast %72 : vector<1x32x256xf32> to vector<32x256xf32>
    %c64_83 = arith.constant 64 : index
    %c512_84 = arith.constant 512 : index
    %74 = vector.load %arg18[%c64_83, %c512_84] : memref<256x1280xf32, #tpu.memory_space<vmem>>, vector<32x256xf32>
    tpu.vector_store %arg18[%c64_83, %c512_84], %73 {strides = array<i32>} : memref<256x1280xf32, #tpu.memory_space<vmem>>, vector<32x256xf32>,
    %c1_85 = arith.constant 1 : index
    %c1_86 = arith.constant 1 : index
    %c0_87 = arith.constant 0 : index
    %75 = vector.load %arg17[%c1_85, %c1_86, %c0_87] : memref<4x128x256xf32, #tpu.memory_space<vmem>>, vector<1x32x256xf32>
    %76 = vector.shape_cast %75 : vector<1x32x256xf32> to vector<32x256xf32>
    %c96_88 = arith.constant 96 : index
    %c512_89 = arith.constant 512 : index
    %77 = vector.load %arg18[%c96_88, %c512_89] : memref<256x1280xf32, #tpu.memory_space<vmem>>, vector<32x256xf32>
    tpu.vector_store %arg18[%c96_88, %c512_89], %76 {strides = array<i32>} : memref<256x1280xf32, #tpu.memory_space<vmem>>, vector<32x256xf32>,
    %c1_90 = arith.constant 1 : index
    %c96_91 = arith.constant 96 : index
    %c0_92 = arith.constant 0 : index
    %78 = vector.load %arg17[%c1_90, %c96_91, %c0_92] : memref<4x128x256xf32, #tpu.memory_space<vmem>>, vector<1x32x256xf32>
    %79 = vector.shape_cast %78 : vector<1x32x256xf32> to vector<32x256xf32>
    %c64_93 = arith.constant 64 : index
    %c768_94 = arith.constant 768 : index
    %80 = vector.load %arg18[%c64_93, %c768_94] : memref<256x1280xf32, #tpu.memory_space<vmem>>, vector<32x256xf32>
    tpu.vector_store %arg18[%c64_93, %c768_94], %79 {strides = array<i32>} : memref<256x1280xf32, #tpu.memory_space<vmem>>, vector<32x256xf32>,
    %c1_95 = arith.constant 1 : index
    %c33_96 = arith.constant 33 : index
    %c0_97 = arith.constant 0 : index
    %81 = vector.load %arg17[%c1_95, %c33_96, %c0_97] : memref<4x128x256xf32, #tpu.memory_space<vmem>>, vector<1x32x256xf32>
    %82 = vector.shape_cast %81 : vector<1x32x256xf32> to vector<32x256xf32>
    %c96_98 = arith.constant 96 : index
    %c768_99 = arith.constant 768 : index
    %83 = vector.load %arg18[%c96_98, %c768_99] : memref<256x1280xf32, #tpu.memory_space<vmem>>, vector<32x256xf32>
    tpu.vector_store %arg18[%c96_98, %c768_99], %82 {strides = array<i32>} : memref<256x1280xf32, #tpu.memory_space<vmem>>, vector<32x256xf32>,
    %c1_100 = arith.constant 1 : index
    %c1_101 = arith.constant 1 : index
    %c0_102 = arith.constant 0 : index
    %84 = vector.load %arg17[%c1_100, %c1_101, %c0_102] : memref<4x128x256xf32, #tpu.memory_space<vmem>>, vector<1x32x256xf32>
    %85 = vector.shape_cast %84 : vector<1x32x256xf32> to vector<32x256xf32>
    %c64_103 = arith.constant 64 : index
    %c1024_104 = arith.constant 1024 : index
    %86 = vector.load %arg18[%c64_103, %c1024_104] : memref<256x1280xf32, #tpu.memory_space<vmem>>, vector<32x256xf32>
    tpu.vector_store %arg18[%c64_103, %c1024_104], %85 {strides = array<i32>} : memref<256x1280xf32, #tpu.memory_space<vmem>>, vector<32x256xf32>,
    %c1_105 = arith.constant 1 : index
    %c65_106 = arith.constant 65 : index
    %c0_107 = arith.constant 0 : index
    %87 = vector.load %arg17[%c1_105, %c65_106, %c0_107] : memref<4x128x256xf32, #tpu.memory_space<vmem>>, vector<1x32x256xf32>
    %88 = vector.shape_cast %87 : vector<1x32x256xf32> to vector<32x256xf32>
    %c96_108 = arith.constant 96 : index
    %c1024_109 = arith.constant 1024 : index
    %89 = vector.load %arg18[%c96_108, %c1024_109] : memref<256x1280xf32, #tpu.memory_space<vmem>>, vector<32x256xf32>
    tpu.vector_store %arg18[%c96_108, %c1024_109], %88 {strides = array<i32>} : memref<256x1280xf32, #tpu.memory_space<vmem>>, vector<32x256xf32>,
    %c2_110 = arith.constant 2 : index
    %c0_111 = arith.constant 0 : index
    %c0_112 = arith.constant 0 : index
    %90 = vector.load %arg17[%c2_110, %c0_111, %c0_112] : memref<4x128x256xf32, #tpu.memory_space<vmem>>, vector<1x32x256xf32>
    %91 = vector.shape_cast %90 : vector<1x32x256xf32> to vector<32x256xf32>
    %c128 = arith.constant 128 : index
    %c0_113 = arith.constant 0 : index
    %92 = vector.load %arg18[%c128, %c0_113] : memref<256x1280xf32, #tpu.memory_space<vmem>>, vector<32x256xf32>
    tpu.vector_store %arg18[%c128, %c0_113], %91 {strides = array<i32>} : memref<256x1280xf32, #tpu.memory_space<vmem>>, vector<32x256xf32>,
    %c2_114 = arith.constant 2 : index
    %c64_115 = arith.constant 64 : index
    %c0_116 = arith.constant 0 : index
    %93 = vector.load %arg17[%c2_114, %c64_115, %c0_116] : memref<4x128x256xf32, #tpu.memory_space<vmem>>, vector<1x32x256xf32>
    %94 = vector.shape_cast %93 : vector<1x32x256xf32> to vector<32x256xf32>
    %c160 = arith.constant 160 : index
    %c0_117 = arith.constant 0 : index
    %95 = vector.load %arg18[%c160, %c0_117] : memref<256x1280xf32, #tpu.memory_space<vmem>>, vector<32x256xf32>
    tpu.vector_store %arg18[%c160, %c0_117], %94 {strides = array<i32>} : memref<256x1280xf32, #tpu.memory_space<vmem>>, vector<32x256xf32>,
    %c2_118 = arith.constant 2 : index
    %c32_119 = arith.constant 32 : index
    %c0_120 = arith.constant 0 : index
    %96 = vector.load %arg17[%c2_118, %c32_119, %c0_120] : memref<4x128x256xf32, #tpu.memory_space<vmem>>, vector<1x32x256xf32>
    %97 = vector.shape_cast %96 : vector<1x32x256xf32> to vector<32x256xf32>
    %c128_121 = arith.constant 128 : index
    %c256_122 = arith.constant 256 : index
    %98 = vector.load %arg18[%c128_121, %c256_122] : memref<256x1280xf32, #tpu.memory_space<vmem>>, vector<32x256xf32>
    tpu.vector_store %arg18[%c128_121, %c256_122], %97 {strides = array<i32>} : memref<256x1280xf32, #tpu.memory_space<vmem>>, vector<32x256xf32>,
    %c2_123 = arith.constant 2 : index
    %c96_124 = arith.constant 96 : index
    %c0_125 = arith.constant 0 : index
    %99 = vector.load %arg17[%c2_123, %c96_124, %c0_125] : memref<4x128x256xf32, #tpu.memory_space<vmem>>, vector<1x32x256xf32>
    %100 = vector.shape_cast %99 : vector<1x32x256xf32> to vector<32x256xf32>
    %c160_126 = arith.constant 160 : index
    %c256_127 = arith.constant 256 : index
    %101 = vector.load %arg18[%c160_126, %c256_127] : memref<256x1280xf32, #tpu.memory_space<vmem>>, vector<32x256xf32>
    tpu.vector_store %arg18[%c160_126, %c256_127], %100 {strides = array<i32>} : memref<256x1280xf32, #tpu.memory_space<vmem>>, vector<32x256xf32>,
    %c2_128 = arith.constant 2 : index
    %c64_129 = arith.constant 64 : index
    %c0_130 = arith.constant 0 : index
    %102 = vector.load %arg17[%c2_128, %c64_129, %c0_130] : memref<4x128x256xf32, #tpu.memory_space<vmem>>, vector<1x32x256xf32>
    %103 = vector.shape_cast %102 : vector<1x32x256xf32> to vector<32x256xf32>
    %c128_131 = arith.constant 128 : index
    %c512_132 = arith.constant 512 : index
    %104 = vector.load %arg18[%c128_131, %c512_132] : memref<256x1280xf32, #tpu.memory_space<vmem>>, vector<32x256xf32>
    tpu.vector_store %arg18[%c128_131, %c512_132], %103 {strides = array<i32>} : memref<256x1280xf32, #tpu.memory_space<vmem>>, vector<32x256xf32>,
    %c2_133 = arith.constant 2 : index
    %c1_134 = arith.constant 1 : index
    %c0_135 = arith.constant 0 : index
    %105 = vector.load %arg17[%c2_133, %c1_134, %c0_135] : memref<4x128x256xf32, #tpu.memory_space<vmem>>, vector<1x32x256xf32>
    %106 = vector.shape_cast %105 : vector<1x32x256xf32> to vector<32x256xf32>
    %c160_136 = arith.constant 160 : index
    %c512_137 = arith.constant 512 : index
    %107 = vector.load %arg18[%c160_136, %c512_137] : memref<256x1280xf32, #tpu.memory_space<vmem>>, vector<32x256xf32>
    tpu.vector_store %arg18[%c160_136, %c512_137], %106 {strides = array<i32>} : memref<256x1280xf32, #tpu.memory_space<vmem>>, vector<32x256xf32>,
    %c2_138 = arith.constant 2 : index
    %c96_139 = arith.constant 96 : index
    %c0_140 = arith.constant 0 : index
    %108 = vector.load %arg17[%c2_138, %c96_139, %c0_140] : memref<4x128x256xf32, #tpu.memory_space<vmem>>, vector<1x32x256xf32>
    %109 = vector.shape_cast %108 : vector<1x32x256xf32> to vector<32x256xf32>
    %c128_141 = arith.constant 128 : index
    %c768_142 = arith.constant 768 : index
    %110 = vector.load %arg18[%c128_141, %c768_142] : memref<256x1280xf32, #tpu.memory_space<vmem>>, vector<32x256xf32>
    tpu.vector_store %arg18[%c128_141, %c768_142], %109 {strides = array<i32>} : memref<256x1280xf32, #tpu.memory_space<vmem>>, vector<32x256xf32>,
    %c2_143 = arith.constant 2 : index
    %c33_144 = arith.constant 33 : index
    %c0_145 = arith.constant 0 : index
    %111 = vector.load %arg17[%c2_143, %c33_144, %c0_145] : memref<4x128x256xf32, #tpu.memory_space<vmem>>, vector<1x32x256xf32>
    %112 = vector.shape_cast %111 : vector<1x32x256xf32> to vector<32x256xf32>
    %c160_146 = arith.constant 160 : index
    %c768_147 = arith.constant 768 : index
    %113 = vector.load %arg18[%c160_146, %c768_147] : memref<256x1280xf32, #tpu.memory_space<vmem>>, vector<32x256xf32>
    tpu.vector_store %arg18[%c160_146, %c768_147], %112 {strides = array<i32>} : memref<256x1280xf32, #tpu.memory_space<vmem>>, vector<32x256xf32>,
    %c2_148 = arith.constant 2 : index
    %c1_149 = arith.constant 1 : index
    %c0_150 = arith.constant 0 : index
    %114 = vector.load %arg17[%c2_148, %c1_149, %c0_150] : memref<4x128x256xf32, #tpu.memory_space<vmem>>, vector<1x32x256xf32>
    %115 = vector.shape_cast %114 : vector<1x32x256xf32> to vector<32x256xf32>
    %c128_151 = arith.constant 128 : index
    %c1024_152 = arith.constant 1024 : index
    %116 = vector.load %arg18[%c128_151, %c1024_152] : memref<256x1280xf32, #tpu.memory_space<vmem>>, vector<32x256xf32>
    tpu.vector_store %arg18[%c128_151, %c1024_152], %115 {strides = array<i32>} : memref<256x1280xf32, #tpu.memory_space<vmem>>, vector<32x256xf32>,
    %c2_153 = arith.constant 2 : index
    %c65_154 = arith.constant 65 : index
    %c0_155 = arith.constant 0 : index
    %117 = vector.load %arg17[%c2_153, %c65_154, %c0_155] : memref<4x128x256xf32, #tpu.memory_space<vmem>>, vector<1x32x256xf32>
    %118 = vector.shape_cast %117 : vector<1x32x256xf32> to vector<32x256xf32>
    %c160_156 = arith.constant 160 : index
    %c1024_157 = arith.constant 1024 : index
    %119 = vector.load %arg18[%c160_156, %c1024_157] : memref<256x1280xf32, #tpu.memory_space<vmem>>, vector<32x256xf32>
    tpu.vector_store %arg18[%c160_156, %c1024_157], %118 {strides = array<i32>} : memref<256x1280xf32, #tpu.memory_space<vmem>>, vector<32x256xf32>,
    %c3_158 = arith.constant 3 : index
    %c0_159 = arith.constant 0 : index
    %c0_160 = arith.constant 0 : index
    %120 = vector.load %arg17[%c3_158, %c0_159, %c0_160] : memref<4x128x256xf32, #tpu.memory_space<vmem>>, vector<1x32x256xf32>
    %121 = vector.shape_cast %120 : vector<1x32x256xf32> to vector<32x256xf32>
    %c192 = arith.constant 192 : index
    %c0_161 = arith.constant 0 : index
    %122 = vector.load %arg18[%c192, %c0_161] : memref<256x1280xf32, #tpu.memory_space<vmem>>, vector<32x256xf32>
    tpu.vector_store %arg18[%c192, %c0_161], %121 {strides = array<i32>} : memref<256x1280xf32, #tpu.memory_space<vmem>>, vector<32x256xf32>,
    %c3_162 = arith.constant 3 : index
    %c64_163 = arith.constant 64 : index
    %c0_164 = arith.constant 0 : index
    %123 = vector.load %arg17[%c3_162, %c64_163, %c0_164] : memref<4x128x256xf32, #tpu.memory_space<vmem>>, vector<1x32x256xf32>
    %124 = vector.shape_cast %123 : vector<1x32x256xf32> to vector<32x256xf32>
    %c224 = arith.constant 224 : index
    %c0_165 = arith.constant 0 : index
    %125 = vector.load %arg18[%c224, %c0_165] : memref<256x1280xf32, #tpu.memory_space<vmem>>, vector<32x256xf32>
    tpu.vector_store %arg18[%c224, %c0_165], %124 {strides = array<i32>} : memref<256x1280xf32, #tpu.memory_space<vmem>>, vector<32x256xf32>,
    %c3_166 = arith.constant 3 : index
    %c32_167 = arith.constant 32 : index
    %c0_168 = arith.constant 0 : index
    %126 = vector.load %arg17[%c3_166, %c32_167, %c0_168] : memref<4x128x256xf32, #tpu.memory_space<vmem>>, vector<1x32x256xf32>
    %127 = vector.shape_cast %126 : vector<1x32x256xf32> to vector<32x256xf32>
    %c192_169 = arith.constant 192 : index
    %c256_170 = arith.constant 256 : index
    %128 = vector.load %arg18[%c192_169, %c256_170] : memref<256x1280xf32, #tpu.memory_space<vmem>>, vector<32x256xf32>
    tpu.vector_store %arg18[%c192_169, %c256_170], %127 {strides = array<i32>} : memref<256x1280xf32, #tpu.memory_space<vmem>>, vector<32x256xf32>,
    %c3_171 = arith.constant 3 : index
    %c96_172 = arith.constant 96 : index
    %c0_173 = arith.constant 0 : index
    %129 = vector.load %arg17[%c3_171, %c96_172, %c0_173] : memref<4x128x256xf32, #tpu.memory_space<vmem>>, vector<1x32x256xf32>
    %130 = vector.shape_cast %129 : vector<1x32x256xf32> to vector<32x256xf32>
    %c224_174 = arith.constant 224 : index
    %c256_175 = arith.constant 256 : index
    %131 = vector.load %arg18[%c224_174, %c256_175] : memref<256x1280xf32, #tpu.memory_space<vmem>>, vector<32x256xf32>
    tpu.vector_store %arg18[%c224_174, %c256_175], %130 {strides = array<i32>} : memref<256x1280xf32, #tpu.memory_space<vmem>>, vector<32x256xf32>,
    %c3_176 = arith.constant 3 : index
    %c64_177 = arith.constant 64 : index
    %c0_178 = arith.constant 0 : index
    %132 = vector.load %arg17[%c3_176, %c64_177, %c0_178] : memref<4x128x256xf32, #tpu.memory_space<vmem>>, vector<1x32x256xf32>
    %133 = vector.shape_cast %132 : vector<1x32x256xf32> to vector<32x256xf32>
    %c192_179 = arith.constant 192 : index
    %c512_180 = arith.constant 512 : index
    %134 = vector.load %arg18[%c192_179, %c512_180] : memref<256x1280xf32, #tpu.memory_space<vmem>>, vector<32x256xf32>
    tpu.vector_store %arg18[%c192_179, %c512_180], %133 {strides = array<i32>} : memref<256x1280xf32, #tpu.memory_space<vmem>>, vector<32x256xf32>,
    %c3_181 = arith.constant 3 : index
    %c1_182 = arith.constant 1 : index
    %c0_183 = arith.constant 0 : index
    %135 = vector.load %arg17[%c3_181, %c1_182, %c0_183] : memref<4x128x256xf32, #tpu.memory_space<vmem>>, vector<1x32x256xf32>
    %136 = vector.shape_cast %135 : vector<1x32x256xf32> to vector<32x256xf32>
    %c224_184 = arith.constant 224 : index
    %c512_185 = arith.constant 512 : index
    %137 = vector.load %arg18[%c224_184, %c512_185] : memref<256x1280xf32, #tpu.memory_space<vmem>>, vector<32x256xf32>
    tpu.vector_store %arg18[%c224_184, %c512_185], %136 {strides = array<i32>} : memref<256x1280xf32, #tpu.memory_space<vmem>>, vector<32x256xf32>,
    %c3_186 = arith.constant 3 : index
    %c96_187 = arith.constant 96 : index
    %c0_188 = arith.constant 0 : index
    %138 = vector.load %arg17[%c3_186, %c96_187, %c0_188] : memref<4x128x256xf32, #tpu.memory_space<vmem>>, vector<1x32x256xf32>
    %139 = vector.shape_cast %138 : vector<1x32x256xf32> to vector<32x256xf32>
    %c192_189 = arith.constant 192 : index
    %c768_190 = arith.constant 768 : index
    %140 = vector.load %arg18[%c192_189, %c768_190] : memref<256x1280xf32, #tpu.memory_space<vmem>>, vector<32x256xf32>
    tpu.vector_store %arg18[%c192_189, %c768_190], %139 {strides = array<i32>} : memref<256x1280xf32, #tpu.memory_space<vmem>>, vector<32x256xf32>,
    %c3_191 = arith.constant 3 : index
    %c33_192 = arith.constant 33 : index
    %c0_193 = arith.constant 0 : index
    %141 = vector.load %arg17[%c3_191, %c33_192, %c0_193] : memref<4x128x256xf32, #tpu.memory_space<vmem>>, vector<1x32x256xf32>
    %142 = vector.shape_cast %141 : vector<1x32x256xf32> to vector<32x256xf32>
    %c224_194 = arith.constant 224 : index
    %c768_195 = arith.constant 768 : index
    %143 = vector.load %arg18[%c224_194, %c768_195] : memref<256x1280xf32, #tpu.memory_space<vmem>>, vector<32x256xf32>
    tpu.vector_store %arg18[%c224_194, %c768_195], %142 {strides = array<i32>} : memref<256x1280xf32, #tpu.memory_space<vmem>>, vector<32x256xf32>,
    %c3_196 = arith.constant 3 : index
    %c1_197 = arith.constant 1 : index
    %c0_198 = arith.constant 0 : index
    %144 = vector.load %arg17[%c3_196, %c1_197, %c0_198] : memref<4x128x256xf32, #tpu.memory_space<vmem>>, vector<1x32x256xf32>
    %145 = vector.shape_cast %144 : vector<1x32x256xf32> to vector<32x256xf32>
    %c192_199 = arith.constant 192 : index
    %c1024_200 = arith.constant 1024 : index
    %146 = vector.load %arg18[%c192_199, %c1024_200] : memref<256x1280xf32, #tpu.memory_space<vmem>>, vector<32x256xf32>
    tpu.vector_store %arg18[%c192_199, %c1024_200], %145 {strides = array<i32>} : memref<256x1280xf32, #tpu.memory_space<vmem>>, vector<32x256xf32>,
    %c3_201 = arith.constant 3 : index
    %c65_202 = arith.constant 65 : index
    %c0_203 = arith.constant 0 : index
    %147 = vector.load %arg17[%c3_201, %c65_202, %c0_203] : memref<4x128x256xf32, #tpu.memory_space<vmem>>, vector<1x32x256xf32>
    %148 = vector.shape_cast %147 : vector<1x32x256xf32> to vector<32x256xf32>
    %c224_204 = arith.constant 224 : index
    %c1024_205 = arith.constant 1024 : index
    %149 = vector.load %arg18[%c224_204, %c1024_205] : memref<256x1280xf32, #tpu.memory_space<vmem>>, vector<32x256xf32>
    tpu.vector_store %arg18[%c224_204, %c1024_205], %148 {strides = array<i32>} : memref<256x1280xf32, #tpu.memory_space<vmem>>, vector<32x256xf32>,
    %c0_206 = arith.constant 0 : index
    %c0_207 = arith.constant 0 : index
    %150 = vector.load %arg18[%c0_206, %c0_207] : memref<256x1280xf32, #tpu.memory_space<vmem>>, vector<256x1280xf32>
    %c0_208 = arith.constant 0 : index
    %c0_209 = arith.constant 0 : index
    %151 = vector.load %arg6[%c0_208, %c0_209] : memref<1280x256xf32, #tpu.memory_space<vmem>>, vector<1280x256xf32>
    %cst_210 = arith.constant dense<0.000000e+00> : vector<256x256xf32>
    %152 = tpu.matmul %150, %151, %cst_210 {dimension_numbers = #tpu.dot_dimension_numbers<[1], [0], [0], [1], [0, 0, 1, 1], [], []>} : vector<256x1280xf32>, vector<1280x256xf32>, vector<256x256xf32> -> vector<256x256xf32>
    %c0_211 = arith.constant 0 : index
    %c0_212 = arith.constant 0 : index
    %153 = vector.load %arg7[%c0_211, %c0_212] : memref<1x256xf32, #tpu.memory_space<vmem>>, vector<1x256xf32>
    %154 = vector.broadcast %153 : vector<1x256xf32> to vector<256x256xf32>
    %155 = arith.addf %152, %154 : vector<256x256xf32>
    %cst_213 = arith.constant 0.000000e+00 : f32
    %156 = vector.broadcast %cst_213 : f32 to vector<256x256xf32>
    %157 = arith.maximumf %155, %156 : vector<256x256xf32>
    %158 = vector.extract_strided_slice %157 {offsets = [0, 0], sizes = [64, 256], strides = [1, 1]} : vector<256x256xf32> to vector<64x256xf32>
    %c0_214 = arith.constant 0 : index
    %c0_215 = arith.constant 0 : index
    %c0_216 = arith.constant 0 : index
    %159 = vector.load %arg19[%c0_214, %c0_215, %c0_216] : memref<4x72x256xf32, #tpu.memory_space<vmem>>, vector<1x64x256xf32>
    %160 = vector.shape_cast %159 : vector<1x64x256xf32> to vector<64x256xf32>
    %161 = vector.shape_cast %158 : vector<64x256xf32> to vector<1x64x256xf32>
    tpu.vector_store %arg19[%c0_214, %c0_215, %c0_216], %161 {strides = array<i32>} : memref<4x72x256xf32, #tpu.memory_space<vmem>>, vector<1x64x256xf32>,
    %162 = vector.extract_strided_slice %157 {offsets = [64, 0], sizes = [64, 256], strides = [1, 1]} : vector<256x256xf32> to vector<64x256xf32>
    %c1_217 = arith.constant 1 : index
    %c0_218 = arith.constant 0 : index
    %c0_219 = arith.constant 0 : index
    %163 = vector.load %arg19[%c1_217, %c0_218, %c0_219] : memref<4x72x256xf32, #tpu.memory_space<vmem>>, vector<1x64x256xf32>
    %164 = vector.shape_cast %163 : vector<1x64x256xf32> to vector<64x256xf32>
    %165 = vector.shape_cast %162 : vector<64x256xf32> to vector<1x64x256xf32>
    tpu.vector_store %arg19[%c1_217, %c0_218, %c0_219], %165 {strides = array<i32>} : memref<4x72x256xf32, #tpu.memory_space<vmem>>, vector<1x64x256xf32>,
    %166 = vector.extract_strided_slice %157 {offsets = [128, 0], sizes = [64, 256], strides = [1, 1]} : vector<256x256xf32> to vector<64x256xf32>
    %c2_220 = arith.constant 2 : index
    %c0_221 = arith.constant 0 : index
    %c0_222 = arith.constant 0 : index
    %167 = vector.load %arg19[%c2_220, %c0_221, %c0_222] : memref<4x72x256xf32, #tpu.memory_space<vmem>>, vector<1x64x256xf32>
    %168 = vector.shape_cast %167 : vector<1x64x256xf32> to vector<64x256xf32>
    %169 = vector.shape_cast %166 : vector<64x256xf32> to vector<1x64x256xf32>
    tpu.vector_store %arg19[%c2_220, %c0_221, %c0_222], %169 {strides = array<i32>} : memref<4x72x256xf32, #tpu.memory_space<vmem>>, vector<1x64x256xf32>,
    %170 = vector.extract_strided_slice %157 {offsets = [192, 0], sizes = [64, 256], strides = [1, 1]} : vector<256x256xf32> to vector<64x256xf32>
    %c3_223 = arith.constant 3 : index
    %c0_224 = arith.constant 0 : index
    %c0_225 = arith.constant 0 : index
    %171 = vector.load %arg19[%c3_223, %c0_224, %c0_225] : memref<4x72x256xf32, #tpu.memory_space<vmem>>, vector<1x64x256xf32>
    %172 = vector.shape_cast %171 : vector<1x64x256xf32> to vector<64x256xf32>
    %173 = vector.shape_cast %170 : vector<64x256xf32> to vector<1x64x256xf32>
    tpu.vector_store %arg19[%c3_223, %c0_224, %c0_225], %173 {strides = array<i32>} : memref<4x72x256xf32, #tpu.memory_space<vmem>>, vector<1x64x256xf32>,
    %cst_226 = arith.constant 0.000000e+00 : f32
    %174 = vector.broadcast %cst_226 : f32 to vector<4x8x256xf32>
    %c0_227 = arith.constant 0 : index
    %c64_228 = arith.constant 64 : index
    %c0_229 = arith.constant 0 : index
    %175 = vector.load %arg19[%c0_227, %c64_228, %c0_229] : memref<4x72x256xf32, #tpu.memory_space<vmem>>, vector<4x8x256xf32>
    tpu.vector_store %arg19[%c0_227, %c64_228, %c0_229], %174 {strides = array<i32>} : memref<4x72x256xf32, #tpu.memory_space<vmem>>, vector<4x8x256xf32>,
    %c0_230 = arith.constant 0 : index
    %c0_231 = arith.constant 0 : index
    %c0_232 = arith.constant 0 : index
    %176 = vector.load %arg19[%c0_230, %c0_231, %c0_232] : memref<4x72x256xf32, #tpu.memory_space<vmem>>, vector<1x32x256xf32>
    %177 = vector.shape_cast %176 : vector<1x32x256xf32> to vector<32x256xf32>
    %c0_233 = arith.constant 0 : index
    %c0_234 = arith.constant 0 : index
    %178 = vector.load %arg20[%c0_233, %c0_234] : memref<128x1280xf32, #tpu.memory_space<vmem>>, vector<32x256xf32>
    tpu.vector_store %arg20[%c0_233, %c0_234], %177 {strides = array<i32>} : memref<128x1280xf32, #tpu.memory_space<vmem>>, vector<32x256xf32>,
    %c0_235 = arith.constant 0 : index
    %c32_236 = arith.constant 32 : index
    %c0_237 = arith.constant 0 : index
    %179 = vector.load %arg19[%c0_235, %c32_236, %c0_237] : memref<4x72x256xf32, #tpu.memory_space<vmem>>, vector<1x32x256xf32>
    %180 = vector.shape_cast %179 : vector<1x32x256xf32> to vector<32x256xf32>
    %c0_238 = arith.constant 0 : index
    %c256_239 = arith.constant 256 : index
    %181 = vector.load %arg20[%c0_238, %c256_239] : memref<128x1280xf32, #tpu.memory_space<vmem>>, vector<32x256xf32>
    tpu.vector_store %arg20[%c0_238, %c256_239], %180 {strides = array<i32>} : memref<128x1280xf32, #tpu.memory_space<vmem>>, vector<32x256xf32>,
    %c0_240 = arith.constant 0 : index
    %c1_241 = arith.constant 1 : index
    %c0_242 = arith.constant 0 : index
    %182 = vector.load %arg19[%c0_240, %c1_241, %c0_242] : memref<4x72x256xf32, #tpu.memory_space<vmem>>, vector<1x32x256xf32>
    %183 = vector.shape_cast %182 : vector<1x32x256xf32> to vector<32x256xf32>
    %c0_243 = arith.constant 0 : index
    %c512_244 = arith.constant 512 : index
    %184 = vector.load %arg20[%c0_243, %c512_244] : memref<128x1280xf32, #tpu.memory_space<vmem>>, vector<32x256xf32>
    tpu.vector_store %arg20[%c0_243, %c512_244], %183 {strides = array<i32>} : memref<128x1280xf32, #tpu.memory_space<vmem>>, vector<32x256xf32>,
    %c0_245 = arith.constant 0 : index
    %c33_246 = arith.constant 33 : index
    %c0_247 = arith.constant 0 : index
    %185 = vector.load %arg19[%c0_245, %c33_246, %c0_247] : memref<4x72x256xf32, #tpu.memory_space<vmem>>, vector<1x32x256xf32>
    %186 = vector.shape_cast %185 : vector<1x32x256xf32> to vector<32x256xf32>
    %c0_248 = arith.constant 0 : index
    %c768_249 = arith.constant 768 : index
    %187 = vector.load %arg20[%c0_248, %c768_249] : memref<128x1280xf32, #tpu.memory_space<vmem>>, vector<32x256xf32>
    tpu.vector_store %arg20[%c0_248, %c768_249], %186 {strides = array<i32>} : memref<128x1280xf32, #tpu.memory_space<vmem>>, vector<32x256xf32>,
    %c0_250 = arith.constant 0 : index
    %c2_251 = arith.constant 2 : index
    %c0_252 = arith.constant 0 : index
    %188 = vector.load %arg19[%c0_250, %c2_251, %c0_252] : memref<4x72x256xf32, #tpu.memory_space<vmem>>, vector<1x32x256xf32>
    %189 = vector.shape_cast %188 : vector<1x32x256xf32> to vector<32x256xf32>
    %c0_253 = arith.constant 0 : index
    %c1024_254 = arith.constant 1024 : index
    %190 = vector.load %arg20[%c0_253, %c1024_254] : memref<128x1280xf32, #tpu.memory_space<vmem>>, vector<32x256xf32>
    tpu.vector_store %arg20[%c0_253, %c1024_254], %189 {strides = array<i32>} : memref<128x1280xf32, #tpu.memory_space<vmem>>, vector<32x256xf32>,
    %c1_255 = arith.constant 1 : index
    %c0_256 = arith.constant 0 : index
    %c0_257 = arith.constant 0 : index
    %191 = vector.load %arg19[%c1_255, %c0_256, %c0_257] : memref<4x72x256xf32, #tpu.memory_space<vmem>>, vector<1x32x256xf32>
    %192 = vector.shape_cast %191 : vector<1x32x256xf32> to vector<32x256xf32>
    %c32_258 = arith.constant 32 : index
    %c0_259 = arith.constant 0 : index
    %193 = vector.load %arg20[%c32_258, %c0_259] : memref<128x1280xf32, #tpu.memory_space<vmem>>, vector<32x256xf32>
    tpu.vector_store %arg20[%c32_258, %c0_259], %192 {strides = array<i32>} : memref<128x1280xf32, #tpu.memory_space<vmem>>, vector<32x256xf32>,
    %c1_260 = arith.constant 1 : index
    %c32_261 = arith.constant 32 : index
    %c0_262 = arith.constant 0 : index
    %194 = vector.load %arg19[%c1_260, %c32_261, %c0_262] : memref<4x72x256xf32, #tpu.memory_space<vmem>>, vector<1x32x256xf32>
    %195 = vector.shape_cast %194 : vector<1x32x256xf32> to vector<32x256xf32>
    %c32_263 = arith.constant 32 : index
    %c256_264 = arith.constant 256 : index
    %196 = vector.load %arg20[%c32_263, %c256_264] : memref<128x1280xf32, #tpu.memory_space<vmem>>, vector<32x256xf32>
    tpu.vector_store %arg20[%c32_263, %c256_264], %195 {strides = array<i32>} : memref<128x1280xf32, #tpu.memory_space<vmem>>, vector<32x256xf32>,
    %c1_265 = arith.constant 1 : index
    %c1_266 = arith.constant 1 : index
    %c0_267 = arith.constant 0 : index
    %197 = vector.load %arg19[%c1_265, %c1_266, %c0_267] : memref<4x72x256xf32, #tpu.memory_space<vmem>>, vector<1x32x256xf32>
    %198 = vector.shape_cast %197 : vector<1x32x256xf32> to vector<32x256xf32>
    %c32_268 = arith.constant 32 : index
    %c512_269 = arith.constant 512 : index
    %199 = vector.load %arg20[%c32_268, %c512_269] : memref<128x1280xf32, #tpu.memory_space<vmem>>, vector<32x256xf32>
    tpu.vector_store %arg20[%c32_268, %c512_269], %198 {strides = array<i32>} : memref<128x1280xf32, #tpu.memory_space<vmem>>, vector<32x256xf32>,
    %c1_270 = arith.constant 1 : index
    %c33_271 = arith.constant 33 : index
    %c0_272 = arith.constant 0 : index
    %200 = vector.load %arg19[%c1_270, %c33_271, %c0_272] : memref<4x72x256xf32, #tpu.memory_space<vmem>>, vector<1x32x256xf32>
    %201 = vector.shape_cast %200 : vector<1x32x256xf32> to vector<32x256xf32>
    %c32_273 = arith.constant 32 : index
    %c768_274 = arith.constant 768 : index
    %202 = vector.load %arg20[%c32_273, %c768_274] : memref<128x1280xf32, #tpu.memory_space<vmem>>, vector<32x256xf32>
    tpu.vector_store %arg20[%c32_273, %c768_274], %201 {strides = array<i32>} : memref<128x1280xf32, #tpu.memory_space<vmem>>, vector<32x256xf32>,
    %c1_275 = arith.constant 1 : index
    %c2_276 = arith.constant 2 : index
    %c0_277 = arith.constant 0 : index
    %203 = vector.load %arg19[%c1_275, %c2_276, %c0_277] : memref<4x72x256xf32, #tpu.memory_space<vmem>>, vector<1x32x256xf32>
    %204 = vector.shape_cast %203 : vector<1x32x256xf32> to vector<32x256xf32>
    %c32_278 = arith.constant 32 : index
    %c1024_279 = arith.constant 1024 : index
    %205 = vector.load %arg20[%c32_278, %c1024_279] : memref<128x1280xf32, #tpu.memory_space<vmem>>, vector<32x256xf32>
    tpu.vector_store %arg20[%c32_278, %c1024_279], %204 {strides = array<i32>} : memref<128x1280xf32, #tpu.memory_space<vmem>>, vector<32x256xf32>,
    %c2_280 = arith.constant 2 : index
    %c0_281 = arith.constant 0 : index
    %c0_282 = arith.constant 0 : index
    %206 = vector.load %arg19[%c2_280, %c0_281, %c0_282] : memref<4x72x256xf32, #tpu.memory_space<vmem>>, vector<1x32x256xf32>
    %207 = vector.shape_cast %206 : vector<1x32x256xf32> to vector<32x256xf32>
    %c64_283 = arith.constant 64 : index
    %c0_284 = arith.constant 0 : index
    %208 = vector.load %arg20[%c64_283, %c0_284] : memref<128x1280xf32, #tpu.memory_space<vmem>>, vector<32x256xf32>
    tpu.vector_store %arg20[%c64_283, %c0_284], %207 {strides = array<i32>} : memref<128x1280xf32, #tpu.memory_space<vmem>>, vector<32x256xf32>,
    %c2_285 = arith.constant 2 : index
    %c32_286 = arith.constant 32 : index
    %c0_287 = arith.constant 0 : index
    %209 = vector.load %arg19[%c2_285, %c32_286, %c0_287] : memref<4x72x256xf32, #tpu.memory_space<vmem>>, vector<1x32x256xf32>
    %210 = vector.shape_cast %209 : vector<1x32x256xf32> to vector<32x256xf32>
    %c64_288 = arith.constant 64 : index
    %c256_289 = arith.constant 256 : index
    %211 = vector.load %arg20[%c64_288, %c256_289] : memref<128x1280xf32, #tpu.memory_space<vmem>>, vector<32x256xf32>
    tpu.vector_store %arg20[%c64_288, %c256_289], %210 {strides = array<i32>} : memref<128x1280xf32, #tpu.memory_space<vmem>>, vector<32x256xf32>,
    %c2_290 = arith.constant 2 : index
    %c1_291 = arith.constant 1 : index
    %c0_292 = arith.constant 0 : index
    %212 = vector.load %arg19[%c2_290, %c1_291, %c0_292] : memref<4x72x256xf32, #tpu.memory_space<vmem>>, vector<1x32x256xf32>
    %213 = vector.shape_cast %212 : vector<1x32x256xf32> to vector<32x256xf32>
    %c64_293 = arith.constant 64 : index
    %c512_294 = arith.constant 512 : index
    %214 = vector.load %arg20[%c64_293, %c512_294] : memref<128x1280xf32, #tpu.memory_space<vmem>>, vector<32x256xf32>
    tpu.vector_store %arg20[%c64_293, %c512_294], %213 {strides = array<i32>} : memref<128x1280xf32, #tpu.memory_space<vmem>>, vector<32x256xf32>,
    %c2_295 = arith.constant 2 : index
    %c33_296 = arith.constant 33 : index
    %c0_297 = arith.constant 0 : index
    %215 = vector.load %arg19[%c2_295, %c33_296, %c0_297] : memref<4x72x256xf32, #tpu.memory_space<vmem>>, vector<1x32x256xf32>
    %216 = vector.shape_cast %215 : vector<1x32x256xf32> to vector<32x256xf32>
    %c64_298 = arith.constant 64 : index
    %c768_299 = arith.constant 768 : index
    %217 = vector.load %arg20[%c64_298, %c768_299] : memref<128x1280xf32, #tpu.memory_space<vmem>>, vector<32x256xf32>
    tpu.vector_store %arg20[%c64_298, %c768_299], %216 {strides = array<i32>} : memref<128x1280xf32, #tpu.memory_space<vmem>>, vector<32x256xf32>,
    %c2_300 = arith.constant 2 : index
    %c2_301 = arith.constant 2 : index
    %c0_302 = arith.constant 0 : index
    %218 = vector.load %arg19[%c2_300, %c2_301, %c0_302] : memref<4x72x256xf32, #tpu.memory_space<vmem>>, vector<1x32x256xf32>
    %219 = vector.shape_cast %218 : vector<1x32x256xf32> to vector<32x256xf32>
    %c64_303 = arith.constant 64 : index
    %c1024_304 = arith.constant 1024 : index
    %220 = vector.load %arg20[%c64_303, %c1024_304] : memref<128x1280xf32, #tpu.memory_space<vmem>>, vector<32x256xf32>
    tpu.vector_store %arg20[%c64_303, %c1024_304], %219 {strides = array<i32>} : memref<128x1280xf32, #tpu.memory_space<vmem>>, vector<32x256xf32>,
    %c3_305 = arith.constant 3 : index
    %c0_306 = arith.constant 0 : index
    %c0_307 = arith.constant 0 : index
    %221 = vector.load %arg19[%c3_305, %c0_306, %c0_307] : memref<4x72x256xf32, #tpu.memory_space<vmem>>, vector<1x32x256xf32>
    %222 = vector.shape_cast %221 : vector<1x32x256xf32> to vector<32x256xf32>
    %c96_308 = arith.constant 96 : index
    %c0_309 = arith.constant 0 : index
    %223 = vector.load %arg20[%c96_308, %c0_309] : memref<128x1280xf32, #tpu.memory_space<vmem>>, vector<32x256xf32>
    tpu.vector_store %arg20[%c96_308, %c0_309], %222 {strides = array<i32>} : memref<128x1280xf32, #tpu.memory_space<vmem>>, vector<32x256xf32>,
    %c3_310 = arith.constant 3 : index
    %c32_311 = arith.constant 32 : index
    %c0_312 = arith.constant 0 : index
    %224 = vector.load %arg19[%c3_310, %c32_311, %c0_312] : memref<4x72x256xf32, #tpu.memory_space<vmem>>, vector<1x32x256xf32>
    %225 = vector.shape_cast %224 : vector<1x32x256xf32> to vector<32x256xf32>
    %c96_313 = arith.constant 96 : index
    %c256_314 = arith.constant 256 : index
    %226 = vector.load %arg20[%c96_313, %c256_314] : memref<128x1280xf32, #tpu.memory_space<vmem>>, vector<32x256xf32>
    tpu.vector_store %arg20[%c96_313, %c256_314], %225 {strides = array<i32>} : memref<128x1280xf32, #tpu.memory_space<vmem>>, vector<32x256xf32>,
    %c3_315 = arith.constant 3 : index
    %c1_316 = arith.constant 1 : index
    %c0_317 = arith.constant 0 : index
    %227 = vector.load %arg19[%c3_315, %c1_316, %c0_317] : memref<4x72x256xf32, #tpu.memory_space<vmem>>, vector<1x32x256xf32>
    %228 = vector.shape_cast %227 : vector<1x32x256xf32> to vector<32x256xf32>
    %c96_318 = arith.constant 96 : index
    %c512_319 = arith.constant 512 : index
    %229 = vector.load %arg20[%c96_318, %c512_319] : memref<128x1280xf32, #tpu.memory_space<vmem>>, vector<32x256xf32>
    tpu.vector_store %arg20[%c96_318, %c512_319], %228 {strides = array<i32>} : memref<128x1280xf32, #tpu.memory_space<vmem>>, vector<32x256xf32>,
    %c3_320 = arith.constant 3 : index
    %c33_321 = arith.constant 33 : index
    %c0_322 = arith.constant 0 : index
    %230 = vector.load %arg19[%c3_320, %c33_321, %c0_322] : memref<4x72x256xf32, #tpu.memory_space<vmem>>, vector<1x32x256xf32>
    %231 = vector.shape_cast %230 : vector<1x32x256xf32> to vector<32x256xf32>
    %c96_323 = arith.constant 96 : index
    %c768_324 = arith.constant 768 : index
    %232 = vector.load %arg20[%c96_323, %c768_324] : memref<128x1280xf32, #tpu.memory_space<vmem>>, vector<32x256xf32>
    tpu.vector_store %arg20[%c96_323, %c768_324], %231 {strides = array<i32>} : memref<128x1280xf32, #tpu.memory_space<vmem>>, vector<32x256xf32>,
    %c3_325 = arith.constant 3 : index
    %c2_326 = arith.constant 2 : index
    %c0_327 = arith.constant 0 : index
    %233 = vector.load %arg19[%c3_325, %c2_326, %c0_327] : memref<4x72x256xf32, #tpu.memory_space<vmem>>, vector<1x32x256xf32>
    %234 = vector.shape_cast %233 : vector<1x32x256xf32> to vector<32x256xf32>
    %c96_328 = arith.constant 96 : index
    %c1024_329 = arith.constant 1024 : index
    %235 = vector.load %arg20[%c96_328, %c1024_329] : memref<128x1280xf32, #tpu.memory_space<vmem>>, vector<32x256xf32>
    tpu.vector_store %arg20[%c96_328, %c1024_329], %234 {strides = array<i32>} : memref<128x1280xf32, #tpu.memory_space<vmem>>, vector<32x256xf32>,
    %c0_330 = arith.constant 0 : index
    %c0_331 = arith.constant 0 : index
    %236 = vector.load %arg20[%c0_330, %c0_331] : memref<128x1280xf32, #tpu.memory_space<vmem>>, vector<128x1280xf32>
    %c0_332 = arith.constant 0 : index
    %c0_333 = arith.constant 0 : index
    %237 = vector.load %arg8[%c0_332, %c0_333] : memref<1280x128xf32, #tpu.memory_space<vmem>>, vector<1280x128xf32>
    %cst_334 = arith.constant dense<0.000000e+00> : vector<128x128xf32>
    %238 = tpu.matmul %236, %237, %cst_334 {dimension_numbers = #tpu.dot_dimension_numbers<[1], [0], [0], [1], [0, 0, 1, 1], [], []>} : vector<128x1280xf32>, vector<1280x128xf32>, vector<128x128xf32> -> vector<128x128xf32>
    %c0_335 = arith.constant 0 : index
    %c0_336 = arith.constant 0 : index
    %239 = vector.load %arg9[%c0_335, %c0_336] : memref<1x128xf32, #tpu.memory_space<vmem>>, vector<1x128xf32>
    %240 = vector.broadcast %239 : vector<1x128xf32> to vector<128x128xf32>
    %241 = arith.addf %238, %240 : vector<128x128xf32>
    %cst_337 = arith.constant 0.000000e+00 : f32
    %242 = vector.broadcast %cst_337 : f32 to vector<128x128xf32>
    %243 = arith.maximumf %241, %242 : vector<128x128xf32>
    %c0_338 = arith.constant 0 : index
    %c0_339 = arith.constant 0 : index
    %244 = vector.load %arg10[%c0_338, %c0_339] : memref<128x1024xf32, #tpu.memory_space<vmem>>, vector<128x1024xf32>
    %cst_340 = arith.constant dense<0.000000e+00> : vector<128x1024xf32>
    %245 = tpu.matmul %243, %244, %cst_340 {dimension_numbers = #tpu.dot_dimension_numbers<[1], [0], [0], [1], [0, 0, 1, 1], [], []>} : vector<128x128xf32>, vector<128x1024xf32>, vector<128x1024xf32> -> vector<128x1024xf32>
    %246 = tpu.iota {dimensions = array<i32: 0>} : vector<128x1024xi32>
    %c31_i32 = arith.constant 31 : i32
    %247 = vector.broadcast %c31_i32 : i32 to vector<128x1024xi32>
    %248 = arith.andi %246, %247 : vector<128x1024xi32>
    %249 = tpu.iota {dimensions = array<i32: 1>} : vector<128x1024xi32>
    %c5_i32 = arith.constant 5 : i32
    %250 = vector.broadcast %c5_i32 : i32 to vector<128x1024xi32>
    %251 = arith.shrsi %249, %250 : vector<128x1024xi32>
    %252 = arith.cmpi eq, %248, %251 : vector<128x1024xi32>
    %cst_341 = arith.constant 0.000000e+00 : f32
    %253 = vector.broadcast %cst_341 : f32 to vector<128x1024xf32>
    %254 = arith.select %252, %245, %253 : vector<128x1024xi1>, vector<128x1024xf32>
    %255 = tpu.iota {dimensions = array<i32: 0>} : vector<1024x32xi32>
    %c31_i32_342 = arith.constant 31 : i32
    %256 = vector.broadcast %c31_i32_342 : i32 to vector<1024x32xi32>
    %257 = arith.andi %255, %256 : vector<1024x32xi32>
    %258 = tpu.iota {dimensions = array<i32: 1>} : vector<1024x32xi32>
    %259 = arith.cmpi eq, %257, %258 : vector<1024x32xi32>
    %cst_343 = arith.constant 1.000000e+00 : f32
    %cst_344 = arith.constant 0.000000e+00 : f32
    %260 = vector.broadcast %cst_343 : f32 to vector<1024x32xf32>
    %261 = vector.broadcast %cst_344 : f32 to vector<1024x32xf32>
    %262 = arith.select %259, %260, %261 : vector<1024x32xi1>, vector<1024x32xf32>
    %cst_345 = arith.constant dense<0.000000e+00> : vector<128x32xf32>
    %263 = tpu.matmul %254, %262, %cst_345 {dimension_numbers = #tpu.dot_dimension_numbers<[1], [0], [0], [1], [0, 0, 1, 1], [], []>} : vector<128x1024xf32>, vector<1024x32xf32>, vector<128x32xf32> -> vector<128x32xf32>
    %264 = tpu.iota {dimensions = array<i32: 1>} : vector<4x128xi32>
    %c5_i32_346 = arith.constant 5 : i32
    %265 = vector.broadcast %c5_i32_346 : i32 to vector<4x128xi32>
    %266 = arith.shrsi %264, %265 : vector<4x128xi32>
    %267 = tpu.iota {dimensions = array<i32: 0>} : vector<4x128xi32>
    %268 = arith.cmpi eq, %266, %267 : vector<4x128xi32>
    %cst_347 = arith.constant 1.000000e+00 : f32
    %cst_348 = arith.constant 0.000000e+00 : f32
    %269 = vector.broadcast %cst_347 : f32 to vector<4x128xf32>
    %270 = vector.broadcast %cst_348 : f32 to vector<4x128xf32>
    %271 = arith.select %268, %269, %270 : vector<4x128xi1>, vector<4x128xf32>
    %cst_349 = arith.constant dense<0.000000e+00> : vector<4x32xf32>
    %272 = tpu.matmul %271, %263, %cst_349 {dimension_numbers = #tpu.dot_dimension_numbers<[1], [0], [0], [1], [0, 0, 1, 1], [], []>} : vector<4x128xf32>, vector<128x32xf32>, vector<4x32xf32> -> vector<4x32xf32>
    %c0_350 = arith.constant 0 : index
    %c0_351 = arith.constant 0 : index
    %273 = vector.load %arg11[%c0_350, %c0_351] : memref<1x32xf32, #tpu.memory_space<vmem>>, vector<1x32xf32>
    %274 = vector.broadcast %273 : vector<1x32xf32> to vector<4x32xf32>
    %275 = arith.addf %272, %274 : vector<4x32xf32>
    %276 = math.tanh %275 : vector<4x32xf32>
    %c0_352 = arith.constant 0 : index
    %c0_353 = arith.constant 0 : index
    %277 = vector.load %arg12[%c0_352, %c0_353] : memref<32x16xf32, #tpu.memory_space<vmem>>, vector<32x16xf32>
    %cst_354 = arith.constant dense<0.000000e+00> : vector<4x16xf32>
    %278 = tpu.matmul %276, %277, %cst_354 {dimension_numbers = #tpu.dot_dimension_numbers<[1], [0], [0], [1], [0, 0, 1, 1], [], []>} : vector<4x32xf32>, vector<32x16xf32>, vector<4x16xf32> -> vector<4x16xf32>
    %c0_355 = arith.constant 0 : index
    %c0_356 = arith.constant 0 : index
    %279 = vector.load %arg13[%c0_355, %c0_356] : memref<1x16xf32, #tpu.memory_space<vmem>>, vector<1x16xf32>
    %280 = vector.broadcast %279 : vector<1x16xf32> to vector<4x16xf32>
    %281 = arith.addf %278, %280 : vector<4x16xf32>
    %282 = math.tanh %281 : vector<4x16xf32>
    %c0_357 = arith.constant 0 : index
    %c0_358 = arith.constant 0 : index
    %283 = vector.load %arg14[%c0_357, %c0_358] : memref<16x4xf32, #tpu.memory_space<vmem>>, vector<16x4xf32>
    %cst_359 = arith.constant dense<0.000000e+00> : vector<4x4xf32>
    %284 = tpu.matmul %282, %283, %cst_359 {dimension_numbers = #tpu.dot_dimension_numbers<[1], [0], [0], [1], [0, 0, 1, 1], [], []>} : vector<4x16xf32>, vector<16x4xf32>, vector<4x4xf32> -> vector<4x4xf32>
    %c0_360 = arith.constant 0 : index
    %c0_361 = arith.constant 0 : index
    %285 = vector.load %arg15[%c0_360, %c0_361] : memref<1x4xf32, #tpu.memory_space<vmem>>, vector<1x4xf32>
    %286 = vector.broadcast %285 : vector<1x4xf32> to vector<4x4xf32>
    %287 = arith.addf %284, %286 : vector<4x4xf32>
    %288 = arith.negf %287 : vector<4x4xf32>
    %289 = math.exp %288 : vector<4x4xf32>
    %cst_362 = arith.constant 1.000000e+00 : f32
    %290 = vector.broadcast %cst_362 : f32 to vector<4x4xf32>
    %291 = arith.addf %290, %289 : vector<4x4xf32>
    %292 = arith.divf %290, %291 : vector<4x4xf32>
    %c0_363 = arith.constant 0 : index
    %c0_364 = arith.constant 0 : index
    %c0_365 = arith.constant 0 : index
    %293 = vector.load %arg16[%c0_363, %c0_364, %c0_365] : memref<1x4x4xf32, #tpu.memory_space<vmem>>, vector<1x4x4xf32>
    %294 = vector.shape_cast %293 : vector<1x4x4xf32> to vector<4x4xf32>
    %295 = vector.shape_cast %292 : vector<4x4xf32> to vector<1x4x4xf32>
    tpu.vector_store %arg16[%c0_363, %c0_364, %c0_365], %295 {strides = array<i32>} : memref<1x4x4xf32, #tpu.memory_space<vmem>>, vector<1x4x4xf32>,
    return
  }
  func.func @transform_0(%arg0: i32) -> (i32, i32) {
    %c0_i32 = arith.constant 0 : i32
    %c0_i32_0 = arith.constant 0 : i32
    return %arg0, %c0_i32 : i32, i32
  }
  func.func @transform_1(%arg0: i32) -> (i32, i32) {
    %c0_i32 = arith.constant 0 : i32
    %c0_i32_0 = arith.constant 0 : i32
    %c0_i32_1 = arith.constant 0 : i32
    return %c0_i32, %c0_i32_0 : i32, i32
  }
  func.func @transform_2(%arg0: i32) -> (i32, i32) {
    %c0_i32 = arith.constant 0 : i32
    %c0_i32_0 = arith.constant 0 : i32
    %c0_i32_1 = arith.constant 0 : i32
    return %c0_i32, %c0_i32_0 : i32, i32
  }
  func.func @transform_3(%arg0: i32) -> (i32, i32) {
    %c0_i32 = arith.constant 0 : i32
    %c0_i32_0 = arith.constant 0 : i32
    %c0_i32_1 = arith.constant 0 : i32
    return %c0_i32, %c0_i32_0 : i32, i32
  }
  func.func @transform_4(%arg0: i32) -> (i32, i32) {
    %c0_i32 = arith.constant 0 : i32
    %c0_i32_0 = arith.constant 0 : i32
    %c0_i32_1 = arith.constant 0 : i32
    return %c0_i32, %c0_i32_0 : i32, i32
  }
  func.func @transform_5(%arg0: i32) -> (i32, i32) {
    %c0_i32 = arith.constant 0 : i32
    %c0_i32_0 = arith.constant 0 : i32
    %c0_i32_1 = arith.constant 0 : i32
    return %c0_i32, %c0_i32_0 : i32, i32
  }
  func.func @transform_6(%arg0: i32) -> (i32, i32) {
    %c0_i32 = arith.constant 0 : i32
    %c0_i32_0 = arith.constant 0 : i32
    %c0_i32_1 = arith.constant 0 : i32
    return %c0_i32, %c0_i32_0 : i32, i32
  }
  func.func @transform_7(%arg0: i32) -> (i32, i32) {
    %c0_i32 = arith.constant 0 : i32
    %c0_i32_0 = arith.constant 0 : i32
    %c0_i32_1 = arith.constant 0 : i32
    return %c0_i32, %c0_i32_0 : i32, i32
  }
  func.func @transform_8(%arg0: i32) -> (i32, i32) {
    %c0_i32 = arith.constant 0 : i32
    %c0_i32_0 = arith.constant 0 : i32
    %c0_i32_1 = arith.constant 0 : i32
    return %c0_i32, %c0_i32_0 : i32, i32
  }
  func.func @transform_9(%arg0: i32) -> (i32, i32) {
    %c0_i32 = arith.constant 0 : i32
    %c0_i32_0 = arith.constant 0 : i32
    %c0_i32_1 = arith.constant 0 : i32
    return %c0_i32, %c0_i32_0 : i32, i32
  }
  func.func @transform_10(%arg0: i32) -> (i32, i32) {
    %c0_i32 = arith.constant 0 : i32
    %c0_i32_0 = arith.constant 0 : i32
    %c0_i32_1 = arith.constant 0 : i32
    return %c0_i32, %c0_i32_0 : i32, i32
  }
  func.func @transform_11(%arg0: i32) -> (i32, i32) {
    %c0_i32 = arith.constant 0 : i32
    %c0_i32_0 = arith.constant 0 : i32
    %c0_i32_1 = arith.constant 0 : i32
    return %c0_i32, %c0_i32_0 : i32, i32
  }
  func.func @transform_12(%arg0: i32) -> (i32, i32) {
    %c0_i32 = arith.constant 0 : i32
    %c0_i32_0 = arith.constant 0 : i32
    %c0_i32_1 = arith.constant 0 : i32
    return %c0_i32, %c0_i32_0 : i32, i32
  }
  func.func @transform_13(%arg0: i32) -> (i32, i32) {
    %c0_i32 = arith.constant 0 : i32
    %c0_i32_0 = arith.constant 0 : i32
    %c0_i32_1 = arith.constant 0 : i32
    return %c0_i32, %c0_i32_0 : i32, i32
  }
  func.func @transform_14(%arg0: i32) -> (i32, i32) {
    %c0_i32 = arith.constant 0 : i32
    %c0_i32_0 = arith.constant 0 : i32
    %c0_i32_1 = arith.constant 0 : i32
    return %c0_i32, %c0_i32_0 : i32, i32
  }
  func.func @transform_15(%arg0: i32) -> (i32, i32, i32) {
    %c0_i32 = arith.constant 0 : i32
    %c0_i32_0 = arith.constant 0 : i32
    %c0_i32_1 = arith.constant 0 : i32
    return %arg0, %c0_i32, %c0_i32_0 : i32, i32, i32
  }
}

</mosaic_0001>

<bundles_post_ra>
// kernel: multitask_forward.1
= control target key start
LH: loop header
LB: loop body
LE: loop exit
PB: predicated region body
PF: predicated region fallthrough
CT: control target
= control target key end

     0   :  { %s11758_s18 = smov 0   ;;  %s17229_s0 = inlined_call_operand.vmem [shape: f32[1024,60], index: 0, kind: input, shape index: {}]   ;;  %s17230_s1 = inlined_call_operand.vmem [shape: f32[60,256], index: 1, kind: input, shape index: {}]   ;;  %s17231_s2 = inlined_call_operand.vmem [shape: f32[1,256], index: 2, kind: input, shape index: {}]   ;;  %s17232_s3 = inlined_call_operand.vmem [shape: f32[1,256], index: 3, kind: input, shape index: {}]   ;;  %s17233_s4 = inlined_call_operand.vmem [shape: f32[1,256], index: 4, kind: input, shape index: {}]   ;;  %s17234_s5 = inlined_call_operand.vmem [shape: f32[1280,256], index: 5, kind: input, shape index: {}]   ;;  %s17235_s6 = inlined_call_operand.vmem [shape: f32[1,256], index: 6, kind: input, shape index: {}]   ;;  %s17236_s7 = inlined_call_operand.vmem [shape: f32[1280,128], index: 7, kind: input, shape index: {}]   ;;  %s17237_s8 = inlined_call_operand.vmem [shape: f32[1,128], index: 8, kind: input, shape index: {}]   ;;  %s17238_s9 = inlined_call_operand.vmem [shape: f32[128,1024], index: 9, kind: input, shape index: {}]   ;;  %s17239_s10 = inlined_call_operand.vmem [shape: f32[1,32], index: 10, kind: input, shape index: {}]   ;;  %s17240_s11 = inlined_call_operand.vmem [shape: f32[32,16], index: 11, kind: input, shape index: {}]   ;;  %s17241_s12 = inlined_call_operand.vmem [shape: f32[1,16], index: 12, kind: input, shape index: {}]   ;;  %s17242_s13 = inlined_call_operand.vmem [shape: f32[16,4], index: 13, kind: input, shape index: {}]   ;;  %s17243_s14 = inlined_call_operand.vmem [shape: f32[1,4], index: 14, kind: input, shape index: {}]   ;;  %s17244_s15 = inlined_call_operand.vmem [shape: f32[2,4,4], index: 15, kind: output, shape index: {}]  }
   0x1 LB: > { %s11764_s19 = sadd.s32 4294967295, %s11670_s18   ;;  %p9397_p0 = scmp.ge.s32.totalorder %s11670_s18, 1  ;;  %s11670_s18 = sphi %s11758_s18, %s25_s18  }
   0x2   : > { %p438_p1 = scmp.lt.s32.totalorder %s11670_s18, 3 }
   0x4   : > { %p439_p2 = pnand %p9397_p0, %p438_p1 }
   0x6   : > { %442 = sbr.rel (%p439_p2) target bundleno = 2934 (0xb76), region = 80 }
   0xd   : > { %v560_v0 = vld [vmem:[%s17230_s1 + $0x8] sm:$0xff]  ;;  %v562_v1 = vld [vmem:[%s17230_s1 + $0x18] sm:$0xff]  ;;  %v559_v2 = vld [vmem:[%s17230_s1] sm:$0xff]  ;;  %v11672_v7 = vmov 0.0   ;;  %s9398_s17 = sshll.u32 %s11764_s19, 6  ;;  %vm780_vm0 = vcmask 1043456  }
   0xe   : > { %v10531_v3 = vpack.c.bf16 %v562_v1, %v560_v0  ;;  %v561_v4 = vld [vmem:[%s17230_s1 + $0x10] sm:$0xff]  ;;  %v564_v5 = vld [vmem:[%s17230_s1 + $0x28] sm:$0xff]  ;;  %v566_v6 = vld [vmem:[%s17230_s1 + $0x38] sm:$0xff]  ;;  %851 = vmatprep.mubr.f32.mxu0 %v11672_v7  ;;  %5092 = vst [vmem:[#allocation4 + $0x80] sm:$0xff] %v11672_v7  ;;  %p486_p3 = scmp.lt.s32.totalorder %s9398_s17, 127  ;;  %vm11673_vm1 = vmmov 1  }
   0xf   : > { %5093 = vst [vmem:[#allocation4 + $0x88] sm:$0xff] %v11672_v7  ;;  %5094 = vst [vmem:[#allocation4 + $0x110] sm:$0xff] %v11672_v7  ;;  %v10533_v8 = vpack.c.bf16 %v561_v4, %v559_v2  ;;  %v10535_v9 = vpack.c.bf16 %v566_v6, %v564_v5  ;;  %v563_v10 = vld [vmem:[%s17230_s1 + $0x20] sm:$0xff]  ;;  %v565_v11 = vld [vmem:[%s17230_s1 + $0x30] sm:$0xff]  ;;  %vm587_vm3 = vcmask 490496   ;;  %vm1875_vm4 = vcmask 1046528  }
  0x10   : > { %5095 = vst [vmem:[#allocation4 + $0x118] sm:$0xff] %v11672_v7  ;;  %5096 = vst [vmem:[#allocation4 + $0x1a0] sm:$0xff] %v11672_v7  ;;  %v568_v12 = vld [vmem:[%s17230_s1 + $0x48] sm:$0xff]  ;;  %10532 = vmatprep.subr.bf16.mxu0 %v10531_v3  ;;  %v570_v13 = vld [vmem:[%s17230_s1 + $0x58] sm:$0xff]  ;;  %v10537_v14 = vpack.c.bf16 %v565_v11, %v563_v10  ;;  %s17598_s17 = smov (!%p486_p3, %s9398_s17), 127  ;;  %vm5260_vm5 = vcmask 1045504  }
  0x11   : > { %5097 = vst [vmem:[#allocation4 + $0x1a8] sm:$0xff] %v11672_v7  ;;  %5098 = vst [vmem:[#allocation4 + $0x230] sm:$0xff] %v11672_v7  ;;  %10534 = vmatpush1.bf16.msra.mxu0 %v10533_v8  ;;  %v10539_v15 = vpack.c.bf16 %v570_v13, %v568_v12  ;;  %v567_v16 = vld [vmem:[%s17230_s1 + $0x40] sm:$0xff]  ;;  %v569_v17 = vld [vmem:[%s17230_s1 + $0x50] sm:$0xff]  ;;  %s9399_s28 = sshll.u32 %s17598_s17, 3  ;;  %p491_p4 = scmp.lt.s32.totalorder %s11764_s19, 1 }
  0x12   : > { %5099 = vst [vmem:[#allocation4 + $0x238] sm:$0xff] %v11672_v7  ;;  %10536 = vmatprep.subr.bf16.mxu0 %v10535_v9  ;;  %v572_v18 = vld [vmem:[%s17230_s1 + $0x68] sm:$0xff]  ;;  %v574_v19 = vld [vmem:[%s17230_s1 + $0x78] sm:$0xf]  ;;  %v10541_v20 = vpack.c.bf16 %v569_v17, %v567_v16  ;;  %v571_v22 = vld [vmem:[%s17230_s1 + $0x60] sm:$0xff]  ;;  %s11829_s16 = scalar_lea.vmem %s17229_s0, %s9399_s28 }
  0x13   : > { %v10543_v21 = vpack.c.bf16 %v574_v19, %v572_v18  ;;  %v573_v23 = vld [vmem:[%s17230_s1 + $0x70] sm:$0xf]  ;;  %vm10544_vm2 = vmpackc.low %vm780_vm0, %vm11673_vm1  ;;  %v495_v25 = vld [vmem:[%s11829_s16] sm:$0xff]  ;;  %s17600_s19 = smov (!%p491_p4, %s11764_s19), 1 }
  0x14   : > { %v10546_v24 = vpack.c.bf16 %v573_v23, %v571_v22  ;;  %v496_v26 = vld [vmem:[%s11829_s16 + $0x8] sm:$0xff]  ;;  %v497_v27 = vld [vmem:[%s11829_s16 + $0x10] sm:$0xff]  ;;  %v498_v28 = vld [vmem:[%s11829_s16 + $0x18] sm:$0xff]  ;;  %s9400_s27 = sshll.u32 %s17600_s19, 2 }
  0x15   : > { %10538 = vmatpush1.bf16.msra.mxu0 %v10537_v14  ;;  %v499_v29 = vld [vmem:[%s11829_s16 + $0x20] sm:$0xff]  ;;  %v500_v30 = vld [vmem:[%s11829_s16 + $0x28] sm:$0xff]  ;;  %v501_v31 = vld [vmem:[%s11829_s16 + $0x30] sm:$0xff]  ;;  %s494_s30 = scalar_lea.vmem %s17244_s15, %s9400_s27 }
  0x16   : > { %10540 = vmatprep.subr.bf16.mxu0 %v10539_v15  ;;  %v502_v32 = vld [vmem:[%s11829_s16 + $0x38] sm:$0xff]  ;;  %v3345_v33 = vld [vmem:[%s17234_s5 + $0x8] sm:$0xff]  ;;  %v3344_v36 = vld [vmem:[%s17234_s5] sm:$0xff] }
  0x17   : > { %v3347_v34 = vld [vmem:[%s17234_s5 + $0x18] sm:$0xff]  ;;  %v3346_v37 = vld [vmem:[%s17234_s5 + $0x10] sm:$0xff]  ;;  %v503_v38 = vld [vmem:[%s11829_s16 + $0x40] sm:$0xff] }
  0x18   : > { %v10549_v35 = vpack.c.bf16 %v3347_v34, %v3345_v33  ;;  %v10551_v39 = vpack.c.bf16 %v3346_v37, %v3344_v36  ;;  %v3349_v40 = vld [vmem:[%s17234_s5 + $0x28] sm:$0xff]  ;;  %v3351_v41 = vld [vmem:[%s17234_s5 + $0x38] sm:$0xff]  ;;  %v3348_v43 = vld [vmem:[%s17234_s5 + $0x20] sm:$0xff] }
  0x19   : > { %10542 = vmatpush1.bf16.msra.mxu0 %v10541_v20  ;;  %v10553_v42 = vpack.c.bf16 %v3351_v41, %v3349_v40  ;;  %v3350_v44 = vld [vmem:[%s17234_s5 + $0x30] sm:$0xff]  ;;  %v504_v45 = vld [vmem:[%s11829_s16 + $0x48] sm:$0xff]  ;;  %v3355_v48 = vld [vmem:[%s17234_s5 + $0x58] sm:$0xff] }
  0x1a   : > { %10545 = vmatprep.subr.msk.bf16.mxu0 %vm10544_vm2, %v10543_v21  ;;  %10550 = vmatprep.subr.bf16.mxu1 %v10549_v35  ;;  %v10555_v46 = vpack.c.bf16 %v3350_v44, %v3348_v43  ;;  %v3353_v47 = vld [vmem:[%s17234_s5 + $0x48] sm:$0xff]  ;;  %v3352_v50 = vld [vmem:[%s17234_s5 + $0x40] sm:$0xff]  ;;  %v3354_v51 = vld [vmem:[%s17234_s5 + $0x50] sm:$0xff] }
  0x1b   : > { %10552 = vmatpush1.bf16.msra.mxu1 %v10551_v39  ;;  %v10557_v49 = vpack.c.bf16 %v3355_v48, %v3353_v47  ;;  %v505_v52 = vld [vmem:[%s11829_s16 + $0x50] sm:$0xff]  ;;  %v10559_v53 = vpack.c.bf16 %v3354_v51, %v3352_v50  ;;  %v3357_v54 = vld [vmem:[%s17234_s5 + $0x68] sm:$0xff]  ;;  %v3359_v55 = vld [vmem:[%s17234_s5 + $0x78] sm:$0xff] }
  0x1c   : > { %10554 = vmatprep.subr.bf16.mxu1 %v10553_v42  ;;  %v10561_v56 = vpack.c.bf16 %v3359_v55, %v3357_v54  ;;  %v3356_v57 = vld [vmem:[%s17234_s5 + $0x60] sm:$0xff]  ;;  %v3358_v58 = vld [vmem:[%s17234_s5 + $0x70] sm:$0xff]  ;;  %v506_v59 = vld [vmem:[%s11829_s16 + $0x58] sm:$0xff] }
  0x1d   : > { %10548 = vmatpush1.bf16.msk.msra.mxu0 %vm10544_vm2, %v10546_v24  ;;  %v10563_v60 = vpack.c.bf16 %v3358_v58, %v3356_v57  ;;  %v3361_v61 = vld [vmem:[%s17234_s5 + $0x88] sm:$0xff]  ;;  %v3363_v62 = vld [vmem:[%s17234_s5 + $0x98] sm:$0xff]  ;;  %v3360_v0 = vld [vmem:[%s17234_s5 + $0x80] sm:$0xff] }
  0x1e   : > { %v10565_v63 = vpack.c.bf16 %v3363_v62, %v3361_v61  ;;  %v3362_v1 = vld [vmem:[%s17234_s5 + $0x90] sm:$0xff]  ;;  %v507_v2 = vld [vmem:[%s11829_s16 + $0x60] sm:$0xff]  ;;  %v3365_v4 = vld [vmem:[%s17234_s5 + $0xa8] sm:$0xff] }
  0x1f   : > { %10556 = vmatpush1.bf16.msra.mxu1 %v10555_v46  ;;  %v10567_v3 = vpack.c.bf16 %v3362_v1, %v3360_v0  ;;  %v3367_v5 = vld [vmem:[%s17234_s5 + $0xb8] sm:$0xff]  ;;  %v3364_v8 = vld [vmem:[%s17234_s5 + $0xa0] sm:$0xff]  ;;  %v3366_v9 = vld [vmem:[%s17234_s5 + $0xb0] sm:$0xff] }
  0x20   : > { %9403 = vmatmul.mubr.msk.f32.vlgmr.msra.gmra.mrb[0].mxu0 %vm587_vm3, %v495_v25  ;;  %10558 = vmatprep.subr.bf16.mxu1 %v10557_v49  ;;  %v10569_v6 = vpack.c.bf16 %v3367_v5, %v3365_v4  ;;  %v508_v10 = vld [vmem:[%s11829_s16 + $0x68] sm:$0xff]  ;;  %v10571_v11 = vpack.c.bf16 %v3366_v9, %v3364_v8  ;;  %v3371_v13 = vld [vmem:[%s17234_s5 + $0xd8] sm:$0xff]  ;;  %v3368_v15 = vld [vmem:[%s17234_s5 + $0xc0] sm:$0xff] }
  0x21   : > { %857 = vmatprep.mubr.f32.mxu0 %v11672_v7  ;;  %v3369_v12 = vld [vmem:[%s17234_s5 + $0xc8] sm:$0xff]  ;;  %v3370_v16 = vld [vmem:[%s17234_s5 + $0xd0] sm:$0xff]  ;;  %v3375_v20 = vld [vmem:[%s17234_s5 + $0xf8] sm:$0xff] }
  0x22   : > { %v10573_v14 = vpack.c.bf16 %v3371_v13, %v3369_v12  ;;  %v509_v17 = vld [vmem:[%s11829_s16 + $0x70] sm:$0xff]  ;;  %v10575_v18 = vpack.c.bf16 %v3370_v16, %v3368_v15  ;;  %v3373_v19 = vld [vmem:[%s17234_s5 + $0xe8] sm:$0xff]  ;;  %v3372_v22 = vld [vmem:[%s17234_s5 + $0xe0] sm:$0xff] }
  0x23   : > { %10560 = vmatpush1.bf16.msra.mxu1 %v10559_v53  ;;  %v10577_v21 = vpack.c.bf16 %v3375_v20, %v3373_v19  ;;  %v3374_v23 = vld [vmem:[%s17234_s5 + $0xf0] sm:$0xff]  ;;  %v510_v24 = vld [vmem:[%s11829_s16 + $0x78] sm:$0xff]  ;;  %v3381_v33 = vld [vmem:[%s17234_s5 + $0x128] sm:$0xff] }
  0x24   : > { %9404 = vmatmul.mubr.msk.f32.gmra.mrb[2].mxu0 %vm587_vm3, %v496_v26  ;;  %10562 = vmatprep.subr.bf16.mxu1 %v10561_v56  ;;  %v10579_v25 = vpack.c.bf16 %v3374_v23, %v3372_v22  ;;  %v3377_v26 = vld [vmem:[%s17234_s5 + $0x108] sm:$0xff]  ;;  %v3383_v34 = vld [vmem:[%s17234_s5 + $0x138] sm:$0xff]  ;;  %v3380_v36 = vld [vmem:[%s17234_s5 + $0x120] sm:$0xff] }
  0x25   : > { %863 = vmatprep.mubr.f32.mxu0 %v11672_v7  ;;  %v10585_v35 = vpack.c.bf16 %v3383_v34, %v3381_v33  ;;  %v3382_v37 = vld [vmem:[%s17234_s5 + $0x130] sm:$0xff]  ;;  %v3385_v40 = vld [vmem:[%s17234_s5 + $0x148] sm:$0xff]  ;;  %v3387_v41 = vld [vmem:[%s17234_s5 + $0x158] sm:$0xff] }
  0x26   : > { %v10587_v39 = vpack.c.bf16 %v3382_v37, %v3380_v36  ;;  %v10589_v42 = vpack.c.bf16 %v3387_v41, %v3385_v40  ;;  %v3384_v43 = vld [vmem:[%s17234_s5 + $0x140] sm:$0xff]  ;;  %v3386_v44 = vld [vmem:[%s17234_s5 + $0x150] sm:$0xff]  ;;  %v3389_v47 = vld [vmem:[%s17234_s5 + $0x168] sm:$0xff] }
  0x27   : > { %10564 = vmatpush1.bf16.msra.mxu1 %v10563_v60  ;;  %v10591_v46 = vpack.c.bf16 %v3386_v44, %v3384_v43  ;;  %v3391_v48 = vld [vmem:[%s17234_s5 + $0x178] sm:$0xff]  ;;  %v3388_v50 = vld [vmem:[%s17234_s5 + $0x160] sm:$0xff]  ;;  %v3390_v51 = vld [vmem:[%s17234_s5 + $0x170] sm:$0xff] }
  0x28   : > { %9405 = vmatmul.mubr.msk.f32.gmra.mrb[4].mxu0 %vm587_vm3, %v497_v27  ;;  %10566 = vmatprep.subr.bf16.mxu1 %v10565_v63  ;;  %v3379_v27 = vld [vmem:[%s17234_s5 + $0x118] sm:$0xff]  ;;  %v10593_v49 = vpack.c.bf16 %v3391_v48, %v3389_v47  ;;  %v10595_v53 = vpack.c.bf16 %v3390_v51, %v3388_v50  ;;  %v3393_v54 = vld [vmem:[%s17234_s5 + $0x188] sm:$0xff]  ;;  %v3392_v57 = vld [vmem:[%s17234_s5 + $0x180] sm:$0xff] }
  0x29   : > { %869 = vmatprep.mubr.f32.mxu0 %v11672_v7  ;;  %v3395_v55 = vld [vmem:[%s17234_s5 + $0x198] sm:$0xff]  ;;  %v3394_v58 = vld [vmem:[%s17234_s5 + $0x190] sm:$0xff]  ;;  %v3397_v61 = vld [vmem:[%s17234_s5 + $0x1a8] sm:$0xff] }
  0x2a   : > { %v10597_v56 = vpack.c.bf16 %v3395_v55, %v3393_v54  ;;  %v10599_v60 = vpack.c.bf16 %v3394_v58, %v3392_v57  ;;  %v3399_v62 = vld [vmem:[%s17234_s5 + $0x1b8] sm:$0xff]  ;;  %v3396_v0 = vld [vmem:[%s17234_s5 + $0x1a0] sm:$0xff]  ;;  %v3398_v1 = vld [vmem:[%s17234_s5 + $0x1b0] sm:$0xff] }
  0x2b   : > { %10568 = vmatpush1.bf16.msra.mxu1 %v10567_v3  ;;  %v10601_v63 = vpack.c.bf16 %v3399_v62, %v3397_v61  ;;  %v10603_v3 = vpack.c.bf16 %v3398_v1, %v3396_v0  ;;  %v3401_v4 = vld [vmem:[%s17234_s5 + $0x1c8] sm:$0xff]  ;;  %v3403_v5 = vld [vmem:[%s17234_s5 + $0x1d8] sm:$0xff]  ;;  %v3400_v8 = vld [vmem:[%s17234_s5 + $0x1c0] sm:$0xff] }
  0x2c   : > { %9406 = vmatmul.mubr.msk.f32.gmra.mrb[6].mxu0 %vm587_vm3, %v498_v28  ;;  %10570 = vmatprep.subr.bf16.mxu1 %v10569_v6  ;;  %v10581_v28 = vpack.c.bf16 %v3379_v27, %v3377_v26  ;;  %v10605_v6 = vpack.c.bf16 %v3403_v5, %v3401_v4  ;;  %v3402_v9 = vld [vmem:[%s17234_s5 + $0x1d0] sm:$0xff]  ;;  %v3405_v12 = vld [vmem:[%s17234_s5 + $0x1e8] sm:$0xff]  ;;  %v3407_v13 = vld [vmem:[%s17234_s5 + $0x1f8] sm:$0xff] }
  0x2d   : > { %875 = vmatprep.mubr.f32.mxu0 %v11672_v7  ;;  %v3406_v15 = vld [vmem:[%s17234_s5 + $0x1f0] sm:$0xff]  ;;  %v518_v16 = vld [vmem:[%s11829_s16 + $0xb8] sm:$0xff]  ;;  %v519_v19 = vld [vmem:[%s11829_s16 + $0xc0] sm:$0xff] }
  0x2e   : > { %v520_v20 = vld [vmem:[%s11829_s16 + $0xc8] sm:$0xff]  ;;  %v522_v22 = vld [vmem:[%s11829_s16 + $0xd8] sm:$0xff]  ;;  %v523_v23 = vld [vmem:[%s11829_s16 + $0xe0] sm:$0xff] }
  0x2f   : > { %10572 = vmatpush1.bf16.msra.mxu1 %v10571_v11  ;;  %v10607_v11 = vpack.c.bf16 %v3402_v9, %v3400_v8  ;;  %v526_v26 = vld [vmem:[%s11829_s16 + $0xf8] sm:$0xff]  ;;  %v527_v27 = vld [vmem:[%s11829_s16 + $0x100] sm:$0xff]  ;;  %v533_v33 = vld [vmem:[%s11829_s16 + $0x130] sm:$0xff] }
  0x30   : > { %9407 = vmatmul.mubr.msk.f32.gmra.mrb[8].mxu0 %vm587_vm3, %v499_v29  ;;  %10574 = vmatprep.subr.bf16.mxu1 %v10573_v14  ;;  %v3376_v29 = vld [vmem:[%s17234_s5 + $0x100] sm:$0xff]  ;;  %v534_v34 = vld [vmem:[%s11829_s16 + $0x138] sm:$0xff]  ;;  %v536_v36 = vld [vmem:[%s11829_s16 + $0x148] sm:$0xff] }
  0x31   : > { %881 = vmatprep.mubr.f32.mxu0 %v11672_v7  ;;  %v3404_v14 = vld [vmem:[%s17234_s5 + $0x1e0] sm:$0xff]  ;;  %v537_v37 = vld [vmem:[%s11829_s16 + $0x150] sm:$0xff]  ;;  %v540_v40 = vld [vmem:[%s11829_s16 + $0x168] sm:$0xff] }
  0x32   : > { %v541_v41 = vld [vmem:[%s11829_s16 + $0x170] sm:$0xff]  ;;  %v543_v43 = vld [vmem:[%s11829_s16 + $0x180] sm:$0xff]  ;;  %v544_v44 = vld [vmem:[%s11829_s16 + $0x188] sm:$0xff] }
  0x33   : > { %10576 = vmatpush1.bf16.msra.mxu1 %v10575_v18  ;;  %v10611_v18 = vpack.c.bf16 %v3406_v15, %v3404_v14  ;;  %v546_v48 = vld [vmem:[%s11829_s16 + $0x198] sm:$0xff]  ;;  %v547_v50 = vld [vmem:[%s11829_s16 + $0x1a0] sm:$0xff]  ;;  %v549_v0 = vld [vmem:[%s11829_s16 + $0x1b0] sm:$0xff] }
  0x34   : > { %9408 = vmatmul.mubr.msk.f32.gmra.mrb[10].mxu0 %vm587_vm3, %v500_v30  ;;  %10578 = vmatprep.subr.bf16.mxu1 %v10577_v21  ;;  %v3378_v30 = vld [vmem:[%s17234_s5 + $0x110] sm:$0xff]  ;;  %v575_v51 = vld [vmem:[%s17231_s2] sm:$0x3] }
  0x35   : > { %887 = vmatprep.mubr.f32.mxu0 %v11672_v7  ;;  %v521_v21 = vld [vmem:[%s11829_s16 + $0xd0] sm:$0xff]  ;;  %v1364_v54 = vld [vmem:[%s17232_s3] sm:$0x3] }
  0x36   : > { %v1504_v58 = vld [vmem:[%s17233_s4] sm:$0x3] }
  0x37   : > { %10580 = vmatpush1.bf16.msra.mxu1 %v10579_v25  ;;  %v525_v25 = vld [vmem:[%s11829_s16 + $0xf0] sm:$0xff] }
  0x38   : > { %9409 = vmatmul.mubr.msk.f32.gmra.mrb[12].mxu0 %vm587_vm3, %v501_v31  ;;  %v511_v31 = vld [vmem:[%s11829_s16 + $0x80] sm:$0xff]  ;;  %10582 = vmatprep.subr.bf16.mxu1 %v10581_v28  ;;  %v528_v28 = vld [vmem:[%s11829_s16 + $0x108] sm:$0xff] }
  0x39   : > { %893 = vmatprep.mubr.f32.mxu0 %v11672_v7 }
  0x3c   : > { %9410 = vmatmul.mubr.msk.f32.gmra.mrb[14].mxu0 %vm587_vm3, %v502_v32  ;;  %v10583_v32 = vpack.c.bf16 %v3378_v30, %v3376_v29  ;;  %v529_v29 = vld [vmem:[%s11829_s16 + $0x110] sm:$0xff]  ;;  %v530_v30 = vld [vmem:[%s11829_s16 + $0x118] sm:$0xff] }
  0x3d   : > { %899 = vmatprep.mubr.f32.mxu0 %v11672_v7 }
  0x3e   : > { %10584 = vmatpush1.bf16.msra.mxu1 %v10583_v32  ;;  %v532_v32 = vld [vmem:[%s11829_s16 + $0x128] sm:$0xff] }
  0x3f   : > { %10586 = vmatprep.subr.bf16.mxu1 %v10585_v35  ;;  %v535_v35 = vld [vmem:[%s11829_s16 + $0x140] sm:$0xff] }
  0x40   : > { %9411 = vmatmul.mubr.msk.f32.gmra.mrb[16].mxu0 %vm587_vm3, %v503_v38  ;;  %v512_v38 = vld [vmem:[%s11829_s16 + $0x88] sm:$0xff] }
  0x41   : > { %905 = vmatprep.mubr.f32.mxu0 %v11672_v7 }
  0x42   : > { %10588 = vmatpush1.bf16.msra.mxu1 %v10587_v39  ;;  %v539_v39 = vld [vmem:[%s11829_s16 + $0x160] sm:$0xff] }
  0x43   : > { %10590 = vmatprep.subr.bf16.mxu1 %v10589_v42  ;;  %v542_v42 = vld [vmem:[%s11829_s16 + $0x178] sm:$0xff] }
  0x44   : > { %9412 = vmatmul.mubr.msk.f32.gmra.mrb[18].mxu0 %vm587_vm3, %v504_v45  ;;  %v513_v45 = vld [vmem:[%s11829_s16 + $0x90] sm:$0xff] }
  0x45   : > { %911 = vmatprep.mubr.f32.mxu0 %v11672_v7 }
  0x46   : > { %10592 = vmatpush1.bf16.msra.mxu1 %v10591_v46  ;;  %v545_v46 = vld [vmem:[%s11829_s16 + $0x190] sm:$0xff] }
  0x47   : > { %10594 = vmatprep.subr.bf16.mxu1 %v10593_v49 }
  0x48   : > { %9413 = vmatmul.mubr.msk.f32.gmra.mrb[20].mxu0 %vm587_vm3, %v505_v52  ;;  %v514_v52 = vld [vmem:[%s11829_s16 + $0x98] sm:$0xff] }
  0x49   : > { %917 = vmatprep.mubr.f32.mxu0 %v11672_v7 }
  0x4a   : > { %10596 = vmatpush1.bf16.msra.mxu1 %v10595_v53 }
  0x4b   : > { %10598 = vmatprep.subr.bf16.mxu1 %v10597_v56  ;;  %v548_v56 = vld [vmem:[%s11829_s16 + $0x1a8] sm:$0xff] }
  0x4c   : > { %9414 = vmatmul.mubr.msk.f32.gmra.mrb[22].mxu0 %vm587_vm3, %v506_v59  ;;  %v515_v59 = vld [vmem:[%s11829_s16 + $0xa0] sm:$0xff] }
  0x4d   : > { %923 = vmatprep.mubr.f32.mxu0 %v11672_v7 }
  0x4e   : > { %10600 = vmatpush1.bf16.msra.mxu1 %v10599_v60 }
  0x4f   : > { %10602 = vmatprep.subr.bf16.mxu1 %v10601_v63 }
  0x50   : > { %9415 = vmatmul.mubr.msk.f32.gmra.mrb[24].mxu0 %vm587_vm3, %v507_v2  ;;  %v516_v2 = vld [vmem:[%s11829_s16 + $0xa8] sm:$0xff] }
  0x51   : > { %929 = vmatprep.mubr.f32.mxu0 %v11672_v7 }
  0x52   : > { %10604 = vmatpush1.bf16.msra.mxu1 %v10603_v3 }
  0x53   : > { %10606 = vmatprep.subr.bf16.mxu1 %v10605_v6 }
  0x54   : > { %9416 = vmatmul.mubr.msk.f32.gmra.mrb[26].mxu0 %vm587_vm3, %v508_v10  ;;  %v517_v10 = vld [vmem:[%s11829_s16 + $0xb0] sm:$0xff] }
  0x55   : > { %935 = vmatprep.mubr.f32.mxu0 %v11672_v7 }
  0x56   : > { %10608 = vmatpush1.bf16.msra.mxu1 %v10607_v11 }
  0x58   : > { %9417 = vmatmul.mubr.msk.f32.gmra.mrb[28].mxu0 %vm587_vm3, %v509_v17  ;;  %v10609_v17 = vpack.c.bf16 %v3407_v13, %v3405_v12  ;;  %v550_v12 = vld [vmem:[%s11829_s16 + $0x1b8] sm:$0xff] }
  0x59   : > { %941 = vmatprep.mubr.f32.mxu0 %v11672_v7 }
  0x5a   : > { %10610 = vmatprep.subr.bf16.mxu1 %v10609_v17 }
  0x5b   : > { %10612 = vmatpush1.bf16.msra.mxu1 %v10611_v18 }
  0x5c   : > { %9418 = vmatmul.mubr.msk.f32.gmra.mrb[30].mxu0 %vm587_vm3, %v510_v24  ;;  %v524_v24 = vld [vmem:[%s11829_s16 + $0xe8] sm:$0xff] }
  0x5d   : > { %947 = vmatprep.mubr.f32.mxu0 %v11672_v7 }
  0x60   : > { %9419 = vmatmul.mubr.msk.f32.gmra.mrb[32].mxu0 %vm587_vm3, %v511_v31  ;;  %v531_v31 = vld [vmem:[%s11829_s16 + $0x120] sm:$0xff] }
  0x61   : > { %953 = vmatprep.mubr.f32.mxu0 %v11672_v7 }
  0x64   : > { %9420 = vmatmul.mubr.msk.f32.gmra.mrb[34].mxu0 %vm587_vm3, %v512_v38  ;;  %v538_v38 = vld [vmem:[%s11829_s16 + $0x158] sm:$0xff] }
  0x65   : > { %959 = vmatprep.mubr.f32.mxu0 %v11672_v7 }
  0x68   : > { %9421 = vmatmul.mubr.msk.f32.gmra.mrb[36].mxu0 %vm587_vm3, %v513_v45  ;;  %v17245_v45 = vlaneseq }
  0x69   : > { %965 = vmatprep.mubr.f32.mxu0 %v11672_v7 }
  0x6a   : > { %v12176_v47 = vshrl.u32 %v17245_v45, 7 }
  0x6c   : > { %9422 = vmatmul.mubr.msk.f32.gmra.mrb[38].mxu0 %vm587_vm3, %v514_v52  ;;  %17306 = vst [vmem:[#allocation6_spill] sm:$0xff] %v12176_v47  ;;  %v12182_v49 = vsub.s32 0, %v12176_v47  ;;  %v12190_v52 = vsub.s32 1, %v12176_v47 }
  0x6d   : > { %971 = vmatprep.mubr.f32.mxu0 %v11672_v7 }
  0x6e   : > { %v12194_v53 = vrot.slane %v575_v51, %v12182_v49  ;;  %v12201_v55 = vrot.slane %v575_v51, %v12190_v52  ;;  %v12209_v60 = vrot.slane %v1364_v54, %v12182_v49  ;;  %v12214_v63 = vrot.slane %v1364_v54, %v12190_v52 }
  0x6f   : > { %v12222_v4 = vrot.slane %v1504_v58, %v12190_v52 }
  0x70   : > { %9423 = vmatmul.mubr.msk.f32.gmra.mrb[40].mxu0 %vm587_vm3, %v515_v59 }
  0x71   : > { %977 = vmatprep.mubr.f32.mxu0 %v11672_v7 }
  0x74   : > { %9424 = vmatmul.mubr.msk.f32.gmra.mrb[42].mxu0 %vm587_vm3, %v516_v2  ;;  %v12219_v2 = vrot.slane %v1504_v58, %v12182_v49 }
  0x75   : > { %983 = vmatprep.mubr.f32.mxu0 %v11672_v7 }
  0x78   : > { %9425 = vmatmul.mubr.msk.f32.gmra.mrb[44].mxu0 %vm587_vm3, %v517_v10 }
  0x79   : > { %989 = vmatprep.mubr.f32.mxu0 %v11672_v7 }
  0x7c   : > { %9426 = vmatmul.mubr.msk.f32.gmra.mrb[46].mxu0 %vm587_vm3, %v518_v16 }
  0x7d   : > { %995 = vmatprep.mubr.f32.mxu0 %v11672_v7 }
  0x80   : > { %9427 = vmatmul.mubr.msk.f32.gmra.mrb[48].mxu0 %vm587_vm3, %v519_v19 }
  0x81   : > { %1001 = vmatprep.mubr.f32.mxu0 %v11672_v7 }
  0x84   : > { %9428 = vmatmul.mubr.msk.f32.gmra.mrb[50].mxu0 %vm587_vm3, %v520_v20 }
  0x85   : > { %1007 = vmatprep.mubr.f32.mxu0 %v11672_v7 }
  0x88   : > { %9429 = vmatmul.mubr.msk.f32.gmra.mrb[52].mxu0 %vm587_vm3, %v521_v21 }
  0x89   : > { %1013 = vmatprep.mubr.f32.mxu0 %v11672_v7 }
  0x8c   : > { %9430 = vmatmul.mubr.msk.f32.gmra.mrb[54].mxu0 %vm587_vm3, %v522_v22 }
  0x8d   : > { %1019 = vmatprep.mubr.f32.mxu0 %v11672_v7 }
  0x90   : > { %9431 = vmatmul.mubr.msk.f32.gmra.mrb[56].mxu0 %vm587_vm3, %v523_v23  ;;  %v551_v23 = vld [vmem:[%s11829_s16 + $0x1c0] sm:$0xff] }
  0x91   : > { %1025 = vmatprep.mubr.f32.mxu0 %v11672_v7 }
  0x94   : > { %9432 = vmatmul.mubr.msk.f32.gmra.mrb[58].mxu0 %vm587_vm3, %v524_v24 }
  0x95   : > { %1031 = vmatprep.mubr.f32.mxu0 %v11672_v7 }
  0x98   : > { %9433 = vmatmul.mubr.msk.f32.gmra.mrb[60].mxu0 %vm587_vm3, %v525_v25 }
  0x99   : > { %1037 = vmatprep.mubr.f32.mxu0 %v11672_v7 }
  0x9c   : > { %9434 = vmatmul.mubr.msk.f32.gmra.mrb[62].mxu0 %vm587_vm3, %v526_v26 }
  0x9d   : > { %1043 = vmatprep.mubr.f32.mxu0 %v11672_v7 }
  0xa0   : > { %9435 = vmatmul.mubr.msk.f32.gmra.mrb[64].mxu0 %vm587_vm3, %v527_v27 }
  0xa1   : > { %1049 = vmatprep.mubr.f32.mxu0 %v11672_v7 }
  0xa4   : > { %9436 = vmatmul.mubr.msk.f32.gmra.mrb[66].mxu0 %vm587_vm3, %v528_v28 }
  0xa5   : > { %1055 = vmatprep.mubr.f32.mxu0 %v11672_v7 }
  0xa8   : > { %9437 = vmatmul.mubr.msk.f32.gmra.mrb[68].mxu0 %vm587_vm3, %v529_v29 }
  0xa9   : > { %1061 = vmatprep.mubr.f32.mxu0 %v11672_v7 }
  0xac   : > { %9438 = vmatmul.mubr.msk.f32.gmra.mrb[70].mxu0 %vm587_vm3, %v530_v30 }
  0xad   : > { %1067 = vmatprep.mubr.f32.mxu0 %v11672_v7 }
  0xb0   : > { %9439 = vmatmul.mubr.msk.f32.gmra.mrb[72].mxu0 %vm587_vm3, %v531_v31 }
  0xb1   : > { %1073 = vmatprep.mubr.f32.mxu0 %v11672_v7 }
  0xb4   : > { %9440 = vmatmul.mubr.msk.f32.gmra.mrb[74].mxu0 %vm587_vm3, %v532_v32 }
  0xb5   : > { %1079 = vmatprep.mubr.f32.mxu0 %v11672_v7 }
  0xb8   : > { %9441 = vmatmul.mubr.msk.f32.gmra.mrb[76].mxu0 %vm587_vm3, %v533_v33 }
  0xb9   : > { %1085 = vmatprep.mubr.f32.mxu0 %v11672_v7 }
  0xbc   : > { %9442 = vmatmul.mubr.msk.f32.gmra.mrb[78].mxu0 %vm587_vm3, %v534_v34  ;;  %v552_v34 = vld [vmem:[%s11829_s16 + $0x1c8] sm:$0xff] }
  0xbd   : > { %1091 = vmatprep.mubr.f32.mxu0 %v11672_v7 }
  0xc0   : > { %9443 = vmatmul.mubr.msk.f32.gmra.mrb[80].mxu0 %vm587_vm3, %v535_v35  ;;  %v3409_v35 = vld [vmem:[%s17234_s5 + $0x208] sm:$0xff] }
  0xc1   : > { %1097 = vmatprep.mubr.f32.mxu0 %v11672_v7 }
  0xc4   : > { %9444 = vmatmul.mubr.msk.f32.gmra.mrb[82].mxu0 %vm587_vm3, %v536_v36  ;;  %v3411_v36 = vld [vmem:[%s17234_s5 + $0x218] sm:$0xff] }
  0xc5   : > { %1103 = vmatprep.mubr.f32.mxu0 %v11672_v7 }
  0xc8   : > { %9445 = vmatmul.mubr.msk.f32.gmra.mrb[84].mxu0 %vm587_vm3, %v537_v37 }
  0xc9   : > { %1109 = vmatprep.mubr.f32.mxu0 %v11672_v7 }
  0xcc   : > { %9446 = vmatmul.mubr.msk.f32.gmra.mrb[86].mxu0 %vm587_vm3, %v538_v38 }
  0xcd   : > { %1115 = vmatprep.mubr.f32.mxu0 %v11672_v7 }
  0xd0   : > { %9447 = vmatmul.mubr.msk.f32.gmra.mrb[88].mxu0 %vm587_vm3, %v539_v39  ;;  %v10613_v39 = vpack.c.bf16 %v3411_v36, %v3409_v35 }
  0xd1   : > { %1121 = vmatprep.mubr.f32.mxu0 %v11672_v7 }
  0xd2   : > { %10614 = vmatprep.subr.bf16.mxu1 %v10613_v39  ;;  %v3419_v39 = vld [vmem:[%s17234_s5 + $0x258] sm:$0xff] }
  0xd4   : > { %9448 = vmatmul.mubr.msk.f32.gmra.mrb[90].mxu0 %vm587_vm3, %v540_v40 }
  0xd5   : > { %1127 = vmatprep.mubr.f32.mxu0 %v11672_v7 }
  0xd8   : > { %9449 = vmatmul.mubr.msk.f32.gmra.mrb[92].mxu0 %vm587_vm3, %v541_v41 }
  0xd9   : > { %1133 = vmatprep.mubr.f32.mxu0 %v11672_v7 }
  0xdc   : > { %9450 = vmatmul.mubr.msk.f32.gmra.mrb[94].mxu0 %vm587_vm3, %v542_v42 }
  0xdd   : > { %1139 = vmatprep.mubr.f32.mxu0 %v11672_v7 }
  0xe0   : > { %9451 = vmatmul.mubr.msk.f32.gmra.mrb[96].mxu0 %vm587_vm3, %v543_v43 }
  0xe1   : > { %1145 = vmatprep.mubr.f32.mxu0 %v11672_v7 }
  0xe4   : > { %9452 = vmatmul.mubr.msk.f32.gmra.mrb[98].mxu0 %vm587_vm3, %v544_v44 }
  0xe5   : > { %1151 = vmatprep.mubr.f32.mxu0 %v11672_v7 }
  0xe8   : > { %9453 = vmatmul.mubr.msk.f32.gmra.mrb[100].mxu0 %vm587_vm3, %v545_v46 }
  0xe9   : > { %1157 = vmatprep.mubr.f32.mxu0 %v11672_v7 }
  0xec   : > { %9454 = vmatmul.mubr.msk.f32.gmra.mrb[102].mxu0 %vm587_vm3, %v546_v48  ;;  %v3408_v48 = vld [vmem:[%s17234_s5 + $0x200] sm:$0xff] }
  0xed   : > { %1163 = vmatprep.mubr.f32.mxu0 %v11672_v7 }
  0xf0   : > { %9455 = vmatmul.mubr.msk.f32.gmra.mrb[104].mxu0 %vm587_vm3, %v547_v50  ;;  %v3410_v50 = vld [vmem:[%s17234_s5 + $0x210] sm:$0xff] }
  0xf1   : > { %1169 = vmatprep.mubr.f32.mxu0 %v11672_v7 }
  0xf3   : > { %v853_v57 = vpop.f32.mrb[0].mxu0 }
  0xf4   : > { %v854_v59 = vadd.f32 %v853_v57, %v12194_v53  ;;  %v855_v61 = vpop.f32.mrb[1].mxu0  ;;  %9456 = vmatmul.mubr.msk.f32.gmra.mrb[106].mxu0 %vm587_vm3, %v548_v56  ;;  %v553_v56 = vld [vmem:[%s11829_s16 + $0x1d0] sm:$0xff]  ;;  %v10615_v57 = vpack.c.bf16 %v3410_v50, %v3408_v48 }
  0xf5   : > { %v856_v62 = vadd.f32 %v855_v61, %v12201_v55  ;;  %1175 = vmatprep.mubr.f32.mxu0 %v11672_v7 }
  0xf6   : > { %v1236_v1 = vmax.f32 %v854_v59, 0.0 }
  0xf7   : > { %v1237_v3 = vmax.f32 %v856_v62, 0.0  ;;  %v859_v5 = vpop.f32.mrb[2].mxu0 }
  0xf8   : > { %v1376_v6 = vmul.f32 %v12209_v60, %v1236_v1  ;;  %v860_v8 = vadd.f32 %v859_v5, %v12194_v53  ;;  %v861_v9 = vpop.f32.mrb[3].mxu0  ;;  %9457 = vmatmul.mubr.msk.f32.gmra.mrb[108].mxu0 %vm587_vm3, %v549_v0 }
  0xf9   : > { %v1377_v10 = vmul.f32 %v12214_v63, %v1237_v3  ;;  %v862_v11 = vadd.f32 %v861_v9, %v12201_v55  ;;  %1181 = vmatprep.mubr.f32.mxu0 %v11672_v7  ;;  %v554_v9 = vld [vmem:[%s11829_s16 + $0x1d8] sm:$0xff] }
  0xfa   : > { %v1516_v13 = vadd.f32 %v12219_v2, %v1376_v6  ;;  %v1238_v14 = vmax.f32 %v860_v8, 0.0 }
  0xfb   : > { %v1517_v15 = vadd.f32 %v12222_v4, %v1377_v10  ;;  %v1239_v16 = vmax.f32 %v862_v11, 0.0  ;;  %v865_v17 = vpop.f32.mrb[4].mxu0  ;;  %v3413_v10 = vld [vmem:[%s17234_s5 + $0x228] sm:$0xff]  ;;  %v3415_v11 = vld [vmem:[%s17234_s5 + $0x238] sm:$0xff] }
  0xfc   : > { %1644 = vst [vmem:[#allocation2] sm:$0xff] %v1516_v13  ;;  %v1378_v18 = vmul.f32 %v12209_v60, %v1238_v14  ;;  %v866_v19 = vadd.f32 %v865_v17, %v12194_v53  ;;  %v867_v20 = vpop.f32.mrb[5].mxu0  ;;  %9458 = vmatmul.mubr.msk.f32.gmra.mrb[110].mxu0 %vm587_vm3, %v550_v12  ;;  %v10617_v14 = vpack.c.bf16 %v3415_v11, %v3413_v10 }
  0xfd   : > { %1645 = vst [vmem:[#allocation2 + $0x8] sm:$0xff] %v1517_v15  ;;  %v1379_v21 = vmul.f32 %v12214_v63, %v1239_v16  ;;  %v868_v22 = vadd.f32 %v867_v20, %v12201_v55  ;;  %1187 = vmatprep.mubr.f32.mxu0 %v11672_v7  ;;  %3740 = vmatprep.mubr.f32.mxu1 %v1517_v15 }
  0xfe   : > { %v1518_v24 = vadd.f32 %v12219_v2, %v1378_v18  ;;  %v1240_v25 = vmax.f32 %v866_v19, 0.0  ;;  %3741 = vmatmul.mubr.f32.vlgmr.msra.gmra.mrb[0].mxu1 %v1516_v13 }
  0xff   : > { %v1519_v26 = vadd.f32 %v12222_v4, %v1379_v21  ;;  %v1241_v27 = vmax.f32 %v868_v22, 0.0  ;;  %v871_v28 = vpop.f32.mrb[6].mxu0  ;;  %10616 = vmatpush1.bf16.msra.mxu1 %v10615_v57  ;;  %v3412_v21 = vld [vmem:[%s17234_s5 + $0x220] sm:$0xff]  ;;  %v3414_v22 = vld [vmem:[%s17234_s5 + $0x230] sm:$0xff] }
 0x100   : > { %1646 = vst [vmem:[#allocation2 + $0x10] sm:$0xff] %v1518_v24  ;;  %v1380_v29 = vmul.f32 %v12209_v60, %v1240_v25  ;;  %v872_v30 = vadd.f32 %v871_v28, %v12194_v53  ;;  %v873_v31 = vpop.f32.mrb[7].mxu0  ;;  %9459 = vmatmul.mubr.msk.f32.gmra.mrb[112].mxu0 %vm587_vm3, %v551_v23  ;;  %10618 = vmatprep.subr.bf16.mxu1 %v10617_v14  ;;  %v555_v25 = vld [vmem:[%s11829_s16 + $0x1e0] sm:$0xff]  ;;  %v3423_v14 = vld [vmem:[%s17234_s5 + $0x278] sm:$0xff] }
 0x101   : > { %1647 = vst [vmem:[#allocation2 + $0x18] sm:$0xff] %v1519_v26  ;;  %v1381_v32 = vmul.f32 %v12214_v63, %v1241_v27  ;;  %v874_v33 = vadd.f32 %v873_v31, %v12201_v55  ;;  %1193 = vmatprep.mubr.f32.mxu0 %v11672_v7  ;;  %3746 = vmatprep.mubr.f32.mxu1 %v1519_v26 }
 0x102   : > { %v1520_v37 = vadd.f32 %v12219_v2, %v1380_v29  ;;  %v1242_v38 = vmax.f32 %v872_v30, 0.0  ;;  %3747 = vmatmul.mubr.f32.gmra.mrb[2].mxu1 %v1518_v24  ;;  %v10619_v26 = vpack.c.bf16 %v3414_v22, %v3412_v21 }
 0x103   : > { %v1521_v40 = vadd.f32 %v12222_v4, %v1381_v32  ;;  %v1243_v41 = vmax.f32 %v874_v33, 0.0  ;;  %v877_v42 = vpop.f32.mrb[8].mxu0 }
 0x104   : > { %1648 = vst [vmem:[#allocation2 + $0x20] sm:$0xff] %v1520_v37  ;;  %v1382_v43 = vmul.f32 %v12209_v60, %v1242_v38  ;;  %v878_v44 = vadd.f32 %v877_v42, %v12194_v53  ;;  %v879_v46 = vpop.f32.mrb[9].mxu0  ;;  %9460 = vmatmul.mubr.msk.f32.gmra.mrb[114].mxu0 %vm587_vm3, %v552_v34  ;;  %10620 = vmatpush1.bf16.msra.mxu1 %v10619_v26  ;;  %v3417_v38 = vld [vmem:[%s17234_s5 + $0x248] sm:$0xff] }
 0x105   : > { %1649 = vst [vmem:[#allocation2 + $0x28] sm:$0xff] %v1521_v40  ;;  %v1383_v51 = vmul.f32 %v12214_v63, %v1243_v41  ;;  %v880_v54 = vadd.f32 %v879_v46, %v12201_v55  ;;  %1199 = vmatprep.mubr.f32.mxu0 %v11672_v7  ;;  %3752 = vmatprep.mubr.f32.mxu1 %v1521_v40 }
 0x106   : > { %v1522_v58 = vadd.f32 %v12219_v2, %v1382_v43  ;;  %v1244_v59 = vmax.f32 %v878_v44, 0.0  ;;  %3753 = vmatmul.mubr.f32.gmra.mrb[4].mxu1 %v1520_v37  ;;  %v556_v37 = vld [vmem:[%s11829_s16 + $0x1e8] sm:$0xff]  ;;  %v10621_v42 = vpack.c.bf16 %v3419_v39, %v3417_v38  ;;  %v3427_v39 = vld [vmem:[%s17234_s5 + $0x298] sm:$0xff] }
 0x107   : > { %v1523_v61 = vadd.f32 %v12222_v4, %v1383_v51  ;;  %v1245_v62 = vmax.f32 %v880_v54, 0.0  ;;  %v883_v0 = vpop.f32.mrb[10].mxu0  ;;  %v3416_v54 = vld [vmem:[%s17234_s5 + $0x240] sm:$0xff]  ;;  %v3425_v38 = vld [vmem:[%s17234_s5 + $0x288] sm:$0xff] }
 0x108   : > { %1650 = vst [vmem:[#allocation2 + $0x30] sm:$0xff] %v1522_v58  ;;  %v1384_v1 = vmul.f32 %v12209_v60, %v1244_v59  ;;  %v884_v3 = vadd.f32 %v883_v0, %v12194_v53  ;;  %v885_v5 = vpop.f32.mrb[11].mxu0  ;;  %9461 = vmatmul.mubr.msk.f32.gmra.mrb[116].mxu0 %vm587_vm3, %v553_v56  ;;  %10622 = vmatprep.subr.bf16.mxu1 %v10621_v42  ;;  %v3418_v56 = vld [vmem:[%s17234_s5 + $0x250] sm:$0xff] }
 0x109   : > { %1651 = vst [vmem:[#allocation2 + $0x38] sm:$0xff] %v1523_v61  ;;  %v1385_v6 = vmul.f32 %v12214_v63, %v1245_v62  ;;  %v886_v8 = vadd.f32 %v885_v5, %v12201_v55  ;;  %1205 = vmatprep.mubr.f32.mxu0 %v11672_v7  ;;  %3758 = vmatprep.mubr.f32.mxu1 %v1523_v61  ;;  %v557_v59 = vld [vmem:[%s11829_s16 + $0x1f0] sm:$0xff] }
 0x10a   : > { %v1524_v12 = vadd.f32 %v12219_v2, %v1384_v1  ;;  %v1246_v13 = vmax.f32 %v884_v3, 0.0  ;;  %3759 = vmatmul.mubr.f32.gmra.mrb[6].mxu1 %v1522_v58  ;;  %v10623_v61 = vpack.c.bf16 %v3418_v56, %v3416_v54  ;;  %v10629_v42 = vpack.c.bf16 %v3427_v39, %v3425_v38  ;;  %v3424_v54 = vld [vmem:[%s17234_s5 + $0x280] sm:$0xff]  ;;  %v3426_v56 = vld [vmem:[%s17234_s5 + $0x290] sm:$0xff] }
 0x10b   : > { %v1525_v15 = vadd.f32 %v12222_v4, %v1385_v6  ;;  %v1247_v16 = vmax.f32 %v886_v8, 0.0  ;;  %v889_v17 = vpop.f32.mrb[12].mxu0 }
 0x10c   : > { %1652 = vst [vmem:[#allocation2 + $0x40] sm:$0xff] %v1524_v12  ;;  %v1386_v18 = vmul.f32 %v12209_v60, %v1246_v13  ;;  %v890_v19 = vadd.f32 %v889_v17, %v12194_v53  ;;  %v891_v20 = vpop.f32.mrb[13].mxu0  ;;  %9462 = vmatmul.mubr.msk.f32.gmra.mrb[118].mxu0 %vm587_vm3, %v554_v9  ;;  %10624 = vmatpush1.bf16.msra.mxu1 %v10623_v61  ;;  %v558_v12 = vld [vmem:[%s11829_s16 + $0x1f8] sm:$0xff]  ;;  %v3421_v13 = vld [vmem:[%s17234_s5 + $0x268] sm:$0xff] }
 0x10d   : > { %1653 = vst [vmem:[#allocation2 + $0x48] sm:$0xff] %v1525_v15  ;;  %v1387_v23 = vmul.f32 %v12214_v63, %v1247_v16  ;;  %v892_v24 = vadd.f32 %v891_v20, %v12201_v55  ;;  %1211 = vmatprep.mubr.f32.mxu0 %v11672_v7  ;;  %v10625_v17 = vpack.c.bf16 %v3423_v14, %v3421_v13 }
 0x10e   : > { %v1526_v27 = vadd.f32 %v12219_v2, %v1386_v18  ;;  %v1248_v28 = vmax.f32 %v890_v19, 0.0 }
 0x10f   : > { %v1527_v29 = vadd.f32 %v12222_v4, %v1387_v23  ;;  %v1249_v30 = vmax.f32 %v892_v24, 0.0  ;;  %v895_v31 = vpop.f32.mrb[14].mxu0  ;;  %10626 = vmatprep.subr.bf16.mxu1 %v10625_v17  ;;  %v3420_v23 = vld [vmem:[%s17234_s5 + $0x260] sm:$0xff]  ;;  %v3422_v24 = vld [vmem:[%s17234_s5 + $0x270] sm:$0xff] }
 0x110   : > { %1654 = vst [vmem:[#allocation2 + $0x50] sm:$0xff] %v1526_v27  ;;  %v1388_v32 = vmul.f32 %v12209_v60, %v1248_v28  ;;  %v896_v33 = vadd.f32 %v895_v31, %v12194_v53  ;;  %v897_v34 = vpop.f32.mrb[15].mxu0  ;;  %9463 = vmatmul.mubr.msk.f32.gmra.mrb[120].mxu0 %vm587_vm3, %v555_v25  ;;  %v10627_v27 = vpack.c.bf16 %v3422_v24, %v3420_v23 }
 0x111   : > { %1655 = vst [vmem:[#allocation2 + $0x58] sm:$0xff] %v1527_v29  ;;  %v1389_v35 = vmul.f32 %v12214_v63, %v1249_v30  ;;  %v898_v36 = vadd.f32 %v897_v34, %v12201_v55  ;;  %1217 = vmatprep.mubr.f32.mxu0 %v11672_v7 }
 0x112   : > { %v1528_v40 = vadd.f32 %v12219_v2, %v1388_v32  ;;  %v1250_v41 = vmax.f32 %v896_v33, 0.0  ;;  %10628 = vmatpush1.bf16.msra.mxu1 %v10627_v27 }
 0x113   : > { %v1529_v43 = vadd.f32 %v12222_v4, %v1389_v35  ;;  %v1251_v44 = vmax.f32 %v898_v36, 0.0  ;;  %v901_v46 = vpop.f32.mrb[16].mxu0  ;;  %10630 = vmatprep.subr.bf16.mxu1 %v10629_v42 }
 0x114   : > { %1656 = vst [vmem:[#allocation2 + $0x60] sm:$0xff] %v1528_v40  ;;  %v1390_v48 = vmul.f32 %v12209_v60, %v1250_v41  ;;  %v902_v50 = vadd.f32 %v901_v46, %v12194_v53  ;;  %v903_v51 = vpop.f32.mrb[17].mxu0  ;;  %9464 = vmatmul.mubr.msk.f32.gmra.mrb[122].mxu0 %vm587_vm3, %v556_v37 }
 0x115   : > { %1657 = vst [vmem:[#allocation2 + $0x68] sm:$0xff] %v1529_v43  ;;  %v1391_v57 = vmul.f32 %v12214_v63, %v1251_v44  ;;  %v904_v58 = vadd.f32 %v903_v51, %v12201_v55  ;;  %1223 = vmatprep.mubr.f32.mxu0 %v11672_v7 }
 0x116   : > { %v1530_v62 = vadd.f32 %v12219_v2, %v1390_v48  ;;  %v1252_v0 = vmax.f32 %v902_v50, 0.0 }
 0x117   : > { %v1531_v1 = vadd.f32 %v12222_v4, %v1391_v57  ;;  %v1253_v3 = vmax.f32 %v904_v58, 0.0  ;;  %v907_v5 = vpop.f32.mrb[18].mxu0 }
 0x118   : > { %1658 = vst [vmem:[#allocation2 + $0x70] sm:$0xff] %v1530_v62  ;;  %v1392_v6 = vmul.f32 %v12209_v60, %v1252_v0  ;;  %v908_v8 = vadd.f32 %v907_v5, %v12194_v53  ;;  %v909_v9 = vpop.f32.mrb[19].mxu0  ;;  %9465 = vmatmul.mubr.msk.f32.gmra.mrb[124].mxu0 %vm587_vm3, %v557_v59  ;;  %v10631_v59 = vpack.c.bf16 %v3426_v56, %v3424_v54 }
 0x119   : > { %1659 = vst [vmem:[#allocation2 + $0x78] sm:$0xff] %v1531_v1  ;;  %v1393_v10 = vmul.f32 %v12214_v63, %v1253_v3  ;;  %v910_v11 = vadd.f32 %v909_v9, %v12201_v55  ;;  %1229 = vmatprep.mubr.f32.mxu0 %v11672_v7 }
 0x11a   : > { %v1532_v15 = vadd.f32 %v12219_v2, %v1392_v6  ;;  %v1254_v16 = vmax.f32 %v908_v8, 0.0  ;;  %10632 = vmatpush1.bf16.msra.mxu1 %v10631_v59 }
 0x11b   : > { %v1533_v18 = vadd.f32 %v12222_v4, %v1393_v10  ;;  %v1255_v19 = vmax.f32 %v910_v11, 0.0  ;;  %v913_v20 = vpop.f32.mrb[20].mxu0  ;;  %v3429_v11 = vld [vmem:[%s17234_s5 + $0x2a8] sm:$0xff] }
 0x11c   : > { %1660 = vst [vmem:[#allocation2 + $0x80] sm:$0xff] %v1532_v15  ;;  %v1394_v7 = vmul.f32 %v12209_v60, %v1254_v16  ;;  %v914_v21 = vadd.f32 %v913_v20, %v12194_v53  ;;  %v915_v22 = vpop.f32.mrb[21].mxu0  ;;  %9466 = vmatmul.mubr.msk.f32.gmra.mrb[126].mxu0 %vm587_vm3, %v558_v12  ;;  %v3431_v12 = vld [vmem:[%s17234_s5 + $0x2b8] sm:$0xff] }
 0x11d   : > { %1661 = vst [vmem:[#allocation2 + $0x88] sm:$0xff] %v1533_v18  ;;  %v1395_v25 = vmul.f32 %v12214_v63, %v1255_v19  ;;  %v916_v26 = vadd.f32 %v915_v22, %v12201_v55  ;;  %3764 = vmatprep.mubr.f32.mxu1 %v1533_v18  ;;  %v3430_v22 = vld [vmem:[%s17234_s5 + $0x2b0] sm:$0xff] }
 0x11e   : > { %v1534_v28 = vadd.f32 %v12219_v2, %v1394_v7  ;;  %v1256_v29 = vmax.f32 %v914_v21, 0.0  ;;  %3765 = vmatmul.mubr.f32.gmra.mrb[8].mxu1 %v1532_v15  ;;  %v10633_v15 = vpack.c.bf16 %v3431_v12, %v3429_v11  ;;  %v3428_v21 = vld [vmem:[%s17234_s5 + $0x2a0] sm:$0xff] }
 0x11f   : > { %v1535_v30 = vadd.f32 %v12222_v4, %v1395_v25  ;;  %v1257_v31 = vmax.f32 %v916_v26, 0.0  ;;  %v919_v32 = vpop.f32.mrb[22].mxu0  ;;  %v10635_v25 = vpack.c.bf16 %v3430_v22, %v3428_v21 }
 0x120   : > { %1662 = vst [vmem:[#allocation2 + $0x90] sm:$0xff] %v1534_v28  ;;  %v1396_v33 = vmul.f32 %v12209_v60, %v1256_v29  ;;  %v920_v34 = vadd.f32 %v919_v32, %v12194_v53  ;;  %v921_v35 = vpop.f32.mrb[23].mxu0  ;;  %10634 = vmatprep.subr.bf16.mxu1 %v10633_v15 }
 0x121   : > { %1663 = vst [vmem:[#allocation2 + $0x98] sm:$0xff] %v1535_v30  ;;  %v1397_v36 = vmul.f32 %v12214_v63, %v1257_v31  ;;  %v922_v37 = vadd.f32 %v921_v35, %v12201_v55  ;;  %3770 = vmatprep.mubr.f32.mxu1 %v1535_v30  ;;  %10636 = vmatpush1.bf16.msra.mxu1 %v10635_v25 }
 0x122   : > { %v1536_v40 = vadd.f32 %v12219_v2, %v1396_v33  ;;  %v1258_v41 = vmax.f32 %v920_v34, 0.0  ;;  %3771 = vmatmul.mubr.f32.gmra.mrb[10].mxu1 %v1534_v28 }
 0x123   : > { %v1537_v43 = vadd.f32 %v12222_v4, %v1397_v36  ;;  %v1259_v44 = vmax.f32 %v922_v37, 0.0  ;;  %v925_v46 = vpop.f32.mrb[24].mxu0  ;;  %v3433_v36 = vld [vmem:[%s17234_s5 + $0x2c8] sm:$0xff]  ;;  %v3435_v37 = vld [vmem:[%s17234_s5 + $0x2d8] sm:$0xff] }
 0x124   : > { %1664 = vst [vmem:[#allocation2 + $0xa0] sm:$0xff] %v1536_v40  ;;  %v1398_v48 = vmul.f32 %v12209_v60, %v1258_v41  ;;  %v926_v50 = vadd.f32 %v925_v46, %v12194_v53  ;;  %v927_v51 = vpop.f32.mrb[25].mxu0 }
 0x125   : > { %1665 = vst [vmem:[#allocation2 + $0xa8] sm:$0xff] %v1537_v43  ;;  %v1399_v57 = vmul.f32 %v12214_v63, %v1259_v44  ;;  %v928_v58 = vadd.f32 %v927_v51, %v12201_v55  ;;  %3776 = vmatprep.mubr.f32.mxu1 %v1537_v43  ;;  %v3434_v51 = vld [vmem:[%s17234_s5 + $0x2d0] sm:$0xff] }
 0x126   : > { %v1538_v61 = vadd.f32 %v12219_v2, %v1398_v48  ;;  %v1260_v62 = vmax.f32 %v926_v50, 0.0  ;;  %3777 = vmatmul.mubr.f32.gmra.mrb[12].mxu1 %v1536_v40  ;;  %v10637_v40 = vpack.c.bf16 %v3435_v37, %v3433_v36  ;;  %v3432_v50 = vld [vmem:[%s17234_s5 + $0x2c0] sm:$0xff] }
 0x127   : > { %v1539_v0 = vadd.f32 %v12222_v4, %v1399_v57  ;;  %v1261_v1 = vmax.f32 %v928_v58, 0.0  ;;  %v931_v3 = vpop.f32.mrb[26].mxu0  ;;  %v10639_v57 = vpack.c.bf16 %v3434_v51, %v3432_v50 }
 0x128   : > { %1666 = vst [vmem:[#allocation2 + $0xb0] sm:$0xff] %v1538_v61  ;;  %v1400_v5 = vmul.f32 %v12209_v60, %v1260_v62  ;;  %v932_v6 = vadd.f32 %v931_v3, %v12194_v53  ;;  %v933_v8 = vpop.f32.mrb[27].mxu0  ;;  %10638 = vmatprep.subr.bf16.mxu1 %v10637_v40 }
 0x129   : > { %1667 = vst [vmem:[#allocation2 + $0xb8] sm:$0xff] %v1539_v0  ;;  %v1401_v9 = vmul.f32 %v12214_v63, %v1261_v1  ;;  %v934_v10 = vadd.f32 %v933_v8, %v12201_v55  ;;  %3782 = vmatprep.mubr.f32.mxu1 %v1539_v0  ;;  %10640 = vmatpush1.bf16.msra.mxu1 %v10639_v57 }
 0x12a   : > { %v1540_v13 = vadd.f32 %v12219_v2, %v1400_v5  ;;  %v1262_v14 = vmax.f32 %v932_v6, 0.0  ;;  %3783 = vmatmul.mubr.f32.gmra.mrb[14].mxu1 %v1538_v61 }
 0x12b   : > { %v1541_v16 = vadd.f32 %v12222_v4, %v1401_v9  ;;  %v1263_v17 = vmax.f32 %v934_v10, 0.0  ;;  %v937_v18 = vpop.f32.mrb[28].mxu0  ;;  %v3437_v9 = vld [vmem:[%s17234_s5 + $0x2e8] sm:$0xff]  ;;  %v3439_v10 = vld [vmem:[%s17234_s5 + $0x2f8] sm:$0xff] }
 0x12c   : > { %1668 = vst [vmem:[#allocation2 + $0xc0] sm:$0xff] %v1540_v13  ;;  %v1402_v19 = vmul.f32 %v12209_v60, %v1262_v14  ;;  %v938_v20 = vadd.f32 %v937_v18, %v12194_v53  ;;  %v939_v7 = vpop.f32.mrb[29].mxu0  ;;  %v10641_v13 = vpack.c.bf16 %v3439_v10, %v3437_v9 }
 0x12d   : > { %1669 = vst [vmem:[#allocation2 + $0xc8] sm:$0xff] %v1541_v16  ;;  %v1403_v23 = vmul.f32 %v12214_v63, %v1263_v17  ;;  %v940_v24 = vadd.f32 %v939_v7, %v12201_v55  ;;  %v3438_v7 = vld [vmem:[%s17234_s5 + $0x2f0] sm:$0xff] }
 0x12e   : > { %v1542_v26 = vadd.f32 %v12219_v2, %v1402_v19  ;;  %v1264_v27 = vmax.f32 %v938_v20, 0.0  ;;  %10642 = vmatprep.subr.bf16.mxu1 %v10641_v13  ;;  %v3436_v20 = vld [vmem:[%s17234_s5 + $0x2e0] sm:$0xff] }
 0x12f   : > { %v1543_v28 = vadd.f32 %v12222_v4, %v1403_v23  ;;  %v1265_v29 = vmax.f32 %v940_v24, 0.0  ;;  %v943_v30 = vpop.f32.mrb[30].mxu0  ;;  %v10643_v23 = vpack.c.bf16 %v3438_v7, %v3436_v20 }
 0x130   : > { %1670 = vst [vmem:[#allocation2 + $0xd0] sm:$0xff] %v1542_v26  ;;  %v1404_v31 = vmul.f32 %v12209_v60, %v1264_v27  ;;  %v944_v32 = vadd.f32 %v943_v30, %v12194_v53  ;;  %v945_v33 = vpop.f32.mrb[31].mxu0 }
 0x131   : > { %1671 = vst [vmem:[#allocation2 + $0xd8] sm:$0xff] %v1543_v28  ;;  %v1405_v34 = vmul.f32 %v12214_v63, %v1265_v29  ;;  %v946_v35 = vadd.f32 %v945_v33, %v12201_v55  ;;  %10644 = vmatpush1.bf16.msra.mxu1 %v10643_v23 }
 0x132   : > { %v1544_v38 = vadd.f32 %v12219_v2, %v1404_v31  ;;  %v1266_v39 = vmax.f32 %v944_v32, 0.0 }
 0x133   : > { %v1545_v41 = vadd.f32 %v12222_v4, %v1405_v34  ;;  %v1267_v42 = vmax.f32 %v946_v35, 0.0  ;;  %v949_v43 = vpop.f32.mrb[32].mxu0  ;;  %v3441_v34 = vld [vmem:[%s17234_s5 + $0x308] sm:$0xff]  ;;  %v3443_v35 = vld [vmem:[%s17234_s5 + $0x318] sm:$0xff] }
 0x134   : > { %1672 = vst [vmem:[#allocation2 + $0xe0] sm:$0xff] %v1544_v38  ;;  %v1406_v44 = vmul.f32 %v12209_v60, %v1266_v39  ;;  %v950_v46 = vadd.f32 %v949_v43, %v12194_v53  ;;  %v951_v48 = vpop.f32.mrb[33].mxu0  ;;  %v10645_v38 = vpack.c.bf16 %v3443_v35, %v3441_v34 }
 0x135   : > { %1673 = vst [vmem:[#allocation2 + $0xe8] sm:$0xff] %v1545_v41  ;;  %v1407_v54 = vmul.f32 %v12214_v63, %v1267_v42  ;;  %v952_v56 = vadd.f32 %v951_v48, %v12201_v55  ;;  %v3442_v48 = vld [vmem:[%s17234_s5 + $0x310] sm:$0xff] }
 0x136   : > { %v1546_v58 = vadd.f32 %v12219_v2, %v1406_v44  ;;  %v1268_v59 = vmax.f32 %v950_v46, 0.0  ;;  %10646 = vmatprep.subr.bf16.mxu1 %v10645_v38  ;;  %v3440_v46 = vld [vmem:[%s17234_s5 + $0x300] sm:$0xff] }
 0x137   : > { %v1547_v61 = vadd.f32 %v12222_v4, %v1407_v54  ;;  %v1269_v62 = vmax.f32 %v952_v56, 0.0  ;;  %v955_v0 = vpop.f32.mrb[34].mxu0  ;;  %v10647_v54 = vpack.c.bf16 %v3442_v48, %v3440_v46 }
 0x138   : > { %1674 = vst [vmem:[#allocation2 + $0xf0] sm:$0xff] %v1546_v58  ;;  %v1408_v1 = vmul.f32 %v12209_v60, %v1268_v59  ;;  %v956_v3 = vadd.f32 %v955_v0, %v12194_v53  ;;  %v957_v5 = vpop.f32.mrb[35].mxu0 }
 0x139   : > { %1675 = vst [vmem:[#allocation2 + $0xf8] sm:$0xff] %v1547_v61  ;;  %v1409_v6 = vmul.f32 %v12214_v63, %v1269_v62  ;;  %v958_v8 = vadd.f32 %v957_v5, %v12201_v55  ;;  %10648 = vmatpush1.bf16.msra.mxu1 %v10647_v54 }
 0x13a   : > { %v1548_v11 = vadd.f32 %v12219_v2, %v1408_v1  ;;  %v1270_v12 = vmax.f32 %v956_v3, 0.0 }
 0x13b   : > { %v1549_v14 = vadd.f32 %v12222_v4, %v1409_v6  ;;  %v1271_v15 = vmax.f32 %v958_v8, 0.0  ;;  %v961_v16 = vpop.f32.mrb[36].mxu0  ;;  %v3445_v6 = vld [vmem:[%s17234_s5 + $0x328] sm:$0xff]  ;;  %v3447_v8 = vld [vmem:[%s17234_s5 + $0x338] sm:$0xff] }
 0x13c   : > { %1677 = vst [vmem:[#allocation2 + $0x100] sm:$0xff] %v1548_v11  ;;  %v1410_v17 = vmul.f32 %v12209_v60, %v1270_v12  ;;  %v962_v18 = vadd.f32 %v961_v16, %v12194_v53  ;;  %v963_v19 = vpop.f32.mrb[37].mxu0 }
 0x13d   : > { %1678 = vst [vmem:[#allocation2 + $0x108] sm:$0xff] %v1549_v14  ;;  %v1411_v21 = vmul.f32 %v12214_v63, %v1271_v15  ;;  %v964_v22 = vadd.f32 %v963_v19, %v12201_v55  ;;  %3788 = vmatprep.mubr.f32.mxu1 %v1549_v14  ;;  %v3446_v19 = vld [vmem:[%s17234_s5 + $0x330] sm:$0xff] }
 0x13e   : > { %v1550_v24 = vadd.f32 %v12219_v2, %v1410_v17  ;;  %v1272_v25 = vmax.f32 %v962_v18, 0.0  ;;  %3789 = vmatmul.mubr.f32.gmra.mrb[16].mxu1 %v1548_v11  ;;  %v10649_v11 = vpack.c.bf16 %v3447_v8, %v3445_v6  ;;  %v3444_v18 = vld [vmem:[%s17234_s5 + $0x320] sm:$0xff]  ;;  %v3454_v6 = vld [vmem:[%s17234_s5 + $0x370] sm:$0xff] }
 0x13f   : > { %v1551_v26 = vadd.f32 %v12222_v4, %v1411_v21  ;;  %v1273_v27 = vmax.f32 %v964_v22, 0.0  ;;  %v967_v28 = vpop.f32.mrb[38].mxu0  ;;  %v10651_v21 = vpack.c.bf16 %v3446_v19, %v3444_v18 }
 0x140   : > { %1679 = vst [vmem:[#allocation2 + $0x110] sm:$0xff] %v1550_v24  ;;  %v1412_v29 = vmul.f32 %v12209_v60, %v1272_v25  ;;  %v968_v30 = vadd.f32 %v967_v28, %v12194_v53  ;;  %v969_v31 = vpop.f32.mrb[39].mxu0  ;;  %10650 = vmatprep.subr.bf16.mxu1 %v10649_v11 }
 0x141   : > { %1680 = vst [vmem:[#allocation2 + $0x118] sm:$0xff] %v1551_v26  ;;  %v1413_v32 = vmul.f32 %v12214_v63, %v1273_v27  ;;  %v970_v33 = vadd.f32 %v969_v31, %v12201_v55  ;;  %3794 = vmatprep.mubr.f32.mxu1 %v1551_v26  ;;  %10652 = vmatpush1.bf16.msra.mxu1 %v10651_v21  ;;  %v3456_v21 = vld [vmem:[%s17234_s5 + $0x380] sm:$0xff] }
 0x142   : > { %v1552_v36 = vadd.f32 %v12219_v2, %v1412_v29  ;;  %v1274_v37 = vmax.f32 %v968_v30, 0.0  ;;  %3795 = vmatmul.mubr.f32.gmra.mrb[18].mxu1 %v1550_v24 }
 0x143   : > { %v1553_v39 = vadd.f32 %v12222_v4, %v1413_v32  ;;  %v1275_v40 = vmax.f32 %v970_v33, 0.0  ;;  %v973_v41 = vpop.f32.mrb[40].mxu0  ;;  %v3449_v32 = vld [vmem:[%s17234_s5 + $0x348] sm:$0xff]  ;;  %v3451_v33 = vld [vmem:[%s17234_s5 + $0x358] sm:$0xff] }
 0x144   : > { %1681 = vst [vmem:[#allocation2 + $0x120] sm:$0xff] %v1552_v36  ;;  %v1414_v42 = vmul.f32 %v12209_v60, %v1274_v37  ;;  %v974_v43 = vadd.f32 %v973_v41, %v12194_v53  ;;  %v975_v44 = vpop.f32.mrb[41].mxu0 }
 0x145   : > { %1682 = vst [vmem:[#allocation2 + $0x128] sm:$0xff] %v1553_v39  ;;  %v1415_v50 = vmul.f32 %v12214_v63, %v1275_v40  ;;  %v976_v51 = vadd.f32 %v975_v44, %v12201_v55  ;;  %3800 = vmatprep.mubr.f32.mxu1 %v1553_v39  ;;  %v3450_v44 = vld [vmem:[%s17234_s5 + $0x350] sm:$0xff] }
 0x146   : > { %v1554_v56 = vadd.f32 %v12219_v2, %v1414_v42  ;;  %v1276_v57 = vmax.f32 %v974_v43, 0.0  ;;  %3801 = vmatmul.mubr.f32.gmra.mrb[20].mxu1 %v1552_v36  ;;  %v10653_v36 = vpack.c.bf16 %v3451_v33, %v3449_v32  ;;  %v3448_v43 = vld [vmem:[%s17234_s5 + $0x340] sm:$0xff]  ;;  %v3463_v32 = vld [vmem:[%s17234_s5 + $0x3b8] sm:$0xff] }
 0x147   : > { %v1555_v58 = vadd.f32 %v12222_v4, %v1415_v50  ;;  %v1277_v59 = vmax.f32 %v976_v51, 0.0  ;;  %v979_v61 = vpop.f32.mrb[42].mxu0  ;;  %v10655_v50 = vpack.c.bf16 %v3450_v44, %v3448_v43 }
 0x148   : > { %1683 = vst [vmem:[#allocation2 + $0x130] sm:$0xff] %v1554_v56  ;;  %v1416_v62 = vmul.f32 %v12209_v60, %v1276_v57  ;;  %v980_v0 = vadd.f32 %v979_v61, %v12194_v53  ;;  %v981_v1 = vpop.f32.mrb[43].mxu0  ;;  %10654 = vmatprep.subr.bf16.mxu1 %v10653_v36  ;;  %v3455_v61 = vld [vmem:[%s17234_s5 + $0x378] sm:$0xff] }
 0x149   : > { %1684 = vst [vmem:[#allocation2 + $0x138] sm:$0xff] %v1555_v58  ;;  %v1417_v3 = vmul.f32 %v12214_v63, %v1277_v59  ;;  %v982_v5 = vadd.f32 %v981_v1, %v12201_v55  ;;  %3806 = vmatprep.mubr.f32.mxu1 %v1555_v58  ;;  %10656 = vmatpush1.bf16.msra.mxu1 %v10655_v50  ;;  %v3453_v59 = vld [vmem:[%s17234_s5 + $0x368] sm:$0xff] }
 0x14a   : > { %v1556_v9 = vadd.f32 %v12219_v2, %v1416_v62  ;;  %v1278_v10 = vmax.f32 %v980_v0, 0.0  ;;  %3807 = vmatmul.mubr.f32.gmra.mrb[22].mxu1 %v1554_v56  ;;  %v3465_v50 = vld [vmem:[%s17234_s5 + $0x3c8] sm:$0xff] }
 0x14b   : > { %v1557_v12 = vadd.f32 %v12222_v4, %v1417_v3  ;;  %v1279_v13 = vmax.f32 %v982_v5, 0.0  ;;  %v985_v14 = vpop.f32.mrb[44].mxu0  ;;  %v10657_v3 = vpack.c.bf16 %v3455_v61, %v3453_v59  ;;  %v3452_v5 = vld [vmem:[%s17234_s5 + $0x360] sm:$0xff]  ;;  %v3466_v61 = vld [vmem:[%s17234_s5 + $0x3d0] sm:$0xff] }
 0x14c   : > { %1685 = vst [vmem:[#allocation2 + $0x140] sm:$0xff] %v1556_v9  ;;  %v1418_v15 = vmul.f32 %v12209_v60, %v1278_v10  ;;  %v986_v16 = vadd.f32 %v985_v14, %v12194_v53  ;;  %v987_v17 = vpop.f32.mrb[45].mxu0  ;;  %v10659_v10 = vpack.c.bf16 %v3454_v6, %v3452_v5  ;;  %v3464_v59 = vld [vmem:[%s17234_s5 + $0x3c0] sm:$0xff] }
 0x14d   : > { %1686 = vst [vmem:[#allocation2 + $0x148] sm:$0xff] %v1557_v12  ;;  %v1419_v20 = vmul.f32 %v12214_v63, %v1279_v13  ;;  %v988_v7 = vadd.f32 %v987_v17, %v12201_v55  ;;  %10658 = vmatprep.subr.bf16.mxu1 %v10657_v3  ;;  %v3459_v17 = vld [vmem:[%s17234_s5 + $0x398] sm:$0xff] }
 0x14e   : > { %v1558_v22 = vadd.f32 %v12219_v2, %v1418_v15  ;;  %v1280_v23 = vmax.f32 %v986_v16, 0.0  ;;  %10660 = vmatpush1.bf16.msra.mxu1 %v10659_v10  ;;  %v3457_v16 = vld [vmem:[%s17234_s5 + $0x388] sm:$0xff] }
 0x14f   : > { %v1559_v24 = vadd.f32 %v12222_v4, %v1419_v20  ;;  %v1281_v25 = vmax.f32 %v988_v7, 0.0  ;;  %v991_v26 = vpop.f32.mrb[46].mxu0  ;;  %v10661_v7 = vpack.c.bf16 %v3459_v17, %v3457_v16  ;;  %v3469_v10 = vld [vmem:[%s17234_s5 + $0x3e8] sm:$0xff]  ;;  %v3468_v16 = vld [vmem:[%s17234_s5 + $0x3e0] sm:$0xff]  ;;  %v3470_v17 = vld [vmem:[%s17234_s5 + $0x3f0] sm:$0xff] }
 0x150   : > { %1687 = vst [vmem:[#allocation2 + $0x150] sm:$0xff] %v1558_v22  ;;  %v1420_v27 = vmul.f32 %v12209_v60, %v1280_v23  ;;  %v992_v28 = vadd.f32 %v991_v26, %v12194_v53  ;;  %v993_v29 = vpop.f32.mrb[47].mxu0  ;;  %v3458_v22 = vld [vmem:[%s17234_s5 + $0x390] sm:$0xff] }
 0x151   : > { %1688 = vst [vmem:[#allocation2 + $0x158] sm:$0xff] %v1559_v24  ;;  %v1421_v30 = vmul.f32 %v12214_v63, %v1281_v25  ;;  %v994_v31 = vadd.f32 %v993_v29, %v12201_v55  ;;  %v10663_v25 = vpack.c.bf16 %v3458_v22, %v3456_v21  ;;  %10662 = vmatprep.subr.bf16.mxu1 %v10661_v7 }
 0x152   : > { %v1560_v34 = vadd.f32 %v12219_v2, %v1420_v27  ;;  %v1282_v35 = vmax.f32 %v992_v28, 0.0 }
 0x153   : > { %v1561_v37 = vadd.f32 %v12222_v4, %v1421_v30  ;;  %v1283_v38 = vmax.f32 %v994_v31, 0.0  ;;  %v997_v39 = vpop.f32.mrb[48].mxu0  ;;  %10664 = vmatpush1.bf16.msra.mxu1 %v10663_v25  ;;  %v3461_v31 = vld [vmem:[%s17234_s5 + $0x3a8] sm:$0xff] }
 0x154   : > { %1689 = vst [vmem:[#allocation2 + $0x160] sm:$0xff] %v1560_v34  ;;  %v1422_v40 = vmul.f32 %v12209_v60, %v1282_v35  ;;  %v998_v41 = vadd.f32 %v997_v39, %v12194_v53  ;;  %v999_v42 = vpop.f32.mrb[49].mxu0  ;;  %v10665_v36 = vpack.c.bf16 %v3463_v32, %v3461_v31 }
 0x155   : > { %1690 = vst [vmem:[#allocation2 + $0x168] sm:$0xff] %v1561_v37  ;;  %v1423_v46 = vmul.f32 %v12214_v63, %v1283_v38  ;;  %v1000_v48 = vadd.f32 %v999_v42, %v12201_v55  ;;  %v3460_v37 = vld [vmem:[%s17234_s5 + $0x3a0] sm:$0xff]  ;;  %v3462_v38 = vld [vmem:[%s17234_s5 + $0x3b0] sm:$0xff] }
 0x156   : > { %v1562_v51 = vadd.f32 %v12219_v2, %v1422_v40  ;;  %v1284_v54 = vmax.f32 %v998_v41, 0.0  ;;  %v10667_v41 = vpack.c.bf16 %v3462_v38, %v3460_v37  ;;  %10666 = vmatprep.subr.bf16.mxu1 %v10665_v36 }
 0x157   : > { %v1563_v56 = vadd.f32 %v12222_v4, %v1423_v46  ;;  %v1285_v57 = vmax.f32 %v1000_v48, 0.0  ;;  %v1003_v58 = vpop.f32.mrb[50].mxu0 }
 0x158   : > { %1691 = vst [vmem:[#allocation2 + $0x170] sm:$0xff] %v1562_v51  ;;  %v1424_v62 = vmul.f32 %v12209_v60, %v1284_v54  ;;  %v1004_v0 = vadd.f32 %v1003_v58, %v12194_v53  ;;  %v1005_v1 = vpop.f32.mrb[51].mxu0  ;;  %10668 = vmatpush1.bf16.msra.mxu1 %v10667_v41  ;;  %v3467_v51 = vld [vmem:[%s17234_s5 + $0x3d8] sm:$0xff] }
 0x159   : > { %1692 = vst [vmem:[#allocation2 + $0x178] sm:$0xff] %v1563_v56  ;;  %v1425_v8 = vmul.f32 %v12214_v63, %v1285_v57  ;;  %v1006_v9 = vadd.f32 %v1005_v1, %v12201_v55  ;;  %v10669_v58 = vpack.c.bf16 %v3467_v51, %v3465_v50  ;;  %v10671_v1 = vpack.c.bf16 %v3466_v61, %v3464_v59 }
 0x15a   : > { %v1564_v11 = vadd.f32 %v12219_v2, %v1424_v62  ;;  %v1286_v12 = vmax.f32 %v1004_v0, 0.0 }
 0x15b   : > { %v1565_v13 = vadd.f32 %v12222_v4, %v1425_v8  ;;  %v1287_v14 = vmax.f32 %v1006_v9, 0.0  ;;  %v1009_v15 = vpop.f32.mrb[52].mxu0  ;;  %10670 = vmatprep.subr.bf16.mxu1 %v10669_v58 }
 0x15c   : > { %1693 = vst [vmem:[#allocation2 + $0x180] sm:$0xff] %v1564_v11  ;;  %v1426_v18 = vmul.f32 %v12209_v60, %v1286_v12  ;;  %v1010_v19 = vadd.f32 %v1009_v15, %v12194_v53  ;;  %v1011_v20 = vpop.f32.mrb[53].mxu0  ;;  %10672 = vmatpush1.bf16.msra.mxu1 %v10671_v1 }
 0x15d   : > { %1694 = vst [vmem:[#allocation2 + $0x188] sm:$0xff] %v1565_v13  ;;  %v1427_v23 = vmul.f32 %v12214_v63, %v1287_v14  ;;  %v1012_v24 = vadd.f32 %v1011_v20, %v12201_v55  ;;  %3812 = vmatprep.mubr.f32.mxu1 %v1565_v13  ;;  %v10675_v20 = vpack.c.bf16 %v3470_v17, %v3468_v16 }
 0x15e   : > { %v1566_v26 = vadd.f32 %v12219_v2, %v1426_v18  ;;  %v1288_v27 = vmax.f32 %v1010_v19, 0.0  ;;  %3813 = vmatmul.mubr.f32.gmra.mrb[24].mxu1 %v1564_v11  ;;  %v3471_v11 = vld [vmem:[%s17234_s5 + $0x3f8] sm:$0xff] }
 0x15f   : > { %v1567_v28 = vadd.f32 %v12222_v4, %v1427_v23  ;;  %v1289_v29 = vmax.f32 %v1012_v24, 0.0  ;;  %v1015_v30 = vpop.f32.mrb[54].mxu0  ;;  %v10673_v15 = vpack.c.bf16 %v3471_v11, %v3469_v10 }
 0x160   : > { %1695 = vst [vmem:[#allocation2 + $0x190] sm:$0xff] %v1566_v26  ;;  %v1428_v33 = vmul.f32 %v12209_v60, %v1288_v27  ;;  %v1016_v34 = vadd.f32 %v1015_v30, %v12194_v53  ;;  %v1017_v35 = vpop.f32.mrb[55].mxu0 }
 0x161   : > { %1696 = vst [vmem:[#allocation2 + $0x198] sm:$0xff] %v1567_v28  ;;  %v1429_v39 = vmul.f32 %v12214_v63, %v1289_v29  ;;  %v1018_v40 = vadd.f32 %v1017_v35, %v12201_v55  ;;  %3818 = vmatprep.mubr.f32.mxu1 %v1567_v28  ;;  %10674 = vmatprep.subr.bf16.mxu1 %v10673_v15 }
 0x162   : > { %v1568_v42 = vadd.f32 %v12219_v2, %v1428_v33  ;;  %v1290_v43 = vmax.f32 %v1016_v34, 0.0  ;;  %3819 = vmatmul.mubr.f32.gmra.mrb[26].mxu1 %v1566_v26 }
 0x163   : > { %v1569_v44 = vadd.f32 %v12222_v4, %v1429_v39  ;;  %v1291_v46 = vmax.f32 %v1018_v40, 0.0  ;;  %v1021_v48 = vpop.f32.mrb[56].mxu0  ;;  %10676 = vmatpush1.bf16.msra.mxu1 %v10675_v20 }
 0x164   : > { %1697 = vst [vmem:[#allocation2 + $0x1a0] sm:$0xff] %v1568_v42  ;;  %v1430_v54 = vmul.f32 %v12209_v60, %v1290_v43  ;;  %v1022_v56 = vadd.f32 %v1021_v48, %v12194_v53  ;;  %v1023_v57 = vpop.f32.mrb[57].mxu0  ;;  %v3475_v43 = vld [vmem:[%s17234_s5 + $0x418] sm:$0xff] }
 0x165   : > { %1698 = vst [vmem:[#allocation2 + $0x1a8] sm:$0xff] %v1569_v44  ;;  %v1431_v62 = vmul.f32 %v12214_v63, %v1291_v46  ;;  %v1024_v0 = vadd.f32 %v1023_v57, %v12201_v55  ;;  %3824 = vmatprep.mubr.f32.mxu1 %v1569_v44 }
 0x166   : > { %v1570_v3 = vadd.f32 %v12219_v2, %v1430_v54  ;;  %v1292_v5 = vmax.f32 %v1022_v56, 0.0  ;;  %3825 = vmatmul.mubr.f32.gmra.mrb[28].mxu1 %v1568_v42  ;;  %v3473_v42 = vld [vmem:[%s17234_s5 + $0x408] sm:$0xff] }
 0x167   : > { %v1571_v6 = vadd.f32 %v12222_v4, %v1431_v62  ;;  %v1293_v8 = vmax.f32 %v1024_v0, 0.0  ;;  %v1027_v9 = vpop.f32.mrb[58].mxu0  ;;  %v10677_v50 = vpack.c.bf16 %v3475_v43, %v3473_v42 }
 0x168   : > { %1699 = vst [vmem:[#allocation2 + $0x1b0] sm:$0xff] %v1570_v3  ;;  %v1432_v12 = vmul.f32 %v12209_v60, %v1292_v5  ;;  %v1028_v13 = vadd.f32 %v1027_v9, %v12194_v53  ;;  %v1029_v14 = vpop.f32.mrb[59].mxu0 }
 0x169   : > { %1700 = vst [vmem:[#allocation2 + $0x1b8] sm:$0xff] %v1571_v6  ;;  %v1433_v18 = vmul.f32 %v12214_v63, %v1293_v8  ;;  %v1030_v19 = vadd.f32 %v1029_v14, %v12201_v55  ;;  %3830 = vmatprep.mubr.f32.mxu1 %v1571_v6  ;;  %10678 = vmatprep.subr.bf16.mxu1 %v10677_v50 }
 0x16a   : > { %v1572_v7 = vadd.f32 %v12219_v2, %v1432_v12  ;;  %v1294_v21 = vmax.f32 %v1028_v13, 0.0  ;;  %3831 = vmatmul.mubr.f32.gmra.mrb[30].mxu1 %v1570_v3 }
 0x16b   : > { %v1573_v22 = vadd.f32 %v12222_v4, %v1433_v18  ;;  %v1295_v23 = vmax.f32 %v1030_v19, 0.0  ;;  %v1033_v24 = vpop.f32.mrb[60].mxu0 }
 0x16c   : > { %1701 = vst [vmem:[#allocation2 + $0x1c0] sm:$0xff] %v1572_v7  ;;  %v1434_v25 = vmul.f32 %v12209_v60, %v1294_v21  ;;  %v1034_v26 = vadd.f32 %v1033_v24, %v12194_v53  ;;  %v1035_v27 = vpop.f32.mrb[61].mxu0 }
 0x16d   : > { %1702 = vst [vmem:[#allocation2 + $0x1c8] sm:$0xff] %v1573_v22  ;;  %v1435_v28 = vmul.f32 %v12214_v63, %v1295_v23  ;;  %v1036_v29 = vadd.f32 %v1035_v27, %v12201_v55 }
 0x16e   : > { %v1574_v30 = vadd.f32 %v12219_v2, %v1434_v25  ;;  %v1296_v31 = vmax.f32 %v1034_v26, 0.0 }
 0x16f   : > { %v1575_v32 = vadd.f32 %v12222_v4, %v1435_v28  ;;  %v1297_v33 = vmax.f32 %v1036_v29, 0.0  ;;  %v1039_v34 = vpop.f32.mrb[62].mxu0 }
 0x170   : > { %1703 = vst [vmem:[#allocation2 + $0x1d0] sm:$0xff] %v1574_v30  ;;  %v1436_v35 = vmul.f32 %v12209_v60, %v1296_v31  ;;  %v1040_v36 = vadd.f32 %v1039_v34, %v12194_v53  ;;  %v1041_v37 = vpop.f32.mrb[63].mxu0 }
 0x171   : > { %1704 = vst [vmem:[#allocation2 + $0x1d8] sm:$0xff] %v1575_v32  ;;  %v1437_v38 = vmul.f32 %v12214_v63, %v1297_v33  ;;  %v1042_v39 = vadd.f32 %v1041_v37, %v12201_v55 }
 0x172   : > { %v1576_v40 = vadd.f32 %v12219_v2, %v1436_v35  ;;  %v1298_v41 = vmax.f32 %v1040_v36, 0.0 }
 0x173   : > { %v1577_v44 = vadd.f32 %v12222_v4, %v1437_v38  ;;  %v1299_v46 = vmax.f32 %v1042_v39, 0.0  ;;  %v1045_v48 = vpop.f32.mrb[64].mxu0 }
 0x174   : > { %1705 = vst [vmem:[#allocation2 + $0x1e0] sm:$0xff] %v1576_v40  ;;  %v1438_v51 = vmul.f32 %v12209_v60, %v1298_v41  ;;  %v1046_v54 = vadd.f32 %v1045_v48, %v12194_v53  ;;  %v1047_v56 = vpop.f32.mrb[65].mxu0 }
 0x175   : > { %1706 = vst [vmem:[#allocation2 + $0x1e8] sm:$0xff] %v1577_v44  ;;  %v1439_v57 = vmul.f32 %v12214_v63, %v1299_v46  ;;  %v1048_v58 = vadd.f32 %v1047_v56, %v12201_v55 }
 0x176   : > { %v1578_v59 = vadd.f32 %v12219_v2, %v1438_v51  ;;  %v1300_v61 = vmax.f32 %v1046_v54, 0.0 }
 0x177   : > { %v1579_v62 = vadd.f32 %v12222_v4, %v1439_v57  ;;  %v1301_v0 = vmax.f32 %v1048_v58, 0.0  ;;  %v1051_v1 = vpop.f32.mrb[66].mxu0 }
 0x178   : > { %1707 = vst [vmem:[#allocation2 + $0x1f0] sm:$0xff] %v1578_v59  ;;  %v1440_v3 = vmul.f32 %v12209_v60, %v1300_v61  ;;  %v1052_v5 = vadd.f32 %v1051_v1, %v12194_v53  ;;  %v1053_v6 = vpop.f32.mrb[67].mxu0 }
 0x179   : > { %1708 = vst [vmem:[#allocation2 + $0x1f8] sm:$0xff] %v1579_v62  ;;  %v1441_v8 = vmul.f32 %v12214_v63, %v1301_v0  ;;  %v1054_v9 = vadd.f32 %v1053_v6, %v12201_v55 }
 0x17a   : > { %v1580_v10 = vadd.f32 %v12219_v2, %v1440_v3  ;;  %v1302_v11 = vmax.f32 %v1052_v5, 0.0 }
 0x17b   : > { %v1581_v12 = vadd.f32 %v12222_v4, %v1441_v8  ;;  %v1303_v13 = vmax.f32 %v1054_v9, 0.0  ;;  %v1057_v14 = vpop.f32.mrb[68].mxu0 }
 0x17c   : > { %1710 = vst [vmem:[#allocation2 + $0x200] sm:$0xff] %v1580_v10  ;;  %v1442_v15 = vmul.f32 %v12209_v60, %v1302_v11  ;;  %v1058_v16 = vadd.f32 %v1057_v14, %v12194_v53  ;;  %v1059_v17 = vpop.f32.mrb[69].mxu0 }
 0x17d   : > { %1711 = vst [vmem:[#allocation2 + $0x208] sm:$0xff] %v1581_v12  ;;  %v1443_v18 = vmul.f32 %v12214_v63, %v1303_v13  ;;  %v1060_v19 = vadd.f32 %v1059_v17, %v12201_v55  ;;  %3836 = vmatprep.mubr.f32.mxu1 %v1581_v12 }
 0x17e   : > { %v1582_v20 = vadd.f32 %v12219_v2, %v1442_v15  ;;  %v1304_v7 = vmax.f32 %v1058_v16, 0.0  ;;  %3837 = vmatmul.mubr.f32.gmra.mrb[32].mxu1 %v1580_v10 }
 0x17f   : > { %v1583_v21 = vadd.f32 %v12222_v4, %v1443_v18  ;;  %v1305_v22 = vmax.f32 %v1060_v19, 0.0  ;;  %v1063_v23 = vpop.f32.mrb[70].mxu0 }
 0x180   : > { %1712 = vst [vmem:[#allocation2 + $0x210] sm:$0xff] %v1582_v20  ;;  %v1444_v24 = vmul.f32 %v12209_v60, %v1304_v7  ;;  %v1064_v25 = vadd.f32 %v1063_v23, %v12194_v53  ;;  %v1065_v26 = vpop.f32.mrb[71].mxu0 }
 0x181   : > { %1713 = vst [vmem:[#allocation2 + $0x218] sm:$0xff] %v1583_v21  ;;  %v1445_v27 = vmul.f32 %v12214_v63, %v1305_v22  ;;  %v1066_v28 = vadd.f32 %v1065_v26, %v12201_v55  ;;  %3842 = vmatprep.mubr.f32.mxu1 %v1583_v21 }
 0x182   : > { %v1584_v29 = vadd.f32 %v12219_v2, %v1444_v24  ;;  %v1306_v30 = vmax.f32 %v1064_v25, 0.0  ;;  %3843 = vmatmul.mubr.f32.gmra.mrb[34].mxu1 %v1582_v20 }
 0x183   : > { %v1585_v31 = vadd.f32 %v12222_v4, %v1445_v27  ;;  %v1307_v32 = vmax.f32 %v1066_v28, 0.0  ;;  %v1069_v33 = vpop.f32.mrb[72].mxu0 }
 0x184   : > { %1714 = vst [vmem:[#allocation2 + $0x220] sm:$0xff] %v1584_v29  ;;  %v1446_v34 = vmul.f32 %v12209_v60, %v1306_v30  ;;  %v1070_v35 = vadd.f32 %v1069_v33, %v12194_v53  ;;  %v1071_v36 = vpop.f32.mrb[73].mxu0 }
 0x185   : > { %1715 = vst [vmem:[#allocation2 + $0x228] sm:$0xff] %v1585_v31  ;;  %v1447_v37 = vmul.f32 %v12214_v63, %v1307_v32  ;;  %v1072_v38 = vadd.f32 %v1071_v36, %v12201_v55  ;;  %3848 = vmatprep.mubr.f32.mxu1 %v1585_v31 }
 0x186   : > { %v1586_v39 = vadd.f32 %v12219_v2, %v1446_v34  ;;  %v1308_v40 = vmax.f32 %v1070_v35, 0.0  ;;  %3849 = vmatmul.mubr.f32.gmra.mrb[36].mxu1 %v1584_v29 }
 0x187   : > { %v1587_v41 = vadd.f32 %v12222_v4, %v1447_v37  ;;  %v1309_v42 = vmax.f32 %v1072_v38, 0.0  ;;  %v1075_v43 = vpop.f32.mrb[74].mxu0 }
 0x188   : > { %1716 = vst [vmem:[#allocation2 + $0x230] sm:$0xff] %v1586_v39  ;;  %v1448_v44 = vmul.f32 %v12209_v60, %v1308_v40  ;;  %v1076_v46 = vadd.f32 %v1075_v43, %v12194_v53  ;;  %v1077_v48 = vpop.f32.mrb[75].mxu0 }
 0x189   : > { %1717 = vst [vmem:[#allocation2 + $0x238] sm:$0xff] %v1587_v41  ;;  %v1449_v50 = vmul.f32 %v12214_v63, %v1309_v42  ;;  %v1078_v51 = vadd.f32 %v1077_v48, %v12201_v55  ;;  %3854 = vmatprep.mubr.f32.mxu1 %v1587_v41 }
 0x18a   : > { %v1588_v54 = vadd.f32 %v12219_v2, %v1448_v44  ;;  %v1310_v56 = vmax.f32 %v1076_v46, 0.0  ;;  %3855 = vmatmul.mubr.f32.gmra.mrb[38].mxu1 %v1586_v39 }
 0x18b   : > { %v1589_v57 = vadd.f32 %v12222_v4, %v1449_v50  ;;  %v1311_v58 = vmax.f32 %v1078_v51, 0.0  ;;  %v1081_v59 = vpop.f32.mrb[76].mxu0 }
 0x18c   : > { %1718 = vst [vmem:[#allocation2 + $0x240] sm:$0xff] %v1588_v54  ;;  %v1450_v61 = vmul.f32 %v12209_v60, %v1310_v56  ;;  %v1082_v62 = vadd.f32 %v1081_v59, %v12194_v53  ;;  %v1083_v0 = vpop.f32.mrb[77].mxu0 }
 0x18d   : > { %1719 = vst [vmem:[#allocation2 + $0x248] sm:$0xff] %v1589_v57  ;;  %v1451_v1 = vmul.f32 %v12214_v63, %v1311_v58  ;;  %v1084_v3 = vadd.f32 %v1083_v0, %v12201_v55 }
 0x18e   : > { %v1590_v5 = vadd.f32 %v12219_v2, %v1450_v61  ;;  %v1312_v6 = vmax.f32 %v1082_v62, 0.0 }
 0x18f   : > { %v1591_v8 = vadd.f32 %v12222_v4, %v1451_v1  ;;  %v1313_v9 = vmax.f32 %v1084_v3, 0.0  ;;  %v1087_v10 = vpop.f32.mrb[78].mxu0 }
 0x190   : > { %1720 = vst [vmem:[#allocation2 + $0x250] sm:$0xff] %v1590_v5  ;;  %v1452_v11 = vmul.f32 %v12209_v60, %v1312_v6  ;;  %v1088_v12 = vadd.f32 %v1087_v10, %v12194_v53  ;;  %v1089_v13 = vpop.f32.mrb[79].mxu0 }
 0x191   : > { %1721 = vst [vmem:[#allocation2 + $0x258] sm:$0xff] %v1591_v8  ;;  %v1453_v14 = vmul.f32 %v12214_v63, %v1313_v9  ;;  %v1090_v15 = vadd.f32 %v1089_v13, %v12201_v55 }
 0x192   : > { %v1592_v16 = vadd.f32 %v12219_v2, %v1452_v11  ;;  %v1314_v17 = vmax.f32 %v1088_v12, 0.0 }
 0x193   : > { %v1593_v18 = vadd.f32 %v12222_v4, %v1453_v14  ;;  %v1315_v19 = vmax.f32 %v1090_v15, 0.0  ;;  %v1093_v20 = vpop.f32.mrb[80].mxu0 }
 0x194   : > { %1722 = vst [vmem:[#allocation2 + $0x260] sm:$0xff] %v1592_v16  ;;  %v1454_v7 = vmul.f32 %v12209_v60, %v1314_v17  ;;  %v1094_v21 = vadd.f32 %v1093_v20, %v12194_v53  ;;  %v1095_v22 = vpop.f32.mrb[81].mxu0 }
 0x195   : > { %1723 = vst [vmem:[#allocation2 + $0x268] sm:$0xff] %v1593_v18  ;;  %v1455_v23 = vmul.f32 %v12214_v63, %v1315_v19  ;;  %v1096_v24 = vadd.f32 %v1095_v22, %v12201_v55 }
 0x196   : > { %v1594_v25 = vadd.f32 %v12219_v2, %v1454_v7  ;;  %v1316_v26 = vmax.f32 %v1094_v21, 0.0 }
 0x197   : > { %v1595_v27 = vadd.f32 %v12222_v4, %v1455_v23  ;;  %v1317_v28 = vmax.f32 %v1096_v24, 0.0  ;;  %v1099_v29 = vpop.f32.mrb[82].mxu0 }
 0x198   : > { %1724 = vst [vmem:[#allocation2 + $0x270] sm:$0xff] %v1594_v25  ;;  %v1456_v30 = vmul.f32 %v12209_v60, %v1316_v26  ;;  %v1100_v31 = vadd.f32 %v1099_v29, %v12194_v53  ;;  %v1101_v32 = vpop.f32.mrb[83].mxu0 }
 0x199   : > { %1725 = vst [vmem:[#allocation2 + $0x278] sm:$0xff] %v1595_v27  ;;  %v1457_v33 = vmul.f32 %v12214_v63, %v1317_v28  ;;  %v1102_v34 = vadd.f32 %v1101_v32, %v12201_v55 }
 0x19a   : > { %v1596_v35 = vadd.f32 %v12219_v2, %v1456_v30  ;;  %v1318_v36 = vmax.f32 %v1100_v31, 0.0 }
 0x19b   : > { %v1597_v37 = vadd.f32 %v12222_v4, %v1457_v33  ;;  %v1319_v38 = vmax.f32 %v1102_v34, 0.0  ;;  %v1105_v39 = vpop.f32.mrb[84].mxu0 }
 0x19c   : > { %1726 = vst [vmem:[#allocation2 + $0x280] sm:$0xff] %v1596_v35  ;;  %v1458_v40 = vmul.f32 %v12209_v60, %v1318_v36  ;;  %v1106_v41 = vadd.f32 %v1105_v39, %v12194_v53  ;;  %v1107_v42 = vpop.f32.mrb[85].mxu0 }
 0x19d   : > { %1727 = vst [vmem:[#allocation2 + $0x288] sm:$0xff] %v1597_v37  ;;  %v1459_v43 = vmul.f32 %v12214_v63, %v1319_v38  ;;  %v1108_v44 = vadd.f32 %v1107_v42, %v12201_v55  ;;  %3860 = vmatprep.mubr.f32.mxu1 %v1597_v37 }
 0x19e   : > { %v1598_v46 = vadd.f32 %v12219_v2, %v1458_v40  ;;  %v1320_v48 = vmax.f32 %v1106_v41, 0.0  ;;  %3861 = vmatmul.mubr.f32.gmra.mrb[40].mxu1 %v1596_v35 }
 0x19f   : > { %v1599_v50 = vadd.f32 %v12222_v4, %v1459_v43  ;;  %v1321_v51 = vmax.f32 %v1108_v44, 0.0  ;;  %v1111_v54 = vpop.f32.mrb[86].mxu0 }
 0x1a0   : > { %1728 = vst [vmem:[#allocation2 + $0x290] sm:$0xff] %v1598_v46  ;;  %v1460_v56 = vmul.f32 %v12209_v60, %v1320_v48  ;;  %v1112_v57 = vadd.f32 %v1111_v54, %v12194_v53  ;;  %v1113_v58 = vpop.f32.mrb[87].mxu0 }
 0x1a1   : > { %1729 = vst [vmem:[#allocation2 + $0x298] sm:$0xff] %v1599_v50  ;;  %v1461_v59 = vmul.f32 %v12214_v63, %v1321_v51  ;;  %v1114_v61 = vadd.f32 %v1113_v58, %v12201_v55  ;;  %3866 = vmatprep.mubr.f32.mxu1 %v1599_v50 }
 0x1a2   : > { %v1600_v62 = vadd.f32 %v12219_v2, %v1460_v56  ;;  %v1322_v0 = vmax.f32 %v1112_v57, 0.0  ;;  %3867 = vmatmul.mubr.f32.gmra.mrb[42].mxu1 %v1598_v46 }
 0x1a3   : > { %v1601_v1 = vadd.f32 %v12222_v4, %v1461_v59  ;;  %v1323_v3 = vmax.f32 %v1114_v61, 0.0  ;;  %v1117_v5 = vpop.f32.mrb[88].mxu0 }
 0x1a4   : > { %1730 = vst [vmem:[#allocation2 + $0x2a0] sm:$0xff] %v1600_v62  ;;  %v1462_v6 = vmul.f32 %v12209_v60, %v1322_v0  ;;  %v1118_v8 = vadd.f32 %v1117_v5, %v12194_v53  ;;  %v1119_v9 = vpop.f32.mrb[89].mxu0 }
 0x1a5   : > { %1731 = vst [vmem:[#allocation2 + $0x2a8] sm:$0xff] %v1601_v1  ;;  %v1463_v10 = vmul.f32 %v12214_v63, %v1323_v3  ;;  %v1120_v11 = vadd.f32 %v1119_v9, %v12201_v55  ;;  %3872 = vmatprep.mubr.f32.mxu1 %v1601_v1 }
 0x1a6   : > { %v1602_v12 = vadd.f32 %v12219_v2, %v1462_v6  ;;  %v1324_v13 = vmax.f32 %v1118_v8, 0.0  ;;  %3873 = vmatmul.mubr.f32.gmra.mrb[44].mxu1 %v1600_v62 }
 0x1a7   : > { %v1603_v14 = vadd.f32 %v12222_v4, %v1463_v10  ;;  %v1325_v15 = vmax.f32 %v1120_v11, 0.0  ;;  %v1123_v16 = vpop.f32.mrb[90].mxu0 }
 0x1a8   : > { %1732 = vst [vmem:[#allocation2 + $0x2b0] sm:$0xff] %v1602_v12  ;;  %v1464_v17 = vmul.f32 %v12209_v60, %v1324_v13  ;;  %v1124_v18 = vadd.f32 %v1123_v16, %v12194_v53  ;;  %v1125_v19 = vpop.f32.mrb[91].mxu0 }
 0x1a9   : > { %1733 = vst [vmem:[#allocation2 + $0x2b8] sm:$0xff] %v1603_v14  ;;  %v1465_v20 = vmul.f32 %v12214_v63, %v1325_v15  ;;  %v1126_v7 = vadd.f32 %v1125_v19, %v12201_v55  ;;  %3878 = vmatprep.mubr.f32.mxu1 %v1603_v14 }
 0x1aa   : > { %v12719_v21 = vadd.f32 %v12219_v2, %v1464_v17  ;;  %v1326_v22 = vmax.f32 %v1124_v18, 0.0  ;;  %3879 = vmatmul.mubr.f32.gmra.mrb[46].mxu1 %v1602_v12 }
 0x1ab   : > { %v12722_v23 = vadd.f32 %v12222_v4, %v1465_v20  ;;  %v1327_v24 = vmax.f32 %v1126_v7, 0.0  ;;  %v1129_v25 = vpop.f32.mrb[92].mxu0 }
 0x1ac   : > { %1734 = vst [vmem:[#allocation2 + $0x2c0] sm:$0xff] %v12719_v21  ;;  %v1466_v26 = vmul.f32 %v12209_v60, %v1326_v22  ;;  %v1130_v27 = vadd.f32 %v1129_v25, %v12194_v53  ;;  %v1131_v28 = vpop.f32.mrb[93].mxu0 }
 0x1ad   : > { %1735 = vst [vmem:[#allocation2 + $0x2c8] sm:$0xff] %v12722_v23  ;;  %v1467_v29 = vmul.f32 %v12214_v63, %v1327_v24  ;;  %v1132_v30 = vadd.f32 %v1131_v28, %v12201_v55 }
 0x1ae   : > { %v12731_v31 = vadd.f32 %v12219_v2, %v1466_v26  ;;  %v1328_v32 = vmax.f32 %v1130_v27, 0.0 }
 0x1af   : > { %v12734_v33 = vadd.f32 %v12222_v4, %v1467_v29  ;;  %v1329_v34 = vmax.f32 %v1132_v30, 0.0  ;;  %v1135_v35 = vpop.f32.mrb[94].mxu0 }
 0x1b0   : > { %1736 = vst [vmem:[#allocation2 + $0x2d0] sm:$0xff] %v12731_v31  ;;  %v1468_v36 = vmul.f32 %v12209_v60, %v1328_v32  ;;  %v1136_v37 = vadd.f32 %v1135_v35, %v12194_v53  ;;  %v1137_v38 = vpop.f32.mrb[95].mxu0 }
 0x1b1   : > { %1737 = vst [vmem:[#allocation2 + $0x2d8] sm:$0xff] %v12734_v33  ;;  %v1469_v39 = vmul.f32 %v12214_v63, %v1329_v34  ;;  %v1138_v40 = vadd.f32 %v1137_v38, %v12201_v55 }
 0x1b2   : > { %v12743_v41 = vadd.f32 %v12219_v2, %v1468_v36  ;;  %v1330_v42 = vmax.f32 %v1136_v37, 0.0 }
 0x1b3   : > { %v12746_v43 = vadd.f32 %v12222_v4, %v1469_v39  ;;  %v1331_v44 = vmax.f32 %v1138_v40, 0.0  ;;  %v1141_v46 = vpop.f32.mrb[96].mxu0 }
 0x1b4   : > { %1738 = vst [vmem:[#allocation2 + $0x2e0] sm:$0xff] %v12743_v41  ;;  %v1470_v48 = vmul.f32 %v12209_v60, %v1330_v42  ;;  %v1142_v50 = vadd.f32 %v1141_v46, %v12194_v53  ;;  %v1143_v51 = vpop.f32.mrb[97].mxu0 }
 0x1b5   : > { %1739 = vst [vmem:[#allocation2 + $0x2e8] sm:$0xff] %v12746_v43  ;;  %v1471_v54 = vmul.f32 %v12214_v63, %v1331_v44  ;;  %v1144_v56 = vadd.f32 %v1143_v51, %v12201_v55 }
 0x1b6   : > { %v12755_v57 = vadd.f32 %v12219_v2, %v1470_v48  ;;  %v1332_v58 = vmax.f32 %v1142_v50, 0.0 }
 0x1b7   : > { %v12758_v59 = vadd.f32 %v12222_v4, %v1471_v54  ;;  %v1333_v61 = vmax.f32 %v1144_v56, 0.0  ;;  %v1147_v62 = vpop.f32.mrb[98].mxu0 }
 0x1b8   : > { %1740 = vst [vmem:[#allocation2 + $0x2f0] sm:$0xff] %v12755_v57  ;;  %v1472_v0 = vmul.f32 %v12209_v60, %v1332_v58  ;;  %v1148_v1 = vadd.f32 %v1147_v62, %v12194_v53  ;;  %v1149_v3 = vpop.f32.mrb[99].mxu0 }
 0x1b9   : > { %1741 = vst [vmem:[#allocation2 + $0x2f8] sm:$0xff] %v12758_v59  ;;  %v1473_v5 = vmul.f32 %v12214_v63, %v1333_v61  ;;  %v1150_v6 = vadd.f32 %v1149_v3, %v12201_v55 }
 0x1ba   : > { %v1612_v8 = vadd.f32 %v12219_v2, %v1472_v0  ;;  %v1334_v9 = vmax.f32 %v1148_v1, 0.0 }
 0x1bb   : > { %v1613_v10 = vadd.f32 %v12222_v4, %v1473_v5  ;;  %v1335_v11 = vmax.f32 %v1150_v6, 0.0  ;;  %v1153_v12 = vpop.f32.mrb[100].mxu0 }
 0x1bc   : > { %1743 = vst [vmem:[#allocation2 + $0x300] sm:$0xff] %v1612_v8  ;;  %v1474_v13 = vmul.f32 %v12209_v60, %v1334_v9  ;;  %v1154_v14 = vadd.f32 %v1153_v12, %v12194_v53  ;;  %v1155_v15 = vpop.f32.mrb[101].mxu0 }
 0x1bd   : > { %1744 = vst [vmem:[#allocation2 + $0x308] sm:$0xff] %v1613_v10  ;;  %v1475_v16 = vmul.f32 %v12214_v63, %v1335_v11  ;;  %v1156_v17 = vadd.f32 %v1155_v15, %v12201_v55  ;;  %3884 = vmatprep.mubr.f32.mxu1 %v1613_v10 }
 0x1be   : > { %v1614_v18 = vadd.f32 %v12219_v2, %v1474_v13  ;;  %v1336_v19 = vmax.f32 %v1154_v14, 0.0  ;;  %3885 = vmatmul.mubr.f32.gmra.mrb[48].mxu1 %v1612_v8 }
 0x1bf   : > { %v1615_v20 = vadd.f32 %v12222_v4, %v1475_v16  ;;  %v1337_v7 = vmax.f32 %v1156_v17, 0.0  ;;  %v1159_v22 = vpop.f32.mrb[102].mxu0 }
 0x1c0   : > { %1745 = vst [vmem:[#allocation2 + $0x310] sm:$0xff] %v1614_v18  ;;  %v1476_v24 = vmul.f32 %v12209_v60, %v1336_v19  ;;  %v1160_v25 = vadd.f32 %v1159_v22, %v12194_v53  ;;  %v1161_v26 = vpop.f32.mrb[103].mxu0 }
 0x1c1   : > { %1746 = vst [vmem:[#allocation2 + $0x318] sm:$0xff] %v1615_v20  ;;  %v1477_v27 = vmul.f32 %v12214_v63, %v1337_v7  ;;  %v1162_v28 = vadd.f32 %v1161_v26, %v12201_v55  ;;  %3890 = vmatprep.mubr.f32.mxu1 %v1615_v20 }
 0x1c2   : > { %v1616_v29 = vadd.f32 %v12219_v2, %v1476_v24  ;;  %v1338_v30 = vmax.f32 %v1160_v25, 0.0  ;;  %3891 = vmatmul.mubr.f32.gmra.mrb[50].mxu1 %v1614_v18 }
 0x1c3   : > { %v1617_v32 = vadd.f32 %v12222_v4, %v1477_v27  ;;  %v1339_v34 = vmax.f32 %v1162_v28, 0.0  ;;  %v1165_v35 = vpop.f32.mrb[104].mxu0 }
 0x1c4   : > { %1747 = vst [vmem:[#allocation2 + $0x320] sm:$0xff] %v1616_v29  ;;  %v1478_v36 = vmul.f32 %v12209_v60, %v1338_v30  ;;  %v1166_v37 = vadd.f32 %v1165_v35, %v12194_v53  ;;  %v1167_v38 = vpop.f32.mrb[105].mxu0 }
 0x1c5   : > { %1748 = vst [vmem:[#allocation2 + $0x328] sm:$0xff] %v1617_v32  ;;  %v1479_v39 = vmul.f32 %v12214_v63, %v1339_v34  ;;  %v1168_v40 = vadd.f32 %v1167_v38, %v12201_v55  ;;  %3896 = vmatprep.mubr.f32.mxu1 %v1617_v32 }
 0x1c6   : > { %v1618_v42 = vadd.f32 %v12219_v2, %v1478_v36  ;;  %v1340_v44 = vmax.f32 %v1166_v37, 0.0  ;;  %3897 = vmatmul.mubr.f32.gmra.mrb[52].mxu1 %v1616_v29 }
 0x1c7   : > { %v1619_v46 = vadd.f32 %v12222_v4, %v1479_v39  ;;  %v1341_v48 = vmax.f32 %v1168_v40, 0.0  ;;  %v1171_v50 = vpop.f32.mrb[106].mxu0 }
 0x1c8   : > { %1749 = vst [vmem:[#allocation2 + $0x330] sm:$0xff] %v1618_v42  ;;  %v1480_v51 = vmul.f32 %v12209_v60, %v1340_v44  ;;  %v1172_v54 = vadd.f32 %v1171_v50, %v12194_v53  ;;  %v1173_v56 = vpop.f32.mrb[107].mxu0 }
 0x1c9   : > { %1750 = vst [vmem:[#allocation2 + $0x338] sm:$0xff] %v1619_v46  ;;  %v1481_v58 = vmul.f32 %v12214_v63, %v1341_v48  ;;  %v1174_v61 = vadd.f32 %v1173_v56, %v12201_v55  ;;  %3902 = vmatprep.mubr.f32.mxu1 %v1619_v46 }
 0x1ca   : > { %v12791_v62 = vadd.f32 %v12219_v2, %v1480_v51  ;;  %v1342_v0 = vmax.f32 %v1172_v54, 0.0  ;;  %3903 = vmatmul.mubr.f32.gmra.mrb[54].mxu1 %v1618_v42 }
 0x1cb   : > { %v12794_v1 = vadd.f32 %v12222_v4, %v1481_v58  ;;  %v1343_v3 = vmax.f32 %v1174_v61, 0.0  ;;  %v1177_v5 = vpop.f32.mrb[108].mxu0 }
 0x1cc   : > { %1751 = vst [vmem:[#allocation2 + $0x340] sm:$0xff] %v12791_v62  ;;  %v1482_v6 = vmul.f32 %v12209_v60, %v1342_v0  ;;  %v1178_v8 = vadd.f32 %v1177_v5, %v12194_v53  ;;  %v1179_v9 = vpop.f32.mrb[109].mxu0 }
 0x1cd   : > { %1752 = vst [vmem:[#allocation2 + $0x348] sm:$0xff] %v12794_v1  ;;  %v1483_v10 = vmul.f32 %v12214_v63, %v1343_v3  ;;  %v1180_v11 = vadd.f32 %v1179_v9, %v12201_v55 }
 0x1ce   : > { %v12803_v12 = vadd.f32 %v12219_v2, %v1482_v6  ;;  %v1344_v13 = vmax.f32 %v1178_v8, 0.0 }
 0x1cf   : > { %v12806_v14 = vadd.f32 %v12222_v4, %v1483_v10  ;;  %v1345_v15 = vmax.f32 %v1180_v11, 0.0  ;;  %v1183_v16 = vpop.f32.mrb[110].mxu0 }
 0x1d0   : > { %1753 = vst [vmem:[#allocation2 + $0x350] sm:$0xff] %v12803_v12  ;;  %v1484_v17 = vmul.f32 %v12209_v60, %v1344_v13  ;;  %v1184_v18 = vadd.f32 %v1183_v16, %v12194_v53  ;;  %v1185_v19 = vpop.f32.mrb[111].mxu0 }
 0x1d1   : > { %1754 = vst [vmem:[#allocation2 + $0x358] sm:$0xff] %v12806_v14  ;;  %v1485_v20 = vmul.f32 %v12214_v63, %v1345_v15  ;;  %v1186_v7 = vadd.f32 %v1185_v19, %v12201_v55 }
 0x1d2   : > { %v12815_v22 = vadd.f32 %v12219_v2, %v1484_v17  ;;  %v1346_v24 = vmax.f32 %v1184_v18, 0.0 }
 0x1d3   : > { %v12818_v25 = vadd.f32 %v12222_v4, %v1485_v20  ;;  %v1347_v26 = vmax.f32 %v1186_v7, 0.0  ;;  %v1189_v27 = vpop.f32.mrb[112].mxu0 }
 0x1d4   : > { %1755 = vst [vmem:[#allocation2 + $0x360] sm:$0xff] %v12815_v22  ;;  %v1486_v28 = vmul.f32 %v12209_v60, %v1346_v24  ;;  %v1190_v29 = vadd.f32 %v1189_v27, %v12194_v53  ;;  %v1191_v30 = vpop.f32.mrb[113].mxu0 }
 0x1d5   : > { %1756 = vst [vmem:[#allocation2 + $0x368] sm:$0xff] %v12818_v25  ;;  %v1487_v32 = vmul.f32 %v12214_v63, %v1347_v26  ;;  %v1192_v34 = vadd.f32 %v1191_v30, %v12201_v55 }
 0x1d6   : > { %v12827_v35 = vadd.f32 %v12219_v2, %v1486_v28  ;;  %v1348_v36 = vmax.f32 %v1190_v29, 0.0 }
 0x1d7   : > { %v12830_v37 = vadd.f32 %v12222_v4, %v1487_v32  ;;  %v1349_v38 = vmax.f32 %v1192_v34, 0.0  ;;  %v1195_v39 = vpop.f32.mrb[114].mxu0 }
 0x1d8   : > { %1757 = vst [vmem:[#allocation2 + $0x370] sm:$0xff] %v12827_v35  ;;  %v1488_v40 = vmul.f32 %v12209_v60, %v1348_v36  ;;  %v1196_v42 = vadd.f32 %v1195_v39, %v12194_v53  ;;  %v1197_v44 = vpop.f32.mrb[115].mxu0 }
 0x1d9   : > { %1758 = vst [vmem:[#allocation2 + $0x378] sm:$0xff] %v12830_v37  ;;  %v1489_v46 = vmul.f32 %v12214_v63, %v1349_v38  ;;  %v1198_v48 = vadd.f32 %v1197_v44, %v12201_v55 }
 0x1da   : > { %v1628_v50 = vadd.f32 %v12219_v2, %v1488_v40  ;;  %v1350_v51 = vmax.f32 %v1196_v42, 0.0 }
 0x1db   : > { %v1629_v54 = vadd.f32 %v12222_v4, %v1489_v46  ;;  %v1351_v56 = vmax.f32 %v1198_v48, 0.0  ;;  %v1201_v58 = vpop.f32.mrb[116].mxu0  ;;  %v3472_v46 = vld [vmem:[%s17234_s5 + $0x400] sm:$0xff]  ;;  %v3474_v48 = vld [vmem:[%s17234_s5 + $0x410] sm:$0xff] }
 0x1dc   : > { %1759 = vst [vmem:[#allocation2 + $0x380] sm:$0xff] %v1628_v50  ;;  %v1490_v61 = vmul.f32 %v12209_v60, %v1350_v51  ;;  %v1202_v0 = vadd.f32 %v1201_v58, %v12194_v53  ;;  %v1203_v3 = vpop.f32.mrb[117].mxu0  ;;  %v3479_v58 = vld [vmem:[%s17234_s5 + $0x438] sm:$0xff] }
 0x1dd   : > { %1760 = vst [vmem:[#allocation2 + $0x388] sm:$0xff] %v1629_v54  ;;  %v1491_v5 = vmul.f32 %v12214_v63, %v1351_v56  ;;  %v1204_v6 = vadd.f32 %v1203_v3, %v12201_v55  ;;  %3908 = vmatprep.mubr.f32.mxu1 %v1629_v54  ;;  %v3477_v56 = vld [vmem:[%s17234_s5 + $0x428] sm:$0xff] }
 0x1de   : > { %v1630_v8 = vadd.f32 %v12219_v2, %v1490_v61  ;;  %v1352_v9 = vmax.f32 %v1202_v0, 0.0  ;;  %3909 = vmatmul.mubr.f32.gmra.mrb[56].mxu1 %v1628_v50  ;;  %v1808_v3 = vld [vmem:[#allocation2 + $0x48] sm:$0xff] }
 0x1df   : > { %v1631_v10 = vadd.f32 %v12222_v4, %v1491_v5  ;;  %v1353_v11 = vmax.f32 %v1204_v6, 0.0  ;;  %v1207_v13 = vpop.f32.mrb[118].mxu0 }
 0x1e0   : > { %1761 = vst [vmem:[#allocation2 + $0x390] sm:$0xff] %v1630_v8  ;;  %v1492_v15 = vmul.f32 %v12209_v60, %v1352_v9  ;;  %v1208_v16 = vadd.f32 %v1207_v13, %v12194_v53  ;;  %v1209_v17 = vpop.f32.mrb[119].mxu0  ;;  %v3476_v13 = vld [vmem:[%s17234_s5 + $0x420] sm:$0xff] }
 0x1e1   : > { %1762 = vst [vmem:[#allocation2 + $0x398] sm:$0xff] %v1631_v10  ;;  %v1493_v18 = vmul.f32 %v12214_v63, %v1353_v11  ;;  %v1210_v19 = vadd.f32 %v1209_v17, %v12201_v55  ;;  %3914 = vmatprep.mubr.f32.mxu1 %v1631_v10  ;;  %v10681_v11 = vpack.c.bf16 %v3479_v58, %v3477_v56  ;;  %v1812_v58 = vld [vmem:[#allocation2 + $0x68] sm:$0xff] }
 0x1e2   : > { %v1632_v20 = vadd.f32 %v12219_v2, %v1492_v15  ;;  %v1354_v7 = vmax.f32 %v1208_v16, 0.0  ;;  %3915 = vmatmul.mubr.f32.gmra.mrb[58].mxu1 %v1630_v8  ;;  %v10679_v8 = vpack.c.bf16 %v3474_v48, %v3472_v46  ;;  %v3478_v15 = vld [vmem:[%s17234_s5 + $0x430] sm:$0xff] }
 0x1e3   : > { %v1633_v24 = vadd.f32 %v12222_v4, %v1493_v18  ;;  %v1355_v26 = vmax.f32 %v1210_v19, 0.0  ;;  %v1213_v27 = vpop.f32.mrb[120].mxu0  ;;  %v1807_v19 = vld [vmem:[#allocation2 + $0x40] sm:$0xff]  ;;  %v1809_v48 = vld [vmem:[#allocation2 + $0x50] sm:$0xff] }
 0x1e4   : > { %1763 = vst [vmem:[#allocation2 + $0x3a0] sm:$0xff] %v1632_v20  ;;  %v1494_v28 = vmul.f32 %v12209_v60, %v1354_v7  ;;  %v1214_v29 = vadd.f32 %v1213_v27, %v12194_v53  ;;  %v1215_v30 = vpop.f32.mrb[121].mxu0  ;;  %v3483_v7 = vld [vmem:[%s17234_s5 + $0x458] sm:$0xff] }
 0x1e5   : > { %1764 = vst [vmem:[#allocation2 + $0x3a8] sm:$0xff] %v1633_v24  ;;  %v1495_v32 = vmul.f32 %v12214_v63, %v1355_v26  ;;  %v1216_v34 = vadd.f32 %v1215_v30, %v12201_v55  ;;  %3920 = vmatprep.mubr.f32.mxu1 %v1633_v24  ;;  %v1810_v27 = vld [vmem:[#allocation2 + $0x58] sm:$0xff]  ;;  %v10683_v30 = vpack.c.bf16 %v3478_v15, %v3476_v13  ;;  %v1811_v13 = vld [vmem:[#allocation2 + $0x60] sm:$0xff]  ;;  %v3489_v15 = vld [vmem:[%s17234_s5 + $0x488] sm:$0xff] }
 0x1e6   : > { %v1634_v36 = vadd.f32 %v12219_v2, %v1494_v28  ;;  %v1356_v38 = vmax.f32 %v1214_v29, 0.0  ;;  %3921 = vmatmul.mubr.f32.gmra.mrb[60].mxu1 %v1632_v20  ;;  %v3481_v20 = vld [vmem:[%s17234_s5 + $0x448] sm:$0xff] }
 0x1e7   : > { %v1635_v39 = vadd.f32 %v12222_v4, %v1495_v32  ;;  %v1357_v40 = vmax.f32 %v1216_v34, 0.0  ;;  %v1219_v42 = vpop.f32.mrb[122].mxu0 }
 0x1e8   : > { %1765 = vst [vmem:[#allocation2 + $0x3b0] sm:$0xff] %v1634_v36  ;;  %v1496_v44 = vmul.f32 %v12209_v60, %v1356_v38  ;;  %v1220_v50 = vadd.f32 %v1219_v42, %v12194_v53  ;;  %v1221_v51 = vpop.f32.mrb[123].mxu0  ;;  %v10685_v38 = vpack.c.bf16 %v3483_v7, %v3481_v20 }
 0x1e9   : > { %1766 = vst [vmem:[#allocation2 + $0x3b8] sm:$0xff] %v1635_v39  ;;  %v1497_v54 = vmul.f32 %v12214_v63, %v1357_v40  ;;  %3926 = vmatprep.mubr.f32.mxu1 %v1635_v39  ;;  %v1222_v61 = vadd.f32 %v1221_v51, %v12201_v55  ;;  %v3480_v39 = vld [vmem:[%s17234_s5 + $0x440] sm:$0xff]  ;;  %v3482_v40 = vld [vmem:[%s17234_s5 + $0x450] sm:$0xff]  ;;  %v3487_v51 = vld [vmem:[%s17234_s5 + $0x478] sm:$0xff] }
 0x1ea   : > { %v12875_v0 = vadd.f32 %v12219_v2, %v1496_v44  ;;  %3927 = vmatmul.mubr.f32.gmra.mrb[62].mxu1 %v1634_v36  ;;  %v1358_v5 = vmax.f32 %v1220_v50, 0.0  ;;  %v3485_v50 = vld [vmem:[%s17234_s5 + $0x468] sm:$0xff] }
 0x1eb   : > { %v12878_v6 = vadd.f32 %v12222_v4, %v1497_v54  ;;  %3997 = vmatprep.mubr.f32.mxu1 %v1808_v3  ;;  %v1359_v9 = vmax.f32 %v1222_v61, 0.0  ;;  %v1225_v10 = vpop.f32.mrb[124].mxu0  ;;  %v10687_v3 = vpack.c.bf16 %v3482_v40, %v3480_v39  ;;  %v3497_v39 = vld [vmem:[%s17234_s5 + $0x4c8] sm:$0xff]  ;;  %v3499_v40 = vld [vmem:[%s17234_s5 + $0x4d8] sm:$0xff] }
 0x1ec   : > { %1767 = vst [vmem:[#allocation2 + $0x3c0] sm:$0xff] %v12875_v0  ;;  %v1498_v16 = vmul.f32 %v12209_v60, %v1358_v5  ;;  %v1226_v17 = vadd.f32 %v1225_v10, %v12194_v53  ;;  %v1227_v18 = vpop.f32.mrb[125].mxu0  ;;  %v3484_v10 = vld [vmem:[%s17234_s5 + $0x460] sm:$0xff] }
 0x1ed   : > { %1768 = vst [vmem:[#allocation2 + $0x3c8] sm:$0xff] %v12878_v6  ;;  %v1499_v24 = vmul.f32 %v12214_v63, %v1359_v9  ;;  %v1228_v26 = vadd.f32 %v1227_v18, %v12201_v55  ;;  %v10689_v9 = vpack.c.bf16 %v3487_v51, %v3485_v50  ;;  %v1814_v18 = vld [vmem:[#allocation2 + $0x78] sm:$0xff]  ;;  %v3498_v50 = vld [vmem:[%s17234_s5 + $0x4d0] sm:$0xff] }
 0x1ee   : > { %3998 = vmatmul.mubr.f32.vlgmr.msra.gmra.mrb[0].mxu1 %v1807_v19  ;;  %v12899_v28 = vadd.f32 %v12219_v2, %v1498_v16  ;;  %v1360_v29 = vmax.f32 %v1226_v17, 0.0  ;;  %v3491_v16 = vld [vmem:[%s17234_s5 + $0x498] sm:$0xff]  ;;  %v1825_v51 = vld [vmem:[#allocation2 + $0xd0] sm:$0xff] }
 0x1ef   : > { %4003 = vmatprep.mubr.f32.mxu1 %v1810_v27  ;;  %10680 = vmatpush1.bf16.msra.mxu1 %v10679_v8  ;;  %v12902_v32 = vadd.f32 %v12222_v4, %v1499_v24  ;;  %v1361_v34 = vmax.f32 %v1228_v26, 0.0  ;;  %v1231_v36 = vpop.f32.mrb[126].mxu0  ;;  %v10693_v7 = vpack.c.bf16 %v3491_v16, %v3489_v15  ;;  %v3488_v24 = vld [vmem:[%s17234_s5 + $0x480] sm:$0xff]  ;;  %v3493_v26 = vld [vmem:[%s17234_s5 + $0x4a8] sm:$0xff] }
 0x1f0   : > { %10682 = vmatprep.subr.bf16.mxu1 %v10681_v11  ;;  %1769 = vst [vmem:[#allocation2 + $0x3d0] sm:$0xff] %v12899_v28  ;;  %v1500_v42 = vmul.f32 %v12209_v60, %v1360_v29  ;;  %v1232_v44 = vadd.f32 %v1231_v36, %v12194_v53  ;;  %v1233_v46 = vpop.f32.mrb[127].mxu0  ;;  %v1824_v27 = vld [vmem:[#allocation2 + $0xc8] sm:$0xff]  ;;  %v3494_v36 = vld [vmem:[%s17234_s5 + $0x4b0] sm:$0xff] }
 0x1f1   : > { %1770 = vst [vmem:[#allocation2 + $0x3d8] sm:$0xff] %v12902_v32  ;;  %v1501_v54 = vmul.f32 %v12214_v63, %v1361_v34  ;;  %v1234_v56 = vadd.f32 %v1233_v46, %v12201_v55  ;;  %v3486_v55 = vld [vmem:[%s17234_s5 + $0x470] sm:$0xff]  ;;  %v3492_v34 = vld [vmem:[%s17234_s5 + $0x4a0] sm:$0xff]  ;;  %v10701_v46 = vpack.c.bf16 %v3499_v40, %v3497_v39 }
 0x1f2   : > { %4004 = vmatmul.mubr.f32.gmra.mrb[2].mxu1 %v1809_v48  ;;  %v12923_v53 = vadd.f32 %v12219_v2, %v1500_v42  ;;  %v1362_v61 = vmax.f32 %v1232_v44, 0.0  ;;  %v1826_v42 = vld [vmem:[#allocation2 + $0xd8] sm:$0xff]  ;;  %v10699_v44 = vpack.c.bf16 %v3494_v36, %v3492_v34  ;;  %v3496_v48 = vld [vmem:[%s17234_s5 + $0x4c0] sm:$0xff] }
 0x1f3   : > { %4009 = vmatprep.mubr.f32.mxu1 %v1812_v58  ;;  %10684 = vmatpush1.bf16.msra.mxu1 %v10683_v30  ;;  %v12926_v5 = vadd.f32 %v12222_v4, %v1501_v54  ;;  %v1363_v8 = vmax.f32 %v1234_v56, 0.0  ;;  %v3501_v54 = vld [vmem:[%s17234_s5 + $0x4e8] sm:$0xff]  ;;  %v3503_v56 = vld [vmem:[%s17234_s5 + $0x4f8] sm:$0xff]  ;;  %v3512_v40 = vld [vmem:[%s17234_s5 + $0x540] sm:$0xff] }
 0x1f4   : > { %10686 = vmatprep.subr.bf16.mxu1 %v10685_v38  ;;  %1771 = vst [vmem:[#allocation2 + $0x3e0] sm:$0xff] %v12923_v53  ;;  %v1502_v11 = vmul.f32 %v12209_v60, %v1362_v61  ;;  %v10691_v60 = vpack.c.bf16 %v3486_v55, %v3484_v10  ;;  %v1823_v38 = vld [vmem:[#allocation2 + $0xc0] sm:$0xff]  ;;  %v1828_v58 = vld [vmem:[#allocation2 + $0xe8] sm:$0xff]  ;;  %v10703_v61 = vpack.c.bf16 %v3498_v50, %v3496_v48  ;;  %v3515_v34 = vld [vmem:[%s17234_s5 + $0x558] sm:$0xff] }
 0x1f5   : > { %1772 = vst [vmem:[#allocation2 + $0x3e8] sm:$0xff] %v12926_v5  ;;  %v1503_v17 = vmul.f32 %v12214_v63, %v1363_v8  ;;  %v3490_v63 = vld [vmem:[%s17234_s5 + $0x490] sm:$0xff]  ;;  %v3500_v8 = vld [vmem:[%s17234_s5 + $0x4e0] sm:$0xff]  ;;  %v3505_v55 = vld [vmem:[%s17234_s5 + $0x508] sm:$0xff] }
 0x1f6   : > { %4010 = vmatmul.mubr.f32.gmra.mrb[4].mxu1 %v1811_v13  ;;  %v12945_v19 = vadd.f32 %v12219_v2, %v1502_v11  ;;  %v1813_v2 = vld [vmem:[#allocation2 + $0x70] sm:$0xff]  ;;  %v10695_v29 = vpack.c.bf16 %v3490_v63, %v3488_v24  ;;  %v1827_v10 = vld [vmem:[#allocation2 + $0xe0] sm:$0xff]  ;;  %v3507_v11 = vld [vmem:[%s17234_s5 + $0x518] sm:$0xff] }
 0x1f7   : > { %4015 = vmatprep.mubr.f32.mxu1 %v1814_v18  ;;  %10688 = vmatpush1.bf16.msra.mxu1 %v10687_v3  ;;  %v12948_v20 = vadd.f32 %v12222_v4, %v1503_v17  ;;  %v3495_v4 = vld [vmem:[%s17234_s5 + $0x4b8] sm:$0xff]  ;;  %v10705_v3 = vpack.c.bf16 %v3503_v56, %v3501_v54  ;;  %v10709_v16 = vpack.c.bf16 %v3507_v11, %v3505_v55  ;;  %v3504_v17 = vld [vmem:[%s17234_s5 + $0x500] sm:$0xff]  ;;  %v3506_v18 = vld [vmem:[%s17234_s5 + $0x510] sm:$0xff] }
 0x1f8   : > { %10690 = vmatprep.subr.bf16.mxu1 %v10689_v9  ;;  %1773 = vst [vmem:[#allocation2 + $0x3f0] sm:$0xff] %v12945_v19  ;;  %v10697_v30 = vpack.c.bf16 %v3495_v4, %v3493_v26  ;;  %v3502_v9 = vld [vmem:[%s17234_s5 + $0x4f0] sm:$0xff]  ;;  %v1830_v13 = vld [vmem:[#allocation2 + $0xf8] sm:$0xff]  ;;  %v2121_v63 = vld [vmem:[#allocation2 + $0x148] sm:$0xff] }
 0x1f9   : > { %1774 = vst [vmem:[#allocation2 + $0x3f8] sm:$0xff] %v12948_v20  ;;  %v10707_v15 = vpack.c.bf16 %v3502_v9, %v3500_v8  ;;  %v3511_v24 = vld [vmem:[%s17234_s5 + $0x538] sm:$0xff]  ;;  %v3508_v4 = vld [vmem:[%s17234_s5 + $0x520] sm:$0xff]  ;;  %v2125_v50 = vld [vmem:[#allocation2 + $0x168] sm:$0xff] }
 0x1fa   : > { %4016 = vmatmul.mubr.f32.gmra.mrb[6].mxu1 %v1813_v2  ;;  %v10711_v2 = vpack.c.bf16 %v3506_v18, %v3504_v17  ;;  %v2123_v36 = vld [vmem:[#allocation2 + $0x158] sm:$0xff]  ;;  %v3516_v56 = vld [vmem:[%s17234_s5 + $0x560] sm:$0xff]  ;;  %v2137_v18 = vld [vmem:[#allocation2 + $0x1c8] sm:$0xff] }
 0x1fb   : > { %4021 = vmatprep.mubr.f32.mxu1 %v1824_v27  ;;  %10692 = vmatpush1.bf16.msra.mxu1 %v10691_v60  ;;  %v1829_v60 = vld [vmem:[#allocation2 + $0xf0] sm:$0xff]  ;;  %v3519_v48 = vld [vmem:[%s17234_s5 + $0x578] sm:$0xff]  ;;  %v3520_v11 = vld [vmem:[%s17234_s5 + $0x580] sm:$0xff] }
 0x1fc   : > { %10694 = vmatprep.subr.bf16.mxu1 %v10693_v7  ;;  %v3509_v7 = vld [vmem:[%s17234_s5 + $0x528] sm:$0xff]  ;;  %v3510_v27 = vld [vmem:[%s17234_s5 + $0x530] sm:$0xff]  ;;  %v3523_v8 = vld [vmem:[%s17234_s5 + $0x598] sm:$0xff] }
 0x1fd   : > { %v10713_v26 = vpack.c.bf16 %v3511_v24, %v3509_v7  ;;  %v2127_v9 = vld [vmem:[#allocation2 + $0x178] sm:$0xff]  ;;  %v3524_v24 = vld [vmem:[%s17234_s5 + $0x5a0] sm:$0xff] }
 0x1fe   : > { %4022 = vmatmul.mubr.f32.gmra.mrb[8].mxu1 %v1823_v38  ;;  %v10715_v38 = vpack.c.bf16 %v3510_v27, %v3508_v4  ;;  %v3527_v17 = vld [vmem:[%s17234_s5 + $0x5b8] sm:$0xff] }
 0x1ff   : > { %4027 = vmatprep.mubr.f32.mxu1 %v1826_v42  ;;  %10696 = vmatpush1.bf16.msra.mxu1 %v10695_v29  ;;  %v2120_v29 = vld [vmem:[#allocation2 + $0x140] sm:$0xff]  ;;  %v3514_v42 = vld [vmem:[%s17234_s5 + $0x550] sm:$0xff]  ;;  %v3531_v4 = vld [vmem:[%s17234_s5 + $0x5d8] sm:$0xff] }
 0x200   : > { %10698 = vmatprep.subr.bf16.mxu1 %v10697_v30  ;;  %v3513_v30 = vld [vmem:[%s17234_s5 + $0x548] sm:$0xff]  ;;  %v2139_v27 = vld [vmem:[#allocation2 + $0x1d8] sm:$0xff] }
 0x201   : > { %v10717_v39 = vpack.c.bf16 %v3515_v34, %v3513_v30  ;;  %v3528_v34 = vld [vmem:[%s17234_s5 + $0x5c0] sm:$0xff] }
 0x202   : > { %4028 = vmatmul.mubr.f32.gmra.mrb[10].mxu1 %v1825_v51  ;;  %v10719_v51 = vpack.c.bf16 %v3514_v42, %v3512_v40  ;;  %v3535_v40 = vld [vmem:[%s17234_s5 + $0x5f8] sm:$0xff]  ;;  %v2141_v42 = vld [vmem:[#allocation2 + $0x1e8] sm:$0xff] }
 0x203   : > { %4033 = vmatprep.mubr.f32.mxu1 %v1828_v58  ;;  %10700 = vmatpush1.bf16.msra.mxu1 %v10699_v44  ;;  %v2122_v44 = vld [vmem:[#allocation2 + $0x150] sm:$0xff] }
 0x204   : > { %10702 = vmatprep.subr.bf16.mxu1 %v10701_v46  ;;  %v3517_v46 = vld [vmem:[%s17234_s5 + $0x568] sm:$0xff]  ;;  %v3518_v58 = vld [vmem:[%s17234_s5 + $0x570] sm:$0xff] }
 0x205   : > { %v10721_v54 = vpack.c.bf16 %v3519_v48, %v3517_v46  ;;  %v3532_v48 = vld [vmem:[%s17234_s5 + $0x5e0] sm:$0xff] }
 0x206   : > { %4034 = vmatmul.mubr.f32.gmra.mrb[12].mxu1 %v1827_v10  ;;  %v10723_v10 = vpack.c.bf16 %v3518_v58, %v3516_v56  ;;  %v3539_v56 = vld [vmem:[%s17234_s5 + $0x618] sm:$0xff] }
 0x207   : > { %4039 = vmatprep.mubr.f32.mxu1 %v1830_v13  ;;  %10704 = vmatpush1.bf16.msra.mxu1 %v10703_v61  ;;  %v2124_v61 = vld [vmem:[#allocation2 + $0x160] sm:$0xff]  ;;  %v3522_v13 = vld [vmem:[%s17234_s5 + $0x590] sm:$0xff]  ;;  %v2143_v58 = vld [vmem:[#allocation2 + $0x1f8] sm:$0xff] }
 0x208   : > { %10706 = vmatprep.subr.bf16.mxu1 %v10705_v3  ;;  %v3521_v3 = vld [vmem:[%s17234_s5 + $0x588] sm:$0xff] }
 0x209   : > { %v10725_v55 = vpack.c.bf16 %v3523_v8, %v3521_v3  ;;  %v2142_v8 = vld [vmem:[#allocation2 + $0x1f0] sm:$0xff] }
 0x20a   : > { %4040 = vmatmul.mubr.f32.gmra.mrb[14].mxu1 %v1829_v60  ;;  %v10727_v60 = vpack.c.bf16 %v3522_v13, %v3520_v11  ;;  %v2434_v11 = vld [vmem:[#allocation2 + $0x250] sm:$0xff]  ;;  %v2437_v13 = vld [vmem:[#allocation2 + $0x268] sm:$0xff] }
 0x20b   : > { %4045 = vmatprep.mubr.f32.mxu1 %v2121_v63  ;;  %10708 = vmatpush1.bf16.msra.mxu1 %v10707_v15  ;;  %v2126_v15 = vld [vmem:[#allocation2 + $0x170] sm:$0xff] }
 0x20c   : > { %10710 = vmatprep.subr.bf16.mxu1 %v10709_v16  ;;  %v3525_v16 = vld [vmem:[%s17234_s5 + $0x5a8] sm:$0xff]  ;;  %v3526_v63 = vld [vmem:[%s17234_s5 + $0x5b0] sm:$0xff] }
 0x20d   : > { %v10729_v7 = vpack.c.bf16 %v3527_v17, %v3525_v16  ;;  %v2439_v16 = vld [vmem:[#allocation2 + $0x278] sm:$0xff]  ;;  %v2438_v17 = vld [vmem:[#allocation2 + $0x270] sm:$0xff] }
 0x20e   : > { %4046 = vmatmul.mubr.f32.gmra.mrb[16].mxu1 %v2120_v29  ;;  %v10731_v29 = vpack.c.bf16 %v3526_v63, %v3524_v24  ;;  %v1843_v24 = vld [vmem:[#allocation2 + $0xa0] sm:$0xff]  ;;  %v3553_v63 = vld [vmem:[%s17234_s5 + $0x688] sm:$0xff] }
 0x20f   : > { %4051 = vmatprep.mubr.f32.mxu1 %v2123_v36  ;;  %10712 = vmatpush1.bf16.msra.mxu1 %v10711_v2  ;;  %v2136_v2 = vld [vmem:[#allocation2 + $0x1c0] sm:$0xff]  ;;  %v3530_v36 = vld [vmem:[%s17234_s5 + $0x5d0] sm:$0xff] }
 0x210   : > { %10714 = vmatprep.subr.bf16.mxu1 %v10713_v26  ;;  %v3529_v26 = vld [vmem:[%s17234_s5 + $0x5c8] sm:$0xff] }
 0x211   : > { %v10733_v30 = vpack.c.bf16 %v3531_v4, %v3529_v26  ;;  %v1846_v26 = vld [vmem:[#allocation2 + $0xb8] sm:$0xff] }
 0x212   : > { %4052 = vmatmul.mubr.f32.gmra.mrb[18].mxu1 %v2122_v44  ;;  %v10735_v44 = vpack.c.bf16 %v3530_v36, %v3528_v34  ;;  %v1855_v36 = vld [vmem:[#allocation2] sm:$0xfe] }
 0x213   : > { %4057 = vmatprep.mubr.f32.mxu1 %v2125_v50  ;;  %10716 = vmatpush1.bf16.msra.mxu1 %v10715_v38  ;;  %v2138_v38 = vld [vmem:[#allocation2 + $0x1d0] sm:$0xff] }
 0x214   : > { %10718 = vmatprep.subr.bf16.mxu1 %v10717_v39  ;;  %v3533_v39 = vld [vmem:[%s17234_s5 + $0x5e8] sm:$0xff]  ;;  %v3534_v50 = vld [vmem:[%s17234_s5 + $0x5f0] sm:$0xff] }
 0x215   : > { %v10737_v46 = vpack.c.bf16 %v3535_v40, %v3533_v39  ;;  %v3552_v39 = vld [vmem:[%s17234_s5 + $0x680] sm:$0xff]  ;;  %v3554_v40 = vld [vmem:[%s17234_s5 + $0x690] sm:$0xff] }
 0x216   : > { %4058 = vmatmul.mubr.f32.gmra.mrb[20].mxu1 %v2124_v61  ;;  %v10739_v61 = vpack.c.bf16 %v3534_v50, %v3532_v48  ;;  %v3559_v48 = vld [vmem:[%s17234_s5 + $0x6b8] sm:$0xff] }
 0x217   : > { %4063 = vmatprep.mubr.f32.mxu1 %v2127_v9  ;;  %10720 = vmatpush1.bf16.msra.mxu1 %v10719_v51  ;;  %v2140_v51 = vld [vmem:[#allocation2 + $0x1e0] sm:$0xff]  ;;  %v2433_v9 = vld [vmem:[#allocation2 + $0x248] sm:$0xff] }
 0x218   : > { %10722 = vmatprep.subr.bf16.mxu1 %v10721_v54  ;;  %v3537_v54 = vld [vmem:[%s17234_s5 + $0x608] sm:$0xff] }
 0x219   : > { %v10741_v3 = vpack.c.bf16 %v3539_v56, %v3537_v54  ;;  %v1859_v54 = vld [vmem:[#allocation2 + $0x20] sm:$0xff]  ;;  %v1876_v56 = vrot.slane %v1855_v36, 1  ;;  %v2155_v36 = vld [vmem:[#allocation2 + $0x198] sm:$0xff] }
 0x21a   : > { %4064 = vmatmul.mubr.f32.gmra.mrb[22].mxu1 %v2126_v15  ;;  %v2436_v15 = vld [vmem:[#allocation2 + $0x260] sm:$0xff] }
 0x21b   : > { %4069 = vmatprep.mubr.f32.mxu1 %v2137_v18  ;;  %10724 = vmatpush1.bf16.msra.mxu1 %v10723_v10  ;;  %v2432_v10 = vld [vmem:[#allocation2 + $0x240] sm:$0xff] }
 0x21c   : > { %10726 = vmatprep.subr.bf16.mxu1 %v10725_v55  ;;  %v2435_v55 = vld [vmem:[#allocation2 + $0x258] sm:$0xff] }
 0x21e   : > { %4070 = vmatmul.mubr.f32.gmra.mrb[24].mxu1 %v2136_v2  ;;  %v3555_v2 = vld [vmem:[%s17234_s5 + $0x698] sm:$0xff] }
 0x21f   : > { %4075 = vmatprep.mubr.f32.mxu1 %v2139_v27  ;;  %10728 = vmatpush1.bf16.msra.mxu1 %v10727_v60  ;;  %v3548_v60 = vld [vmem:[%s17234_s5 + $0x660] sm:$0xff]  ;;  %v1857_v27 = vld [vmem:[#allocation2 + $0x10] sm:$0xff] }
 0x220   : > { %10730 = vmatprep.subr.bf16.mxu1 %v10729_v7  ;;  %v3550_v7 = vld [vmem:[%s17234_s5 + $0x670] sm:$0xff] }
 0x222   : > { %4076 = vmatmul.mubr.f32.gmra.mrb[26].mxu1 %v2138_v38  ;;  %v10757_v38 = vpack.c.bf16 %v3555_v2, %v3553_v63  ;;  %v2153_v63 = vld [vmem:[#allocation2 + $0x188] sm:$0xff] }
 0x223   : > { %4081 = vmatprep.mubr.f32.mxu1 %v2141_v42  ;;  %10732 = vmatpush1.bf16.msra.mxu1 %v10731_v29  ;;  %v1860_v29 = vld [vmem:[#allocation2 + $0x28] sm:$0xff]  ;;  %v1845_v42 = vld [vmem:[#allocation2 + $0xb0] sm:$0xff] }
 0x224   : > { %10734 = vmatprep.subr.bf16.mxu1 %v10733_v30  ;;  %v10755_v30 = vpack.c.bf16 %v3550_v7, %v3548_v60  ;;  %v3573_v7 = vld [vmem:[%s17234_s5 + $0x728] sm:$0xff] }
 0x226   : > { %4082 = vmatmul.mubr.f32.gmra.mrb[28].mxu1 %v2140_v51  ;;  %v1884_v51 = vrot.slane %v1860_v29, 1  ;;  %v2152_v29 = vld [vmem:[#allocation2 + $0x180] sm:$0xff] }
 0x227   : > { %4087 = vmatprep.mubr.f32.mxu1 %v2143_v58  ;;  %10736 = vmatpush1.bf16.msra.mxu1 %v10735_v44  ;;  %v1877_v44 = vrot.slane %v1857_v27, 1  ;;  %v1862_v58 = vld [vmem:[#allocation2 + $0x38] sm:$0xff]  ;;  %v3574_v27 = vld [vmem:[%s17234_s5 + $0x730] sm:$0xff] }
 0x228   : > { %10738 = vmatprep.subr.bf16.mxu1 %v10737_v46  ;;  %v3557_v46 = vld [vmem:[%s17234_s5 + $0x6a8] sm:$0xff] }
 0x22a   : > { %4088 = vmatmul.mubr.f32.gmra.mrb[30].mxu1 %v2142_v8  ;;  %v3556_v8 = vld [vmem:[%s17234_s5 + $0x6a0] sm:$0xff] }
 0x22b   : > { %4093 = vmatprep.mubr.f32.mxu1 %v2433_v9  ;;  %10740 = vmatpush1.bf16.msra.mxu1 %v10739_v61  ;;  %v10759_v61 = vpack.c.bf16 %v3554_v40, %v3552_v39  ;;  %v3558_v9 = vld [vmem:[%s17234_s5 + $0x6b0] sm:$0xff]  ;;  %v3576_v40 = vld [vmem:[%s17234_s5 + $0x740] sm:$0xff] }
 0x22c   : > { %10742 = vmatprep.subr.bf16.mxu1 %v10741_v3  ;;  %v10761_v3 = vpack.c.bf16 %v3559_v48, %v3557_v46  ;;  %v3581_v46 = vld [vmem:[%s17234_s5 + $0x768] sm:$0xff]  ;;  %v3583_v48 = vld [vmem:[%s17234_s5 + $0x778] sm:$0xff] }
 0x22e   : > { %4094 = vmatmul.mubr.f32.gmra.mrb[32].mxu1 %v2432_v10  ;;  %v1878_v10 = vsel %vm1875_vm4, %v1876_v56, %v1877_v44  ;;  %v2169_v56 = vld [vmem:[#allocation2 + $0x108] sm:$0xfe] }
 0x22f   : > { %4099 = vmatprep.mubr.f32.mxu1 %v2435_v55  ;;  %v1882_v55 = vrot.slane %v1859_v54, 1 }
 0x232   : > { %4100 = vmatmul.mubr.f32.gmra.mrb[34].mxu1 %v2434_v11  ;;  %v3561_v11 = vld [vmem:[%s17234_s5 + $0x6c8] sm:$0xff] }
 0x233   : > { %4105 = vmatprep.mubr.f32.mxu1 %v2437_v13  ;;  %v3563_v13 = vld [vmem:[%s17234_s5 + $0x6d8] sm:$0xff] }
 0x236   : > { %4106 = vmatmul.mubr.f32.gmra.mrb[36].mxu1 %v2436_v15 }
 0x237   : > { %4111 = vmatprep.mubr.f32.mxu1 %v2439_v16  ;;  %v1888_v16 = vrot.slane %v1862_v58, 1  ;;  %v10785_v58 = vpack.c.bf16 %v3583_v48, %v3581_v46  ;;  %v3601_v46 = vld [vmem:[%s17234_s5 + $0x808] sm:$0xff]  ;;  %v3603_v48 = vld [vmem:[%s17234_s5 + $0x818] sm:$0xff] }
 0x23a   : > { %4112 = vmatmul.mubr.f32.gmra.mrb[38].mxu1 %v2438_v17  ;;  %v1861_v17 = vld [vmem:[#allocation2 + $0x30] sm:$0xff] }
 0x23b   : > { %4117 = vmatprep.mubr.f32.mxu1 %v12722_v23  ;;  %v3538_v23 = vld [vmem:[%s17234_s5 + $0x610] sm:$0xff] }
 0x23e   : > { %4118 = vmatmul.mubr.f32.gmra.mrb[40].mxu1 %v12719_v21  ;;  %v3536_v21 = vld [vmem:[%s17234_s5 + $0x600] sm:$0xff] }
 0x23f   : > { %4123 = vmatprep.mubr.f32.mxu1 %v12734_v33  ;;  %v3543_v33 = vld [vmem:[%s17234_s5 + $0x638] sm:$0xff] }
 0x242   : > { %4124 = vmatmul.mubr.f32.gmra.mrb[42].mxu1 %v12731_v31  ;;  %v3541_v31 = vld [vmem:[%s17234_s5 + $0x628] sm:$0xff] }
 0x243   : > { %4129 = vmatprep.mubr.f32.mxu1 %v12746_v43  ;;  %v10743_v43 = vpack.c.bf16 %v3538_v23, %v3536_v21  ;;  %v1864_v21 = vld [vmem:[#allocation2 + $0x48] sm:$0x1]  ;;  %v10763_v23 = vpack.c.bf16 %v3558_v9, %v3556_v8  ;;  %v2156_v8 = vld [vmem:[#allocation2 + $0x1a0] sm:$0xff] }
 0x244   : > { %v3585_v9 = vld [vmem:[%s17234_s5 + $0x788] sm:$0xff] }
 0x246   : > { %4130 = vmatmul.mubr.f32.gmra.mrb[44].mxu1 %v12743_v41  ;;  %v1840_v41 = vld [vmem:[#allocation2 + $0x88] sm:$0xff] }
 0x247   : > { %4135 = vmatprep.mubr.f32.mxu1 %v12758_v59  ;;  %v3540_v59 = vld [vmem:[%s17234_s5 + $0x620] sm:$0xff] }
 0x24a   : > { %4136 = vmatmul.mubr.f32.gmra.mrb[46].mxu1 %v12755_v57  ;;  %v10745_v57 = vpack.c.bf16 %v3543_v33, %v3541_v31  ;;  %v10765_v31 = vpack.c.bf16 %v3563_v13, %v3561_v11  ;;  %v3560_v33 = vld [vmem:[%s17234_s5 + $0x6c0] sm:$0xff]  ;;  %v2170_v13 = vld [vmem:[#allocation2 + $0x110] sm:$0xff] }
 0x24b   : > { %4141 = vmatprep.mubr.f32.mxu1 %v12794_v1  ;;  %v1839_v1 = vld [vmem:[#allocation2 + $0x80] sm:$0xff] }
 0x24e   : > { %4142 = vmatmul.mubr.f32.gmra.mrb[48].mxu1 %v12791_v62  ;;  %v3542_v62 = vld [vmem:[%s17234_s5 + $0x630] sm:$0xff] }
 0x24f   : > { %4147 = vmatprep.mubr.f32.mxu1 %v12806_v14  ;;  %v3547_v14 = vld [vmem:[%s17234_s5 + $0x658] sm:$0xff] }
 0x252   : > { %4148 = vmatmul.mubr.f32.gmra.mrb[50].mxu1 %v12803_v12  ;;  %v3545_v12 = vld [vmem:[%s17234_s5 + $0x648] sm:$0xff] }
 0x253   : > { %4153 = vmatprep.mubr.f32.mxu1 %v12818_v25  ;;  %v10747_v25 = vpack.c.bf16 %v3542_v62, %v3540_v59  ;;  %v3565_v59 = vld [vmem:[%s17234_s5 + $0x6e8] sm:$0xff]  ;;  %v3567_v62 = vld [vmem:[%s17234_s5 + $0x6f8] sm:$0xff] }
 0x256   : > { %4154 = vmatmul.mubr.f32.gmra.mrb[52].mxu1 %v12815_v22  ;;  %v1842_v22 = vld [vmem:[#allocation2 + $0x98] sm:$0xff] }
 0x257   : > { %4159 = vmatprep.mubr.f32.mxu1 %v12830_v37  ;;  %v3544_v37 = vld [vmem:[%s17234_s5 + $0x640] sm:$0xff] }
 0x25a   : > { %4160 = vmatmul.mubr.f32.gmra.mrb[54].mxu1 %v12827_v35  ;;  %v10749_v35 = vpack.c.bf16 %v3547_v14, %v3545_v12  ;;  %v1892_v12 = vrot.slane %v1864_v21, 1  ;;  %v1863_v14 = vld [vmem:[#allocation2 + $0x40] sm:$0x1]  ;;  %v2168_v21 = vld [vmem:[#allocation2 + $0x100] sm:$0xfe] }
 0x25b   : > { %4165 = vmatprep.mubr.f32.mxu1 %v12878_v6  ;;  %v1841_v6 = vld [vmem:[#allocation2 + $0x90] sm:$0xff] }
 0x25e   : > { %4166 = vmatmul.mubr.f32.gmra.mrb[56].mxu1 %v12875_v0  ;;  %v3546_v0 = vld [vmem:[%s17234_s5 + $0x650] sm:$0xff] }
 0x25f   : > { %4171 = vmatprep.mubr.f32.mxu1 %v12902_v32  ;;  %v3551_v32 = vld [vmem:[%s17234_s5 + $0x678] sm:$0xff] }
 0x262   : > { %4172 = vmatmul.mubr.f32.gmra.mrb[58].mxu1 %v12899_v28  ;;  %v3549_v28 = vld [vmem:[%s17234_s5 + $0x668] sm:$0xff] }
 0x263   : > { %4177 = vmatprep.mubr.f32.mxu1 %v12926_v5  ;;  %v1858_v5 = vld [vmem:[#allocation2 + $0x18] sm:$0xff]  ;;  %v10753_v18 = vpack.c.bf16 %v3551_v32, %v3549_v28  ;;  %v3569_v28 = vld [vmem:[%s17234_s5 + $0x708] sm:$0xff] }
 0x264   : > { %v1880_v4 = vrot.slane %v1858_v5, 1  ;;  %v3571_v32 = vld [vmem:[%s17234_s5 + $0x718] sm:$0xff] }
 0x266   : > { %4178 = vmatmul.mubr.f32.gmra.mrb[60].mxu1 %v12923_v53  ;;  %v1844_v53 = vld [vmem:[#allocation2 + $0xa8] sm:$0xff]  ;;  %v1885_v15 = vsel %vm1875_vm4, %v1880_v4, %v1884_v51 }
 0x267   : > { %4183 = vmatprep.mubr.f32.mxu1 %v12948_v20  ;;  %v1856_v20 = vld [vmem:[#allocation2 + $0x8] sm:$0xfe] }
 0x268   : > { %v1879_v34 = vrot.slane %v1856_v20, 1  ;;  %v3568_v20 = vld [vmem:[%s17234_s5 + $0x700] sm:$0xff] }
 0x26a   : > { %4184 = vmatmul.mubr.f32.gmra.mrb[62].mxu1 %v12945_v19  ;;  %v10751_v19 = vpack.c.bf16 %v3546_v0, %v3544_v37  ;;  %v1881_v50 = vsel %vm1875_vm4, %v1879_v34, %v1880_v4  ;;  %v3566_v37 = vld [vmem:[%s17234_s5 + $0x6f0] sm:$0xff]  ;;  %v3572_v4 = vld [vmem:[%s17234_s5 + $0x720] sm:$0xff]  ;;  %v3579_v34 = vld [vmem:[%s17234_s5 + $0x758] sm:$0xff] }
 0x26b   : > { %4254 = vmatprep.mubr.f32.mxu1 %v1840_v41  ;;  %v3562_v41 = vld [vmem:[%s17234_s5 + $0x6d0] sm:$0xff] }
 0x26e   : > { %4255 = vmatmul.mubr.f32.vlgmr.msra.gmra.mrb[0].mxu1 %v1839_v1  ;;  %v1889_v1 = vsel %vm1875_vm4, %v1884_v51, %v1888_v16  ;;  %v2171_v51 = vld [vmem:[#allocation2 + $0x118] sm:$0xff] }
 0x26f   : > { %4260 = vmatprep.mubr.f32.mxu1 %v1842_v22  ;;  %10744 = vmatpush1.bf16.msra.mxu1 %v10743_v43  ;;  %v1883_v43 = vsel %vm1875_vm4, %v1877_v44, %v1882_v55  ;;  %v10767_v22 = vpack.c.bf16 %v3562_v41, %v3560_v33  ;;  %v2154_v44 = vld [vmem:[#allocation2 + $0x190] sm:$0xff]  ;;  %v2192_v11 = vrot.slane %v2171_v51, 1 }
 0x270   : > { %10746 = vmatprep.subr.bf16.mxu1 %v10745_v57  ;;  %v1886_v57 = vrot.slane %v1861_v17, 1  ;;  %v2191_v17 = vrot.slane %v2169_v56, 1  ;;  %v3586_v33 = vld [vmem:[%s17234_s5 + $0x790] sm:$0xff] }
 0x271   : > { %v2158_v41 = vld [vmem:[#allocation2 + $0x1b0] sm:$0xff] }
 0x272   : > { %4261 = vmatmul.mubr.f32.gmra.mrb[2].mxu1 %v1841_v6  ;;  %v1887_v0 = vsel %vm1875_vm4, %v1882_v55, %v1886_v57  ;;  %v1890_v6 = vrot.slane %v1863_v14, 1  ;;  %v2159_v55 = vld [vmem:[#allocation2 + $0x1b8] sm:$0xff]  ;;  %v2188_v14 = vrot.slane %v2168_v21, 1 }
 0x273   : > { %4266 = vmatprep.mubr.f32.mxu1 %v1844_v53  ;;  %10748 = vmatpush1.bf16.msra.mxu1 %v10747_v25  ;;  %v10769_v25 = vpack.c.bf16 %v3567_v62, %v3565_v59  ;;  %v1893_v53 = vsel %vm1875_vm4, %v1888_v16, %v1892_v12  ;;  %v3591_v59 = vld [vmem:[%s17234_s5 + $0x7b8] sm:$0xff]  ;;  %v2193_v62 = vsel %vm1875_vm4, %v2191_v17, %v2192_v11  ;;  %v2172_v12 = vld [vmem:[#allocation2 + $0x120] sm:$0xff]  ;;  %v2485_v17 = vld [vmem:[#allocation2 + $0x228] sm:$0xff] }
 0x274   : > { %10750 = vmatprep.subr.bf16.mxu1 %v10749_v35  ;;  %v3564_v35 = vld [vmem:[%s17234_s5 + $0x6e0] sm:$0xff]  ;;  %v1891_v60 = vsel %vm1875_vm4, %v1886_v57, %v1890_v6  ;;  %v3589_v57 = vld [vmem:[%s17234_s5 + $0x7a8] sm:$0xff] }
 0x275   : > { %v10771_v5 = vpack.c.bf16 %v3566_v37, %v3564_v35  ;;  %v10793_v35 = vpack.c.bf16 %v3591_v59, %v3589_v57  ;;  %v3588_v37 = vld [vmem:[%s17234_s5 + $0x7a0] sm:$0xff] }
 0x276   : > { %4267 = vmatmul.mubr.f32.gmra.mrb[4].mxu1 %v1843_v24  ;;  %v3575_v24 = vld [vmem:[%s17234_s5 + $0x738] sm:$0xff]  ;;  %v2484_v57 = vld [vmem:[#allocation2 + $0x220] sm:$0xff] }
 0x277   : > { %4272 = vmatprep.mubr.f32.mxu1 %v1846_v26  ;;  %10752 = vmatpush1.bf16.msra.mxu1 %v10751_v19  ;;  %v10773_v19 = vpack.c.bf16 %v3571_v32, %v3569_v28  ;;  %v10777_v26 = vpack.c.bf16 %v3575_v24, %v3573_v7  ;;  %v2194_v28 = vrot.slane %v2172_v12, 1  ;;  %v3593_v32 = vld [vmem:[%s17234_s5 + $0x7c8] sm:$0xff]  ;;  %v3592_v24 = vld [vmem:[%s17234_s5 + $0x7c0] sm:$0xff]  ;;  %v2506_v12 = vrot.slane %v2484_v57, 1 }
 0x278   : > { %10754 = vmatprep.subr.bf16.mxu1 %v10753_v18  ;;  %v3570_v18 = vld [vmem:[%s17234_s5 + $0x710] sm:$0xff] }
 0x279   : > { %v10775_v2 = vpack.c.bf16 %v3570_v18, %v3568_v20  ;;  %v2174_v20 = vld [vmem:[#allocation2 + $0x130] sm:$0xff]  ;;  %v2177_v18 = vld [vmem:[#allocation2 + $0x148] sm:$0x1] }
 0x27a   : > { %4273 = vmatmul.mubr.f32.gmra.mrb[6].mxu1 %v1845_v42  ;;  %v3578_v42 = vld [vmem:[%s17234_s5 + $0x750] sm:$0xff] }
 0x27b   : > { %4278 = vmatprep.mubr.f32.mxu1 %v1881_v50  ;;  %10756 = vmatpush1.bf16.msra.mxu1 %v10755_v30  ;;  %v3577_v30 = vld [vmem:[%s17234_s5 + $0x748] sm:$0xff]  ;;  %v10783_v54 = vpack.c.bf16 %v3578_v42, %v3576_v40  ;;  %v3598_v40 = vld [vmem:[%s17234_s5 + $0x7f0] sm:$0xff] }
 0x27c   : > { %10758 = vmatprep.subr.bf16.mxu1 %v10757_v38  ;;  %v10779_v38 = vpack.c.bf16 %v3574_v27, %v3572_v4  ;;  %v10781_v39 = vpack.c.bf16 %v3579_v34, %v3577_v30  ;;  %v2157_v50 = vld [vmem:[#allocation2 + $0x1a8] sm:$0xff]  ;;  %v3599_v27 = vld [vmem:[%s17234_s5 + $0x7f8] sm:$0xff]  ;;  %v2204_v30 = vrot.slane %v2177_v18, 1  ;;  %v2176_v34 = vld [vmem:[#allocation2 + $0x140] sm:$0x1] }
 0x27d   : > { %v3597_v4 = vld [vmem:[%s17234_s5 + $0x7e8] sm:$0xff] }
 0x27e   : > { %4279 = vmatmul.mubr.f32.gmra.mrb[8].mxu1 %v1878_v10  ;;  %v3587_v10 = vld [vmem:[%s17234_s5 + $0x798] sm:$0xff]  ;;  %v2777_v18 = vld [vmem:[#allocation2 + $0x388] sm:$0xff] }
 0x27f   : > { %4284 = vmatprep.mubr.f32.mxu1 %v1885_v15  ;;  %10760 = vmatpush1.bf16.msra.mxu1 %v10759_v61  ;;  %v3580_v61 = vld [vmem:[%s17234_s5 + $0x760] sm:$0xff]  ;;  %v2173_v15 = vld [vmem:[#allocation2 + $0x128] sm:$0xff] }
 0x280   : > { %10762 = vmatprep.subr.bf16.mxu1 %v10761_v3  ;;  %v3582_v3 = vld [vmem:[%s17234_s5 + $0x770] sm:$0xff] }
 0x281   : > { %v10787_v16 = vpack.c.bf16 %v3582_v3, %v3580_v61  ;;  %v2464_v61 = vld [vmem:[#allocation2 + $0x280] sm:$0xff]  ;;  %v2467_v3 = vld [vmem:[#allocation2 + $0x298] sm:$0xff] }
 0x282   : > { %4285 = vmatmul.mubr.f32.gmra.mrb[10].mxu1 %v1883_v43  ;;  %v2189_v43 = vrot.slane %v2170_v13, 1  ;;  %v2471_v13 = vld [vmem:[#allocation2 + $0x2b8] sm:$0xff] }
 0x283   : > { %4290 = vmatprep.mubr.f32.mxu1 %v1889_v1  ;;  %10764 = vmatpush1.bf16.msra.mxu1 %v10763_v23  ;;  %v10789_v23 = vpack.c.bf16 %v3587_v10, %v3585_v9  ;;  %v2196_v1 = vrot.slane %v2173_v15, 1  ;;  %v2469_v9 = vld [vmem:[#allocation2 + $0x2a8] sm:$0xff]  ;;  %v2483_v10 = vld [vmem:[#allocation2 + $0x218] sm:$0xff] }
 0x284   : > { %10766 = vmatprep.subr.bf16.mxu1 %v10765_v31  ;;  %v3584_v31 = vld [vmem:[%s17234_s5 + $0x780] sm:$0xff]  ;;  %v2190_v6 = vsel %vm1875_vm4, %v2188_v14, %v2189_v43  ;;  %v2504_v15 = vrot.slane %v2483_v10, 1 }
 0x286   : > { %4291 = vmatmul.mubr.f32.gmra.mrb[12].mxu1 %v1887_v0  ;;  %v3590_v0 = vld [vmem:[%s17234_s5 + $0x7b0] sm:$0xff] }
 0x287   : > { %4296 = vmatprep.mubr.f32.mxu1 %v1893_v53  ;;  %10768 = vmatpush1.bf16.msra.mxu1 %v10767_v22  ;;  %v2175_v22 = vld [vmem:[#allocation2 + $0x138] sm:$0xff] }
 0x288   : > { %10770 = vmatprep.subr.bf16.mxu1 %v10769_v25  ;;  %v10791_v25 = vpack.c.bf16 %v3586_v33, %v3584_v31  ;;  %v3595_v53 = vld [vmem:[%s17234_s5 + $0x7d8] sm:$0xff]  ;;  %v2470_v31 = vld [vmem:[#allocation2 + $0x2b0] sm:$0xff] }
 0x289   : > { %v10797_v7 = vpack.c.bf16 %v3595_v53, %v3593_v32  ;;  %v2488_v32 = vld [vmem:[#allocation2 + $0x240] sm:$0x1] }
 0x28a   : > { %4297 = vmatmul.mubr.f32.gmra.mrb[14].mxu1 %v1891_v60  ;;  %v10795_v60 = vpack.c.bf16 %v3590_v0, %v3588_v37 }
 0x28b   : > { %4302 = vmatprep.mubr.f32.mxu1 %v2153_v63  ;;  %10772 = vmatpush1.bf16.msra.mxu1 %v10771_v5  ;;  %v2197_v5 = vsel %vm1875_vm4, %v2192_v11, %v2196_v1  ;;  %v3594_v63 = vld [vmem:[%s17234_s5 + $0x7d0] sm:$0xff]  ;;  %v2481_v11 = vld [vmem:[#allocation2 + $0x208] sm:$0xfe] }
 0x28c   : > { %10774 = vmatprep.subr.bf16.mxu1 %v10773_v19  ;;  %v2200_v19 = vrot.slane %v2175_v22, 1  ;;  %v2503_v21 = vrot.slane %v2481_v11, 1  ;;  %v2800_v11 = vld [vmem:[#allocation2 + $0x340] sm:$0x1] }
 0x28e   : > { %4303 = vmatmul.mubr.f32.gmra.mrb[16].mxu1 %v2152_v29  ;;  %v2201_v29 = vsel %vm1875_vm4, %v2196_v1, %v2200_v19 }
 0x28f   : > { %4308 = vmatprep.mubr.f32.mxu1 %v2155_v36  ;;  %10776 = vmatpush1.bf16.msra.mxu1 %v10775_v2  ;;  %v2195_v2 = vsel %vm1875_vm4, %v2189_v43, %v2194_v28  ;;  %v10799_v36 = vpack.c.bf16 %v3594_v63, %v3592_v24  ;;  %v2508_v43 = vrot.slane %v2485_v17, 1  ;;  %v2778_v24 = vld [vmem:[#allocation2 + $0x390] sm:$0xff]  ;;  %v2781_v63 = vld [vmem:[#allocation2 + $0x3a8] sm:$0xff]  ;;  %v3600_v17 = vld [vmem:[%s17234_s5 + $0x800] sm:$0xff] }
 0x290   : > { %10778 = vmatprep.subr.bf16.mxu1 %v10777_v26  ;;  %v2198_v26 = vrot.slane %v2174_v20, 1 }
 0x291   : > { %v2509_v14 = vsel %vm1875_vm4, %v2504_v15, %v2508_v43 }
 0x292   : > { %4309 = vmatmul.mubr.f32.gmra.mrb[18].mxu1 %v2154_v44  ;;  %v2199_v42 = vsel %vm1875_vm4, %v2194_v28, %v2198_v26  ;;  %v2202_v44 = vrot.slane %v2176_v34, 1  ;;  %v2797_v34 = vld [vmem:[#allocation2 + $0x328] sm:$0xff] }
 0x293   : > { %4314 = vmatprep.mubr.f32.mxu1 %v2157_v50  ;;  %10780 = vmatpush1.bf16.msra.mxu1 %v10779_v38  ;;  %v10801_v38 = vpack.c.bf16 %v3599_v27, %v3597_v4  ;;  %v2205_v50 = vsel %vm1875_vm4, %v2200_v19, %v2204_v30  ;;  %v2793_v4 = vld [vmem:[#allocation2 + $0x308] sm:$0xfe]  ;;  %v2783_v27 = vld [vmem:[#allocation2 + $0x3b8] sm:$0xff]  ;;  %v2794_v30 = vld [vmem:[#allocation2 + $0x310] sm:$0xff] }
 0x294   : > { %10782 = vmatprep.subr.bf16.mxu1 %v10781_v39  ;;  %v3596_v39 = vld [vmem:[%s17234_s5 + $0x7e0] sm:$0xff]  ;;  %v2203_v56 = vsel %vm1875_vm4, %v2198_v26, %v2202_v44  ;;  %v2820_v44 = vrot.slane %v2797_v34, 1 }
 0x295   : > { %v10803_v51 = vpack.c.bf16 %v3598_v40, %v3596_v39  ;;  %v2780_v26 = vld [vmem:[#allocation2 + $0x3a0] sm:$0xff]  ;;  %v2782_v39 = vld [vmem:[#allocation2 + $0x3b0] sm:$0xff]  ;;  %v2813_v40 = vrot.slane %v2794_v30, 1 }
 0x296   : > { %4315 = vmatmul.mubr.f32.gmra.mrb[20].mxu1 %v2156_v8  ;;  %v2466_v8 = vld [vmem:[#allocation2 + $0x290] sm:$0xff] }
 0x297   : > { %4320 = vmatprep.mubr.f32.mxu1 %v2159_v55  ;;  %10784 = vmatpush1.bf16.msra.mxu1 %v10783_v54  ;;  %v10805_v54 = vpack.c.bf16 %v3603_v48, %v3601_v46  ;;  %v2468_v55 = vld [vmem:[#allocation2 + $0x2a0] sm:$0xff] }
 0x298   : > { %10786 = vmatprep.subr.bf16.mxu1 %v10785_v58  ;;  %v2465_v58 = vld [vmem:[#allocation2 + $0x288] sm:$0xff]  ;;  %v2796_v46 = vld [vmem:[#allocation2 + $0x320] sm:$0xff] }
 0x29a   : > { %4321 = vmatmul.mubr.f32.gmra.mrb[22].mxu1 %v2158_v41  ;;  %v2505_v41 = vsel %vm1875_vm4, %v2503_v21, %v2504_v15  ;;  %v2826_v15 = vrot.slane %v2800_v11, 1  ;;  %v3602_v21 = vld [vmem:[%s17234_s5 + $0x810] sm:$0xff]  ;;  %v3625_v11 = vld [vmem:[%s17234_s5 + $0x8c8] sm:$0xff] }
 0x29b   : > { %4326 = vmatprep.mubr.f32.mxu1 %v2193_v62  ;;  %10788 = vmatpush1.bf16.msra.mxu1 %v10787_v16  ;;  %v2482_v16 = vld [vmem:[#allocation2 + $0x210] sm:$0xff]  ;;  %v2487_v62 = vld [vmem:[#allocation2 + $0x238] sm:$0xff] }
 0x29c   : > { %10790 = vmatprep.subr.bf16.mxu1 %v10789_v23  ;;  %v2480_v23 = vld [vmem:[#allocation2 + $0x200] sm:$0xfe]  ;;  %v2501_v33 = vrot.slane %v2482_v16, 1  ;;  %v2512_v22 = vrot.slane %v2487_v62, 1  ;;  %v3606_v62 = vld [vmem:[%s17234_s5 + $0x830] sm:$0xff] }
 0x29d   : > { %v2500_v59 = vrot.slane %v2480_v23, 1 }
 0x29e   : > { %4327 = vmatmul.mubr.f32.gmra.mrb[24].mxu1 %v2190_v6  ;;  %v2507_v37 = vsel %vm1875_vm4, %v2501_v33, %v2506_v12  ;;  %v2513_v6 = vsel %vm1875_vm4, %v2508_v43, %v2512_v22  ;;  %v10807_v43 = vpack.c.bf16 %v3602_v21, %v3600_v17  ;;  %v1932_v17 = vld [vmem:[#allocation2 + $0x70] sm:$0xff]  ;;  %v1935_v21 = vld [vmem:[#allocation2 + $0x88] sm:$0x1] }
 0x29f   : > { %4332 = vmatprep.mubr.f32.mxu1 %v2197_v5  ;;  %10792 = vmatpush1.bf16.msra.mxu1 %v10791_v25  ;;  %v2502_v1 = vsel %vm1875_vm4, %v2500_v59, %v2501_v33  ;;  %v2486_v25 = vld [vmem:[#allocation2 + $0x230] sm:$0xff]  ;;  %v2514_v5 = vrot.slane %v2488_v32, 1  ;;  %v3607_v33 = vld [vmem:[%s17234_s5 + $0x838] sm:$0xff]  ;;  %v3604_v59 = vld [vmem:[%s17234_s5 + $0x820] sm:$0xff] }
 0x2a0   : > { %10794 = vmatprep.subr.bf16.mxu1 %v10793_v35  ;;  %v2489_v35 = vld [vmem:[#allocation2 + $0x248] sm:$0x1]  ;;  %v2510_v0 = vrot.slane %v2486_v25, 1  ;;  %v10811_v25 = vpack.c.bf16 %v3606_v62, %v3604_v59  ;;  %v3615_v32 = vld [vmem:[%s17234_s5 + $0x878] sm:$0xff] }
 0x2a1   : > { %v2516_v28 = vrot.slane %v2489_v35, 1  ;;  %v3629_v59 = vld [vmem:[%s17234_s5 + $0x8e8] sm:$0xff]  ;;  %v3631_v62 = vld [vmem:[%s17234_s5 + $0x8f8] sm:$0xff] }
 0x2a2   : > { %4333 = vmatmul.mubr.f32.gmra.mrb[26].mxu1 %v2195_v2  ;;  %v2511_v53 = vsel %vm1875_vm4, %v2506_v12, %v2510_v0  ;;  %v2515_v20 = vsel %vm1875_vm4, %v2510_v0, %v2514_v5  ;;  %v2795_v2 = vld [vmem:[#allocation2 + $0x318] sm:$0xff]  ;;  %v3609_v12 = vld [vmem:[%s17234_s5 + $0x848] sm:$0xff]  ;;  %v3610_v0 = vld [vmem:[%s17234_s5 + $0x850] sm:$0xff] }
 0x2a3   : > { %4338 = vmatprep.mubr.f32.mxu1 %v2201_v29  ;;  %10796 = vmatpush1.bf16.msra.mxu1 %v10795_v60  ;;  %v2517_v19 = vsel %vm1875_vm4, %v2512_v22, %v2516_v28  ;;  %v2776_v60 = vld [vmem:[#allocation2 + $0x380] sm:$0xff]  ;;  %v2816_v29 = vrot.slane %v2795_v2, 1  ;;  %v1913_v22 = vld [vmem:[#allocation2 + $0xd8] sm:$0xff]  ;;  %v3613_v28 = vld [vmem:[%s17234_s5 + $0x868] sm:$0xff] }
 0x2a4   : > { %10798 = vmatprep.subr.bf16.mxu1 %v10797_v7  ;;  %v2779_v7 = vld [vmem:[#allocation2 + $0x398] sm:$0xff] }
 0x2a5   : > { %v1929_v5 = vld [vmem:[#allocation2 + $0x58] sm:$0xff] }
 0x2a6   : > { %4339 = vmatmul.mubr.f32.gmra.mrb[28].mxu1 %v2199_v42  ;;  %v3619_v2 = vld [vmem:[%s17234_s5 + $0x898] sm:$0xff] }
 0x2a7   : > { %4344 = vmatprep.mubr.f32.mxu1 %v2205_v50  ;;  %10800 = vmatpush1.bf16.msra.mxu1 %v10799_v36  ;;  %v2815_v36 = vrot.slane %v2793_v4, 1  ;;  %v2799_v50 = vld [vmem:[#allocation2 + $0x338] sm:$0xff]  ;;  %v1950_v4 = vrot.slane %v1929_v5, 1 }
 0x2a8   : > { %10802 = vmatprep.subr.bf16.mxu1 %v10801_v38  ;;  %v2792_v38 = vld [vmem:[#allocation2 + $0x300] sm:$0xfe] }
 0x2a9   : > { %v2817_v42 = vsel %vm1875_vm4, %v2815_v36, %v2816_v29  ;;  %v2812_v48 = vrot.slane %v2792_v38, 1  ;;  %v1926_v36 = vld [vmem:[#allocation2 + $0x40] sm:$0xfe] }
 0x2aa   : > { %4345 = vmatmul.mubr.f32.gmra.mrb[30].mxu1 %v2203_v56  ;;  %v2821_v56 = vsel %vm1875_vm4, %v2816_v29, %v2820_v44  ;;  %v1931_v29 = vld [vmem:[#allocation2 + $0x68] sm:$0xff] }
 0x2ab   : > { %4350 = vmatprep.mubr.f32.mxu1 %v2465_v58  ;;  %10804 = vmatpush1.bf16.msra.mxu1 %v10803_v51  ;;  %v2814_v51 = vsel %vm1875_vm4, %v2812_v48, %v2813_v40  ;;  %v2824_v58 = vrot.slane %v2799_v50, 1  ;;  %v3623_v48 = vld [vmem:[%s17234_s5 + $0x8b8] sm:$0xff] }
 0x2ac   : > { %10806 = vmatprep.subr.bf16.mxu1 %v10805_v54  ;;  %v2818_v54 = vrot.slane %v2796_v46, 1  ;;  %v3621_v46 = vld [vmem:[%s17234_s5 + $0x8a8] sm:$0xff] }
 0x2ad   : > { %v2825_v10 = vsel %vm1875_vm4, %v2820_v44, %v2824_v58 }
 0x2ae   : > { %4351 = vmatmul.mubr.f32.gmra.mrb[32].mxu1 %v2464_v61  ;;  %v2798_v61 = vld [vmem:[#allocation2 + $0x330] sm:$0xff] }
 0x2af   : > { %4356 = vmatprep.mubr.f32.mxu1 %v2467_v3  ;;  %v2801_v3 = vld [vmem:[#allocation2 + $0x348] sm:$0x1] }
 0x2b2   : > { %4357 = vmatmul.mubr.f32.gmra.mrb[34].mxu1 %v2466_v8  ;;  %v2819_v8 = vsel %vm1875_vm4, %v2813_v40, %v2818_v54  ;;  %v3618_v40 = vld [vmem:[%s17234_s5 + $0x890] sm:$0xff] }
 0x2b3   : > { %4362 = vmatprep.mubr.f32.mxu1 %v2469_v9  ;;  %v2822_v9 = vrot.slane %v2798_v61, 1 }
 0x2b5   : > { %v2827_v23 = vsel %vm1875_vm4, %v2822_v9, %v2826_v15 }
 0x2b6   : > { %4363 = vmatmul.mubr.f32.gmra.mrb[36].mxu1 %v2468_v55  ;;  %v2828_v55 = vrot.slane %v2801_v3, 1  ;;  %v10825_v3 = vpack.c.bf16 %v3623_v48, %v3621_v46  ;;  %v2225_v46 = vld [vmem:[#allocation2 + $0x1d8] sm:$0xff] }
 0x2b7   : > { %4368 = vmatprep.mubr.f32.mxu1 %v2471_v13  ;;  %v2823_v13 = vsel %vm1875_vm4, %v2818_v54, %v2822_v9  ;;  %v1930_v54 = vld [vmem:[#allocation2 + $0x60] sm:$0xff]  ;;  %v3622_v9 = vld [vmem:[%s17234_s5 + $0x8b0] sm:$0xff] }
 0x2b8   : > { %v2829_v16 = vsel %vm1875_vm4, %v2824_v58, %v2828_v55  ;;  %v1933_v58 = vld [vmem:[#allocation2 + $0x78] sm:$0xff]  ;;  %v1952_v55 = vrot.slane %v1930_v54, 1  ;;  %v3642_v54 = vld [vmem:[%s17234_s5 + $0x950] sm:$0xff] }
 0x2ba   : > { %4369 = vmatmul.mubr.f32.gmra.mrb[38].mxu1 %v2470_v31  ;;  %v3605_v31 = vld [vmem:[%s17234_s5 + $0x828] sm:$0xff] }
 0x2bb   : > { %4374 = vmatprep.mubr.f32.mxu1 %v2505_v41  ;;  %v1911_v41 = vld [vmem:[#allocation2 + $0xc8] sm:$0xff]  ;;  %v10809_v57 = vpack.c.bf16 %v3607_v33, %v3605_v31  ;;  %v3624_v33 = vld [vmem:[%s17234_s5 + $0x8c0] sm:$0xff] }
 0x2be   : > { %4375 = vmatmul.mubr.f32.gmra.mrb[40].mxu1 %v2502_v1  ;;  %v1910_v1 = vld [vmem:[#allocation2 + $0xc0] sm:$0xff] }
 0x2bf   : > { %4380 = vmatprep.mubr.f32.mxu1 %v2509_v14  ;;  %v3611_v14 = vld [vmem:[%s17234_s5 + $0x858] sm:$0xff] }
 0x2c0   : > { %v10813_v35 = vpack.c.bf16 %v3611_v14, %v3609_v12  ;;  %v1962_v12 = vrot.slane %v1935_v21, 1  ;;  %v1934_v14 = vld [vmem:[#allocation2 + $0x80] sm:$0x1]  ;;  %v2229_v21 = vld [vmem:[#allocation2 + $0x1f8] sm:$0xff] }
 0x2c2   : > { %4381 = vmatmul.mubr.f32.gmra.mrb[42].mxu1 %v2507_v37  ;;  %v3608_v37 = vld [vmem:[%s17234_s5 + $0x840] sm:$0xff] }
 0x2c3   : > { %4386 = vmatprep.mubr.f32.mxu1 %v2513_v6  ;;  %v1912_v6 = vld [vmem:[#allocation2 + $0xd0] sm:$0xff] }
 0x2c6   : > { %4387 = vmatmul.mubr.f32.gmra.mrb[44].mxu1 %v2511_v53  ;;  %v1915_v53 = vld [vmem:[#allocation2 + $0xe8] sm:$0xff] }
 0x2c7   : > { %4392 = vmatprep.mubr.f32.mxu1 %v2517_v19  ;;  %v10815_v19 = vpack.c.bf16 %v3610_v0, %v3608_v37  ;;  %v6037_v37 = vld [vmem:[%s17236_s7] sm:$0xff]  ;;  %v10833_v0 = vpack.c.bf16 %v3631_v62, %v3629_v59 }
 0x2c8   : > { %v3648_v62 = vld [vmem:[%s17234_s5 + $0x980] sm:$0xff] }
 0x2ca   : > { %4393 = vmatmul.mubr.f32.gmra.mrb[46].mxu1 %v2515_v20  ;;  %v1927_v20 = vld [vmem:[#allocation2 + $0x48] sm:$0xfe] }
 0x2cb   : > { %4398 = vmatprep.mubr.f32.mxu1 %v2777_v18  ;;  %v10817_v18 = vpack.c.bf16 %v3615_v32, %v3613_v28  ;;  %v1949_v34 = vrot.slane %v1927_v20, 1  ;;  %v3630_v28 = vld [vmem:[%s17234_s5 + $0x8f0] sm:$0xff]  ;;  %v3633_v20 = vld [vmem:[%s17234_s5 + $0x908] sm:$0xff] }
 0x2cd   : > { %v1951_v50 = vsel %vm1875_vm4, %v1949_v34, %v1950_v4 }
 0x2ce   : > { %4399 = vmatmul.mubr.f32.gmra.mrb[48].mxu1 %v2776_v60  ;;  %v3612_v60 = vld [vmem:[%s17234_s5 + $0x860] sm:$0xff] }
 0x2cf   : > { %4404 = vmatprep.mubr.f32.mxu1 %v2779_v7  ;;  %v3614_v7 = vld [vmem:[%s17234_s5 + $0x870] sm:$0xff] }
 0x2d0   : > { %v10819_v30 = vpack.c.bf16 %v3614_v7, %v3612_v60 }
 0x2d2   : > { %4405 = vmatmul.mubr.f32.gmra.mrb[50].mxu1 %v2778_v24  ;;  %v1914_v24 = vld [vmem:[#allocation2 + $0xe0] sm:$0xff] }
 0x2d3   : > { %4410 = vmatprep.mubr.f32.mxu1 %v2781_v63  ;;  %v3617_v63 = vld [vmem:[%s17234_s5 + $0x888] sm:$0xff] }
 0x2d4   : > { %v10821_v38 = vpack.c.bf16 %v3619_v2, %v3617_v63  ;;  %v3632_v2 = vld [vmem:[%s17234_s5 + $0x900] sm:$0xff] }
 0x2d6   : > { %4411 = vmatmul.mubr.f32.gmra.mrb[52].mxu1 %v2780_v26  ;;  %v1917_v26 = vld [vmem:[#allocation2 + $0xf8] sm:$0xff] }
 0x2d7   : > { %4416 = vmatprep.mubr.f32.mxu1 %v2783_v27  ;;  %v1928_v27 = vld [vmem:[#allocation2 + $0x50] sm:$0xff] }
 0x2d8   : > { %v1947_v44 = vrot.slane %v1928_v27, 1  ;;  %v3637_v27 = vld [vmem:[%s17234_s5 + $0x928] sm:$0xff] }
 0x2da   : > { %4417 = vmatmul.mubr.f32.gmra.mrb[54].mxu1 %v2782_v39  ;;  %v3616_v39 = vld [vmem:[%s17234_s5 + $0x880] sm:$0xff] }
 0x2db   : > { %4422 = vmatprep.mubr.f32.mxu1 %v2817_v42  ;;  %v1916_v42 = vld [vmem:[#allocation2 + $0xf0] sm:$0xff]  ;;  %v10823_v61 = vpack.c.bf16 %v3618_v40, %v3616_v39  ;;  %v2222_v40 = vld [vmem:[#allocation2 + $0x1c0] sm:$0xff] }
 0x2dc   : > { %v3638_v39 = vld [vmem:[%s17234_s5 + $0x930] sm:$0xff] }
 0x2de   : > { %4423 = vmatmul.mubr.f32.gmra.mrb[56].mxu1 %v2814_v51  ;;  %v1954_v51 = vrot.slane %v1931_v29, 1  ;;  %v3639_v29 = vld [vmem:[%s17234_s5 + $0x938] sm:$0xff] }
 0x2df   : > { %4428 = vmatprep.mubr.f32.mxu1 %v2821_v56  ;;  %v1946_v56 = vrot.slane %v1926_v36, 1  ;;  %v10841_v36 = vpack.c.bf16 %v3639_v29, %v3637_v27  ;;  %v3656_v29 = vld [vmem:[%s17234_s5 + $0x9c0] sm:$0xff] }
 0x2e0   : > { %v1955_v15 = vsel %vm1875_vm4, %v1950_v4, %v1954_v51 }
 0x2e2   : > { %4429 = vmatmul.mubr.f32.gmra.mrb[58].mxu1 %v2819_v8  ;;  %v3620_v8 = vld [vmem:[%s17234_s5 + $0x8a0] sm:$0xff] }
 0x2e3   : > { %4434 = vmatprep.mubr.f32.mxu1 %v2825_v10  ;;  %v1948_v10 = vsel %vm1875_vm4, %v1946_v56, %v1947_v44  ;;  %v2224_v56 = vld [vmem:[#allocation2 + $0x1d0] sm:$0xff] }
 0x2e6   : > { %4435 = vmatmul.mubr.f32.gmra.mrb[60].mxu1 %v2823_v13  ;;  %v3627_v13 = vld [vmem:[%s17234_s5 + $0x8d8] sm:$0xff] }
 0x2e7   : > { %4440 = vmatprep.mubr.f32.mxu1 %v2829_v16  ;;  %v1958_v16 = vrot.slane %v1933_v58, 1  ;;  %v10829_v31 = vpack.c.bf16 %v3627_v13, %v3625_v11  ;;  %v3645_v58 = vld [vmem:[%s17234_s5 + $0x968] sm:$0xff]  ;;  %v3644_v11 = vld [vmem:[%s17234_s5 + $0x960] sm:$0xff]  ;;  %v3646_v13 = vld [vmem:[%s17234_s5 + $0x970] sm:$0xff] }
 0x2e9   : > { %v1963_v7 = vsel %vm1875_vm4, %v1958_v16, %v1962_v12  ;;  %v2228_v12 = vld [vmem:[#allocation2 + $0x1f0] sm:$0xff] }
 0x2ea   : > { %4441 = vmatmul.mubr.f32.gmra.mrb[62].mxu1 %v2827_v23  ;;  %v10827_v23 = vpack.c.bf16 %v3622_v9, %v3620_v8  ;;  %v2241_v8 = vld [vmem:[#allocation2 + $0x158] sm:$0xff] }
 0x2eb   : > { %4511 = vmatprep.mubr.f32.mxu1 %v1911_v41  ;;  %v3626_v41 = vld [vmem:[%s17234_s5 + $0x8d0] sm:$0xff] }
 0x2ee   : > { %4512 = vmatmul.mubr.f32.vlgmr.msra.gmra.mrb[0].mxu1 %v1910_v1  ;;  %v1959_v1 = vsel %vm1875_vm4, %v1954_v51, %v1958_v16  ;;  %v3640_v51 = vld [vmem:[%s17234_s5 + $0x940] sm:$0xff]  ;;  %v3649_v16 = vld [vmem:[%s17234_s5 + $0x988] sm:$0xff] }
 0x2ef   : > { %4517 = vmatprep.mubr.f32.mxu1 %v1913_v22  ;;  %10808 = vmatpush1.bf16.msra.mxu1 %v10807_v43  ;;  %v1953_v43 = vsel %vm1875_vm4, %v1947_v44, %v1952_v55  ;;  %v10831_v22 = vpack.c.bf16 %v3626_v41, %v3624_v33  ;;  %v3643_v44 = vld [vmem:[%s17234_s5 + $0x958] sm:$0xff]  ;;  %v10847_v9 = vpack.c.bf16 %v3642_v54, %v3640_v51  ;;  %v2243_v33 = vld [vmem:[#allocation2 + $0x168] sm:$0xff]  ;;  %v6039_v51 = vld [vmem:[%s17236_s7 + $0x10] sm:$0xff] }
 0x2f0   : > { %10810 = vmatprep.subr.bf16.mxu1 %v10809_v57  ;;  %v1956_v57 = vrot.slane %v1932_v17, 1  ;;  %v3651_v17 = vld [vmem:[%s17234_s5 + $0x998] sm:$0xff]  ;;  %v10851_v41 = vpack.c.bf16 %v3646_v13, %v3644_v11 }
 0x2f1   : > { %v10853_v59 = vpack.c.bf16 %v3651_v17, %v3649_v16  ;;  %v2534_v16 = vld [vmem:[#allocation2 + $0x2c0] sm:$0xff]  ;;  %v2537_v17 = vld [vmem:[#allocation2 + $0x2d8] sm:$0xff] }
 0x2f2   : > { %4518 = vmatmul.mubr.f32.gmra.mrb[2].mxu1 %v1912_v6  ;;  %v3628_v6 = vld [vmem:[%s17234_s5 + $0x8e0] sm:$0xff]  ;;  %v1957_v5 = vsel %vm1875_vm4, %v1952_v55, %v1956_v57 }
 0x2f3   : > { %4523 = vmatprep.mubr.f32.mxu1 %v1915_v53  ;;  %10812 = vmatpush1.bf16.msra.mxu1 %v10811_v25  ;;  %v6053_v25 = vld [vmem:[%s17236_s7 + $0x80] sm:$0xff]  ;;  %v6038_v53 = vld [vmem:[%s17236_s7 + $0x8] sm:$0xff] }
 0x2f4   : > { %10814 = vmatprep.subr.bf16.mxu1 %v10813_v35  ;;  %v6054_v35 = vld [vmem:[%s17236_s7 + $0x88] sm:$0xff]  ;;  %v10871_v60 = vpack.c.bf16 %v6038_v53, %v6037_v37  ;;  %v2266_v37 = vrot.slane %v2243_v33, 1  ;;  %v2538_v33 = vld [vmem:[#allocation2 + $0x2e0] sm:$0xff] }
 0x2f5   : > { %v10869_v32 = vpack.c.bf16 %v6054_v35, %v6053_v25  ;;  %v3655_v25 = vld [vmem:[%s17234_s5 + $0x9b8] sm:$0xff] }
 0x2f6   : > { %4524 = vmatmul.mubr.f32.gmra.mrb[4].mxu1 %v1914_v24  ;;  %v10835_v24 = vpack.c.bf16 %v3630_v28, %v3628_v6  ;;  %v2245_v28 = vld [vmem:[#allocation2 + $0x178] sm:$0xff] }
 0x2f7   : > { %4529 = vmatprep.mubr.f32.mxu1 %v1917_v26  ;;  %10816 = vmatpush1.bf16.msra.mxu1 %v10815_v19  ;;  %v1960_v19 = vrot.slane %v1934_v14, 1  ;;  %v3634_v26 = vld [vmem:[%s17234_s5 + $0x910] sm:$0xff] }
 0x2f8   : > { %10818 = vmatprep.subr.bf16.mxu1 %v10817_v18  ;;  %v3635_v18 = vld [vmem:[%s17234_s5 + $0x918] sm:$0xff]  ;;  %10870 = vmatprep.subr.bf16.mxu0 %v10869_v32  ;;  %v10839_v34 = vpack.c.bf16 %v3634_v26, %v3632_v2  ;;  %v2244_v2 = vld [vmem:[#allocation2 + $0x170] sm:$0xff]  ;;  %v2247_v26 = vld [vmem:[#allocation2 + $0x188] sm:$0x1] }
 0x2f9   : > { %v10837_v63 = vpack.c.bf16 %v3635_v18, %v3633_v20  ;;  %10872 = vmatpush3.bf16.msra.mxu0 %v10871_v60  ;;  %v1961_v4 = vsel %vm1875_vm4, %v1956_v57, %v1960_v19  ;;  %v2238_v57 = vld [vmem:[#allocation2 + $0x140] sm:$0xfe]  ;;  %v3654_v19 = vld [vmem:[%s17234_s5 + $0x9b0] sm:$0xff]  ;;  %v3657_v60 = vld [vmem:[%s17234_s5 + $0x9c8] sm:$0xff] }
 0x2fa   : > { %4530 = vmatmul.mubr.f32.gmra.mrb[6].mxu1 %v1916_v42  ;;  %v3641_v42 = vld [vmem:[%s17234_s5 + $0x948] sm:$0xff]  ;;  %v2258_v6 = vrot.slane %v2238_v57, 1 }
 0x2fb   : > { %4535 = vmatprep.mubr.f32.mxu1 %v1951_v50  ;;  %10820 = vmatpush1.bf16.msra.mxu1 %v10819_v30  ;;  %v2223_v30 = vld [vmem:[#allocation2 + $0x1c8] sm:$0xff]  ;;  %v10845_v50 = vpack.c.bf16 %v3643_v44, %v3641_v42  ;;  %v2274_v42 = vrot.slane %v2247_v26, 1  ;;  %v2246_v44 = vld [vmem:[#allocation2 + $0x180] sm:$0x1] }
 0x2fc   : > { %10822 = vmatprep.subr.bf16.mxu1 %v10821_v38  ;;  %v3636_v38 = vld [vmem:[%s17234_s5 + $0x920] sm:$0xff]  ;;  %v6058_v26 = vld [vmem:[%s17236_s7 + $0xa8] sm:$0xff] }
 0x2fd   : > { %v10843_v48 = vpack.c.bf16 %v3638_v39, %v3636_v38  ;;  %v3661_v38 = vld [vmem:[%s17234_s5 + $0x9e8] sm:$0xff]  ;;  %v3663_v39 = vld [vmem:[%s17234_s5 + $0x9f8] sm:$0xff] }
 0x2fe   : > { %4536 = vmatmul.mubr.f32.gmra.mrb[8].mxu1 %v1948_v10  ;;  %v2239_v10 = vld [vmem:[#allocation2 + $0x148] sm:$0xfe]  ;;  %v10865_v54 = vpack.c.bf16 %v3663_v39, %v3661_v38 }
 0x2ff   : > { %4541 = vmatprep.mubr.f32.mxu1 %v1955_v15  ;;  %10824 = vmatpush1.bf16.msra.mxu1 %v10823_v61  ;;  %v3647_v61 = vld [vmem:[%s17234_s5 + $0x978] sm:$0xff]  ;;  %v2226_v15 = vld [vmem:[#allocation2 + $0x1e0] sm:$0xff] }
 0x300   : > { %10826 = vmatprep.subr.bf16.mxu1 %v10825_v3  ;;  %v2227_v3 = vld [vmem:[#allocation2 + $0x1e8] sm:$0xff]  ;;  %v10849_v55 = vpack.c.bf16 %v3647_v61, %v3645_v58  ;;  %v3662_v58 = vld [vmem:[%s17234_s5 + $0x9f0] sm:$0xff] }
 0x302   : > { %4542 = vmatmul.mubr.f32.gmra.mrb[10].mxu1 %v1953_v43  ;;  %v2261_v43 = vrot.slane %v2239_v10, 1 }
 0x303   : > { %4547 = vmatprep.mubr.f32.mxu1 %v1959_v1  ;;  %10828 = vmatpush1.bf16.msra.mxu1 %v10827_v23  ;;  %v2262_v23 = vrot.slane %v2241_v8, 1  ;;  %v3650_v1 = vld [vmem:[%s17234_s5 + $0x990] sm:$0xff] }
 0x304   : > { %10830 = vmatprep.subr.bf16.mxu1 %v10829_v31  ;;  %v2240_v31 = vld [vmem:[#allocation2 + $0x150] sm:$0xff]  ;;  %v10855_v32 = vpack.c.bf16 %v3650_v1, %v3648_v62  ;;  %v2555_v62 = vld [vmem:[#allocation2 + $0x268] sm:$0xff] }
 0x305   : > { %v2259_v14 = vrot.slane %v2240_v31, 1  ;;  %v2263_v35 = vsel %vm1875_vm4, %v2261_v43, %v2262_v23  ;;  %v2553_v31 = vld [vmem:[#allocation2 + $0x258] sm:$0xff] }
 0x306   : > { %4548 = vmatmul.mubr.f32.gmra.mrb[12].mxu1 %v1957_v5  ;;  %v3652_v5 = vld [vmem:[%s17234_s5 + $0x9a0] sm:$0xff]  ;;  %v2541_v43 = vld [vmem:[#allocation2 + $0x2f8] sm:$0xff]  ;;  %v2574_v57 = vrot.slane %v2553_v31, 1 }
 0x307   : > { %4553 = vmatprep.mubr.f32.mxu1 %v1963_v7  ;;  %10832 = vmatpush1.bf16.msra.mxu1 %v10831_v22  ;;  %v3653_v22 = vld [vmem:[%s17234_s5 + $0x9a8] sm:$0xff]  ;;  %v2260_v20 = vsel %vm1875_vm4, %v2258_v6, %v2259_v14  ;;  %v3659_v7 = vld [vmem:[%s17234_s5 + $0x9d8] sm:$0xff] }
 0x308   : > { %10834 = vmatprep.subr.bf16.mxu1 %v10833_v0  ;;  %v2242_v0 = vld [vmem:[#allocation2 + $0x160] sm:$0xff]  ;;  %v10857_v53 = vpack.c.bf16 %v3655_v25, %v3653_v22  ;;  %v10861_v27 = vpack.c.bf16 %v3659_v7, %v3657_v60  ;;  %v2557_v6 = vld [vmem:[#allocation2 + $0x278] sm:$0xff] }
 0x309   : > { %v2264_v18 = vrot.slane %v2242_v0, 1 }
 0x30a   : > { %4554 = vmatmul.mubr.f32.gmra.mrb[14].mxu1 %v1961_v4  ;;  %v10859_v4 = vpack.c.bf16 %v3654_v19, %v3652_v5  ;;  %v2582_v5 = vrot.slane %v2557_v6, 1  ;;  %v2556_v19 = vld [vmem:[#allocation2 + $0x270] sm:$0xff] }
 0x30b   : > { %4559 = vmatprep.mubr.f32.mxu1 %v2223_v30  ;;  %10836 = vmatpush1.bf16.msra.mxu1 %v10835_v24  ;;  %v2267_v24 = vsel %vm1875_vm4, %v2262_v23, %v2266_v37  ;;  %v3658_v30 = vld [vmem:[%s17234_s5 + $0x9d0] sm:$0xff]  ;;  %v2539_v23 = vld [vmem:[#allocation2 + $0x2e8] sm:$0xff]  ;;  %v2580_v60 = vrot.slane %v2556_v19, 1 }
 0x30c   : > { %10838 = vmatprep.subr.bf16.mxu1 %v10837_v63  ;;  %v2270_v63 = vrot.slane %v2245_v28, 1 }
 0x30e   : > { %4560 = vmatmul.mubr.f32.gmra.mrb[16].mxu1 %v2222_v40  ;;  %v2271_v40 = vsel %vm1875_vm4, %v2266_v37, %v2270_v63  ;;  %v2554_v37 = vld [vmem:[#allocation2 + $0x260] sm:$0xff] }
 0x30f   : > { %4565 = vmatprep.mubr.f32.mxu1 %v2225_v46  ;;  %10840 = vmatpush1.bf16.msra.mxu1 %v10839_v34  ;;  %v2265_v34 = vsel %vm1875_vm4, %v2259_v14, %v2264_v18  ;;  %v10863_v46 = vpack.c.bf16 %v3658_v30, %v3656_v29  ;;  %v2540_v14 = vld [vmem:[#allocation2 + $0x2f0] sm:$0xff]  ;;  %v6042_v29 = vld [vmem:[%s17236_s7 + $0x28] sm:$0xff] }
 0x310   : > { %10842 = vmatprep.subr.bf16.mxu1 %v10841_v36  ;;  %v2268_v36 = vrot.slane %v2244_v2, 1  ;;  %v6057_v2 = vld [vmem:[%s17236_s7 + $0xa0] sm:$0xff] }
 0x312   : > { %4566 = vmatmul.mubr.f32.gmra.mrb[18].mxu1 %v2224_v56  ;;  %v3660_v56 = vld [vmem:[%s17234_s5 + $0x9e0] sm:$0xff]  ;;  %v2269_v8 = vsel %vm1875_vm4, %v2264_v18, %v2268_v36 }
 0x313   : > { %4571 = vmatprep.mubr.f32.mxu1 %v2227_v3  ;;  %10844 = vmatpush1.bf16.msra.mxu1 %v10843_v48  ;;  %v6055_v48 = vld [vmem:[%s17236_s7 + $0x90] sm:$0xff]  ;;  %v6040_v3 = vld [vmem:[%s17236_s7 + $0x18] sm:$0xff]  ;;  %v10867_v11 = vpack.c.bf16 %v3662_v58, %v3660_v56 }
 0x314   : > { %10846 = vmatprep.subr.bf16.mxu1 %v10845_v50  ;;  %v6056_v50 = vld [vmem:[%s17236_s7 + $0x98] sm:$0xff]  ;;  %v10875_v10 = vpack.c.bf16 %v6040_v3, %v6039_v51  ;;  %v2850_v51 = vld [vmem:[#allocation2 + $0x3e0] sm:$0xff]  ;;  %v2867_v3 = vld [vmem:[#allocation2 + $0x368] sm:$0xff] }
 0x315   : > { %v10873_v61 = vpack.c.bf16 %v6056_v50, %v6055_v48  ;;  %v2851_v48 = vld [vmem:[#allocation2 + $0x3e8] sm:$0xff]  ;;  %v2865_v50 = vld [vmem:[#allocation2 + $0x358] sm:$0xff] }
 0x316   : > { %4572 = vmatmul.mubr.f32.gmra.mrb[20].mxu1 %v2226_v15  ;;  %v2535_v15 = vld [vmem:[#allocation2 + $0x2c8] sm:$0xff]  ;;  %v2853_v56 = vld [vmem:[#allocation2 + $0x3f8] sm:$0xff]  ;;  %v2886_v58 = vrot.slane %v2865_v50, 1 }
 0x317   : > { %4577 = vmatprep.mubr.f32.mxu1 %v2229_v21  ;;  %10848 = vmatpush1.bf16.msra.mxu1 %v10847_v9  ;;  %v2272_v9 = vrot.slane %v2246_v44, 1  ;;  %v2536_v21 = vld [vmem:[#allocation2 + $0x2d0] sm:$0xff]  ;;  %v2849_v44 = vld [vmem:[#allocation2 + $0x3d8] sm:$0xff] }
 0x318   : > { %10850 = vmatprep.subr.bf16.mxu1 %v10849_v55  ;;  %v2275_v55 = vsel %vm1875_vm4, %v2270_v63, %v2274_v42  ;;  %10874 = vmatprep.subr.bf16.mxu0 %v10873_v61  ;;  %v2558_v63 = vld [vmem:[#allocation2 + $0x280] sm:$0x1]  ;;  %v2864_v61 = vld [vmem:[#allocation2 + $0x350] sm:$0xff]  ;;  %v6048_v50 = vld [vmem:[%s17236_s7 + $0x58] sm:$0xff] }
 0x319   : > { %10876 = vmatpush3.bf16.msra.mxu0 %v10875_v10  ;;  %v2273_v13 = vsel %vm1875_vm4, %v2268_v36, %v2272_v9  ;;  %v2846_v42 = vld [vmem:[#allocation2 + $0x3c0] sm:$0xff]  ;;  %v2852_v10 = vld [vmem:[#allocation2 + $0x3f0] sm:$0xff] }
 0x31a   : > { %4578 = vmatmul.mubr.f32.gmra.mrb[22].mxu1 %v2228_v12  ;;  %v2550_v12 = vld [vmem:[#allocation2 + $0x240] sm:$0xfe] }
 0x31b   : > { %4583 = vmatprep.mubr.f32.mxu1 %v2263_v35  ;;  %10852 = vmatpush1.bf16.msra.mxu1 %v10851_v41  ;;  %v2551_v41 = vld [vmem:[#allocation2 + $0x248] sm:$0xfe]  ;;  %v2578_v35 = vrot.slane %v2555_v62, 1  ;;  %v2570_v0 = vrot.slane %v2550_v12, 1  ;;  %v2862_v9 = vld [vmem:[#allocation2 + $0x340] sm:$0xfe] }
 0x31c   : > { %10854 = vmatprep.subr.bf16.mxu1 %v10853_v59  ;;  %v2552_v59 = vld [vmem:[#allocation2 + $0x250] sm:$0xff]  ;;  %v2573_v1 = vrot.slane %v2551_v41, 1  ;;  %v2870_v12 = vld [vmem:[#allocation2 + $0x380] sm:$0x1] }
 0x31d   : > { %v2571_v22 = vrot.slane %v2552_v59, 1  ;;  %v2583_v7 = vsel %vm1875_vm4, %v2578_v35, %v2582_v5  ;;  %v2868_v41 = vld [vmem:[#allocation2 + $0x370] sm:$0xff] }
 0x31e   : > { %4584 = vmatmul.mubr.f32.gmra.mrb[24].mxu1 %v2260_v20  ;;  %v2575_v25 = vsel %vm1875_vm4, %v2573_v1, %v2574_v57  ;;  %v2559_v20 = vld [vmem:[#allocation2 + $0x288] sm:$0x1]  ;;  %v2892_v59 = vrot.slane %v2868_v41, 1 }
 0x31f   : > { %4589 = vmatprep.mubr.f32.mxu1 %v2267_v24  ;;  %10856 = vmatpush1.bf16.msra.mxu1 %v10855_v32  ;;  %v2572_v28 = vsel %vm1875_vm4, %v2570_v0, %v2571_v22  ;;  %v2576_v32 = vrot.slane %v2554_v37, 1  ;;  %v2586_v24 = vrot.slane %v2559_v20, 1  ;;  %v6044_v0 = vld [vmem:[%s17236_s7 + $0x38] sm:$0xff]  ;;  %v1982_v20 = vld [vmem:[#allocation2 + $0x10] sm:$0xff]  ;;  %v2039_v41 = vld [vmem:[#allocation2 + $0xa8] sm:$0xff] }
 0x320   : > { %10858 = vmatprep.subr.bf16.mxu1 %v10857_v53  ;;  %v2579_v53 = vsel %vm1875_vm4, %v2574_v57, %v2578_v35  ;;  %v6043_v35 = vld [vmem:[%s17236_s7 + $0x30] sm:$0xff] }
 0x321   : > { %v2577_v18 = vsel %vm1875_vm4, %v2571_v22, %v2576_v32  ;;  %v2581_v30 = vsel %vm1875_vm4, %v2576_v32, %v2580_v60  ;;  %v2587_v38 = vsel %vm1875_vm4, %v2582_v5, %v2586_v24  ;;  %v6059_v22 = vld [vmem:[%s17236_s7 + $0xb0] sm:$0xff]  ;;  %v1981_v32 = vld [vmem:[#allocation2 + $0x8] sm:$0xfe] }
 0x322   : > { %4590 = vmatmul.mubr.f32.gmra.mrb[26].mxu1 %v2265_v34  ;;  %v2584_v34 = vrot.slane %v2558_v63, 1  ;;  %v2001_v63 = vrot.slane %v1982_v20, 1 }
 0x323   : > { %4595 = vmatprep.mubr.f32.mxu1 %v2271_v40  ;;  %10860 = vmatpush1.bf16.msra.mxu1 %v10859_v4  ;;  %v6041_v4 = vld [vmem:[%s17236_s7 + $0x20] sm:$0xff]  ;;  %v2847_v40 = vld [vmem:[#allocation2 + $0x3c8] sm:$0xff] }
 0x324   : > { %10862 = vmatprep.subr.bf16.mxu1 %v10861_v27  ;;  %v10877_v27 = vpack.c.bf16 %v6058_v26, %v6057_v2  ;;  %v10879_v36 = vpack.c.bf16 %v6042_v29, %v6041_v4  ;;  %v2585_v39 = vsel %vm1875_vm4, %v2580_v60, %v2584_v34  ;;  %v2003_v60 = vrot.slane %v1981_v32, 1  ;;  %v1984_v2 = vld [vmem:[#allocation2 + $0x20] sm:$0xff]  ;;  %v1987_v26 = vld [vmem:[#allocation2 + $0x38] sm:$0xff]  ;;  %v2043_v32 = vld [vmem:[#allocation2 + $0xc8] sm:$0x1] }
 0x325   : > { %v6061_v29 = vld [vmem:[%s17236_s7 + $0xc0] sm:$0xff]  ;;  %v2070_v20 = vrot.slane %v2043_v32, 1 }
 0x326   : > { %4596 = vmatmul.mubr.f32.gmra.mrb[28].mxu1 %v2269_v8  ;;  %10878 = vmatprep.subr.bf16.mxu0 %v10877_v27  ;;  %v6045_v34 = vld [vmem:[%s17236_s7 + $0x40] sm:$0xff] }
 0x327   : > { %4601 = vmatprep.mubr.f32.mxu1 %v2275_v55  ;;  %10864 = vmatpush1.bf16.msra.mxu1 %v10863_v46  ;;  %v2848_v46 = vld [vmem:[#allocation2 + $0x3d0] sm:$0xff]  ;;  %v2883_v55 = vrot.slane %v2864_v61, 1 }
 0x328   : > { %10866 = vmatprep.subr.bf16.mxu1 %v10865_v54  ;;  %10880 = vmatpush3.bf16.msra.mxu0 %v10879_v36  ;;  %v2863_v54 = vld [vmem:[#allocation2 + $0x348] sm:$0xfe]  ;;  %v1986_v61 = vld [vmem:[#allocation2 + $0x30] sm:$0xff] }
 0x329   : > { %v2885_v8 = vrot.slane %v2863_v54, 1  ;;  %v2006_v54 = vrot.slane %v1984_v2, 1 }
 0x32a   : > { %4602 = vmatmul.mubr.f32.gmra.mrb[30].mxu1 %v2273_v13  ;;  %v2890_v13 = vrot.slane %v2867_v3, 1 }
 0x32b   : > { %4607 = vmatprep.mubr.f32.mxu1 %v2535_v15  ;;  %10868 = vmatpush1.bf16.msra.mxu1 %v10867_v11  ;;  %v2887_v11 = vsel %vm1875_vm4, %v2885_v8, %v2886_v58  ;;  %v2866_v15 = vld [vmem:[#allocation2 + $0x360] sm:$0xff]  ;;  %v1989_v8 = vld [vmem:[#allocation2 + $0x48] sm:$0x1] }
 0x32c   : > { %v2891_v31 = vsel %vm1875_vm4, %v2886_v58, %v2890_v13  ;;  %v2012_v58 = vrot.slane %v1987_v26, 1 }
 0x32e   : > { %4608 = vmatmul.mubr.f32.gmra.mrb[32].mxu1 %v2534_v16  ;;  %v2882_v16 = vrot.slane %v2862_v9, 1  ;;  %v2007_v9 = vsel %vm1875_vm4, %v2001_v63, %v2006_v54 }
 0x32f   : > { %4613 = vmatprep.mubr.f32.mxu1 %v2537_v17  ;;  %v2869_v17 = vld [vmem:[#allocation2 + $0x378] sm:$0xff] }
 0x332   : > { %4614 = vmatmul.mubr.f32.gmra.mrb[34].mxu1 %v2536_v21  ;;  %v2884_v21 = vsel %vm1875_vm4, %v2882_v16, %v2883_v55 }
 0x333   : > { %4619 = vmatprep.mubr.f32.mxu1 %v2539_v23  ;;  %v2888_v23 = vrot.slane %v2866_v15, 1  ;;  %v2037_v15 = vld [vmem:[#allocation2 + $0x98] sm:$0xff] }
 0x335   : > { %v2889_v57 = vsel %vm1875_vm4, %v2883_v55, %v2888_v23  ;;  %v2893_v6 = vsel %vm1875_vm4, %v2888_v23, %v2892_v59 }
 0x336   : > { %4620 = vmatmul.mubr.f32.gmra.mrb[36].mxu1 %v2538_v33  ;;  %v2894_v33 = vrot.slane %v2869_v17, 1 }
 0x337   : > { %4625 = vmatprep.mubr.f32.mxu1 %v2541_v43  ;;  %v2871_v43 = vld [vmem:[#allocation2 + $0x388] sm:$0x1] }
 0x338   : > { %v2895_v62 = vsel %vm1875_vm4, %v2890_v13, %v2894_v33  ;;  %v2898_v1 = vrot.slane %v2871_v43, 1  ;;  %v1988_v13 = vld [vmem:[#allocation2 + $0x40] sm:$0x1] }
 0x339   : > { %v2014_v17 = vrot.slane %v1988_v13, 1  ;;  %v2347_v13 = vld [vmem:[#allocation2 + $0x188] sm:$0xfe] }
 0x33a   : > { %4626 = vmatmul.mubr.f32.gmra.mrb[38].mxu1 %v2540_v14  ;;  %v1983_v14 = vld [vmem:[#allocation2 + $0x18] sm:$0xff]  ;;  %v2899_v5 = vsel %vm1875_vm4, %v2894_v33, %v2898_v1  ;;  %v2036_v33 = vld [vmem:[#allocation2 + $0x90] sm:$0xff] }
 0x33b   : > { %4631 = vmatprep.mubr.f32.mxu1 %v2575_v25  ;;  %v6060_v25 = vld [vmem:[%s17236_s7 + $0xb8] sm:$0xff]  ;;  %v2004_v19 = vrot.slane %v1983_v14, 1  ;;  %v2038_v14 = vld [vmem:[#allocation2 + $0xa0] sm:$0xff] }
 0x33c   : > { %v10881_v37 = vpack.c.bf16 %v6060_v25, %v6059_v22  ;;  %v2041_v25 = vld [vmem:[#allocation2 + $0xb8] sm:$0xff] }
 0x33d   : > { %v2005_v4 = vsel %vm1875_vm4, %v2003_v60, %v2004_v19  ;;  %v2295_v60 = vld [vmem:[#allocation2 + $0x118] sm:$0xff] }
 0x33e   : > { %4632 = vmatmul.mubr.f32.gmra.mrb[40].mxu1 %v2572_v28  ;;  %v2896_v28 = vrot.slane %v2870_v12, 1  ;;  %10882 = vmatprep.subr.bf16.mxu0 %v10881_v37  ;;  %v2062_v12 = vrot.slane %v2039_v41, 1  ;;  %v2060_v37 = vrot.slane %v2038_v14, 1  ;;  %v2316_v26 = vrot.slane %v2295_v60, 1 }
 0x33f   : > { %4637 = vmatprep.mubr.f32.mxu1 %v2579_v53  ;;  %v10883_v53 = vpack.c.bf16 %v6044_v0, %v6043_v35 }
 0x340   : > { %v2897_v24 = vsel %vm1875_vm4, %v2892_v59, %v2896_v28  ;;  %v2040_v28 = vld [vmem:[#allocation2 + $0xb0] sm:$0xff] }
 0x341   : > { %10884 = vmatpush3.bf16.msra.mxu0 %v10883_v53 }
 0x342   : > { %4638 = vmatmul.mubr.f32.gmra.mrb[42].mxu1 %v2577_v18  ;;  %v1985_v18 = vld [vmem:[#allocation2 + $0x28] sm:$0xff] }
 0x343   : > { %4643 = vmatprep.mubr.f32.mxu1 %v2583_v7  ;;  %v1980_v7 = vld [vmem:[#allocation2] sm:$0xfe]  ;;  %v2008_v27 = vrot.slane %v1985_v18, 1  ;;  %v2042_v18 = vld [vmem:[#allocation2 + $0xc0] sm:$0x1] }
 0x344   : > { %v2000_v36 = vrot.slane %v1980_v7, 1 }
 0x345   : > { %v2013_v55 = vsel %vm1875_vm4, %v2008_v27, %v2012_v58 }
 0x346   : > { %4644 = vmatmul.mubr.f32.gmra.mrb[44].mxu1 %v2581_v30  ;;  %v6062_v30 = vld [vmem:[%s17236_s7 + $0xc8] sm:$0xff] }
 0x347   : > { %4649 = vmatprep.mubr.f32.mxu1 %v2587_v38  ;;  %v10885_v38 = vpack.c.bf16 %v6062_v30, %v6061_v29  ;;  %v2292_v30 = vld [vmem:[#allocation2 + $0x100] sm:$0xfe] }
 0x349   : > { %10886 = vmatprep.subr.bf16.mxu0 %v10885_v38 }
 0x34a   : > { %4650 = vmatmul.mubr.f32.gmra.mrb[46].mxu1 %v2585_v39  ;;  %v6046_v39 = vld [vmem:[%s17236_s7 + $0x48] sm:$0xff] }
 0x34b   : > { %4655 = vmatprep.mubr.f32.mxu1 %v2847_v40  ;;  %v6063_v40 = vld [vmem:[%s17236_s7 + $0xd0] sm:$0xff] }
 0x34e   : > { %4656 = vmatmul.mubr.f32.gmra.mrb[48].mxu1 %v2846_v42  ;;  %v6064_v42 = vld [vmem:[%s17236_s7 + $0xd8] sm:$0xff] }
 0x34f   : > { %4661 = vmatprep.mubr.f32.mxu1 %v2849_v44  ;;  %v10887_v44 = vpack.c.bf16 %v6046_v39, %v6045_v34 }
 0x351   : > { %10888 = vmatpush3.bf16.msra.mxu0 %v10887_v44  ;;  %v2299_v44 = vld [vmem:[#allocation2 + $0x138] sm:$0xff] }
 0x352   : > { %4662 = vmatmul.mubr.f32.gmra.mrb[50].mxu1 %v2848_v46  ;;  %v10889_v46 = vpack.c.bf16 %v6064_v42, %v6063_v40  ;;  %v2296_v40 = vld [vmem:[#allocation2 + $0x120] sm:$0xff]  ;;  %v2312_v42 = vrot.slane %v2292_v30, 1 }
 0x353   : > { %4667 = vmatprep.mubr.f32.mxu1 %v2851_v48  ;;  %v6047_v48 = vld [vmem:[%s17236_s7 + $0x50] sm:$0xff] }
 0x354   : > { %v10891_v3 = vpack.c.bf16 %v6048_v50, %v6047_v48  ;;  %10890 = vmatprep.subr.bf16.mxu0 %v10889_v46  ;;  %v2318_v48 = vrot.slane %v2296_v40, 1 }
 0x356   : > { %4668 = vmatmul.mubr.f32.gmra.mrb[52].mxu1 %v2850_v51  ;;  %v2002_v51 = vsel %vm1875_vm4, %v2000_v36, %v2001_v63  ;;  %10892 = vmatpush3.bf16.msra.mxu0 %v10891_v3  ;;  %v2293_v63 = vld [vmem:[#allocation2 + $0x108] sm:$0xfe] }
 0x357   : > { %4673 = vmatprep.mubr.f32.mxu1 %v2853_v56  ;;  %v2009_v56 = vsel %vm1875_vm4, %v2004_v19, %v2008_v27  ;;  %v2297_v27 = vld [vmem:[#allocation2 + $0x128] sm:$0xff]  ;;  %v2315_v29 = vrot.slane %v2293_v63, 1 }
 0x358   : > { %v2320_v39 = vrot.slane %v2297_v27, 1  ;;  %v2609_v63 = vld [vmem:[#allocation2 + $0x228] sm:$0xff] }
 0x359   : > { %v2317_v38 = vsel %vm1875_vm4, %v2315_v29, %v2316_v26  ;;  %v2632_v30 = vrot.slane %v2609_v63, 1  ;;  %v2916_v63 = vld [vmem:[#allocation2 + $0x300] sm:$0xfe] }
 0x35a   : > { %4674 = vmatmul.mubr.f32.gmra.mrb[54].mxu1 %v2852_v10  ;;  %v2010_v10 = vrot.slane %v1986_v61, 1  ;;  %v2321_v50 = vsel %vm1875_vm4, %v2316_v26, %v2320_v39  ;;  %v2604_v26 = vld [vmem:[#allocation2 + $0x200] sm:$0xfe] }
 0x35b   : > { %4679 = vmatprep.mubr.f32.mxu1 %v2887_v11  ;;  %v2016_v11 = vrot.slane %v1989_v8, 1 }
 0x35c   : > { %v2011_v16 = vsel %vm1875_vm4, %v2006_v54, %v2010_v10  ;;  %v2015_v59 = vsel %vm1875_vm4, %v2010_v10, %v2014_v17  ;;  %v2298_v54 = vld [vmem:[#allocation2 + $0x130] sm:$0xff]  ;;  %v2349_v10 = vld [vmem:[#allocation2 + $0x198] sm:$0xff] }
 0x35d   : > { %v2017_v23 = vsel %vm1875_vm4, %v2012_v58, %v2016_v11  ;;  %v2322_v61 = vrot.slane %v2298_v54, 1  ;;  %v2348_v17 = vld [vmem:[#allocation2 + $0x190] sm:$0xff] }
 0x35e   : > { %4680 = vmatmul.mubr.f32.gmra.mrb[56].mxu1 %v2884_v21  ;;  %v2035_v21 = vld [vmem:[#allocation2 + $0x88] sm:$0xfe]  ;;  %v2367_v41 = vrot.slane %v2348_v17, 1 }
 0x35f   : > { %4685 = vmatprep.mubr.f32.mxu1 %v2891_v31  ;;  %v2058_v31 = vrot.slane %v2037_v15, 1  ;;  %v2057_v43 = vrot.slane %v2035_v21, 1  ;;  %v2351_v21 = vld [vmem:[#allocation2 + $0x1a8] sm:$0xff] }
 0x361   : > { %v2059_v1 = vsel %vm1875_vm4, %v2057_v43, %v2058_v31  ;;  %v2063_v0 = vsel %vm1875_vm4, %v2058_v31, %v2062_v12  ;;  %v2346_v31 = vld [vmem:[#allocation2 + $0x180] sm:$0xfe] }
 0x362   : > { %4686 = vmatmul.mubr.f32.gmra.mrb[58].mxu1 %v2889_v57  ;;  %v2034_v57 = vld [vmem:[#allocation2 + $0x80] sm:$0xfe] }
 0x363   : > { %4691 = vmatprep.mubr.f32.mxu1 %v2895_v62  ;;  %v2055_v62 = vrot.slane %v2036_v33, 1  ;;  %v2054_v22 = vrot.slane %v2034_v57, 1  ;;  %v2374_v57 = vrot.slane %v2351_v21, 1 }
 0x365   : > { %v2056_v35 = vsel %vm1875_vm4, %v2054_v22, %v2055_v62  ;;  %v2061_v53 = vsel %vm1875_vm4, %v2055_v62, %v2060_v37  ;;  %v2366_v62 = vrot.slane %v2346_v31, 1 }
 0x366   : > { %4692 = vmatmul.mubr.f32.gmra.mrb[60].mxu1 %v2893_v6  ;;  %v2066_v6 = vrot.slane %v2041_v25, 1 }
 0x367   : > { %4697 = vmatprep.mubr.f32.mxu1 %v2899_v5  ;;  %v2064_v5 = vrot.slane %v2040_v28, 1 }
 0x368   : > { %v2067_v19 = vsel %vm1875_vm4, %v2062_v12, %v2066_v6  ;;  %v2071_v2 = vsel %vm1875_vm4, %v2066_v6, %v2070_v20  ;;  %v2368_v12 = vsel %vm1875_vm4, %v2366_v62, %v2367_v41 }
 0x369   : > { %v2065_v7 = vsel %vm1875_vm4, %v2060_v37, %v2064_v5  ;;  %v2355_v37 = vld [vmem:[#allocation2 + $0x1c8] sm:$0x1] }
 0x36a   : > { %4698 = vmatmul.mubr.f32.gmra.mrb[62].mxu1 %v2897_v24  ;;  %v2068_v24 = vrot.slane %v2042_v18, 1  ;;  %v2382_v32 = vrot.slane %v2355_v37, 1  ;;  %v2605_v18 = vld [vmem:[#allocation2 + $0x208] sm:$0xfe] }
 0x36b   : > { %4768 = vmatprep.mubr.f32.mxu1 %v2005_v4  ;;  %v2294_v4 = vld [vmem:[#allocation2 + $0x110] sm:$0xff] }
 0x36c   : > { %v2069_v34 = vsel %vm1875_vm4, %v2064_v5, %v2068_v24  ;;  %v2313_v36 = vrot.slane %v2294_v4, 1  ;;  %v2607_v5 = vld [vmem:[#allocation2 + $0x218] sm:$0xff]  ;;  %v2606_v24 = vld [vmem:[#allocation2 + $0x210] sm:$0xff] }
 0x36d   : > { %v2625_v27 = vrot.slane %v2606_v24, 1 }
 0x36e   : > { %4769 = vmatmul.mubr.f32.vlgmr.msra.gmra.mrb[0].mxu1 %v2002_v51  ;;  %v2314_v46 = vsel %vm1875_vm4, %v2312_v42, %v2313_v36  ;;  %v2324_v51 = vrot.slane %v2299_v44, 1  ;;  %v2319_v58 = vsel %vm1875_vm4, %v2313_v36, %v2318_v48  ;;  %v2624_v36 = vrot.slane %v2604_v26, 1 }
 0x36f   : > { %4774 = vmatprep.mubr.f32.mxu1 %v2009_v56  ;;  %v2301_v56 = vld [vmem:[#allocation2 + $0x148] sm:$0x1] }
 0x370   : > { %v2325_v3 = vsel %vm1875_vm4, %v2320_v39, %v2324_v51  ;;  %v2328_v8 = vrot.slane %v2301_v56, 1  ;;  %v2626_v39 = vsel %vm1875_vm4, %v2624_v36, %v2625_v27  ;;  %v6050_v36 = vld [vmem:[%s17236_s7 + $0x68] sm:$0xff] }
 0x372   : > { %4775 = vmatmul.mubr.f32.gmra.mrb[2].mxu1 %v2007_v9  ;;  %v2300_v9 = vld [vmem:[#allocation2 + $0x140] sm:$0x1]  ;;  %v2329_v15 = vsel %vm1875_vm4, %v2324_v51, %v2328_v8 }
 0x373   : > { %4780 = vmatprep.mubr.f32.mxu1 %v2013_v55  ;;  %v2323_v55 = vsel %vm1875_vm4, %v2318_v48, %v2322_v61  ;;  %v2326_v11 = vrot.slane %v2300_v9, 1  ;;  %v2613_v48 = vld [vmem:[#allocation2 + $0x248] sm:$0x1]  ;;  %v2659_v9 = vld [vmem:[#allocation2 + $0x288] sm:$0xfe] }
 0x374   : > { %v2640_v56 = vrot.slane %v2613_v48, 1 }
 0x375   : > { %v2327_v33 = vsel %vm1875_vm4, %v2322_v61, %v2326_v11  ;;  %v2661_v61 = vld [vmem:[#allocation2 + $0x298] sm:$0xff]  ;;  %v2660_v11 = vld [vmem:[#allocation2 + $0x290] sm:$0xff] }
 0x376   : > { %4781 = vmatmul.mubr.f32.gmra.mrb[4].mxu1 %v2011_v16  ;;  %v2370_v16 = vrot.slane %v2349_v10, 1  ;;  %v2679_v21 = vrot.slane %v2660_v11, 1 }
 0x377   : > { %4786 = vmatprep.mubr.f32.mxu1 %v2017_v23  ;;  %v2369_v23 = vrot.slane %v2347_v13, 1  ;;  %v2663_v13 = vld [vmem:[#allocation2 + $0x2a8] sm:$0xff] }
 0x378   : > { %v2375_v22 = vsel %vm1875_vm4, %v2370_v16, %v2374_v57  ;;  %v2686_v31 = vrot.slane %v2663_v13, 1  ;;  %v2924_v13 = vld [vmem:[#allocation2 + $0x340] sm:$0x1] }
 0x379   : > { %v2371_v43 = vsel %vm1875_vm4, %v2369_v23, %v2370_v16  ;;  %v2658_v16 = vld [vmem:[#allocation2 + $0x280] sm:$0xfe] }
 0x37a   : > { %4787 = vmatmul.mubr.f32.gmra.mrb[6].mxu1 %v2015_v59  ;;  %v2350_v59 = vld [vmem:[#allocation2 + $0x1a0] sm:$0xff] }
 0x37b   : > { %4792 = vmatprep.mubr.f32.mxu1 %v2059_v1  ;;  %v2353_v1 = vld [vmem:[#allocation2 + $0x1b8] sm:$0xff]  ;;  %v2372_v14 = vrot.slane %v2350_v59, 1 }
 0x37c   : > { %v2378_v25 = vrot.slane %v2353_v1, 1 }
 0x37e   : > { %4793 = vmatmul.mubr.f32.gmra.mrb[8].mxu1 %v2056_v35  ;;  %v2352_v35 = vld [vmem:[#allocation2 + $0x1b0] sm:$0xff]  ;;  %v2379_v28 = vsel %vm1875_vm4, %v2374_v57, %v2378_v25  ;;  %v2383_v60 = vsel %vm1875_vm4, %v2378_v25, %v2382_v32 }
 0x37f   : > { %4798 = vmatprep.mubr.f32.mxu1 %v2063_v0  ;;  %v2373_v0 = vsel %vm1875_vm4, %v2367_v41, %v2372_v14  ;;  %v2376_v6 = vrot.slane %v2352_v35, 1  ;;  %v2678_v41 = vrot.slane %v2658_v16, 1 }
 0x381   : > { %v2680_v57 = vsel %vm1875_vm4, %v2678_v41, %v2679_v21  ;;  %v2975_v41 = vld [vmem:[#allocation2 + $0x3a8] sm:$0xff] }
 0x382   : > { %4799 = vmatmul.mubr.f32.gmra.mrb[10].mxu1 %v2061_v53  ;;  %v2354_v53 = vld [vmem:[#allocation2 + $0x1c0] sm:$0x1] }
 0x383   : > { %4804 = vmatprep.mubr.f32.mxu1 %v2067_v19  ;;  %v2377_v19 = vsel %vm1875_vm4, %v2372_v14, %v2376_v6  ;;  %v2380_v20 = vrot.slane %v2354_v53, 1  ;;  %v2667_v14 = vld [vmem:[#allocation2 + $0x2c8] sm:$0x1]  ;;  %v2917_v53 = vld [vmem:[#allocation2 + $0x308] sm:$0xfe] }
 0x384   : > { %v2694_v37 = vrot.slane %v2667_v14, 1  ;;  %v2939_v24 = vrot.slane %v2917_v53, 1  ;;  %v2974_v14 = vld [vmem:[#allocation2 + $0x3a0] sm:$0xff] }
 0x385   : > { %v2381_v4 = vsel %vm1875_vm4, %v2376_v6, %v2380_v20  ;;  %v2919_v6 = vld [vmem:[#allocation2 + $0x318] sm:$0xff]  ;;  %v2918_v20 = vld [vmem:[#allocation2 + $0x310] sm:$0xff] }
 0x386   : > { %4805 = vmatmul.mubr.f32.gmra.mrb[12].mxu1 %v2065_v7  ;;  %v2628_v7 = vrot.slane %v2607_v5, 1 }
 0x387   : > { %4810 = vmatprep.mubr.f32.mxu1 %v2071_v2  ;;  %v2627_v2 = vrot.slane %v2605_v18, 1  ;;  %v2921_v18 = vld [vmem:[#allocation2 + $0x328] sm:$0xff] }
 0x388   : > { %v2633_v42 = vsel %vm1875_vm4, %v2628_v7, %v2632_v30 }
 0x389   : > { %v2629_v29 = vsel %vm1875_vm4, %v2627_v2, %v2628_v7  ;;  %v6066_v7 = vld [vmem:[%s17236_s7 + $0xe8] sm:$0xff] }
 0x38a   : > { %4811 = vmatmul.mubr.f32.gmra.mrb[14].mxu1 %v2069_v34  ;;  %v2608_v34 = vld [vmem:[#allocation2 + $0x220] sm:$0xff] }
 0x38b   : > { %4816 = vmatprep.mubr.f32.mxu1 %v2317_v38  ;;  %v2611_v38 = vld [vmem:[#allocation2 + $0x238] sm:$0xff]  ;;  %v2630_v40 = vrot.slane %v2608_v34, 1  ;;  %v6049_v34 = vld [vmem:[%s17236_s7 + $0x60] sm:$0xff] }
 0x38c   : > { %v2636_v44 = vrot.slane %v2611_v38, 1  ;;  %v2936_v38 = vrot.slane %v2916_v63, 1 }
 0x38e   : > { %4817 = vmatmul.mubr.f32.gmra.mrb[16].mxu1 %v2314_v46  ;;  %v2610_v46 = vld [vmem:[#allocation2 + $0x230] sm:$0xff]  ;;  %v2637_v54 = vsel %vm1875_vm4, %v2632_v30, %v2636_v44  ;;  %v2641_v10 = vsel %vm1875_vm4, %v2636_v44, %v2640_v56  ;;  %v2920_v30 = vld [vmem:[#allocation2 + $0x320] sm:$0xff]  ;;  %v2925_v56 = vld [vmem:[#allocation2 + $0x348] sm:$0x1] }
 0x38f   : > { %4822 = vmatprep.mubr.f32.mxu1 %v2321_v50  ;;  %v2631_v50 = vsel %vm1875_vm4, %v2625_v27, %v2630_v40  ;;  %v2634_v51 = vrot.slane %v2610_v46, 1  ;;  %v2942_v44 = vrot.slane %v2920_v30, 1  ;;  %v2952_v11 = vrot.slane %v2925_v56, 1 }
 0x392   : > { %4823 = vmatmul.mubr.f32.gmra.mrb[18].mxu1 %v2319_v58  ;;  %v2612_v58 = vld [vmem:[#allocation2 + $0x240] sm:$0x1] }
 0x393   : > { %4828 = vmatprep.mubr.f32.mxu1 %v2325_v3  ;;  %v2635_v3 = vsel %vm1875_vm4, %v2630_v40, %v2634_v51  ;;  %v2638_v8 = vrot.slane %v2612_v58, 1  ;;  %v10895_v40 = vpack.c.bf16 %v6050_v36, %v6049_v34 }
 0x395   : > { %v2639_v17 = vsel %vm1875_vm4, %v2634_v51, %v2638_v8  ;;  %v6067_v51 = vld [vmem:[%s17236_s7 + $0xf0] sm:$0xff] }
 0x396   : > { %4829 = vmatmul.mubr.f32.gmra.mrb[20].mxu1 %v2323_v55  ;;  %v2682_v55 = vrot.slane %v2661_v61, 1  ;;  %v6051_v61 = vld [vmem:[%s17236_s7 + $0x70] sm:$0xff] }
 0x397   : > { %4834 = vmatprep.mubr.f32.mxu1 %v2329_v15  ;;  %v2681_v15 = vrot.slane %v2659_v9, 1 }
 0x398   : > { %v2687_v62 = vsel %vm1875_vm4, %v2682_v55, %v2686_v31 }
 0x399   : > { %v2683_v23 = vsel %vm1875_vm4, %v2681_v15, %v2682_v55  ;;  %v2973_v15 = vld [vmem:[#allocation2 + $0x398] sm:$0xff] }
 0x39a   : > { %4835 = vmatmul.mubr.f32.gmra.mrb[22].mxu1 %v2327_v33  ;;  %v2662_v33 = vld [vmem:[#allocation2 + $0x2a0] sm:$0xff] }
 0x39b   : > { %4840 = vmatprep.mubr.f32.mxu1 %v2371_v43  ;;  %v2665_v43 = vld [vmem:[#allocation2 + $0x2b8] sm:$0xff]  ;;  %v2684_v59 = vrot.slane %v2662_v33, 1  ;;  %v2972_v33 = vld [vmem:[#allocation2 + $0x390] sm:$0xff] }
 0x39c   : > { %v2690_v1 = vrot.slane %v2665_v43, 1 }
 0x39e   : > { %4841 = vmatmul.mubr.f32.gmra.mrb[24].mxu1 %v2368_v12  ;;  %v2664_v12 = vld [vmem:[#allocation2 + $0x2b0] sm:$0xff]  ;;  %v2691_v35 = vsel %vm1875_vm4, %v2686_v31, %v2690_v1  ;;  %v2695_v5 = vsel %vm1875_vm4, %v2690_v1, %v2694_v37  ;;  %v2994_v31 = vrot.slane %v2973_v15, 1  ;;  %v2996_v37 = vrot.slane %v2974_v14, 1 }
 0x39f   : > { %4846 = vmatprep.mubr.f32.mxu1 %v2375_v22  ;;  %v2685_v22 = vsel %vm1875_vm4, %v2679_v21, %v2684_v59  ;;  %v2688_v25 = vrot.slane %v2664_v12, 1  ;;  %v2971_v21 = vld [vmem:[#allocation2 + $0x388] sm:$0xfe]  ;;  %v2998_v12 = vrot.slane %v2975_v41, 1  ;;  %v6091_v41 = vld [vmem:[%s17236_s7 + $0x1b0] sm:$0xff] }
 0x3a0   : > { %v2993_v43 = vrot.slane %v2971_v21, 1 }
 0x3a2   : > { %4847 = vmatmul.mubr.f32.gmra.mrb[26].mxu1 %v2373_v0  ;;  %v2666_v0 = vld [vmem:[#allocation2 + $0x2c0] sm:$0x1]  ;;  %v2995_v1 = vsel %vm1875_vm4, %v2993_v43, %v2994_v31  ;;  %v6092_v43 = vld [vmem:[%s17236_s7 + $0x1b8] sm:$0xff] }
 0x3a3   : > { %4852 = vmatprep.mubr.f32.mxu1 %v2379_v28  ;;  %v2689_v28 = vsel %vm1875_vm4, %v2684_v59, %v2688_v25  ;;  %v2692_v32 = vrot.slane %v2666_v0, 1  ;;  %v2999_v0 = vsel %vm1875_vm4, %v2994_v31, %v2998_v12  ;;  %v6074_v31 = vld [vmem:[%s17236_s7 + $0x128] sm:$0xff] }
 0x3a5   : > { %v2693_v26 = vsel %vm1875_vm4, %v2688_v25, %v2692_v32  ;;  %v2977_v25 = vld [vmem:[#allocation2 + $0x3b8] sm:$0xff]  ;;  %v2979_v32 = vld [vmem:[#allocation2 + $0x3c8] sm:$0x1] }
 0x3a6   : > { %4853 = vmatmul.mubr.f32.gmra.mrb[28].mxu1 %v2377_v19  ;;  %v2940_v19 = vrot.slane %v2919_v6, 1  ;;  %v3002_v6 = vrot.slane %v2977_v25, 1  ;;  %v6075_v25 = vld [vmem:[%s17236_s7 + $0x130] sm:$0xff] }
 0x3a7   : > { %4858 = vmatprep.mubr.f32.mxu1 %v2383_v60  ;;  %v6065_v60 = vld [vmem:[%s17236_s7 + $0xe0] sm:$0xff] }
 0x3a8   : > { %v10893_v2 = vpack.c.bf16 %v6066_v7, %v6065_v60  ;;  %v2941_v27 = vsel %vm1875_vm4, %v2939_v24, %v2940_v19 }
 0x3aa   : > { %4859 = vmatmul.mubr.f32.gmra.mrb[30].mxu1 %v2381_v4  ;;  %v2937_v4 = vrot.slane %v2918_v20, 1  ;;  %10894 = vmatprep.subr.bf16.mxu0 %v10893_v2  ;;  %v3006_v20 = vrot.slane %v2979_v32, 1  ;;  %v11660_v2 = vld [vmem:[#allocation4 + $0x80] sm:$0xff] }
 0x3ab   : > { %4864 = vmatprep.mubr.f32.mxu1 %v2629_v29  ;;  %v2944_v29 = vrot.slane %v2921_v18, 1  ;;  %10896 = vmatpush3.bf16.msra.mxu0 %v10895_v40  ;;  %v2978_v18 = vld [vmem:[#allocation2 + $0x3c0] sm:$0x1] }
 0x3ac   : > { %v2943_v9 = vsel %vm1875_vm4, %v2937_v4, %v2942_v44  ;;  %v3004_v7 = vrot.slane %v2978_v18, 1  ;;  %v3007_v24 = vsel %vm1875_vm4, %v3002_v6, %v3006_v20  ;;  %v6069_v40 = vld [vmem:[%s17236_s7 + $0x100] sm:$0xff] }
 0x3ad   : > { %v2945_v46 = vsel %vm1875_vm4, %v2940_v19, %v2944_v29  ;;  %v3003_v19 = vsel %vm1875_vm4, %v2998_v12, %v3002_v6  ;;  %v6094_v6 = vld [vmem:[%s17236_s7 + $0x1c8] sm:$0xff] }
 0x3ae   : > { %4865 = vmatmul.mubr.f32.gmra.mrb[32].mxu1 %v2626_v39  ;;  %v2923_v39 = vld [vmem:[#allocation2 + $0x338] sm:$0xff] }
 0x3af   : > { %4870 = vmatprep.mubr.f32.mxu1 %v2633_v42  ;;  %v2938_v42 = vsel %vm1875_vm4, %v2936_v38, %v2937_v4  ;;  %v2948_v48 = vrot.slane %v2923_v39, 1  ;;  %v6086_v4 = vld [vmem:[%s17236_s7 + $0x188] sm:$0xff] }
 0x3b1   : > { %v2949_v55 = vsel %vm1875_vm4, %v2944_v29, %v2948_v48  ;;  %v3664_v29 = vld [vmem:[%s17235_s6] sm:$0x3] }
 0x3b2   : > { %4871 = vmatmul.mubr.f32.gmra.mrb[34].mxu1 %v2631_v50  ;;  %v2922_v50 = vld [vmem:[#allocation2 + $0x330] sm:$0xff]  ;;  %v13732_v30 = vrot.slane %v3664_v29, %v12182_v49  ;;  %v13735_v34 = vrot.slane %v3664_v29, %v12190_v52  ;;  %v6088_v52 = vld [vmem:[%s17236_s7 + $0x198] sm:$0xff] }
 0x3b3   : > { %4876 = vmatprep.mubr.f32.mxu1 %v2637_v54  ;;  %v6068_v54 = vld [vmem:[%s17236_s7 + $0xf8] sm:$0xff]  ;;  %v6087_v49 = vld [vmem:[%s17236_s7 + $0x190] sm:$0xff] }
 0x3b4   : > { %v10897_v58 = vpack.c.bf16 %v6068_v54, %v6067_v51 }
 0x3b6   : > { %4877 = vmatmul.mubr.f32.gmra.mrb[36].mxu1 %v2635_v3  ;;  %v6052_v3 = vld [vmem:[%s17236_s7 + $0x78] sm:$0xff]  ;;  %10898 = vmatprep.subr.bf16.mxu0 %v10897_v58  ;;  %v10905_v58 = vpack.c.bf16 %v6088_v52, %v6087_v49 }
 0x3b7   : > { %4882 = vmatprep.mubr.f32.mxu1 %v2641_v10  ;;  %v10899_v8 = vpack.c.bf16 %v6052_v3, %v6051_v61  ;;  %v2946_v10 = vrot.slane %v2922_v50, 1  ;;  %v6071_v61 = vld [vmem:[%s17236_s7 + $0x110] sm:$0xff]  ;;  %v6072_v3 = vld [vmem:[%s17236_s7 + $0x118] sm:$0xff] }
 0x3b8   : > { %v10907_v15 = vpack.c.bf16 %v6072_v3, %v6071_v61  ;;  %v6097_v61 = vld [vmem:[%s17236_s7 + $0x1e0] sm:$0xff]  ;;  %v6098_v3 = vld [vmem:[%s17236_s7 + $0x1e8] sm:$0xff] }
 0x3b9   : > { %10900 = vmatpush3.bf16.msra.mxu0 %v10899_v8  ;;  %v2947_v16 = vsel %vm1875_vm4, %v2942_v44, %v2946_v10 }
 0x3ba   : > { %4883 = vmatmul.mubr.f32.gmra.mrb[38].mxu1 %v2639_v17  ;;  %v2950_v17 = vrot.slane %v2924_v13, 1 }
 0x3bb   : > { %4888 = vmatprep.mubr.f32.mxu1 %v2683_v23  ;;  %v2953_v23 = vsel %vm1875_vm4, %v2948_v48, %v2952_v11 }
 0x3bc   : > { %v2951_v59 = vsel %vm1875_vm4, %v2946_v10, %v2950_v17  ;;  %v6090_v10 = vld [vmem:[%s17236_s7 + $0x1a8] sm:$0xff] }
 0x3be   : > { %4889 = vmatmul.mubr.f32.gmra.mrb[40].mxu1 %v2680_v57  ;;  %v2970_v57 = vld [vmem:[#allocation2 + $0x380] sm:$0xfe] }
 0x3bf   : > { %4894 = vmatprep.mubr.f32.mxu1 %v2687_v62  ;;  %v2991_v62 = vrot.slane %v2972_v33, 1 }
 0x3c1   : > { %v2997_v53 = vsel %vm1875_vm4, %v2991_v62, %v2996_v37 }
 0x3c2   : > { %4895 = vmatmul.mubr.f32.gmra.mrb[42].mxu1 %v2685_v22  ;;  %v2990_v22 = vrot.slane %v2970_v57, 1 }
 0x3c3   : > { %4900 = vmatprep.mubr.f32.mxu1 %v2691_v35 }
 0x3c4   : > { %v2992_v35 = vsel %vm1875_vm4, %v2990_v22, %v2991_v62  ;;  %v10913_v22 = vpack.c.bf16 %v6092_v43, %v6091_v41  ;;  %v6099_v43 = vld [vmem:[%s17236_s7 + $0x1f0] sm:$0xff] }
 0x3c6   : > { %4901 = vmatmul.mubr.f32.gmra.mrb[44].mxu1 %v2689_v28  ;;  %v2976_v28 = vld [vmem:[#allocation2 + $0x3b0] sm:$0xff] }
 0x3c7   : > { %4906 = vmatprep.mubr.f32.mxu1 %v2695_v5  ;;  %v3000_v5 = vrot.slane %v2976_v28, 1 }
 0x3c9   : > { %v3001_v60 = vsel %vm1875_vm4, %v2996_v37, %v3000_v5  ;;  %v3005_v63 = vsel %vm1875_vm4, %v3000_v5, %v3004_v7 }
 0x3ca   : > { %4907 = vmatmul.mubr.f32.gmra.mrb[46].mxu1 %v2693_v26  ;;  %v6085_v26 = vld [vmem:[%s17236_s7 + $0x180] sm:$0xff] }
 0x3cb   : > { %4912 = vmatprep.mubr.f32.mxu1 %v2941_v27  ;;  %v10901_v27 = vpack.c.bf16 %v6086_v4, %v6085_v26  ;;  %v6095_v4 = vld [vmem:[%s17236_s7 + $0x1d0] sm:$0xff] }
 0x3cd   : > { %10902 = vmatprep.subr.bf16.mxu0 %v10901_v27  ;;  %v6096_v27 = vld [vmem:[%s17236_s7 + $0x1d8] sm:$0xff] }
 0x3ce   : > { %4913 = vmatmul.mubr.f32.gmra.mrb[48].mxu1 %v2938_v42  ;;  %v6070_v42 = vld [vmem:[%s17236_s7 + $0x108] sm:$0xff] }
 0x3cf   : > { %4918 = vmatprep.mubr.f32.mxu1 %v2945_v46  ;;  %v10903_v51 = vpack.c.bf16 %v6070_v42, %v6069_v40 }
 0x3d2   : > { %4919 = vmatmul.mubr.f32.gmra.mrb[50].mxu1 %v2943_v9  ;;  %v6089_v9 = vld [vmem:[%s17236_s7 + $0x1a0] sm:$0xff] }
 0x3d3   : > { %4924 = vmatprep.mubr.f32.mxu1 %v2949_v55  ;;  %v10909_v21 = vpack.c.bf16 %v6090_v10, %v6089_v9 }
 0x3d6   : > { %4925 = vmatmul.mubr.f32.gmra.mrb[52].mxu1 %v2947_v16 }
 0x3d7   : > { %4930 = vmatprep.mubr.f32.mxu1 %v2953_v23  ;;  %v6073_v23 = vld [vmem:[%s17236_s7 + $0x120] sm:$0xff] }
 0x3da   : > { %4931 = vmatmul.mubr.f32.gmra.mrb[54].mxu1 %v2951_v59 }
 0x3db   : > { %4936 = vmatprep.mubr.f32.mxu1 %v2995_v1  ;;  %v10911_v1 = vpack.c.bf16 %v6074_v31, %v6073_v23  ;;  %v6081_v23 = vld [vmem:[%s17236_s7 + $0x160] sm:$0xff]  ;;  %v6082_v31 = vld [vmem:[%s17236_s7 + $0x168] sm:$0xff] }
 0x3de   : > { %4937 = vmatmul.mubr.f32.gmra.mrb[56].mxu1 %v2992_v35  ;;  %v6076_v35 = vld [vmem:[%s17236_s7 + $0x138] sm:$0xff] }
 0x3df   : > { %4942 = vmatprep.mubr.f32.mxu1 %v2999_v0  ;;  %v6093_v0 = vld [vmem:[%s17236_s7 + $0x1c0] sm:$0xff]  ;;  %v10915_v20 = vpack.c.bf16 %v6076_v35, %v6075_v25 }
 0x3e2   : > { %4943 = vmatmul.mubr.f32.gmra.mrb[58].mxu1 %v2997_v53 }
 0x3e3   : > { %4948 = vmatprep.mubr.f32.mxu1 %v3003_v19 }
 0x3e6   : > { %4949 = vmatmul.mubr.f32.gmra.mrb[60].mxu1 %v3001_v60 }
 0x3e7   : > { %4954 = vmatprep.mubr.f32.mxu1 %v3007_v24  ;;  %v10917_v24 = vpack.c.bf16 %v6094_v6, %v6093_v0  ;;  %v6084_v0 = vld [vmem:[%s17236_s7 + $0x178] sm:$0xff] }
 0x3ea   : > { %4955 = vmatmul.mubr.f32.gmra.mrb[62].mxu1 %v3005_v63  ;;  %v6077_v63 = vld [vmem:[%s17236_s7 + $0x140] sm:$0xff] }
 0x3eb   : > { %7459 = vmatprep.mubr.f32.mxu1 %v11660_v2  ;;  %v6078_v2 = vld [vmem:[%s17236_s7 + $0x148] sm:$0xff] }
 0x3ec   : > { %v10919_v42 = vpack.c.bf16 %v6078_v2, %v6077_v63 }
 0x441   : > { %v4770_v36 = vpop.f32.mrb[0].mxu1 }
 0x442   : > { %v11318_v38 = vadd.f32 %v4770_v36, %v13732_v30  ;;  %v4772_v39 = vpop.f32.mrb[1].mxu1 }
 0x443   : > { %v11319_v44 = vadd.f32 %v4772_v39, %v13735_v34 }
 0x444   : > { %v4961_v46 = vmax.f32 %v11318_v38, 0.0 }
 0x445   : > { %v4962_v48 = vmax.f32 %v11319_v44, 0.0  ;;  %v4776_v50 = vpop.f32.mrb[2].mxu1 }
 0x446   : > { %5025 = vst [vmem:[#allocation4] sm:$0xff] %v4961_v46  ;;  %v11320_v54 = vadd.f32 %v4776_v50, %v13732_v30  ;;  %v4778_v56 = vpop.f32.mrb[3].mxu1  ;;  %v6079_v50 = vld [vmem:[%s17236_s7 + $0x150] sm:$0xff] }
 0x447   : > { %5026 = vst [vmem:[#allocation4 + $0x8] sm:$0xff] %v4962_v48  ;;  %v11321_v8 = vadd.f32 %v4778_v56, %v13735_v34  ;;  %6268 = vmatprep.mubr.f32.mxu0 %v4962_v48  ;;  %v10921_v48 = vpack.c.bf16 %v6096_v27, %v6095_v4 }
 0x448   : > { %v4963_v55 = vmax.f32 %v11320_v54, 0.0  ;;  %6269 = vmatmul.mubr.f32.vlgmr.msra.gmra.mrb[128].mxu0 %v4961_v46 }
 0x449   : > { %v13765_v11 = vmax.f32 %v11321_v8, 0.0  ;;  %v4782_v13 = vpop.f32.mrb[4].mxu1  ;;  %10904 = vmatpush3.bf16.msra.mxu0 %v10903_v51  ;;  %v6080_v51 = vld [vmem:[%s17236_s7 + $0x158] sm:$0xff] }
 0x44a   : > { %5027 = vst [vmem:[#allocation4 + $0x10] sm:$0xff] %v4963_v55  ;;  %v11322_v16 = vadd.f32 %v4782_v13, %v13732_v30  ;;  %v4784_v17 = vpop.f32.mrb[5].mxu1  ;;  %10906 = vmatprep.subr.bf16.mxu0 %v10905_v58  ;;  %v10923_v13 = vpack.c.bf16 %v6080_v51, %v6079_v50 }
 0x44b   : > { %5028 = vst [vmem:[#allocation4 + $0x18] sm:$0xff] %v13765_v11  ;;  %v11323_v33 = vadd.f32 %v4784_v17, %v13735_v34  ;;  %6273 = vmatprep.mubr.f32.mxu0 %v13765_v11  ;;  %v17253_v28 = vrot.slane %v13765_v11, 1 }
 0x44c   : > { %v4965_v57 = vmax.f32 %v11322_v16, 0.0  ;;  %6274 = vmatmul.mubr.f32.gmra.mrb[130].mxu0 %v4963_v55 }
 0x44d   : > { %v4966_v59 = vmax.f32 %v11323_v33, 0.0  ;;  %v4788_v62 = vpop.f32.mrb[6].mxu1  ;;  %10908 = vmatpush3.bf16.msra.mxu0 %v10907_v15 }
 0x44e   : > { %5029 = vst [vmem:[#allocation4 + $0x20] sm:$0xff] %v4965_v57  ;;  %v11324_v12 = vadd.f32 %v4788_v62, %v13732_v30  ;;  %v4790_v14 = vpop.f32.mrb[7].mxu1  ;;  %10910 = vmatprep.subr.bf16.mxu0 %v10909_v21  ;;  %v10925_v21 = vpack.c.bf16 %v6098_v3, %v6097_v61 }
 0x44f   : > { %5030 = vst [vmem:[#allocation4 + $0x28] sm:$0xff] %v4966_v59  ;;  %v11325_v37 = vadd.f32 %v4790_v14, %v13735_v34  ;;  %6278 = vmatprep.mubr.f32.mxu0 %v4966_v59  ;;  %v5160_v32 = vrot.slane %v4966_v59, 1  ;;  %v10927_v14 = vpack.c.bf16 %v6082_v31, %v6081_v23 }
 0x450   : > { %v4967_v53 = vmax.f32 %v11324_v12, 0.0  ;;  %6279 = vmatmul.mubr.f32.gmra.mrb[132].mxu0 %v4965_v57  ;;  %v6100_v57 = vld [vmem:[%s17236_s7 + $0x1f8] sm:$0xff] }
 0x451   : > { %v13798_v5 = vmax.f32 %v11325_v37, 0.0  ;;  %v4794_v19 = vpop.f32.mrb[8].mxu1  ;;  %10912 = vmatpush3.bf16.msra.mxu0 %v10911_v1  ;;  %v13803_v18 = vsel %vm1875_vm4, %v17253_v28, %v5160_v32  ;;  %v13825_v29 = vld [vmem:[#allocation4 + $0x10] sm:$0xff]  ;;  %v10929_v35 = vpack.c.bf16 %v6100_v57, %v6099_v43 }
 0x452   : > { %5031 = vst [vmem:[#allocation4 + $0x30] sm:$0xff] %v4967_v53  ;;  %v13806_v60 = vadd.f32 %v4794_v19, %v13732_v30  ;;  %v4796_v7 = vpop.f32.mrb[9].mxu1  ;;  %10914 = vmatprep.subr.bf16.mxu0 %v10913_v22  ;;  %v17247_v54 = vrot.slane %v13825_v29, 2  ;;  %v6083_v37 = vld [vmem:[%s17236_s7 + $0x170] sm:$0xff] }
 0x453   : > { %5032 = vst [vmem:[#allocation4 + $0x38] sm:$0xff] %v13798_v5  ;;  %v13816_v26 = vadd.f32 %v4796_v7, %v13735_v34  ;;  %6283 = vmatprep.mubr.f32.mxu0 %v13798_v5  ;;  %v17252_v36 = vrot.slane %v13798_v5, 1 }
 0x454   : > { %v17278_v38 = vmax.f32 %v13806_v60, 0.0  ;;  %6284 = vmatmul.mubr.f32.gmra.mrb[134].mxu0 %v4967_v53  ;;  %v6118_v53 = vld [vmem:[%s17236_s7 + $0x288] sm:$0xff] }
 0x455   : > { %v17279_v39 = vmax.f32 %v13816_v26, 0.0  ;;  %v4800_v40 = vpop.f32.mrb[10].mxu1  ;;  %10916 = vmatpush3.bf16.msra.mxu0 %v10915_v20  ;;  %v13830_v44 = vld [vmem:[#allocation4 + $0x20] sm:$0xff]  ;;  %v13835_v49 = vsel %vm1875_vm4, %v5160_v32, %v17252_v36 }
 0x456   : > { %5033 = vst [vmem:[#allocation4 + $0x40] sm:$0xff] %v17278_v38  ;;  %v13840_v52 = vadd.f32 %v4800_v40, %v13732_v30  ;;  %v4802_v46 = vpop.f32.mrb[11].mxu1  ;;  %10918 = vmatprep.subr.bf16.mxu0 %v10917_v24  ;;  %v5267_v56 = vrot.slane %v13830_v44, 2  ;;  %v6117_v32 = vld [vmem:[%s17236_s7 + $0x280] sm:$0xff]  ;;  %v10931_v24 = vpack.c.bf16 %v6084_v0, %v6083_v37 }
 0x457   : > { %5034 = vst [vmem:[#allocation4 + $0x48] sm:$0xff] %v17279_v39  ;;  %v13853_v58 = vadd.f32 %v4802_v46, %v13735_v34  ;;  %v10933_v4 = vpack.c.bf16 %v6118_v53, %v6117_v32 }
 0x458   : > { %v17276_v8 = vmax.f32 %v13840_v52, 0.0  ;;  %v13865_v9 = vsel %vm5260_vm5, %v17247_v54, %v5267_v56 }
 0x459   : > { %17307 = vst [vmem:[#allocation7_spill] sm:$0xff] %v13865_v9  ;;  %v17277_v10 = vmax.f32 %v13853_v58, 0.0  ;;  %v4806_v55 = vpop.f32.mrb[12].mxu1  ;;  %10920 = vmatpush3.bf16.msra.mxu0 %v10919_v42  ;;  %v13868_v15 = vld [vmem:[#allocation4 + $0x30] sm:$0xff] }
 0x45a   : > { %5035 = vst [vmem:[#allocation4 + $0x50] sm:$0xff] %v17276_v8  ;;  %v13873_v16 = vadd.f32 %v4806_v55, %v13732_v30  ;;  %v4808_v17 = vpop.f32.mrb[13].mxu1  ;;  %10922 = vmatprep.subr.bf16.mxu0 %v10921_v48  ;;  %v17246_v33 = vrot.slane %v13868_v15, 2 }
 0x45b   : > { %5036 = vst [vmem:[#allocation4 + $0x58] sm:$0xff] %v17277_v10  ;;  %v13885_v41 = vadd.f32 %v4808_v17, %v13735_v34 }
 0x45c   : > { %v17272_v59 = vmax.f32 %v13873_v16, 0.0  ;;  %v13897_v62 = vsel %vm5260_vm5, %v5267_v56, %v17246_v33 }
 0x45d   : > { %17308 = vst [vmem:[#allocation8_spill] sm:$0xff] %v13897_v62  ;;  %v17274_v1 = vmax.f32 %v13885_v41, 0.0  ;;  %v4812_v12 = vpop.f32.mrb[14].mxu1  ;;  %10924 = vmatpush3.bf16.msra.mxu0 %v10923_v13 }
 0x45e   : > { %5037 = vst [vmem:[#allocation4 + $0x60] sm:$0xff] %v17272_v59  ;;  %v13903_v22 = vadd.f32 %v4812_v12, %v13732_v30  ;;  %v4814_v25 = vpop.f32.mrb[15].mxu1  ;;  %10926 = vmatprep.subr.bf16.mxu0 %v10925_v21 }
 0x45f   : > { %5038 = vst [vmem:[#allocation4 + $0x68] sm:$0xff] %v17274_v1  ;;  %v13914_v6 = vadd.f32 %v4814_v25, %v13735_v34 }
 0x460   : > { %v17265_v19 = vmax.f32 %v13903_v22, 0.0 }
 0x461   : > { %v17271_v20 = vmax.f32 %v13914_v6, 0.0  ;;  %v4818_v7 = vpop.f32.mrb[16].mxu1  ;;  %10928 = vmatpush3.bf16.msra.mxu0 %v10927_v14 }
 0x462   : > { %5039 = vst [vmem:[#allocation4 + $0x70] sm:$0xff] %v17265_v19  ;;  %v11334_v63 = vadd.f32 %v4818_v7, %v13732_v30  ;;  %v4820_v2 = vpop.f32.mrb[17].mxu1  ;;  %10930 = vmatprep.subr.bf16.mxu0 %v10929_v35 }
 0x463   : > { %5040 = vst [vmem:[#allocation4 + $0x78] sm:$0xff] %v17271_v20  ;;  %v11335_v27 = vadd.f32 %v4820_v2, %v13735_v34 }
 0x464   : > { %v4977_v40 = vmax.f32 %v11334_v63, 0.0 }
 0x465   : > { %v4978_v42 = vmax.f32 %v11335_v27, 0.0  ;;  %v4824_v46 = vpop.f32.mrb[18].mxu1  ;;  %10932 = vmatpush3.bf16.msra.mxu0 %v10931_v24 }
 0x466   : > { %5042 = vst [vmem:[#allocation4 + $0x90] sm:$0xff] %v4977_v40  ;;  %v11336_v48 = vadd.f32 %v4824_v46, %v13732_v30  ;;  %v4826_v50 = vpop.f32.mrb[19].mxu1  ;;  %10934 = vmatprep.subr.bf16.mxu0 %v10933_v4 }
 0x467   : > { %5043 = vst [vmem:[#allocation4 + $0x98] sm:$0xff] %v4978_v42  ;;  %v11337_v51 = vadd.f32 %v4826_v50, %v13735_v34  ;;  %6288 = vmatprep.mubr.f32.mxu0 %v4978_v42 }
 0x468   : > { %v13932_v56 = vmax.f32 %v11336_v48, 0.0  ;;  %6289 = vmatmul.mubr.f32.gmra.mrb[136].mxu0 %v4977_v40 }
 0x469   : > { %v13934_v61 = vmax.f32 %v11337_v51, 0.0  ;;  %v4830_v3 = vpop.f32.mrb[20].mxu1 }
 0x46a   : > { %5044 = vst [vmem:[#allocation4 + $0xa0] sm:$0xff] %v13932_v56  ;;  %v11338_v55 = vadd.f32 %v4830_v3, %v13732_v30  ;;  %v4832_v13 = vpop.f32.mrb[21].mxu1  ;;  %v17250_v12 = vrot.slane %v13932_v56, 1 }
 0x46b   : > { %5045 = vst [vmem:[#allocation4 + $0xa8] sm:$0xff] %v13934_v61  ;;  %v11339_v17 = vadd.f32 %v4832_v13, %v13735_v34  ;;  %6293 = vmatprep.mubr.f32.mxu0 %v13934_v61  ;;  %v17251_v35 = vrot.slane %v13934_v61, 1 }
 0x46c   : > { %v4981_v21 = vmax.f32 %v11338_v55, 0.0  ;;  %6294 = vmatmul.mubr.f32.gmra.mrb[138].mxu0 %v13932_v56 }
 0x46d   : > { %v4982_v23 = vmax.f32 %v11339_v17, 0.0  ;;  %v4836_v31 = vpop.f32.mrb[22].mxu1 }
 0x46e   : > { %5046 = vst [vmem:[#allocation4 + $0xb0] sm:$0xff] %v4981_v21  ;;  %v11340_v43 = vadd.f32 %v4836_v31, %v13732_v30  ;;  %v4838_v57 = vpop.f32.mrb[23].mxu1  ;;  %v5353_v14 = vrot.slane %v4981_v21, 1 }
 0x46f   : > { %5047 = vst [vmem:[#allocation4 + $0xb8] sm:$0xff] %v4982_v23  ;;  %v11341_v25 = vadd.f32 %v4838_v57, %v13735_v34  ;;  %6298 = vmatprep.mubr.f32.mxu0 %v4982_v23  ;;  %v5355_v37 = vrot.slane %v4982_v23, 1 }
 0x470   : > { %v13946_v0 = vmax.f32 %v11340_v43, 0.0  ;;  %6299 = vmatmul.mubr.f32.gmra.mrb[140].mxu0 %v4981_v21  ;;  %v13951_v32 = vsel %vm1875_vm4, %v17250_v12, %v5353_v14 }
 0x471   : > { %v13953_v53 = vmax.f32 %v11341_v25, 0.0  ;;  %v4842_v7 = vpop.f32.mrb[24].mxu1  ;;  %v13958_v24 = vsel %vm1875_vm4, %v17251_v35, %v5355_v37 }
 0x472   : > { %5048 = vst [vmem:[#allocation4 + $0xc0] sm:$0xff] %v13946_v0  ;;  %v13962_v63 = vadd.f32 %v4842_v7, %v13732_v30  ;;  %v4844_v2 = vpop.f32.mrb[25].mxu1  ;;  %v17248_v4 = vrot.slane %v13946_v0, 1 }
 0x473   : > { %5049 = vst [vmem:[#allocation4 + $0xc8] sm:$0xff] %v13953_v53  ;;  %v13967_v27 = vadd.f32 %v4844_v2, %v13735_v34  ;;  %6303 = vmatprep.mubr.f32.mxu0 %v13953_v53  ;;  %v17249_v40 = vrot.slane %v13953_v53, 1 }
 0x474   : > { %v17262_v42 = vmax.f32 %v13962_v63, 0.0  ;;  %6304 = vmatmul.mubr.f32.gmra.mrb[142].mxu0 %v13946_v0  ;;  %v13976_v46 = vsel %vm1875_vm4, %v5353_v14, %v17248_v4 }
 0x475   : > { %v17264_v48 = vmax.f32 %v13967_v27, 0.0  ;;  %v4848_v50 = vpop.f32.mrb[26].mxu1  ;;  %v13982_v51 = vsel %vm1875_vm4, %v5355_v37, %v17249_v40 }
 0x476   : > { %5050 = vst [vmem:[#allocation4 + $0xd0] sm:$0xff] %v17262_v42  ;;  %v13987_v3 = vadd.f32 %v4848_v50, %v13732_v30  ;;  %v4850_v55 = vpop.f32.mrb[27].mxu1 }
 0x477   : > { %5051 = vst [vmem:[#allocation4 + $0xd8] sm:$0xff] %v17264_v48  ;;  %v13992_v13 = vadd.f32 %v4850_v55, %v13735_v34 }
 0x478   : > { %v17260_v17 = vmax.f32 %v13987_v3, 0.0 }
 0x479   : > { %v17261_v21 = vmax.f32 %v13992_v13, 0.0  ;;  %v4854_v23 = vpop.f32.mrb[28].mxu1 }
 0x47a   : > { %5052 = vst [vmem:[#allocation4 + $0xe0] sm:$0xff] %v17260_v17  ;;  %v13999_v31 = vadd.f32 %v4854_v23, %v13732_v30  ;;  %v4856_v43 = vpop.f32.mrb[29].mxu1 }
 0x47b   : > { %5053 = vst [vmem:[#allocation4 + $0xe8] sm:$0xff] %v17261_v21  ;;  %v14004_v57 = vadd.f32 %v4856_v43, %v13735_v34 }
 0x47c   : > { %v17256_v14 = vmax.f32 %v13999_v31, 0.0 }
 0x47d   : > { %v17257_v25 = vmax.f32 %v14004_v57, 0.0  ;;  %v4860_v37 = vpop.f32.mrb[30].mxu1 }
 0x47e   : > { %5054 = vst [vmem:[#allocation4 + $0xf0] sm:$0xff] %v17256_v14  ;;  %v14011_v7 = vadd.f32 %v4860_v37, %v13732_v30  ;;  %v4862_v2 = vpop.f32.mrb[31].mxu1 }
 0x47f   : > { %5055 = vst [vmem:[#allocation4 + $0xf8] sm:$0xff] %v17257_v25  ;;  %v14016_v50 = vadd.f32 %v4862_v2, %v13735_v34 }
 0x480   : > { %v17254_v55 = vmax.f32 %v14011_v7, 0.0 }
 0x481   : > { %v17255_v23 = vmax.f32 %v14016_v50, 0.0  ;;  %v4866_v43 = vpop.f32.mrb[32].mxu1 }
 0x482   : > { %5056 = vst [vmem:[#allocation4 + $0x100] sm:$0xff] %v17254_v55  ;;  %v11350_v45 = vadd.f32 %v4866_v43, %v13732_v30  ;;  %v4868_v33 = vpop.f32.mrb[33].mxu1 }
 0x483   : > { %5057 = vst [vmem:[#allocation4 + $0x108] sm:$0xff] %v17255_v23  ;;  %v11351_v37 = vadd.f32 %v4868_v33, %v13735_v34 }
 0x484   : > { %v4993_v54 = vmax.f32 %v11350_v45, 0.0 }
 0x485   : > { %v4994_v4 = vmax.f32 %v11351_v37, 0.0  ;;  %v4872_v2 = vpop.f32.mrb[34].mxu1 }
 0x486   : > { %5059 = vst [vmem:[#allocation4 + $0x120] sm:$0xff] %v4993_v54  ;;  %v11352_v40 = vadd.f32 %v4872_v2, %v13732_v30  ;;  %v4874_v12 = vpop.f32.mrb[35].mxu1 }
 0x487   : > { %5060 = vst [vmem:[#allocation4 + $0x128] sm:$0xff] %v4994_v4  ;;  %v11353_v35 = vadd.f32 %v4874_v12, %v13735_v34  ;;  %6308 = vmatprep.mubr.f32.mxu0 %v4994_v4 }
 0x488   : > { %v14028_v36 = vmax.f32 %v11352_v40, 0.0  ;;  %6309 = vmatmul.mubr.f32.gmra.mrb[144].mxu0 %v4993_v54 }
 0x489   : > { %v14030_v43 = vmax.f32 %v11353_v35, 0.0  ;;  %v4878_v28 = vpop.f32.mrb[36].mxu1 }
 0x48a   : > { %5061 = vst [vmem:[#allocation4 + $0x130] sm:$0xff] %v14028_v36  ;;  %v11354_v45 = vadd.f32 %v4878_v28, %v13732_v30  ;;  %v4880_v33 = vpop.f32.mrb[37].mxu1  ;;  %v17258_v40 = vrot.slane %v14028_v36, 1 }
 0x48b   : > { %5062 = vst [vmem:[#allocation4 + $0x138] sm:$0xff] %v14030_v43  ;;  %v11355_v37 = vadd.f32 %v4880_v33, %v13735_v34  ;;  %6313 = vmatprep.mubr.f32.mxu0 %v14030_v43  ;;  %v17259_v33 = vrot.slane %v14030_v43, 1 }
 0x48c   : > { %v4997_v2 = vmax.f32 %v11354_v45, 0.0  ;;  %6314 = vmatmul.mubr.f32.gmra.mrb[146].mxu0 %v14028_v36 }
 0x48d   : > { %v4998_v12 = vmax.f32 %v11355_v37, 0.0  ;;  %v4884_v4 = vpop.f32.mrb[38].mxu1 }
 0x48e   : > { %5063 = vst [vmem:[#allocation4 + $0x140] sm:$0xff] %v4997_v2  ;;  %v11356_v54 = vadd.f32 %v4884_v4, %v13732_v30  ;;  %v4886_v35 = vpop.f32.mrb[39].mxu1  ;;  %v5547_v55 = vrot.slane %v4997_v2, 1 }
 0x48f   : > { %5064 = vst [vmem:[#allocation4 + $0x148] sm:$0xff] %v4998_v12  ;;  %v11357_v28 = vadd.f32 %v4886_v35, %v13735_v34  ;;  %6318 = vmatprep.mubr.f32.mxu0 %v4998_v12  ;;  %v5549_v23 = vrot.slane %v4998_v12, 1 }
 0x490   : > { %v14042_v14 = vmax.f32 %v11356_v54, 0.0  ;;  %6319 = vmatmul.mubr.f32.gmra.mrb[148].mxu0 %v4997_v2  ;;  %v14047_v45 = vsel %vm1875_vm4, %v17258_v40, %v5547_v55 }
 0x491   : > { %v14049_v37 = vmax.f32 %v11357_v28, 0.0  ;;  %v4890_v4 = vpop.f32.mrb[40].mxu1  ;;  %v14054_v25 = vsel %vm1875_vm4, %v17259_v33, %v5549_v23 }
 0x492   : > { %17309 = vst [vmem:[#allocation9_spill] sm:$0xff] %v14042_v14  ;;  %5065 = vst [vmem:[#allocation4 + $0x150] sm:$0xff] %v14042_v14  ;;  %v14058_v12 = vadd.f32 %v4890_v4, %v13732_v30  ;;  %v4892_v54 = vpop.f32.mrb[41].mxu1  ;;  %v17263_v2 = vrot.slane %v14042_v14, 1 }
 0x493   : > { %17310 = vst [vmem:[#allocation10_spill] sm:$0xff] %v14049_v37  ;;  %5066 = vst [vmem:[#allocation4 + $0x158] sm:$0xff] %v14049_v37  ;;  %v14063_v35 = vadd.f32 %v4892_v54, %v13735_v34  ;;  %6323 = vmatprep.mubr.f32.mxu0 %v14049_v37  ;;  %v17266_v28 = vrot.slane %v14049_v37, 1  ;;  %v17320_v37 = vmax.f32 %v13816_v26, 0.0  ;;  %v6104_v26 = vld [vmem:[%s17236_s7 + $0x218] sm:$0xff] }
 0x494   : > { %v17267_v40 = vmax.f32 %v14058_v12, 0.0  ;;  %6324 = vmatmul.mubr.f32.gmra.mrb[150].mxu0 %v14042_v14  ;;  %v14072_v4 = vsel %vm1875_vm4, %v5547_v55, %v17263_v2 }
 0x495   : > { %17311 = vst [vmem:[#allocation11_spill] sm:$0xff] %v14072_v4  ;;  %v17268_v33 = vmax.f32 %v14063_v35, 0.0  ;;  %v4896_v17 = vpop.f32.mrb[42].mxu1  ;;  %v14078_v54 = vsel %vm1875_vm4, %v5549_v23, %v17266_v28 }
 0x496   : > { %17312 = vst [vmem:[#allocation12_spill] sm:$0xff] %v14078_v54  ;;  %5067 = vst [vmem:[#allocation4 + $0x160] sm:$0xff] %v17267_v40  ;;  %v14083_v21 = vadd.f32 %v4896_v17, %v13732_v30  ;;  %v4898_v42 = vpop.f32.mrb[43].mxu1 }
 0x497   : > { %5068 = vst [vmem:[#allocation4 + $0x168] sm:$0xff] %v17268_v33  ;;  %v14088_v55 = vadd.f32 %v4898_v42, %v13735_v34 }
 0x498   : > { %v17269_v2 = vmax.f32 %v14083_v21, 0.0 }
 0x499   : > { %v17270_v48 = vmax.f32 %v14088_v55, 0.0  ;;  %v4902_v19 = vpop.f32.mrb[44].mxu1 }
 0x49a   : > { %5069 = vst [vmem:[#allocation4 + $0x170] sm:$0xff] %v17269_v2  ;;  %v14095_v23 = vadd.f32 %v4902_v19, %v13732_v30  ;;  %v4904_v17 = vpop.f32.mrb[45].mxu1 }
 0x49b   : > { %5070 = vst [vmem:[#allocation4 + $0x178] sm:$0xff] %v17270_v48  ;;  %v14100_v28 = vadd.f32 %v4904_v17, %v13735_v34 }
 0x49c   : > { %v17273_v42 = vmax.f32 %v14095_v23, 0.0 }
 0x49d   : > { %v17275_v40 = vmax.f32 %v14100_v28, 0.0  ;;  %v4908_v33 = vpop.f32.mrb[46].mxu1 }
 0x49e   : > { %5071 = vst [vmem:[#allocation4 + $0x180] sm:$0xff] %v17273_v42  ;;  %v14107_v2 = vadd.f32 %v4908_v33, %v13732_v30  ;;  %v4910_v19 = vpop.f32.mrb[47].mxu1 }
 0x49f   : > { %5072 = vst [vmem:[#allocation4 + $0x188] sm:$0xff] %v17275_v40  ;;  %v14112_v48 = vadd.f32 %v4910_v19, %v13735_v34 }
 0x4a0   : > { %v17280_v17 = vmax.f32 %v14107_v2, 0.0 }
 0x4a1   : > { %v17283_v20 = vmax.f32 %v14112_v48, 0.0  ;;  %v4914_v59 = vpop.f32.mrb[48].mxu1 }
 0x4a2   : > { %5073 = vst [vmem:[#allocation4 + $0x190] sm:$0xff] %v17280_v17  ;;  %v11366_v42 = vadd.f32 %v4914_v59, %v13732_v30  ;;  %v4916_v1 = vpop.f32.mrb[49].mxu1 }
 0x4a3   : > { %5074 = vst [vmem:[#allocation4 + $0x198] sm:$0xff] %v17283_v20  ;;  %v11367_v33 = vadd.f32 %v4916_v1, %v13735_v34 }
 0x4a4   : > { %v5009_v40 = vmax.f32 %v11366_v42, 0.0 }
 0x4a5   : > { %v5010_v8 = vmax.f32 %v11367_v33, 0.0  ;;  %v4920_v19 = vpop.f32.mrb[50].mxu1 }
 0x4a6   : > { %5076 = vst [vmem:[#allocation4 + $0x1b0] sm:$0xff] %v5009_v40  ;;  %v11368_v10 = vadd.f32 %v4920_v19, %v13732_v30  ;;  %v4922_v38 = vpop.f32.mrb[51].mxu1 }
 0x4a7   : > { %5077 = vst [vmem:[#allocation4 + $0x1b8] sm:$0xff] %v5010_v8  ;;  %v11369_v39 = vadd.f32 %v4922_v38, %v13735_v34  ;;  %6328 = vmatprep.mubr.f32.mxu0 %v5010_v8 }
 0x4a8   : > { %v14124_v17 = vmax.f32 %v11368_v10, 0.0  ;;  %6329 = vmatmul.mubr.f32.gmra.mrb[152].mxu0 %v5009_v40 }
 0x4a9   : > { %v14126_v59 = vmax.f32 %v11369_v39, 0.0  ;;  %v4926_v47 = vpop.f32.mrb[52].mxu1 }
 0x4aa   : > { %17313 = vst [vmem:[#allocation13_spill] sm:$0xff] %v14124_v17  ;;  %5078 = vst [vmem:[#allocation4 + $0x1c0] sm:$0xff] %v14124_v17  ;;  %v11370_v1 = vadd.f32 %v4926_v47, %v13732_v30  ;;  %v4928_v42 = vpop.f32.mrb[53].mxu1  ;;  %v17285_v40 = vrot.slane %v14124_v17, 1 }
 0x4ab   : > { %17314 = vst [vmem:[#allocation14_spill] sm:$0xff] %v14126_v59  ;;  %5079 = vst [vmem:[#allocation4 + $0x1c8] sm:$0xff] %v14126_v59  ;;  %v11371_v33 = vadd.f32 %v4928_v42, %v13735_v34  ;;  %6333 = vmatprep.mubr.f32.mxu0 %v14126_v59  ;;  %v17286_v42 = vrot.slane %v14126_v59, 1 }
 0x4ac   : > { %v5013_v19 = vmax.f32 %v11370_v1, 0.0  ;;  %6334 = vmatmul.mubr.f32.gmra.mrb[154].mxu0 %v14124_v17  ;;  %v6103_v17 = vld [vmem:[%s17236_s7 + $0x210] sm:$0xff] }
 0x4ad   : > { %v5014_v38 = vmax.f32 %v11371_v33, 0.0  ;;  %v4932_v8 = vpop.f32.mrb[54].mxu1 }
 0x4ae   : > { %5080 = vst [vmem:[#allocation4 + $0x1d0] sm:$0xff] %v5013_v19  ;;  %v11372_v39 = vadd.f32 %v4932_v8, %v13732_v30  ;;  %v4934_v10 = vpop.f32.mrb[55].mxu1  ;;  %v5741_v20 = vrot.slane %v5013_v19, 1 }
 0x4af   : > { %5081 = vst [vmem:[#allocation4 + $0x1d8] sm:$0xff] %v5014_v38  ;;  %v11373_v47 = vadd.f32 %v4934_v10, %v13735_v34  ;;  %6338 = vmatprep.mubr.f32.mxu0 %v5014_v38  ;;  %v5743_v62 = vrot.slane %v5014_v38, 1  ;;  %v6102_v10 = vld [vmem:[%s17236_s7 + $0x208] sm:$0xff] }
 0x4b0   : > { %v14138_v9 = vmax.f32 %v11372_v39, 0.0  ;;  %6339 = vmatmul.mubr.f32.gmra.mrb[156].mxu0 %v5013_v19  ;;  %v14143_v1 = vsel %vm1875_vm4, %v17285_v40, %v5741_v20  ;;  %v6101_v19 = vld [vmem:[%s17236_s7 + $0x200] sm:$0xff] }
 0x4b1   : > { %17316 = vst [vmem:[#allocation16_spill] sm:$0xff] %v14143_v1  ;;  %v14145_v33 = vmax.f32 %v11373_v47, 0.0  ;;  %v4938_v8 = vpop.f32.mrb[56].mxu1  ;;  %v14150_v14 = vsel %vm1875_vm4, %v17286_v42, %v5743_v62  ;;  %v6120_v42 = vld [vmem:[%s17236_s7 + $0x298] sm:$0xff]  ;;  %v10935_v4 = vpack.c.bf16 %v6102_v10, %v6101_v19  ;;  %v17322_v10 = vmax.f32 %v13806_v60, 0.0  ;;  %v6105_v60 = vld [vmem:[%s17236_s7 + $0x220] sm:$0xff] }
 0x4b2   : > { %17315 = vst [vmem:[#allocation15_spill] sm:$0xff] %v14138_v9  ;;  %17318 = vst [vmem:[#allocation18_spill] sm:$0xff] %v14150_v14  ;;  %v14154_v38 = vadd.f32 %v4938_v8, %v13732_v30  ;;  %v4940_v39 = vpop.f32.mrb[57].mxu1  ;;  %v17291_v47 = vrot.slane %v14138_v9, 1  ;;  %v6119_v8 = vld [vmem:[%s17236_s7 + $0x290] sm:$0xff] }
 0x4b3   : > { %17317 = vst [vmem:[#allocation17_spill] sm:$0xff] %v14145_v33  ;;  %5082 = vst [vmem:[#allocation4 + $0x1e0] sm:$0xff] %v14138_v9  ;;  %v14165_v40 = vadd.f32 %v4940_v39, %v13735_v34  ;;  %6343 = vmatprep.mubr.f32.mxu0 %v14145_v33  ;;  %v17292_v1 = vrot.slane %v14145_v33, 1 }
 0x4b4   : > { %5083 = vst [vmem:[#allocation4 + $0x1e8] sm:$0xff] %v14145_v33  ;;  %v17293_v14 = vmax.f32 %v14154_v38, 0.0  ;;  %6344 = vmatmul.mubr.f32.gmra.mrb[158].mxu0 %v14138_v9  ;;  %v14180_v39 = vsel %vm1875_vm4, %v5741_v20, %v17291_v47  ;;  %v10937_v47 = vpack.c.bf16 %v6120_v42, %v6119_v8  ;;  %v6122_v42 = vld [vmem:[%s17236_s7 + $0x2a8] sm:$0xff] }
 0x4b5   : > { %17319 = vst [vmem:[#allocation19_spill] sm:$0xff] %v14180_v39  ;;  %v4944_v59 = vpop.f32.mrb[58].mxu1  ;;  %6413 = vmatprep.mubr.f32.mxu0 %v17320_v37  ;;  %v14188_v54 = vsel %vm1875_vm4, %v5743_v62, %v17292_v1  ;;  %v17321_v37 = vmax.f32 %v14165_v40, 0.0 }
 0x4b6   : > { %5084 = vst [vmem:[#allocation4 + $0x1f0] sm:$0xff] %v17293_v14  ;;  %v14193_v9 = vadd.f32 %v4944_v59, %v13732_v30  ;;  %v4946_v20 = vpop.f32.mrb[59].mxu1  ;;  %v6121_v59 = vld [vmem:[%s17236_s7 + $0x2a0] sm:$0xff] }
 0x4b7   : > { %5085 = vst [vmem:[#allocation4 + $0x1f8] sm:$0xff] %v17321_v37  ;;  %v14204_v62 = vadd.f32 %v4946_v20, %v13735_v34  ;;  %v17323_v37 = vmax.f32 %v13853_v58, 0.0  ;;  %v10939_v20 = vpack.c.bf16 %v6104_v26, %v6103_v17  ;;  %v10941_v39 = vpack.c.bf16 %v6122_v42, %v6121_v59  ;;  %v6106_v58 = vld [vmem:[%s17236_s7 + $0x228] sm:$0xff]  ;;  %v6123_v17 = vld [vmem:[%s17236_s7 + $0x2b0] sm:$0xff] }
 0x4b8   : > { %v17295_v19 = vmax.f32 %v14193_v9, 0.0  ;;  %6414 = vmatmul.mubr.f32.vlgmr.msra.gmra.mrb[160].mxu0 %v17322_v10  ;;  %v17324_v26 = vmax.f32 %v13840_v52, 0.0  ;;  %v17325_v10 = vmax.f32 %v13885_v41, 0.0  ;;  %v6107_v52 = vld [vmem:[%s17236_s7 + $0x230] sm:$0xff]  ;;  %v6108_v41 = vld [vmem:[%s17236_s7 + $0x238] sm:$0xff] }
 0x4b9   : > { %v17296_v8 = vmax.f32 %v14204_v62, 0.0  ;;  %v4950_v1 = vpop.f32.mrb[60].mxu1  ;;  %6418 = vmatprep.mubr.f32.mxu0 %v17323_v37  ;;  %10936 = vmatpush3.bf16.msra.mxu0 %v10935_v4 }
 0x4ba   : > { %5086 = vst [vmem:[#allocation4 + $0x200] sm:$0xff] %v17295_v19  ;;  %v14221_v14 = vadd.f32 %v4950_v1, %v13732_v30  ;;  %v4952_v33 = vpop.f32.mrb[61].mxu1  ;;  %10938 = vmatprep.subr.bf16.mxu0 %v10937_v47  ;;  %v6124_v1 = vld [vmem:[%s17236_s7 + $0x2b8] sm:$0xff] }
 0x4bb   : > { %5087 = vst [vmem:[#allocation4 + $0x208] sm:$0xff] %v17296_v8  ;;  %v14232_v4 = vadd.f32 %v4952_v33, %v13735_v34  ;;  %v10943_v33 = vpack.c.bf16 %v6106_v58, %v6105_v60  ;;  %v10945_v8 = vpack.c.bf16 %v6124_v1, %v6123_v17  ;;  %v17326_v58 = vmax.f32 %v13873_v16, 0.0  ;;  %v6110_v16 = vld [vmem:[%s17236_s7 + $0x248] sm:$0xff] }
 0x4bc   : > { %v5021_v47 = vmax.f32 %v14221_v14, 0.0  ;;  %6419 = vmatmul.mubr.f32.gmra.mrb[162].mxu0 %v17324_v26  ;;  %v17327_v1 = vmax.f32 %v13914_v6, 0.0  ;;  %v6109_v26 = vld [vmem:[%s17236_s7 + $0x240] sm:$0xff]  ;;  %v6127_v6 = vld [vmem:[%s17236_s7 + $0x2d0] sm:$0xff] }
 0x4bd   : > { %v5022_v59 = vmax.f32 %v14232_v4, 0.0  ;;  %v4956_v42 = vpop.f32.mrb[62].mxu1  ;;  %6423 = vmatprep.mubr.f32.mxu0 %v17325_v10  ;;  %10940 = vmatpush3.bf16.msra.mxu0 %v10939_v20  ;;  %v17329_v10 = vmax.f32 %v13967_v27, 0.0  ;;  %v6130_v27 = vld [vmem:[%s17236_s7 + $0x2e8] sm:$0xff]  ;;  %v6151_v14 = vld [vmem:[%s17236_s7 + $0x390] sm:$0xff]  ;;  %v17349_v4 = vrot.slane %v13765_v11, 1 }
 0x4be   : > { %5088 = vst [vmem:[#allocation4 + $0x210] sm:$0xff] %v5021_v47  ;;  %v14249_v37 = vadd.f32 %v4956_v42, %v13732_v30  ;;  %v4958_v19 = vpop.f32.mrb[63].mxu1  ;;  %10942 = vmatprep.subr.bf16.mxu0 %v10941_v39  ;;  %v6125_v30 = vld [vmem:[%s17236_s7 + $0x2c0] sm:$0xff]  ;;  %v6126_v39 = vld [vmem:[%s17236_s7 + $0x2c8] sm:$0xff]  ;;  %v17328_v42 = vmax.f32 %v13903_v22, 0.0 }
 0x4bf   : > { %5089 = vst [vmem:[#allocation4 + $0x218] sm:$0xff] %v5022_v59  ;;  %v14260_v20 = vadd.f32 %v4958_v19, %v13735_v34  ;;  %v10947_v34 = vpack.c.bf16 %v6108_v41, %v6107_v52  ;;  %v10949_v19 = vpack.c.bf16 %v6126_v39, %v6125_v30  ;;  %v6111_v41 = vld [vmem:[%s17236_s7 + $0x250] sm:$0xff]  ;;  %v6112_v30 = vld [vmem:[%s17236_s7 + $0x258] sm:$0xff]  ;;  %v6129_v22 = vld [vmem:[%s17236_s7 + $0x2e0] sm:$0xff]  ;;  %v17330_v39 = vmax.f32 %v13962_v63, 0.0 }
 0x4c0   : > { %v5023_v60 = vmax.f32 %v14249_v37, 0.0  ;;  %6424 = vmatmul.mubr.f32.gmra.mrb[164].mxu0 %v17326_v58  ;;  %v17331_v58 = vmax.f32 %v13992_v13, 0.0  ;;  %v6131_v63 = vld [vmem:[%s17236_s7 + $0x2f0] sm:$0xff]  ;;  %v6132_v13 = vld [vmem:[%s17236_s7 + $0x2f8] sm:$0xff]  ;;  %v5158_v37 = vrot.slane %v13830_v44, 1  ;;  %v6153_v11 = vld [vmem:[%s17236_s7 + $0x3a0] sm:$0xff] }
 0x4c1   : > { %v5024_v17 = vmax.f32 %v14260_v20, 0.0  ;;  %6428 = vmatprep.mubr.f32.mxu0 %v17327_v1  ;;  %10944 = vmatpush3.bf16.msra.mxu0 %v10943_v33  ;;  %v10951_v33 = vpack.c.bf16 %v6110_v16, %v6109_v26  ;;  %v10955_v1 = vpack.c.bf16 %v6112_v30, %v6111_v41  ;;  %v6114_v26 = vld [vmem:[%s17236_s7 + $0x268] sm:$0xff]  ;;  %v17332_v16 = vmax.f32 %v13987_v3, 0.0  ;;  %v6149_v3 = vld [vmem:[%s17236_s7 + $0x380] sm:$0xff] }
 0x4c2   : > { %5090 = vst [vmem:[#allocation4 + $0x220] sm:$0xff] %v5023_v60  ;;  %10946 = vmatprep.subr.bf16.mxu0 %v10945_v8  ;;  %v6128_v8 = vld [vmem:[%s17236_s7 + $0x2d8] sm:$0xff]  ;;  %v17335_v41 = vmax.f32 %v14016_v50, 0.0  ;;  %v17340_v50 = vmax.f32 %v14083_v21, 0.0  ;;  %v17347_v21 = vmax.f32 %v14204_v62, 0.0  ;;  %v6137_v44 = vld [vmem:[%s17236_s7 + $0x320] sm:$0xff] }
 0x4c3   : > { %5091 = vst [vmem:[#allocation4 + $0x228] sm:$0xff] %v5024_v17  ;;  %v10953_v52 = vpack.c.bf16 %v6128_v8, %v6127_v6  ;;  %v17333_v6 = vmax.f32 %v14004_v57, 0.0  ;;  %v6150_v57 = vld [vmem:[%s17236_s7 + $0x388] sm:$0xff]  ;;  %v6152_v62 = vld [vmem:[%s17236_s7 + $0x398] sm:$0xff] }
 0x4c4   : > { %6429 = vmatmul.mubr.f32.gmra.mrb[166].mxu0 %v17328_v42  ;;  %v10961_v42 = vpack.c.bf16 %v6132_v13, %v6131_v63  ;;  %v5141_v13 = vld [vmem:[#allocation4 + $0x48] sm:$0x1] }
 0x4c5   : > { %6433 = vmatprep.mubr.f32.mxu0 %v17329_v10  ;;  %10948 = vmatpush3.bf16.msra.mxu0 %v10947_v34  ;;  %v10957_v34 = vpack.c.bf16 %v6130_v27, %v6129_v22  ;;  %v6115_v10 = vld [vmem:[%s17236_s7 + $0x270] sm:$0xff]  ;;  %v10965_v22 = vpack.c.bf16 %v6150_v57, %v6149_v3  ;;  %v17336_v27 = vmax.f32 %v14011_v7, 0.0  ;;  %v17342_v7 = vmax.f32 %v14095_v23, 0.0  ;;  %v5132_v23 = vld [vmem:[#allocation4] sm:$0xfe] }
 0x4c6   : > { %10950 = vmatprep.subr.bf16.mxu0 %v10949_v19  ;;  %v6113_v19 = vld [vmem:[%s17236_s7 + $0x260] sm:$0xff]  ;;  %v5168_v3 = vrot.slane %v5141_v13, 1 }
 0x4c7   : > { %v10959_v8 = vpack.c.bf16 %v6114_v26, %v6113_v19  ;;  %v6135_v19 = vld [vmem:[%s17236_s7 + $0x310] sm:$0xff]  ;;  %v6136_v26 = vld [vmem:[%s17236_s7 + $0x318] sm:$0xff]  ;;  %v5140_v57 = vld [vmem:[#allocation4 + $0x40] sm:$0x1] }
 0x4c8   : > { %6434 = vmatmul.mubr.f32.gmra.mrb[168].mxu0 %v17330_v39  ;;  %v17337_v39 = vmax.f32 %v14063_v35, 0.0  ;;  %v17343_v35 = vmax.f32 %v14112_v48, 0.0  ;;  %v5133_v48 = vld [vmem:[#allocation4 + $0x8] sm:$0xfe] }
 0x4c9   : > { %6438 = vmatprep.mubr.f32.mxu0 %v17331_v58  ;;  %10952 = vmatpush3.bf16.msra.mxu0 %v10951_v33  ;;  %v6116_v33 = vld [vmem:[%s17236_s7 + $0x278] sm:$0xff]  ;;  %v17338_v58 = vmax.f32 %v14058_v12, 0.0  ;;  %v17345_v12 = vmax.f32 %v14165_v40, 0.0  ;;  %v6133_v40 = vld [vmem:[%s17236_s7 + $0x300] sm:$0xff] }
 0x4ca   : > { %10954 = vmatprep.subr.bf16.mxu0 %v10953_v52  ;;  %v17334_v52 = vmax.f32 %v13999_v31, 0.0  ;;  %v10963_v30 = vpack.c.bf16 %v6116_v33, %v6115_v10  ;;  %v17339_v31 = vmax.f32 %v14088_v55, 0.0  ;;  %v17346_v55 = vmax.f32 %v14154_v38, 0.0  ;;  %v6156_v33 = vld [vmem:[%s17236_s7 + $0x3b8] sm:$0xff] }
 0x4cb   : > { %v5153_v38 = vrot.slane %v13825_v29, 1  ;;  %v5162_v10 = vrot.slane %v13868_v15, 1 }
 0x4cc   : > { %6439 = vmatmul.mubr.f32.gmra.mrb[170].mxu0 %v17332_v16  ;;  %v10971_v16 = vpack.c.bf16 %v6136_v26, %v6135_v19  ;;  %v6146_v26 = vld [vmem:[%s17236_s7 + $0x368] sm:$0xff] }
 0x4cd   : > { %6443 = vmatprep.mubr.f32.mxu0 %v17333_v6  ;;  %10956 = vmatpush3.bf16.msra.mxu0 %v10955_v1  ;;  %v17341_v1 = vmax.f32 %v14100_v28, 0.0  ;;  %v17348_v28 = vmax.f32 %v14193_v9, 0.0  ;;  %v6134_v9 = vld [vmem:[%s17236_s7 + $0x308] sm:$0xff] }
 0x4ce   : > { %10958 = vmatprep.subr.bf16.mxu0 %v10957_v34  ;;  %v17344_v34 = vmax.f32 %v14107_v2, 0.0  ;;  %v5155_v2 = vrot.slane %v5133_v48, 1  ;;  %v10967_v20 = vpack.c.bf16 %v6134_v9, %v6133_v40  ;;  %v6159_v48 = vld [vmem:[%s17236_s7 + $0x3d0] sm:$0xff] }
 0x4d0   : > { %6444 = vmatmul.mubr.f32.gmra.mrb[172].mxu0 %v17334_v52  ;;  %v5328_v52 = vld [vmem:[#allocation4 + $0x98] sm:$0xfe] }
 0x4d1   : > { %6448 = vmatprep.mubr.f32.mxu0 %v17335_v41  ;;  %10960 = vmatpush3.bf16.msra.mxu0 %v10959_v8  ;;  %v6138_v8 = vld [vmem:[%s17236_s7 + $0x328] sm:$0xff] }
 0x4d2   : > { %10962 = vmatprep.subr.bf16.mxu0 %v10961_v42  ;;  %v5159_v42 = vsel %vm1875_vm4, %v5153_v38, %v5158_v37  ;;  %v10975_v41 = vpack.c.bf16 %v6138_v8, %v6137_v44  ;;  %v6148_v44 = vld [vmem:[%s17236_s7 + $0x378] sm:$0xff] }
 0x4d4   : > { %6449 = vmatmul.mubr.f32.gmra.mrb[174].mxu0 %v17336_v27  ;;  %v6140_v27 = vld [vmem:[%s17236_s7 + $0x338] sm:$0xff] }
 0x4d5   : > { %6453 = vmatprep.mubr.f32.mxu0 %v17337_v39  ;;  %10964 = vmatpush3.bf16.msra.mxu0 %v10963_v30  ;;  %v5163_v39 = vsel %vm1875_vm4, %v5158_v37, %v5162_v10 }
 0x4d6   : > { %10966 = vmatprep.subr.bf16.mxu0 %v10965_v22  ;;  %v6139_v22 = vld [vmem:[%s17236_s7 + $0x330] sm:$0xff] }
 0x4d8   : > { %6454 = vmatmul.mubr.f32.gmra.mrb[176].mxu0 %v17338_v58  ;;  %v5166_v58 = vrot.slane %v5140_v57, 1 }
 0x4d9   : > { %6458 = vmatprep.mubr.f32.mxu0 %v17339_v31  ;;  %v6158_v31 = vld [vmem:[%s17236_s7 + $0x3c8] sm:$0xff] }
 0x4dc   : > { %6459 = vmatmul.mubr.f32.gmra.mrb[178].mxu0 %v17340_v50  ;;  %v17350_v50 = vrot.slane %v13798_v5, 1 }
 0x4dd   : > { %6463 = vmatprep.mubr.f32.mxu0 %v17341_v1 }
 0x4de   : > { %v5169_v1 = vsel %vm1875_vm4, %v17350_v50, %v5168_v3  ;;  %v17357_v50 = vld [vmem:[#allocation12_spill] sm:$0xff] }
 0x4e0   : > { %6464 = vmatmul.mubr.f32.gmra.mrb[180].mxu0 %v17342_v7  ;;  %v5350_v7 = vrot.slane %v5328_v52, 1  ;;  %v17354_v52 = vrot.slane %v13946_v0, 1 }
 0x4e1   : > { %6468 = vmatprep.mubr.f32.mxu0 %v17343_v35  ;;  %v5327_v35 = vld [vmem:[#allocation4 + $0x90] sm:$0xfe] }
 0x4e2   : > { %v5347_v5 = vrot.slane %v5327_v35, 1 }
 0x4e4   : > { %6469 = vmatmul.mubr.f32.gmra.mrb[182].mxu0 %v17344_v34  ;;  %v10979_v34 = vpack.c.bf16 %v6140_v27, %v6139_v22  ;;  %v17355_v22 = vrot.slane %v14030_v43, 1 }
 0x4e5   : > { %6473 = vmatprep.mubr.f32.mxu0 %v17345_v12 }
 0x4e8   : > { %6474 = vmatmul.mubr.f32.gmra.mrb[184].mxu0 %v17346_v55  ;;  %v6141_v55 = vld [vmem:[%s17236_s7 + $0x340] sm:$0xff] }
 0x4e9   : > { %6478 = vmatprep.mubr.f32.mxu0 %v17347_v21  ;;  %v6142_v21 = vld [vmem:[%s17236_s7 + $0x348] sm:$0xff] }
 0x4ea   : > { %v10983_v9 = vpack.c.bf16 %v6142_v21, %v6141_v55 }
 0x4ec   : > { %6479 = vmatmul.mubr.f32.gmra.mrb[186].mxu0 %v17348_v28  ;;  %v5167_v28 = vsel %vm1875_vm4, %v5162_v10, %v5166_v58 }
 0x4ed   : > { %6483 = vmatprep.mubr.f32.mxu0 %v5022_v59  ;;  %v5152_v59 = vrot.slane %v5132_v23, 1  ;;  %v17351_v23 = vrot.slane %v13934_v61, 1  ;;  %v6161_v61 = vld [vmem:[%s17236_s7 + $0x3e0] sm:$0xff] }
 0x4ef   : > { %v5154_v63 = vsel %vm1875_vm4, %v5152_v59, %v5153_v38  ;;  %v5352_v40 = vsel %vm1875_vm4, %v5350_v7, %v17351_v23  ;;  %v6162_v59 = vld [vmem:[%s17236_s7 + $0x3e8] sm:$0xff] }
 0x4f0   : > { %6484 = vmatmul.mubr.f32.gmra.mrb[188].mxu0 %v5021_v47  ;;  %v5157_v47 = vsel %vm1875_vm4, %v5155_v2, %v17349_v4  ;;  %v6160_v2 = vld [vmem:[%s17236_s7 + $0x3d8] sm:$0xff]  ;;  %v17352_v4 = vrot.slane %v13932_v56, 1  ;;  %v10989_v19 = vpack.c.bf16 %v6162_v59, %v6161_v61  ;;  %v6145_v56 = vld [vmem:[%s17236_s7 + $0x360] sm:$0xff] }
 0x4f1   : > { %6488 = vmatprep.mubr.f32.mxu0 %v5024_v17  ;;  %v10969_v17 = vpack.c.bf16 %v6152_v62, %v6151_v14  ;;  %v10985_v38 = vpack.c.bf16 %v6160_v2, %v6159_v48  ;;  %v6143_v14 = vld [vmem:[%s17236_s7 + $0x350] sm:$0xff]  ;;  %v6144_v62 = vld [vmem:[%s17236_s7 + $0x358] sm:$0xff]  ;;  %v10991_v13 = vpack.c.bf16 %v6146_v26, %v6145_v56  ;;  %v17367_v56 = vld [vmem:[#allocation18_spill] sm:$0xff] }
 0x4f2   : > { %v17361_v48 = vld [vmem:[#allocation9_spill] sm:$0xff] }
 0x4f3   : > { %v17362_v2 = vrot.slane %v17361_v48, 1  ;;  %v17365_v61 = vld [vmem:[#allocation13_spill] sm:$0xff]  ;;  %v6170_v48 = vld [vmem:[%s17236_s7 + $0x428] sm:$0xff] }
 0x4f4   : > { %6489 = vmatmul.mubr.f32.gmra.mrb[190].mxu0 %v5023_v60  ;;  %v6154_v60 = vld [vmem:[%s17236_s7 + $0x3a8] sm:$0xff]  ;;  %v17366_v59 = vrot.slane %v17365_v61, 1  ;;  %v5724_v26 = vld [vmem:[#allocation4 + $0x1f8] sm:$0x1]  ;;  %v5194_v61 = vld [vmem:[#allocation4 + $0x80] sm:$0x1] }
 0x4f5   : > { %6558 = vmatprep.mubr.f32.mxu0 %v5157_v47  ;;  %v10973_v6 = vpack.c.bf16 %v6154_v60, %v6153_v11  ;;  %v5349_v47 = vsel %vm1875_vm4, %v5347_v5, %v17352_v4  ;;  %v5335_v11 = vld [vmem:[#allocation4 + $0xd0] sm:$0x1]  ;;  %v5522_v60 = vld [vmem:[#allocation4 + $0x128] sm:$0xfe] }
 0x4f6   : > { %v5361_v8 = vrot.slane %v5335_v11, 1  ;;  %v5189_v11 = vld [vmem:[#allocation4 + $0x58] sm:$0xff] }
 0x4f8   : > { %6559 = vmatmul.mubr.f32.vlgmr.msra.gmra.mrb[192].mxu0 %v5154_v63  ;;  %v6163_v63 = vld [vmem:[%s17236_s7 + $0x3f0] sm:$0xff] }
 0x4f9   : > { %6563 = vmatprep.mubr.f32.mxu0 %v13803_v18  ;;  %10968 = vmatpush3.bf16.msra.mxu0 %v10967_v20  ;;  %v6155_v18 = vld [vmem:[%s17236_s7 + $0x3b0] sm:$0xff]  ;;  %v5336_v20 = vld [vmem:[#allocation4 + $0xd8] sm:$0x1] }
 0x4fa   : > { %10970 = vmatprep.subr.bf16.mxu0 %v10969_v17  ;;  %v10977_v30 = vpack.c.bf16 %v6156_v33, %v6155_v18  ;;  %v10987_v17 = vpack.c.bf16 %v6144_v62, %v6143_v14  ;;  %v5363_v37 = vrot.slane %v5336_v20, 1  ;;  %v5544_v18 = vrot.slane %v5522_v60, 1  ;;  %v5521_v33 = vld [vmem:[#allocation4 + $0x120] sm:$0xfe] }
 0x4fc   : > { %6564 = vmatmul.mubr.f32.gmra.mrb[194].mxu0 %v5159_v42  ;;  %v17353_v42 = vrot.slane %v13953_v53, 1  ;;  %v17356_v53 = vrot.slane %v14028_v36, 1 }
 0x4fd   : > { %6568 = vmatprep.mubr.f32.mxu0 %v13835_v49  ;;  %10972 = vmatpush3.bf16.msra.mxu0 %v10971_v16  ;;  %v6157_v49 = vld [vmem:[%s17236_s7 + $0x3c0] sm:$0xff] }
 0x4fe   : > { %10974 = vmatprep.subr.bf16.mxu0 %v10973_v6  ;;  %v10981_v12 = vpack.c.bf16 %v6158_v31, %v6157_v49  ;;  %v6147_v6 = vld [vmem:[%s17236_s7 + $0x370] sm:$0xff]  ;;  %v5364_v10 = vsel %vm1875_vm4, %v17353_v42, %v5363_v37  ;;  %v5529_v31 = vld [vmem:[#allocation4 + $0x160] sm:$0x1]  ;;  %v5191_v42 = vld [vmem:[#allocation4 + $0x68] sm:$0xff] }
 0x4ff   : > { %v10995_v3 = vpack.c.bf16 %v6148_v44, %v6147_v6  ;;  %v5555_v35 = vrot.slane %v5529_v31, 1  ;;  %v5723_v37 = vld [vmem:[#allocation4 + $0x1f0] sm:$0x1]  ;;  %v17370_v6 = vld [vmem:[#allocation17_spill] sm:$0xff] }
 0x500   : > { %6569 = vmatmul.mubr.f32.gmra.mrb[196].mxu0 %v5163_v39  ;;  %v5530_v39 = vld [vmem:[#allocation4 + $0x168] sm:$0x1]  ;;  %v5749_v60 = vrot.slane %v5723_v37, 1  ;;  %v17371_v44 = vrot.slane %v17370_v6, 1  ;;  %v6167_v31 = vld [vmem:[%s17236_s7 + $0x410] sm:$0xff] }
 0x501   : > { %6573 = vmatprep.mubr.f32.mxu0 %v5169_v1  ;;  %10976 = vmatpush3.bf16.msra.mxu0 %v10975_v41  ;;  %v5362_v41 = vsel %vm1875_vm4, %v17354_v52, %v5361_v8  ;;  %v5557_v49 = vrot.slane %v5530_v39, 1  ;;  %v5716_v1 = vld [vmem:[#allocation4 + $0x1b8] sm:$0xfe]  ;;  %v5556_v23 = vsel %vm1875_vm4, %v17362_v2, %v5555_v35  ;;  %v6185_v35 = vld [vmem:[%s17236_s7 + $0x4a0] sm:$0xff] }
 0x502   : > { %10978 = vmatprep.subr.bf16.mxu0 %v10977_v30  ;;  %v5541_v30 = vrot.slane %v5521_v33, 1  ;;  %v5738_v21 = vrot.slane %v5716_v1, 1  ;;  %v6165_v33 = vld [vmem:[%s17236_s7 + $0x400] sm:$0xff] }
 0x504   : > { %6574 = vmatmul.mubr.f32.gmra.mrb[198].mxu0 %v5167_v28  ;;  %v5543_v27 = vsel %vm1875_vm4, %v5541_v30, %v17356_v53  ;;  %v5715_v28 = vld [vmem:[#allocation4 + $0x1b0] sm:$0xfe]  ;;  %v5214_v53 = vrot.slane %v5191_v42, 1  ;;  %v5386_v42 = vld [vmem:[#allocation4 + $0xf8] sm:$0xff] }
 0x505   : > { %6578 = vmatprep.mubr.f32.mxu0 %v5352_v40  ;;  %10980 = vmatpush3.bf16.msra.mxu0 %v10979_v34  ;;  %v17358_v34 = vld [vmem:[#allocation11_spill] sm:$0xff]  ;;  %v5735_v40 = vrot.slane %v5715_v28, 1  ;;  %v6183_v30 = vld [vmem:[%s17236_s7 + $0x490] sm:$0xff] }
 0x506   : > { %10982 = vmatprep.subr.bf16.mxu0 %v10981_v12  ;;  %v17359_v12 = vld [vmem:[#allocation10_spill] sm:$0xff] }
 0x507   : > { %v17360_v55 = vrot.slane %v17359_v12, 1  ;;  %v5737_v20 = vsel %vm1875_vm4, %v5735_v40, %v17366_v59 }
 0x508   : > { %6579 = vmatmul.mubr.f32.gmra.mrb[200].mxu0 %v5349_v47 }
 0x509   : > { %6583 = vmatprep.mubr.f32.mxu0 %v13958_v24  ;;  %10984 = vmatpush3.bf16.msra.mxu0 %v10983_v9  ;;  %v6164_v24 = vld [vmem:[%s17236_s7 + $0x3f8] sm:$0xff] }
 0x50a   : > { %10986 = vmatprep.subr.bf16.mxu0 %v10985_v38  ;;  %v10993_v16 = vpack.c.bf16 %v6164_v24, %v6163_v63  ;;  %v17363_v38 = vld [vmem:[#allocation14_spill] sm:$0xff]  ;;  %v17368_v63 = vld [vmem:[#allocation16_spill] sm:$0xff]  ;;  %v5751_v24 = vrot.slane %v5724_v26, 1 }
 0x50b   : > { %v17364_v14 = vrot.slane %v17363_v38, 1  ;;  %v6188_v38 = vld [vmem:[%s17236_s7 + $0x4b8] sm:$0xff]  ;;  %v6171_v26 = vld [vmem:[%s17236_s7 + $0x430] sm:$0xff] }
 0x50c   : > { %6584 = vmatmul.mubr.f32.gmra.mrb[202].mxu0 %v13951_v32  ;;  %v6181_v32 = vld [vmem:[%s17236_s7 + $0x480] sm:$0xff]  ;;  %v5752_v8 = vsel %vm1875_vm4, %v17371_v44, %v5751_v24 }
 0x50d   : > { %6588 = vmatprep.mubr.f32.mxu0 %v13982_v51  ;;  %10988 = vmatpush3.bf16.msra.mxu0 %v10987_v17  ;;  %v6182_v51 = vld [vmem:[%s17236_s7 + $0x488] sm:$0xff]  ;;  %v5740_v62 = vsel %vm1875_vm4, %v5738_v21, %v17364_v14 }
 0x50e   : > { %10990 = vmatprep.subr.bf16.mxu0 %v10989_v19  ;;  %v10997_v57 = vpack.c.bf16 %v6182_v51, %v6181_v32  ;;  %v5210_v32 = vrot.slane %v5189_v11, 1  ;;  %v5188_v51 = vld [vmem:[#allocation4 + $0x50] sm:$0xff]  ;;  %v5220_v11 = vrot.slane %v5194_v61, 1 }
 0x50f   : > { %v6195_v61 = vld [vmem:[%s17236_s7 + $0x4f0] sm:$0xff] }
 0x510   : > { %6589 = vmatmul.mubr.f32.gmra.mrb[204].mxu0 %v13976_v46  ;;  %v5546_v46 = vsel %vm1875_vm4, %v5544_v18, %v17355_v22  ;;  %v5186_v18 = vld [vmem:[#allocation4 + $0x40] sm:$0xfe]  ;;  %v6184_v22 = vld [vmem:[%s17236_s7 + $0x498] sm:$0xff] }
 0x511   : > { %6593 = vmatprep.mubr.f32.mxu0 %v5364_v10  ;;  %10992 = vmatpush3.bf16.msra.mxu0 %v10991_v13  ;;  %v5187_v13 = vld [vmem:[#allocation4 + $0x48] sm:$0xfe]  ;;  %v5206_v39 = vrot.slane %v5186_v18, 1 }
 0x512   : > { %10994 = vmatprep.subr.bf16.mxu0 %v10993_v16  ;;  %v17369_v16 = vld [vmem:[#allocation19_spill] sm:$0xff]  ;;  %v5209_v10 = vrot.slane %v5187_v13, 1  ;;  %v6189_v13 = vld [vmem:[%s17236_s7 + $0x4c0] sm:$0xff] }
 0x514   : > { %6594 = vmatmul.mubr.f32.gmra.mrb[206].mxu0 %v5362_v41  ;;  %v5207_v41 = vrot.slane %v5188_v51, 1 }
 0x515   : > { %6598 = vmatprep.mubr.f32.mxu0 %v5546_v46  ;;  %10996 = vmatpush3.bf16.msra.mxu0 %v10995_v3  ;;  %v17372_v3 = vld [vmem:[#allocation15_spill] sm:$0xff]  ;;  %v5211_v46 = vsel %vm1875_vm4, %v5209_v10, %v5210_v32 }
 0x516   : > { %10998 = vmatprep.subr.bf16.mxu0 %v10997_v57  ;;  %v17373_v57 = vrot.slane %v17372_v3, 1  ;;  %v5208_v1 = vsel %vm1875_vm4, %v5206_v39, %v5207_v41  ;;  %v6173_v3 = vld [vmem:[%s17236_s7 + $0x440] sm:$0xff]  ;;  %v5409_v39 = vrot.slane %v5386_v42, 1  ;;  %v5580_v42 = vld [vmem:[#allocation4 + $0x188] sm:$0xff] }
 0x518   : > { %6599 = vmatmul.mubr.f32.gmra.mrb[208].mxu0 %v5543_v27  ;;  %v5750_v52 = vsel %vm1875_vm4, %v17373_v57, %v5749_v60  ;;  %v5190_v27 = vld [vmem:[#allocation4 + $0x60] sm:$0xff]  ;;  %v5382_v60 = vld [vmem:[#allocation4 + $0xd8] sm:$0xfe]  ;;  %v6174_v57 = vld [vmem:[%s17236_s7 + $0x448] sm:$0xff] }
 0x519   : > { %6603 = vmatprep.mubr.f32.mxu0 %v14054_v25  ;;  %v5558_v25 = vsel %vm1875_vm4, %v17360_v55, %v5557_v49  ;;  %v11001_v49 = vpack.c.bf16 %v6184_v22, %v6183_v30  ;;  %v5192_v55 = vld [vmem:[#allocation4 + $0x70] sm:$0xff]  ;;  %v5404_v18 = vrot.slane %v5382_v60, 1  ;;  %v6180_v60 = vld [vmem:[%s17236_s7 + $0x478] sm:$0xff] }
 0x51a   : > { %v5216_v40 = vrot.slane %v5192_v55, 1  ;;  %v6191_v22 = vld [vmem:[%s17236_s7 + $0x4d0] sm:$0xff]  ;;  %v6193_v55 = vld [vmem:[%s17236_s7 + $0x4e0] sm:$0xff] }
 0x51b   : > { %v9765_v0 = vpop.f32.mrb[128].mxu0 }
 0x51c   : > { %v9766_v58 = vpop.f32.mrb[129].mxu0  ;;  %6604 = vmatmul.mubr.f32.gmra.mrb[210].mxu0 %v14047_v45 }
 0x51d   : > { %v14511_v43 = vadd.f32 %v9766_v58, %v9765_v0  ;;  %6608 = vmatprep.mubr.f32.mxu0 %v17357_v50  ;;  %v5193_v0 = vld [vmem:[#allocation4 + $0x78] sm:$0xff] }
 0x51e   : > { %v6168_v50 = vld [vmem:[%s17236_s7 + $0x418] sm:$0xff]  ;;  %v5218_v12 = vrot.slane %v5193_v0, 1  ;;  %v5385_v0 = vld [vmem:[#allocation4 + $0xf0] sm:$0xff] }
 0x51f   : > { %v9768_v7 = vpop.f32.mrb[130].mxu0  ;;  %v11003_v21 = vpack.c.bf16 %v6168_v50, %v6167_v31  ;;  %v5388_v31 = vld [vmem:[#allocation4 + $0x108] sm:$0xff]  ;;  %v11015_v50 = vpack.c.bf16 %v6174_v57, %v6173_v3 }
 0x520   : > { %v9769_v36 = vpop.f32.mrb[131].mxu0  ;;  %6609 = vmatmul.mubr.f32.gmra.mrb[212].mxu0 %v17358_v34  ;;  %v5215_v34 = vsel %vm1875_vm4, %v5210_v32, %v5214_v53  ;;  %v5383_v32 = vld [vmem:[#allocation4 + $0xe0] sm:$0xff] }
 0x521   : > { %v14518_v5 = vadd.f32 %v9769_v36, %v9768_v7  ;;  %6613 = vmatprep.mubr.f32.mxu0 %v5558_v25  ;;  %v5212_v7 = vrot.slane %v5190_v27, 1  ;;  %v6186_v36 = vld [vmem:[%s17236_s7 + $0x4a8] sm:$0xff]  ;;  %v5402_v30 = vrot.slane %v5383_v32, 1  ;;  %v5577_v32 = vld [vmem:[#allocation4 + $0x170] sm:$0xff] }
 0x522   : > { %v5195_v25 = vld [vmem:[#allocation4 + $0x88] sm:$0x1]  ;;  %v11005_v28 = vpack.c.bf16 %v6186_v36, %v6185_v35  ;;  %v6176_v35 = vld [vmem:[%s17236_s7 + $0x458] sm:$0xff]  ;;  %v5596_v3 = vrot.slane %v5577_v32, 1 }
 0x523   : > { %v9771_v45 = vpop.f32.mrb[132].mxu0  ;;  %v5217_v37 = vsel %vm1875_vm4, %v5212_v7, %v5216_v40 }
 0x524   : > { %v9772_v9 = vpop.f32.mrb[133].mxu0  ;;  %6614 = vmatmul.mubr.f32.gmra.mrb[214].mxu0 %v5556_v23  ;;  %v5213_v23 = vsel %vm1875_vm4, %v5207_v41, %v5212_v7  ;;  %v5221_v41 = vsel %vm1875_vm4, %v5216_v40, %v5220_v11  ;;  %v6175_v7 = vld [vmem:[%s17236_s7 + $0x450] sm:$0xff] }
 0x525   : > { %v14526_v4 = vadd.f32 %v9772_v9, %v9771_v45  ;;  %6618 = vmatprep.mubr.f32.mxu0 %v5740_v62  ;;  %v6169_v45 = vld [vmem:[%s17236_s7 + $0x420] sm:$0xff]  ;;  %v6187_v9 = vld [vmem:[%s17236_s7 + $0x4b0] sm:$0xff]  ;;  %v5219_v62 = vsel %vm1875_vm4, %v5214_v53, %v5218_v12  ;;  %v11019_v40 = vpack.c.bf16 %v6176_v35, %v6175_v7 }
 0x526   : > { %v6179_v11 = vld [vmem:[%s17236_s7 + $0x470] sm:$0xff] }
 0x527   : > { %v9774_v47 = vpop.f32.mrb[134].mxu0 }
 0x528   : > { %v9775_v17 = vpop.f32.mrb[135].mxu0  ;;  %6619 = vmatmul.mubr.f32.gmra.mrb[216].mxu0 %v5737_v20  ;;  %v5384_v20 = vld [vmem:[#allocation4 + $0xe8] sm:$0xff] }
 0x529   : > { %v14531_v19 = vadd.f32 %v9775_v17, %v9774_v47  ;;  %6623 = vmatprep.mubr.f32.mxu0 %v17367_v56  ;;  %v5222_v47 = vrot.slane %v5195_v25, 1  ;;  %v11007_v17 = vpack.c.bf16 %v6170_v48, %v6169_v45  ;;  %v11009_v56 = vpack.c.bf16 %v6188_v38, %v6187_v9  ;;  %v6194_v25 = vld [vmem:[%s17236_s7 + $0x4e8] sm:$0xff]  ;;  %v5387_v48 = vld [vmem:[#allocation4 + $0x100] sm:$0xff] }
 0x52a   : > { %v5413_v45 = vrot.slane %v5388_v31, 1  ;;  %v11021_v9 = vpack.c.bf16 %v6194_v25, %v6193_v55  ;;  %v6177_v38 = vld [vmem:[%s17236_s7 + $0x460] sm:$0xff]  ;;  %v5772_v55 = vld [vmem:[#allocation4 + $0x208] sm:$0xff] }
 0x52b   : > { %v5223_v44 = vsel %vm1875_vm4, %v5218_v12, %v5222_v47  ;;  %v5407_v12 = vrot.slane %v5385_v0, 1  ;;  %v5411_v47 = vrot.slane %v5387_v48, 1  ;;  %v5581_v0 = vld [vmem:[#allocation4 + $0x190] sm:$0xff] }
 0x52c   : > { %6624 = vmatmul.mubr.f32.gmra.mrb[218].mxu0 %v17368_v63  ;;  %v6172_v63 = vld [vmem:[%s17236_s7 + $0x438] sm:$0xff] }
 0x52d   : > { %6628 = vmatprep.mubr.f32.mxu0 %v14188_v54  ;;  %v6166_v54 = vld [vmem:[%s17236_s7 + $0x408] sm:$0xff]  ;;  %v11011_v10 = vpack.c.bf16 %v6172_v63, %v6171_v26  ;;  %v5389_v26 = vld [vmem:[#allocation4 + $0x110] sm:$0x1]  ;;  %v5578_v63 = vld [vmem:[#allocation4 + $0x178] sm:$0xff] }
 0x52e   : > { %v10999_v58 = vpack.c.bf16 %v6166_v54, %v6165_v33  ;;  %v5381_v33 = vld [vmem:[#allocation4 + $0xd0] sm:$0xfe] }
 0x530   : > { %6629 = vmatmul.mubr.f32.gmra.mrb[220].mxu0 %v17369_v16  ;;  %v6190_v16 = vld [vmem:[%s17236_s7 + $0x4c8] sm:$0xff] }
 0x531   : > { %6633 = vmatprep.mubr.f32.mxu0 %v5752_v8  ;;  %v5405_v8 = vrot.slane %v5384_v20, 1  ;;  %v11013_v54 = vpack.c.bf16 %v6190_v16, %v6189_v13  ;;  %v6196_v20 = vld [vmem:[%s17236_s7 + $0x4f8] sm:$0xff]  ;;  %v5412_v13 = vsel %vm1875_vm4, %v5407_v12, %v5411_v47  ;;  %v5415_v16 = vrot.slane %v5389_v26, 1 }
 0x533   : > { %v5406_v27 = vsel %vm1875_vm4, %v5404_v18, %v5405_v8 }
 0x534   : > { %6634 = vmatmul.mubr.f32.gmra.mrb[222].mxu0 %v5750_v52 }
 0x535   : > { %6703 = vmatprep.mubr.f32.mxu0 %v5211_v46  ;;  %v6192_v46 = vld [vmem:[%s17236_s7 + $0x4d8] sm:$0xff] }
 0x538   : > { %6704 = vmatmul.mubr.f32.vlgmr.msra.gmra.mrb[224].mxu0 %v5208_v1  ;;  %v11017_v1 = vpack.c.bf16 %v6192_v46, %v6191_v22  ;;  %v5582_v22 = vld [vmem:[#allocation4 + $0x198] sm:$0xff] }
 0x539   : > { %6708 = vmatprep.mubr.f32.mxu0 %v5215_v34  ;;  %11000 = vmatpush3.bf16.msra.mxu0 %v10999_v58 }
 0x53a   : > { %11002 = vmatprep.subr.bf16.mxu0 %v11001_v49  ;;  %v5401_v49 = vrot.slane %v5381_v33, 1  ;;  %v5575_v33 = vld [vmem:[#allocation4 + $0x160] sm:$0xfe] }
 0x53b   : > { %v9777_v2 = vpop.f32.mrb[136].mxu0 }
 0x53c   : > { %v9778_v14 = vpop.f32.mrb[137].mxu0  ;;  %6709 = vmatmul.mubr.f32.gmra.mrb[226].mxu0 %v5213_v23  ;;  %v5403_v34 = vsel %vm1875_vm4, %v5401_v49, %v5402_v30  ;;  %v5390_v23 = vld [vmem:[#allocation4 + $0x118] sm:$0x1]  ;;  %v5584_v49 = vld [vmem:[#allocation4 + $0x1a8] sm:$0x1] }
 0x53d   : > { %v14584_v59 = vadd.f32 %v9778_v14, %v9777_v2  ;;  %6713 = vmatprep.mubr.f32.mxu0 %v5219_v62  ;;  %11004 = vmatpush3.bf16.msra.mxu0 %v11003_v21  ;;  %v6178_v14 = vld [vmem:[%s17236_s7 + $0x468] sm:$0xff]  ;;  %v5408_v62 = vsel %vm1875_vm4, %v5402_v30, %v5407_v12  ;;  %v5595_v30 = vrot.slane %v5575_v33, 1 }
 0x53e   : > { %11006 = vmatprep.subr.bf16.mxu0 %v11005_v28  ;;  %v5410_v28 = vsel %vm1875_vm4, %v5405_v8, %v5409_v39  ;;  %v5599_v8 = vrot.slane %v5578_v63, 1 }
 0x53f   : > { %v9780_v24 = vpop.f32.mrb[138].mxu0  ;;  %v5597_v46 = vsel %vm1875_vm4, %v5595_v30, %v5596_v3 }
 0x540   : > { %v9781_v6 = vpop.f32.mrb[139].mxu0  ;;  %6714 = vmatmul.mubr.f32.gmra.mrb[228].mxu0 %v5217_v37  ;;  %v11025_v37 = vpack.c.bf16 %v6196_v20, %v6195_v61 }
 0x541   : > { %v14600_v51 = vadd.f32 %v9781_v6, %v9780_v24  ;;  %6718 = vmatprep.mubr.f32.mxu0 %v5223_v44  ;;  %11008 = vmatpush3.bf16.msra.mxu0 %v11007_v17  ;;  %v5414_v17 = vsel %vm1875_vm4, %v5409_v39, %v5413_v45  ;;  %v11023_v24 = vpack.c.bf16 %v6178_v14, %v6177_v38  ;;  %v5576_v6 = vld [vmem:[#allocation4 + $0x168] sm:$0xfe]  ;;  %v5607_v39 = vrot.slane %v5582_v22, 1  ;;  %v5774_v14 = vld [vmem:[#allocation4 + $0x218] sm:$0xff] }
 0x542   : > { %11010 = vmatprep.subr.bf16.mxu0 %v11009_v56  ;;  %v5417_v56 = vrot.slane %v5390_v23, 1  ;;  %v5598_v18 = vrot.slane %v5576_v6, 1  ;;  %v5797_v63 = vrot.slane %v5774_v14, 1 }
 0x543   : > { %v9783_v52 = vpop.f32.mrb[140].mxu0 }
 0x544   : > { %v9784_v53 = vpop.f32.mrb[141].mxu0  ;;  %6719 = vmatmul.mubr.f32.gmra.mrb[230].mxu0 %v5221_v41  ;;  %v5418_v44 = vsel %vm1875_vm4, %v5413_v45, %v5417_v56  ;;  %v5600_v57 = vsel %vm1875_vm4, %v5598_v18, %v5599_v8  ;;  %v5579_v41 = vld [vmem:[#allocation4 + $0x180] sm:$0xff]  ;;  %v5770_v45 = vld [vmem:[#allocation4 + $0x1f8] sm:$0xfe]  ;;  %v5778_v18 = vld [vmem:[#allocation4 + $0x238] sm:$0x1] }
 0x545   : > { %v14616_v58 = vadd.f32 %v9784_v53, %v9783_v52  ;;  %6723 = vmatprep.mubr.f32.mxu0 %v5406_v27  ;;  %11012 = vmatpush3.bf16.msra.mxu0 %v11011_v10  ;;  %v11027_v10 = vpack.c.bf16 %v6180_v60, %v6179_v11  ;;  %v5603_v52 = vrot.slane %v5580_v42, 1  ;;  %v5601_v53 = vrot.slane %v5579_v41, 1  ;;  %v5776_v60 = vld [vmem:[#allocation4 + $0x228] sm:$0xff]  ;;  %v5775_v42 = vld [vmem:[#allocation4 + $0x220] sm:$0xff]  ;;  %v5243_v41 = vld [vmem:[#allocation4 + $0x18] sm:$0xff] }
 0x546   : > { %11014 = vmatprep.subr.bf16.mxu0 %v11013_v54  ;;  %v5416_v54 = vsel %vm1875_vm4, %v5411_v47, %v5415_v16  ;;  %v5769_v47 = vld [vmem:[#allocation4 + $0x1f0] sm:$0xfe]  ;;  %v5801_v32 = vrot.slane %v5776_v60, 1 }
 0x547   : > { %v9786_v36 = vpop.f32.mrb[142].mxu0  ;;  %v5604_v27 = vsel %vm1875_vm4, %v5599_v8, %v5603_v52  ;;  %v5608_v35 = vsel %vm1875_vm4, %v5603_v52, %v5607_v39  ;;  %v5789_v11 = vrot.slane %v5769_v47, 1  ;;  %v5777_v52 = vld [vmem:[#allocation4 + $0x230] sm:$0x1] }
 0x548   : > { %v9787_v21 = vpop.f32.mrb[143].mxu0  ;;  %6724 = vmatmul.mubr.f32.gmra.mrb[232].mxu0 %v5403_v34  ;;  %v5583_v34 = vld [vmem:[#allocation4 + $0x1a0] sm:$0x1]  ;;  %v5803_v22 = vrot.slane %v5777_v52, 1 }
 0x549   : > { %v14632_v2 = vadd.f32 %v9787_v21, %v9786_v36  ;;  %6728 = vmatprep.mubr.f32.mxu0 %v5410_v28  ;;  %11016 = vmatpush3.bf16.msra.mxu0 %v11015_v50  ;;  %v5602_v50 = vsel %vm1875_vm4, %v5596_v3, %v5601_v53  ;;  %v5611_v36 = vrot.slane %v5584_v49, 1  ;;  %v5609_v28 = vrot.slane %v5583_v34, 1  ;;  %v5240_v49 = vld [vmem:[#allocation4] sm:$0xfc] }
 0x54a   : > { %11018 = vmatprep.subr.bf16.mxu0 %v11017_v1  ;;  %v5605_v1 = vrot.slane %v5581_v0, 1  ;;  %v5802_v3 = vsel %vm1875_vm4, %v5797_v63, %v5801_v32 }
 0x54b   : > { %v5612_v23 = vsel %vm1875_vm4, %v5607_v39, %v5611_v36  ;;  %v5245_v39 = vld [vmem:[#allocation4 + $0x28] sm:$0xff]  ;;  %v17374_v36 = vrot.slane %v13825_v29, 2 }
 0x54c   : > { %6729 = vmatmul.mubr.f32.gmra.mrb[234].mxu0 %v5408_v62  ;;  %v5606_v21 = vsel %vm1875_vm4, %v5601_v53, %v5605_v1  ;;  %v5792_v62 = vrot.slane %v5770_v45, 1  ;;  %v5610_v20 = vsel %vm1875_vm4, %v5605_v1, %v5609_v28  ;;  %v5269_v1 = vrot.slane %v5245_v39, 2  ;;  %v5438_v29 = vld [vmem:[#allocation4 + $0xa8] sm:$0xff]  ;;  %v5444_v39 = vld [vmem:[#allocation4 + $0xd8] sm:$0x3] }
 0x54d   : > { %6733 = vmatprep.mubr.f32.mxu0 %v5414_v17  ;;  %11020 = vmatpush3.bf16.msra.mxu0 %v11019_v40  ;;  %v5793_v40 = vrot.slane %v5772_v55, 1 }
 0x54e   : > { %11022 = vmatprep.subr.bf16.mxu0 %v11021_v9  ;;  %v5771_v9 = vld [vmem:[#allocation4 + $0x200] sm:$0xff] }
 0x54f   : > { %v5790_v17 = vrot.slane %v5771_v9, 1  ;;  %v5794_v26 = vsel %vm1875_vm4, %v5792_v62, %v5793_v40  ;;  %v5798_v8 = vsel %vm1875_vm4, %v5793_v40, %v5797_v63  ;;  %v5248_v9 = vld [vmem:[#allocation4 + $0x40] sm:$0x3] }
 0x550   : > { %6734 = vmatmul.mubr.f32.gmra.mrb[236].mxu0 %v5412_v13  ;;  %v5275_v47 = vrot.slane %v5248_v9, 2  ;;  %v5437_v63 = vld [vmem:[#allocation4 + $0xa0] sm:$0xff] }
 0x551   : > { %6738 = vmatprep.mubr.f32.mxu0 %v5418_v44  ;;  %11024 = vmatpush3.bf16.msra.mxu0 %v11023_v24  ;;  %v5773_v24 = vld [vmem:[#allocation4 + $0x210] sm:$0xff]  ;;  %v5791_v16 = vsel %vm1875_vm4, %v5789_v11, %v5790_v17  ;;  %v5440_v11 = vld [vmem:[#allocation4 + $0xb8] sm:$0xff] }
 0x552   : > { %11026 = vmatprep.subr.bf16.mxu0 %v11025_v37  ;;  %v5795_v6 = vrot.slane %v5773_v24, 1 }
 0x554   : > { %6739 = vmatmul.mubr.f32.gmra.mrb[238].mxu0 %v5416_v54  ;;  %v5796_v33 = vsel %vm1875_vm4, %v5790_v17, %v5795_v6  ;;  %v5799_v54 = vrot.slane %v5775_v42, 1  ;;  %v17376_v17 = vld [vmem:[#allocation8_spill] sm:$0xff] }
 0x555   : > { %6743 = vmatprep.mubr.f32.mxu0 %v5600_v57  ;;  %11028 = vmatpush3.bf16.msra.mxu0 %v11027_v10  ;;  %v5805_v57 = vrot.slane %v5778_v18, 1  ;;  %v5463_v18 = vrot.slane %v5440_v11, 2 }
 0x556   : > { %v5800_v30 = vsel %vm1875_vm4, %v5795_v6, %v5799_v54  ;;  %v17377_v6 = vrot.slane %v13868_v15, 2 }
 0x557   : > { %v5806_v53 = vsel %vm1875_vm4, %v5801_v32, %v5805_v57  ;;  %v5442_v57 = vld [vmem:[#allocation4 + $0xc8] sm:$0xff] }
 0x558   : > { %6744 = vmatmul.mubr.f32.gmra.mrb[240].mxu0 %v5597_v46  ;;  %v5241_v46 = vld [vmem:[#allocation4 + $0x8] sm:$0xfc] }
 0x559   : > { %6748 = vmatprep.mubr.f32.mxu0 %v5604_v27  ;;  %v5265_v27 = vrot.slane %v5243_v41, 2  ;;  %v5264_v0 = vrot.slane %v5241_v46, 2  ;;  %v5467_v46 = vrot.slane %v5442_v57, 2  ;;  %v6946_v57 = vld [vmem:[%s17238_s9 + $0x8] sm:$0xff] }
 0x55b   : > { %v9789_v31 = vpop.f32.mrb[144].mxu0  ;;  %v5270_v55 = vsel %vm5260_vm5, %v5265_v27, %v5269_v1 }
 0x55c   : > { %v9790_v7 = vpop.f32.mrb[145].mxu0  ;;  %6749 = vmatmul.mubr.f32.gmra.mrb[242].mxu0 %v5602_v50  ;;  %v5266_v50 = vsel %vm5260_vm5, %v5264_v0, %v5265_v27  ;;  %v14707_v0 = vld [vmem:[%s17237_s8] ss:$0 sm:$0xff] }
 0x55d   : > { %v14662_v12 = vadd.f32 %v9790_v7, %v9789_v31  ;;  %6753 = vmatprep.mubr.f32.mxu0 %v5608_v35  ;;  %v5804_v31 = vsel %vm1875_vm4, %v5799_v54, %v5803_v22  ;;  %v5261_v7 = vrot.slane %v5240_v49, 2  ;;  %v5247_v35 = vld [vmem:[#allocation4 + $0x38] sm:$0xff] }
 0x55f   : > { %v9792_v25 = vpop.f32.mrb[146].mxu0  ;;  %v5263_v34 = vsel %vm5260_vm5, %v5261_v7, %v17374_v36  ;;  %v5468_v7 = vsel %vm5260_vm5, %v5463_v18, %v5467_v46  ;;  %v5443_v36 = vld [vmem:[#allocation4 + $0xd0] sm:$0x3] }
 0x560   : > { %v9793_v48 = vpop.f32.mrb[147].mxu0  ;;  %6754 = vmatmul.mubr.f32.gmra.mrb[244].mxu0 %v5606_v21  ;;  %v5249_v21 = vld [vmem:[#allocation4 + $0x48] sm:$0x3] }
 0x561   : > { %v14666_v38 = vadd.f32 %v9793_v48, %v9792_v25  ;;  %6758 = vmatprep.mubr.f32.mxu0 %v5612_v23  ;;  %v5273_v25 = vrot.slane %v5247_v35, 2  ;;  %v17375_v48 = vld [vmem:[#allocation7_spill] sm:$0xff]  ;;  %v5277_v40 = vrot.slane %v5249_v21, 2  ;;  %v5471_v35 = vrot.slane %v5444_v39, 2 }
 0x562   : > { %v5638_v39 = vld [vmem:[#allocation4 + $0x168] sm:$0x3] }
 0x563   : > { %v9795_v61 = vpop.f32.mrb[148].mxu0  ;;  %v5274_v23 = vsel %vm5260_vm5, %v5269_v1, %v5273_v25  ;;  %v5472_v9 = vsel %vm5260_vm5, %v5467_v46, %v5471_v35  ;;  %v6286_v46 = vadd.f32 %v14531_v19, %v14707_v0  ;;  %v6953_v35 = vld [vmem:[%s17238_s9 + $0x40] sm:$0xff] }
 0x564   : > { %v9796_v56 = vpop.f32.mrb[149].mxu0  ;;  %6759 = vmatmul.mubr.f32.gmra.mrb[246].mxu0 %v5610_v20 }
 0x565   : > { %v14670_v37 = vadd.f32 %v9796_v56, %v9795_v61  ;;  %6763 = vmatprep.mubr.f32.mxu0 %v5794_v26  ;;  %v5436_v61 = vld [vmem:[#allocation4 + $0x98] sm:$0xfc]  ;;  %v5278_v56 = vsel %vm5260_vm5, %v5273_v25, %v5277_v40  ;;  %v5459_v26 = vrot.slane %v5438_v29, 2 }
 0x566   : > { %v5458_v60 = vrot.slane %v5436_v61, 2  ;;  %v5632_v25 = vld [vmem:[#allocation4 + $0x138] sm:$0xff]  ;;  %v5634_v61 = vld [vmem:[#allocation4 + $0x148] sm:$0xff] }
 0x567   : > { %v9798_v13 = vpop.f32.mrb[150].mxu0  ;;  %v5464_v15 = vsel %vm5260_vm5, %v5459_v26, %v5463_v18  ;;  %v5653_v29 = vrot.slane %v5632_v25, 2 }
 0x568   : > { %v9799_v44 = vpop.f32.mrb[151].mxu0  ;;  %6764 = vmatmul.mubr.f32.gmra.mrb[248].mxu0 %v5791_v16  ;;  %v5460_v42 = vsel %vm5260_vm5, %v5458_v60, %v5459_v26 }
 0x569   : > { %v14674_v10 = vadd.f32 %v9799_v44, %v9798_v13  ;;  %6768 = vmatprep.mubr.f32.mxu0 %v5798_v8  ;;  %v5435_v13 = vld [vmem:[#allocation4 + $0x90] sm:$0xfc]  ;;  %v5276_v44 = vsel %vm5260_vm5, %v17377_v6, %v5275_v47  ;;  %v5456_v8 = vrot.slane %v5437_v63, 2  ;;  %v6276_v47 = vadd.f32 %v14518_v5, %v14707_v0  ;;  %v5633_v6 = vld [vmem:[#allocation4 + $0x140] sm:$0xff] }
 0x56a   : > { %v6281_v5 = vadd.f32 %v14526_v4, %v14707_v0 }
 0x56c   : > { %6769 = vmatmul.mubr.f32.gmra.mrb[250].mxu0 %v5796_v33  ;;  %v5439_v33 = vld [vmem:[#allocation4 + $0xb0] sm:$0xff] }
 0x56d   : > { %6773 = vmatprep.mubr.f32.mxu0 %v5802_v3  ;;  %v5455_v3 = vrot.slane %v5435_v13, 2 }
 0x56f   : > { %v5457_v41 = vsel %vm5260_vm5, %v5455_v3, %v5456_v8 }
 0x570   : > { %6774 = vmatmul.mubr.f32.gmra.mrb[252].mxu0 %v5800_v30  ;;  %v5461_v30 = vrot.slane %v5439_v33, 2  ;;  %v5655_v33 = vrot.slane %v5633_v6, 2 }
 0x571   : > { %6778 = vmatprep.mubr.f32.mxu0 %v5806_v53  ;;  %v5441_v53 = vld [vmem:[#allocation4 + $0xc0] sm:$0xff] }
 0x574   : > { %6779 = vmatmul.mubr.f32.gmra.mrb[254].mxu0 %v5804_v31  ;;  %v5462_v31 = vsel %vm5260_vm5, %v5456_v8, %v5461_v30 }
 0x575   : > { %6848 = vmatprep.mubr.f32.mxu0 %v5266_v50  ;;  %v5465_v50 = vrot.slane %v5441_v53, 2 }
 0x578   : > { %6849 = vmatmul.mubr.f32.vlgmr.msra.gmra.mrb[0].mxu0 %v5263_v34  ;;  %v6271_v34 = vadd.f32 %v14511_v43, %v14707_v0 }
 0x579   : > { %6853 = vmatprep.mubr.f32.mxu0 %v5270_v55 }
 0x57b   : > { %v9801_v28 = vpop.f32.mrb[152].mxu0 }
 0x57c   : > { %v9802_v45 = vpop.f32.mrb[153].mxu0  ;;  %6854 = vmatmul.mubr.f32.gmra.mrb[2].mxu0 %v17375_v48  ;;  %v5630_v48 = vld [vmem:[#allocation4 + $0x128] sm:$0xfc] }
 0x57d   : > { %v14688_v14 = vadd.f32 %v9802_v45, %v9801_v28  ;;  %6858 = vmatprep.mubr.f32.mxu0 %v5274_v23  ;;  %v5466_v28 = vsel %vm5260_vm5, %v5461_v30, %v5465_v50  ;;  %v5469_v45 = vrot.slane %v5443_v36, 2 }
 0x57f   : > { %v9804_v62 = vpop.f32.mrb[154].mxu0  ;;  %v5470_v26 = vsel %vm5260_vm5, %v5465_v50, %v5469_v45  ;;  %v5826_v45 = vld [vmem:[#allocation4 + $0x1c8] sm:$0xff] }
 0x580   : > { %v9805_v20 = vpop.f32.mrb[155].mxu0  ;;  %6859 = vmatmul.mubr.f32.gmra.mrb[4].mxu0 %v17376_v17  ;;  %v5629_v17 = vld [vmem:[#allocation4 + $0x120] sm:$0xfc] }
 0x581   : > { %v14692_v24 = vadd.f32 %v9805_v20, %v9804_v62  ;;  %6863 = vmatprep.mubr.f32.mxu0 %v5278_v56  ;;  %v5631_v62 = vld [vmem:[#allocation4 + $0x130] sm:$0xff]  ;;  %v5652_v20 = vrot.slane %v5630_v48, 2  ;;  %v5649_v8 = vrot.slane %v5629_v17, 2  ;;  %v5825_v17 = vld [vmem:[#allocation4 + $0x1c0] sm:$0xff] }
 0x582   : > { %v5650_v63 = vrot.slane %v5631_v62, 2 }
 0x583   : > { %v9807_v16 = vpop.f32.mrb[156].mxu0  ;;  %v5654_v13 = vsel %vm5260_vm5, %v5652_v20, %v5653_v29  ;;  %v5847_v20 = vrot.slane %v5826_v45, 2 }
 0x584   : > { %v9808_v32 = vpop.f32.mrb[157].mxu0  ;;  %6864 = vmatmul.mubr.f32.gmra.mrb[6].mxu0 %v5276_v44  ;;  %v5651_v18 = vsel %vm5260_vm5, %v5649_v8, %v5650_v63 }
 0x585   : > { %v14698_v54 = vadd.f32 %v9808_v32, %v9807_v16  ;;  %6868 = vmatprep.mubr.f32.mxu0 %v5460_v42  ;;  %v5657_v16 = vrot.slane %v5634_v61, 2  ;;  %v5636_v32 = vld [vmem:[#allocation4 + $0x158] sm:$0xff] }
 0x586   : > { %v5661_v30 = vrot.slane %v5636_v32, 2  ;;  %v6961_v32 = vld [vmem:[%s17238_s9 + $0x80] sm:$0xff] }
 0x587   : > { %v9810_v52 = vpop.f32.mrb[158].mxu0  ;;  %v5658_v4 = vsel %vm5260_vm5, %v5653_v29, %v5657_v16  ;;  %v5824_v29 = vld [vmem:[#allocation4 + $0x1b8] sm:$0xfc] }
 0x588   : > { %v9811_v22 = vpop.f32.mrb[159].mxu0  ;;  %6869 = vmatmul.mubr.f32.gmra.mrb[8].mxu0 %v5457_v41  ;;  %v5662_v19 = vsel %vm5260_vm5, %v5657_v16, %v5661_v30  ;;  %v5823_v16 = vld [vmem:[#allocation4 + $0x1b0] sm:$0xfc] }
 0x589   : > { %v14702_v27 = vadd.f32 %v9811_v22, %v9810_v52  ;;  %6873 = vmatprep.mubr.f32.mxu0 %v5464_v15  ;;  %v6954_v52 = vld [vmem:[%s17238_s9 + $0x48] sm:$0xff]  ;;  %v5635_v22 = vld [vmem:[#allocation4 + $0x150] sm:$0xff] }
 0x58a   : > { %v11029_v15 = vpack.c.bf16 %v6954_v52, %v6946_v57  ;;  %v5659_v50 = vrot.slane %v5635_v22, 2  ;;  %v5827_v57 = vld [vmem:[#allocation4 + $0x1d0] sm:$0xff]  ;;  %v5830_v22 = vld [vmem:[#allocation4 + $0x1e8] sm:$0xff] }
 0x58b   : > { %v9845_v49 = vpop.f32.mrb[160].mxu0 }
 0x58c   : > { %v9846_v1 = vpop.f32.mrb[161].mxu0  ;;  %6874 = vmatmul.mubr.f32.gmra.mrb[10].mxu0 %v5462_v31  ;;  %11030 = vmatprep.subr.bf16.mxu0 %v11029_v15  ;;  %v5656_v31 = vsel %vm5260_vm5, %v5650_v63, %v5655_v33 }
 0x58d   : > { %v9847_v55 = vadd.f32 %v9846_v1, %v9845_v49  ;;  %6878 = vmatprep.mubr.f32.mxu0 %v5468_v7  ;;  %v6945_v7 = vld [vmem:[%s17238_s9] sm:$0xff] }
 0x58e   : > { %v11031_v25 = vpack.c.bf16 %v6953_v35, %v6945_v7  ;;  %v5855_v7 = vrot.slane %v5830_v22, 2  ;;  %v5829_v35 = vld [vmem:[#allocation4 + $0x1e0] sm:$0xff] }
 0x58f   : > { %v9848_v21 = vpop.f32.mrb[162].mxu0  ;;  %v14714_v23 = vadd.f32 %v9847_v55, %v6271_v34  ;;  %v5665_v34 = vrot.slane %v5638_v39, 2  ;;  %v5637_v55 = vld [vmem:[#allocation4 + $0x160] sm:$0x3] }
 0x590   : > { %v9849_v40 = vpop.f32.mrb[163].mxu0  ;;  %6879 = vmatmul.mubr.f32.gmra.mrb[12].mxu0 %v5466_v28  ;;  %v14826_v22 = vld [vmem:[#allocation4 + $0x80] sm:$0xff] }
 0x591   : > { %v9850_v43 = vadd.f32 %v9849_v40, %v9848_v21  ;;  %6883 = vmatprep.mubr.f32.mxu0 %v5472_v9  ;;  %v6291_v21 = vadd.f32 %v14584_v59, %v14707_v0  ;;  %11032 = vmatpush1.bf16.msra.mxu0 %v11031_v25  ;;  %v5660_v40 = vsel %vm5260_vm5, %v5655_v33, %v5659_v50  ;;  %v5663_v9 = vrot.slane %v5637_v55, 2  ;;  %v5832_v55 = vld [vmem:[#allocation4 + $0x1f8] sm:$0x3] }
 0x592   : > { %v5666_v61 = vsel %vm5260_vm5, %v5661_v30, %v5665_v34  ;;  %v5843_v30 = vrot.slane %v5823_v16, 2 }
 0x593   : > { %v9851_v56 = vpop.f32.mrb[164].mxu0  ;;  %v14720_v11 = vadd.f32 %v9850_v43, %v6276_v47  ;;  %v6962_v47 = vld [vmem:[%s17238_s9 + $0x88] sm:$0xff] }
 0x594   : > { %v9852_v60 = vpop.f32.mrb[165].mxu0  ;;  %6884 = vmatmul.mubr.f32.gmra.mrb[14].mxu0 %v5470_v26  ;;  %v6970_v43 = vld [vmem:[%s17238_s9 + $0xc8] sm:$0xff]  ;;  %v6296_v26 = vadd.f32 %v14600_v51, %v14707_v0  ;;  %v6969_v51 = vld [vmem:[%s17238_s9 + $0xc0] sm:$0xff] }
 0x595   : > { %v9853_v44 = vadd.f32 %v9852_v60, %v9851_v56  ;;  %6888 = vmatprep.mubr.f32.mxu0 %v5654_v13  ;;  %v11033_v56 = vpack.c.bf16 %v6970_v43, %v6962_v47  ;;  %v5828_v60 = vld [vmem:[#allocation4 + $0x1d8] sm:$0xff]  ;;  %v5846_v13 = vrot.slane %v5824_v29, 2  ;;  %v11035_v52 = vpack.c.bf16 %v6969_v51, %v6961_v32  ;;  %v5831_v47 = vld [vmem:[#allocation4 + $0x1f0] sm:$0x3] }
 0x596   : > { %v5851_v33 = vrot.slane %v5828_v60, 2  ;;  %v5859_v29 = vrot.slane %v5832_v55, 2  ;;  %v7002_v60 = vld [vmem:[%s17238_s9 + $0x1c8] sm:$0xff] }
 0x597   : > { %v9854_v42 = vpop.f32.mrb[166].mxu0  ;;  %v14726_v3 = vadd.f32 %v9853_v44, %v6281_v5  ;;  %11034 = vmatprep.subr.bf16.mxu0 %v11033_v56  ;;  %v5664_v5 = vsel %vm5260_vm5, %v5659_v50, %v5663_v9  ;;  %v5844_v44 = vrot.slane %v5825_v17, 2  ;;  %v5857_v56 = vrot.slane %v5831_v47, 2  ;;  %v6990_v47 = vld [vmem:[%s17238_s9 + $0x168] sm:$0xff] }
 0x598   : > { %v9855_v41 = vpop.f32.mrb[167].mxu0  ;;  %6889 = vmatmul.mubr.f32.gmra.mrb[16].mxu0 %v5651_v18  ;;  %v5848_v18 = vsel %vm5260_vm5, %v5846_v13, %v5847_v20  ;;  %v5852_v50 = vsel %vm5260_vm5, %v5847_v20, %v5851_v33 }
 0x599   : > { %v9856_v53 = vadd.f32 %v9855_v41, %v9854_v42  ;;  %6893 = vmatprep.mubr.f32.mxu0 %v5658_v4  ;;  %v6301_v41 = vadd.f32 %v14616_v58, %v14707_v0  ;;  %11036 = vmatpush1.bf16.msra.mxu0 %v11035_v52  ;;  %v6958_v52 = vld [vmem:[%s17238_s9 + $0x68] sm:$0xff] }
 0x59b   : > { %v9857_v49 = vpop.f32.mrb[168].mxu0  ;;  %v14738_v1 = vadd.f32 %v9856_v53, %v6286_v46  ;;  %v5845_v46 = vsel %vm5260_vm5, %v5843_v30, %v5844_v44  ;;  %v5849_v53 = vrot.slane %v5827_v57, 2 }
 0x59c   : > { %v9858_v36 = vpop.f32.mrb[169].mxu0  ;;  %6894 = vmatmul.mubr.f32.gmra.mrb[18].mxu0 %v5656_v31  ;;  %v6986_v31 = vld [vmem:[%s17238_s9 + $0x148] sm:$0xff] }
 0x59d   : > { %v9859_v28 = vadd.f32 %v9858_v36, %v9857_v49  ;;  %6898 = vmatprep.mubr.f32.mxu0 %v5662_v19  ;;  %v6978_v49 = vld [vmem:[%s17238_s9 + $0x108] sm:$0xff]  ;;  %v6306_v19 = vadd.f32 %v14632_v2, %v14707_v0  ;;  %v5856_v2 = vsel %vm5260_vm5, %v5851_v33, %v5855_v7 }
 0x59e   : > { %v11037_v36 = vpack.c.bf16 %v6986_v31, %v6978_v49  ;;  %v6957_v49 = vld [vmem:[%s17238_s9 + $0x60] sm:$0xff] }
 0x59f   : > { %v9860_v48 = vpop.f32.mrb[170].mxu0  ;;  %v14750_v62 = vadd.f32 %v9859_v28, %v6291_v21  ;;  %v5850_v21 = vsel %vm5260_vm5, %v5844_v44, %v5849_v53  ;;  %v5853_v28 = vrot.slane %v5829_v35, 2  ;;  %v6974_v35 = vld [vmem:[%s17238_s9 + $0xe8] sm:$0xff] }
 0x5a0   : > { %v9861_v59 = vpop.f32.mrb[171].mxu0  ;;  %6899 = vmatmul.mubr.f32.gmra.mrb[20].mxu0 %v5660_v40  ;;  %11038 = vmatprep.subr.bf16.mxu0 %v11037_v36  ;;  %v6985_v40 = vld [vmem:[%s17238_s9 + $0x140] sm:$0xff]  ;;  %v6326_v36 = vadd.f32 %v14674_v10, %v14707_v0 }
 0x5a1   : > { %v9862_v63 = vadd.f32 %v9861_v59, %v9860_v48  ;;  %6903 = vmatprep.mubr.f32.mxu0 %v5666_v61  ;;  %v6977_v48 = vld [vmem:[%s17238_s9 + $0x100] sm:$0xff]  ;;  %v6311_v59 = vadd.f32 %v14662_v12, %v14707_v0  ;;  %v5854_v17 = vsel %vm5260_vm5, %v5849_v53, %v5853_v28  ;;  %v5860_v12 = vsel %vm5260_vm5, %v5855_v7, %v5859_v29  ;;  %v6966_v7 = vld [vmem:[%s17238_s9 + $0xa8] sm:$0xff] }
 0x5a2   : > { %v11039_v43 = vpack.c.bf16 %v6985_v40, %v6977_v48  ;;  %v5858_v32 = vsel %vm5260_vm5, %v5853_v28, %v5857_v56  ;;  %v6949_v53 = vld [vmem:[%s17238_s9 + $0x20] sm:$0xff]  ;;  %v11097_v55 = vpack.c.bf16 %v6974_v35, %v6966_v7  ;;  %v6982_v29 = vld [vmem:[%s17238_s9 + $0x128] sm:$0xff] }
 0x5a3   : > { %v9863_v6 = vpop.f32.mrb[172].mxu0  ;;  %v14762_v8 = vadd.f32 %v9862_v63, %v6296_v26  ;;  %v6994_v63 = vld [vmem:[%s17238_s9 + $0x188] sm:$0xff]  ;;  %v7009_v28 = vld [vmem:[%s17238_s9 + $0x200] sm:$0xff] }
 0x5a4   : > { %v9864_v42 = vpop.f32.mrb[173].mxu0  ;;  %6904 = vmatmul.mubr.f32.gmra.mrb[22].mxu0 %v5664_v5  ;;  %v11041_v16 = vpack.c.bf16 %v7002_v60, %v6994_v63  ;;  %v7017_v48 = vld [vmem:[%s17238_s9 + $0x240] sm:$0xff] }
 0x5a5   : > { %v9865_v4 = vadd.f32 %v9864_v42, %v9863_v6  ;;  %6908 = vmatprep.mubr.f32.mxu0 %v5848_v18  ;;  %11040 = vmatpush1.bf16.msra.mxu0 %v11039_v43  ;;  %v6316_v6 = vadd.f32 %v14666_v38, %v14707_v0  ;;  %v6993_v42 = vld [vmem:[%s17238_s9 + $0x180] sm:$0xff]  ;;  %v6950_v38 = vld [vmem:[%s17238_s9 + $0x28] sm:$0xff]  ;;  %v6331_v43 = vadd.f32 %v14688_v14, %v14707_v0 }
 0x5a6   : > { %11042 = vmatprep.subr.bf16.mxu0 %v11041_v16  ;;  %v7001_v18 = vld [vmem:[%s17238_s9 + $0x1c0] sm:$0xff]  ;;  %v11093_v30 = vpack.c.bf16 %v6958_v52, %v6950_v38  ;;  %v7026_v14 = vld [vmem:[%s17238_s9 + $0x288] sm:$0xff] }
 0x5a7   : > { %v9866_v15 = vpop.f32.mrb[174].mxu0  ;;  %v14774_v39 = vadd.f32 %v9865_v4, %v6301_v41  ;;  %v11043_v57 = vpack.c.bf16 %v7001_v18, %v6993_v42  ;;  %v6321_v41 = vadd.f32 %v14670_v37, %v14707_v0  ;;  %v7010_v37 = vld [vmem:[%s17238_s9 + $0x208] sm:$0xff]  ;;  %v6965_v10 = vld [vmem:[%s17238_s9 + $0xa0] sm:$0xff] }
 0x5a8   : > { %v9867_v58 = vpop.f32.mrb[175].mxu0  ;;  %6909 = vmatmul.mubr.f32.gmra.mrb[24].mxu0 %v5845_v46  ;;  %11094 = vmatprep.subr.bf16.mxu1 %v11093_v30  ;;  %v6981_v63 = vld [vmem:[%s17238_s9 + $0x120] sm:$0xff]  ;;  %v7034_v16 = vld [vmem:[%s17238_s9 + $0x2c8] sm:$0xff] }
 0x5a9   : > { %v9868_v34 = vadd.f32 %v9867_v58, %v9866_v15  ;;  %6913 = vmatprep.mubr.f32.mxu0 %v5852_v50  ;;  %11044 = vmatpush1.bf16.msra.mxu0 %v11043_v57  ;;  %v11095_v58 = vpack.c.bf16 %v6957_v49, %v6949_v53  ;;  %v7018_v50 = vld [vmem:[%s17238_s9 + $0x248] sm:$0xff]  ;;  %v6989_v60 = vld [vmem:[%s17238_s9 + $0x160] sm:$0xff]  ;;  %v11049_v42 = vpack.c.bf16 %v7034_v16, %v7026_v14 }
 0x5aa   : > { %v7025_v57 = vld [vmem:[%s17238_s9 + $0x280] sm:$0xff]  ;;  %v7022_v53 = vld [vmem:[%s17238_s9 + $0x268] sm:$0xff]  ;;  %v6341_v49 = vadd.f32 %v14698_v54, %v14707_v0 }
 0x5ab   : > { %v9869_v25 = vpop.f32.mrb[176].mxu0  ;;  %v14786_v45 = vadd.f32 %v9868_v34, %v6306_v19  ;;  %v11045_v34 = vpack.c.bf16 %v7018_v50, %v7010_v37  ;;  %11096 = vmatpush1.bf16.msra.mxu1 %v11095_v58  ;;  %v7033_v52 = vld [vmem:[%s17238_s9 + $0x2c0] sm:$0xff]  ;;  %v7042_v54 = vld [vmem:[%s17238_s9 + $0x308] sm:$0xff] }
 0x5ac   : > { %v9870_v9 = vpop.f32.mrb[177].mxu0  ;;  %6914 = vmatmul.mubr.f32.gmra.mrb[26].mxu0 %v5850_v21  ;;  %11098 = vmatprep.subr.bf16.mxu1 %v11097_v55  ;;  %v7005_v30 = vld [vmem:[%s17238_s9 + $0x1e0] sm:$0xff]  ;;  %v7050_v55 = vld [vmem:[%s17238_s9 + $0x348] sm:$0xff] }
 0x5ad   : > { %v9871_v61 = vadd.f32 %v9870_v9, %v9869_v25  ;;  %6918 = vmatprep.mubr.f32.mxu0 %v5856_v2  ;;  %11046 = vmatprep.subr.bf16.mxu0 %v11045_v34  ;;  %v11047_v9 = vpack.c.bf16 %v7017_v48, %v7009_v28  ;;  %v6973_v2 = vld [vmem:[%s17238_s9 + $0xe0] sm:$0xff]  ;;  %v7038_v28 = vld [vmem:[%s17238_s9 + $0x2e8] sm:$0xff]  ;;  %v6346_v48 = vadd.f32 %v14702_v27, %v14707_v0 }
 0x5ae   : > { %v7013_v35 = vld [vmem:[%s17238_s9 + $0x220] sm:$0xff] }
 0x5af   : > { %v9872_v20 = vpop.f32.mrb[178].mxu0  ;;  %v14798_v26 = vadd.f32 %v9871_v61, %v6311_v59  ;;  %v11099_v61 = vpack.c.bf16 %v6973_v2, %v6965_v10  ;;  %11048 = vmatpush1.bf16.msra.mxu0 %v11047_v9  ;;  %v7029_v27 = vld [vmem:[%s17238_s9 + $0x2a0] sm:$0xff] }
 0x5b0   : > { %v9873_v13 = vpop.f32.mrb[179].mxu0  ;;  %6919 = vmatmul.mubr.f32.gmra.mrb[28].mxu0 %v5854_v17  ;;  %11050 = vmatprep.subr.bf16.mxu0 %v11049_v42 }
 0x5b1   : > { %v9874_v5 = vadd.f32 %v9873_v13, %v9872_v20  ;;  %6923 = vmatprep.mubr.f32.mxu0 %v5860_v12  ;;  %v11101_v20 = vpack.c.bf16 %v6990_v47, %v6982_v29  ;;  %11100 = vmatpush1.bf16.msra.mxu1 %v11099_v61  ;;  %v11103_v12 = vpack.c.bf16 %v6989_v60, %v6981_v63  ;;  %v7041_v47 = vld [vmem:[%s17238_s9 + $0x300] sm:$0xff] }
 0x5b2   : > { %v7037_v61 = vld [vmem:[%s17238_s9 + $0x2e0] sm:$0xff] }
 0x5b3   : > { %v9875_v44 = vpop.f32.mrb[180].mxu0  ;;  %v14810_v51 = vadd.f32 %v9874_v5, %v6316_v6  ;;  %11102 = vmatprep.subr.bf16.mxu1 %v11101_v20  ;;  %v6998_v6 = vld [vmem:[%s17238_s9 + $0x1a8] sm:$0xff]  ;;  %v11115_v60 = vpack.c.bf16 %v7037_v61, %v7029_v27 }
 0x5b4   : > { %v9876_v33 = vpop.f32.mrb[181].mxu0  ;;  %6924 = vmatmul.mubr.f32.gmra.mrb[30].mxu0 %v5858_v32  ;;  %v7006_v5 = vld [vmem:[%s17238_s9 + $0x1e8] sm:$0xff] }
 0x5b5   : > { %v9877_v4 = vadd.f32 %v9876_v33, %v9875_v44  ;;  %7137 = vmatprep.mubr.f32.mxu0 %v14826_v22  ;;  %v6336_v44 = vadd.f32 %v14692_v24, %v14707_v0  ;;  %v11105_v18 = vpack.c.bf16 %v7006_v5, %v6998_v6  ;;  %11104 = vmatpush1.bf16.msra.mxu1 %v11103_v12  ;;  %v6997_v24 = vld [vmem:[%s17238_s9 + $0x1a0] sm:$0xff]  ;;  %v7046_v20 = vld [vmem:[%s17238_s9 + $0x328] sm:$0xff] }
 0x5b6   : > { %v7045_v5 = vld [vmem:[%s17238_s9 + $0x320] sm:$0xff] }
 0x5b7   : > { %v9878_v15 = vpop.f32.mrb[182].mxu0  ;;  %v14829_v46 = vadd.f32 %v9877_v4, %v6321_v41  ;;  %11106 = vmatprep.subr.bf16.mxu1 %v11105_v18  ;;  %v11051_v4 = vpack.c.bf16 %v7033_v52, %v7025_v57  ;;  %v7062_v18 = vld [vmem:[%s17238_s9 + $0x3a8] sm:$0xff] }
 0x5b8   : > { %v9879_v31 = vpop.f32.mrb[183].mxu0 }
 0x5b9   : > { %v9880_v19 = vadd.f32 %v9879_v31, %v9878_v15  ;;  %v7014_v15 = vld [vmem:[%s17238_s9 + $0x228] sm:$0xff]  ;;  %v11107_v31 = vpack.c.bf16 %v7005_v30, %v6997_v24  ;;  %11052 = vmatpush1.bf16.msra.mxu0 %v11051_v4 }
 0x5ba   : > { %v11109_v58 = vpack.c.bf16 %v7022_v53, %v7014_v15  ;;  %v7057_v15 = vld [vmem:[%s17238_s9 + $0x380] sm:$0xff] }
 0x5bb   : > { %v9881_v25 = vpop.f32.mrb[184].mxu0  ;;  %v14851_v21 = vadd.f32 %v9880_v19, %v6326_v36  ;;  %11108 = vmatpush1.bf16.msra.mxu1 %v11107_v31  ;;  %v7021_v36 = vld [vmem:[%s17238_s9 + $0x260] sm:$0xff] }
 0x5bc   : > { %v9882_v40 = vpop.f32.mrb[185].mxu0  ;;  %11110 = vmatprep.subr.bf16.mxu1 %v11109_v58  ;;  %v11111_v34 = vpack.c.bf16 %v7021_v36, %v7013_v35  ;;  %v7065_v53 = vld [vmem:[%s17238_s9 + $0x3c0] sm:$0xff] }
 0x5bd   : > { %v9883_v59 = vadd.f32 %v9882_v40, %v9881_v25  ;;  %v7030_v25 = vld [vmem:[%s17238_s9 + $0x2a8] sm:$0xff]  ;;  %v11053_v40 = vpack.c.bf16 %v7050_v55, %v7042_v54  ;;  %v6948_v54 = vld [vmem:[%s17238_s9 + $0x18] sm:$0xff] }
 0x5be   : > { %v11113_v9 = vpack.c.bf16 %v7038_v28, %v7030_v25 }
 0x5bf   : > { %v9884_v17 = vpop.f32.mrb[186].mxu0  ;;  %v14873_v56 = vadd.f32 %v9883_v59, %v6331_v43  ;;  %11112 = vmatpush1.bf16.msra.mxu1 %v11111_v34  ;;  %11054 = vmatprep.subr.bf16.mxu0 %v11053_v40  ;;  %v7049_v43 = vld [vmem:[%s17238_s9 + $0x340] sm:$0xff] }
 0x5c0   : > { %v9885_v13 = vpop.f32.mrb[187].mxu0  ;;  %11114 = vmatprep.subr.bf16.mxu1 %v11113_v9  ;;  %v11055_v59 = vpack.c.bf16 %v7049_v43, %v7041_v47 }
 0x5c1   : > { %v9886_v32 = vadd.f32 %v9885_v13, %v9884_v17  ;;  %v7054_v17 = vld [vmem:[%s17238_s9 + $0x368] sm:$0xff] }
 0x5c2   : > { %v11117_v14 = vpack.c.bf16 %v7054_v17, %v7046_v20  ;;  %11056 = vmatpush1.bf16.msra.mxu0 %v11055_v59 }
 0x5c3   : > { %v9887_v38 = vpop.f32.mrb[188].mxu0  ;;  %v14895_v33 = vadd.f32 %v9886_v32, %v6336_v44  ;;  %11116 = vmatpush1.bf16.msra.mxu1 %v11115_v60  ;;  %v7053_v44 = vld [vmem:[%s17238_s9 + $0x360] sm:$0xff]  ;;  %v7058_v32 = vld [vmem:[%s17238_s9 + $0x388] sm:$0xff] }
 0x5c4   : > { %v9888_v41 = vpop.f32.mrb[189].mxu0  ;;  %11118 = vmatprep.subr.bf16.mxu1 %v11117_v14  ;;  %v11119_v42 = vpack.c.bf16 %v7053_v44, %v7045_v5 }
 0x5c5   : > { %v9889_v37 = vadd.f32 %v9888_v41, %v9887_v38  ;;  %v7070_v38 = vld [vmem:[%s17238_s9 + $0x3e8] sm:$0xff] }
 0x5c6   : > { %v11121_v41 = vpack.c.bf16 %v7070_v38, %v7062_v18 }
 0x5c7   : > { %v9890_v50 = vpop.f32.mrb[190].mxu0  ;;  %v14917_v7 = vadd.f32 %v9889_v37, %v6341_v49  ;;  %11120 = vmatpush1.bf16.msra.mxu1 %v11119_v42  ;;  %v11059_v49 = vpack.c.bf16 %v7065_v53, %v7057_v15  ;;  %v7069_v37 = vld [vmem:[%s17238_s9 + $0x3e0] sm:$0xff] }
 0x5c8   : > { %v9891_v19 = vpop.f32.mrb[191].mxu0  ;;  %11122 = vmatprep.subr.bf16.mxu1 %v11121_v41 }
 0x5c9   : > { %v9892_v10 = vadd.f32 %v9891_v19, %v9890_v50  ;;  %v6956_v19 = vld [vmem:[%s17238_s9 + $0x58] sm:$0xff] }
 0x5ca   : > { %v11061_v34 = vpack.c.bf16 %v6956_v19, %v6948_v54 }
 0x5cb   : > { %v9925_v2 = vpop.f32.mrb[192].mxu0  ;;  %v14939_v29 = vadd.f32 %v9892_v10, %v6346_v48 }
 0x5cc   : > { %v9926_v0 = vpop.f32.mrb[193].mxu0 }
 0x5cd   : > { %v9927_v63 = vadd.f32 %v9926_v0, %v9925_v2 }
 0x5cf   : > { %v14960_v13 = vadd.f32 %v9927_v63, %v14714_v23  ;;  %v9928_v12 = vpop.f32.mrb[194].mxu0  ;;  %v7066_v23 = vld [vmem:[%s17238_s9 + $0x3c8] sm:$0xff] }
 0x5d0   : > { %v9929_v16 = vpop.f32.mrb[195].mxu0  ;;  %v11057_v24 = vpack.c.bf16 %v7066_v23, %v7058_v32 }
 0x5d1   : > { %v9930_v6 = vadd.f32 %v9929_v16, %v9928_v12 }
 0x5d2   : > { %11058 = vmatprep.subr.bf16.mxu0 %v11057_v24 }
 0x5d3   : > { %v14981_v57 = vadd.f32 %v9930_v6, %v14720_v11  ;;  %v9931_v52 = vpop.f32.mrb[196].mxu0  ;;  %v7061_v11 = vld [vmem:[%s17238_s9 + $0x3a0] sm:$0xff]  ;;  %11060 = vmatpush1.bf16.msra.mxu0 %v11059_v49 }
 0x5d4   : > { %v9932_v4 = vpop.f32.mrb[197].mxu0  ;;  %v11123_v50 = vpack.c.bf16 %v7069_v37, %v7061_v11  ;;  %11062 = vmatprep.subr.bf16.mxu0 %v11061_v34 }
 0x5d5   : > { %v9933_v30 = vadd.f32 %v9932_v4, %v9931_v52 }
 0x5d6   : > { %11124 = vmatpush1.bf16.msra.mxu1 %v11123_v50 }
 0x5d7   : > { %v14996_v31 = vadd.f32 %v9933_v30, %v14726_v3  ;;  %v9934_v58 = vpop.f32.mrb[198].mxu0 }
 0x5d8   : > { %v9935_v35 = vpop.f32.mrb[199].mxu0 }
 0x5d9   : > { %v9936_v36 = vadd.f32 %v9935_v35, %v9934_v58 }
 0x5db   : > { %v15005_v55 = vadd.f32 %v9936_v36, %v14738_v1  ;;  %v9937_v3 = vpop.f32.mrb[200].mxu0 }
 0x5dc   : > { %v9938_v25 = vpop.f32.mrb[201].mxu0 }
 0x5dd   : > { %v9939_v28 = vadd.f32 %v9938_v25, %v9937_v3 }
 0x5df   : > { %v15008_v48 = vadd.f32 %v9939_v28, %v14750_v62  ;;  %v9940_v10 = vpop.f32.mrb[202].mxu0 }
 0x5e0   : > { %v9941_v40 = vpop.f32.mrb[203].mxu0 }
 0x5e1   : > { %v9942_v9 = vadd.f32 %v9941_v40, %v9940_v10 }
 0x5e3   : > { %v15011_v2 = vadd.f32 %v9942_v9, %v14762_v8  ;;  %v9943_v47 = vpop.f32.mrb[204].mxu0 }
 0x5e4   : > { %v9944_v43 = vpop.f32.mrb[205].mxu0 }
 0x5e5   : > { %v9945_v27 = vadd.f32 %v9944_v43, %v9943_v47 }
 0x5e7   : > { %v15014_v0 = vadd.f32 %v9945_v27, %v14774_v39  ;;  %v9946_v1 = vpop.f32.mrb[206].mxu0 }
 0x5e8   : > { %v9947_v59 = vpop.f32.mrb[207].mxu0 }
 0x5e9   : > { %v9948_v61 = vadd.f32 %v9947_v59, %v9946_v1 }
 0x5eb   : > { %v15017_v20 = vadd.f32 %v9948_v61, %v14786_v45  ;;  %v9949_v62 = vpop.f32.mrb[208].mxu0 }
 0x5ec   : > { %v9950_v17 = vpop.f32.mrb[209].mxu0 }
 0x5ed   : > { %v9951_v63 = vadd.f32 %v9950_v17, %v9949_v62 }
 0x5ef   : > { %v15020_v60 = vadd.f32 %v9951_v63, %v14798_v26  ;;  %v9952_v8 = vpop.f32.mrb[210].mxu0 }
 0x5f0   : > { %v9953_v14 = vpop.f32.mrb[211].mxu0 }
 0x5f1   : > { %v9954_v12 = vadd.f32 %v9953_v14, %v9952_v8 }
 0x5f3   : > { %v15023_v16 = vadd.f32 %v9954_v12, %v14810_v51  ;;  %v9955_v39 = vpop.f32.mrb[212].mxu0 }
 0x5f4   : > { %v9956_v6 = vpop.f32.mrb[213].mxu0 }
 0x5f5   : > { %v9957_v5 = vadd.f32 %v9956_v6, %v9955_v39 }
 0x5f7   : > { %v15026_v44 = vadd.f32 %v9957_v5, %v14829_v46  ;;  %v9958_v45 = vpop.f32.mrb[214].mxu0 }
 0x5f8   : > { %v9959_v32 = vpop.f32.mrb[215].mxu0 }
 0x5f9   : > { %v9960_v42 = vadd.f32 %v9959_v32, %v9958_v45 }
 0x5fb   : > { %v15029_v23 = vadd.f32 %v9960_v42, %v14851_v21  ;;  %v9961_v26 = vpop.f32.mrb[216].mxu0 }
 0x5fc   : > { %v9962_v18 = vpop.f32.mrb[217].mxu0 }
 0x5fd   : > { %v9963_v38 = vadd.f32 %v9962_v18, %v9961_v26 }
 0x5ff   : > { %v15032_v52 = vadd.f32 %v9963_v38, %v14873_v56  ;;  %v9964_v51 = vpop.f32.mrb[218].mxu0 }
 0x600   : > { %v9965_v24 = vpop.f32.mrb[219].mxu0 }
 0x601   : > { %v9966_v41 = vadd.f32 %v9965_v24, %v9964_v51 }
 0x603   : > { %v15035_v4 = vadd.f32 %v9966_v41, %v14895_v33  ;;  %v9967_v46 = vpop.f32.mrb[220].mxu0 }
 0x604   : > { %v9968_v30 = vpop.f32.mrb[221].mxu0 }
 0x605   : > { %v9969_v15 = vadd.f32 %v9968_v30, %v9967_v46 }
 0x607   : > { %v15038_v53 = vadd.f32 %v9969_v15, %v14917_v7  ;;  %v9970_v21 = vpop.f32.mrb[222].mxu0 }
 0x608   : > { %v9971_v11 = vpop.f32.mrb[223].mxu0 }
 0x609   : > { %v9972_v49 = vadd.f32 %v9971_v11, %v9970_v21 }
 0x60b   : > { %v15041_v37 = vadd.f32 %v9972_v49, %v14939_v29  ;;  %v10005_v56 = vpop.f32.mrb[224].mxu0 }
 0x60c   : > { %v10006_v58 = vpop.f32.mrb[225].mxu0 }
 0x60d   : > { %v10007_v50 = vadd.f32 %v10006_v58, %v10005_v56 }
 0x60f   : > { %v15044_v35 = vadd.f32 %v10007_v50, %v14960_v13  ;;  %v10008_v33 = vpop.f32.mrb[226].mxu0 }
 0x610   : > { %v10009_v36 = vpop.f32.mrb[227].mxu0 }
 0x611   : > { %v10010_v54 = vadd.f32 %v10009_v36, %v10008_v33 }
 0x613   : > { %v15047_v19 = vadd.f32 %v10010_v54, %v14981_v57  ;;  %v10011_v7 = vpop.f32.mrb[228].mxu0 }
 0x614   : > { %v10012_v34 = vpop.f32.mrb[229].mxu0 }
 0x615   : > { %v10013_v3 = vadd.f32 %v10012_v34, %v10011_v7  ;;  %v6955_v34 = vld [vmem:[%s17238_s9 + $0x50] sm:$0xff] }
 0x617   : > { %v15050_v25 = vadd.f32 %v10013_v3, %v14996_v31  ;;  %v10014_v29 = vpop.f32.mrb[230].mxu0 }
 0x618   : > { %v10015_v28 = vpop.f32.mrb[231].mxu0 }
 0x619   : > { %v10016_v10 = vadd.f32 %v10015_v28, %v10014_v29  ;;  %v6964_v29 = vld [vmem:[%s17238_s9 + $0x98] sm:$0xff] }
 0x61b   : > { %v15053_v40 = vadd.f32 %v10016_v10, %v15005_v55  ;;  %v10017_v13 = vpop.f32.mrb[232].mxu0 }
 0x61c   : > { %v10018_v9 = vpop.f32.mrb[233].mxu0 }
 0x61d   : > { %v10019_v47 = vadd.f32 %v10018_v9, %v10017_v13 }
 0x61f   : > { %v15056_v43 = vadd.f32 %v10019_v47, %v15008_v48  ;;  %v10020_v57 = vpop.f32.mrb[234].mxu0 }
 0x620   : > { %v10021_v27 = vpop.f32.mrb[235].mxu0 }
 0x621   : > { %v10022_v1 = vadd.f32 %v10021_v27, %v10020_v57  ;;  %v6963_v57 = vld [vmem:[%s17238_s9 + $0x90] sm:$0xff] }
 0x623   : > { %v15059_v59 = vadd.f32 %v10022_v1, %v15011_v2  ;;  %v10023_v31 = vpop.f32.mrb[236].mxu0 }
 0x624   : > { %v10024_v61 = vpop.f32.mrb[237].mxu0 }
 0x625   : > { %v10025_v62 = vadd.f32 %v10024_v61, %v10023_v31  ;;  %v6980_v31 = vld [vmem:[%s17238_s9 + $0x118] sm:$0xff] }
 0x626   : > { %v6988_v61 = vld [vmem:[%s17238_s9 + $0x158] sm:$0xff] }
 0x627   : > { %v15062_v17 = vadd.f32 %v10025_v62, %v15014_v0  ;;  %v10026_v55 = vpop.f32.mrb[238].mxu0 }
 0x628   : > { %v10027_v63 = vpop.f32.mrb[239].mxu0 }
 0x629   : > { %v10028_v8 = vadd.f32 %v10027_v63, %v10026_v55 }
 0x62b   : > { %v15065_v14 = vadd.f32 %v10028_v8, %v15017_v20  ;;  %v10029_v48 = vpop.f32.mrb[240].mxu0  ;;  %v11069_v8 = vpack.c.bf16 %v6988_v61, %v6980_v31  ;;  %v7051_v31 = vld [vmem:[%s17238_s9 + $0x350] sm:$0xff] }
 0x62c   : > { %v10030_v12 = vpop.f32.mrb[241].mxu0 }
 0x62d   : > { %v10031_v39 = vadd.f32 %v10030_v12, %v10029_v48  ;;  %v6979_v48 = vld [vmem:[%s17238_s9 + $0x110] sm:$0xff] }
 0x62e   : > { %v6987_v12 = vld [vmem:[%s17238_s9 + $0x150] sm:$0xff] }
 0x62f   : > { %v15068_v6 = vadd.f32 %v10031_v39, %v15020_v60  ;;  %v10032_v2 = vpop.f32.mrb[242].mxu0 }
 0x630   : > { %v10033_v5 = vpop.f32.mrb[243].mxu0 }
 0x631   : > { %v10034_v45 = vadd.f32 %v10033_v5, %v10032_v2  ;;  %v6996_v5 = vld [vmem:[%s17238_s9 + $0x198] sm:$0xff] }
 0x633   : > { %v15071_v32 = vadd.f32 %v10034_v45, %v15023_v16  ;;  %v10035_v0 = vpop.f32.mrb[244].mxu0  ;;  %v7004_v45 = vld [vmem:[%s17238_s9 + $0x1d8] sm:$0xff] }
 0x634   : > { %v10036_v42 = vpop.f32.mrb[245].mxu0 }
 0x635   : > { %v10037_v26 = vadd.f32 %v10036_v42, %v10035_v0 }
 0x637   : > { %v15074_v18 = vadd.f32 %v10037_v26, %v15026_v44  ;;  %v10038_v20 = vpop.f32.mrb[246].mxu0  ;;  %v11071_v26 = vpack.c.bf16 %v6987_v12, %v6979_v48 }
 0x638   : > { %v10039_v38 = vpop.f32.mrb[247].mxu0 }
 0x639   : > { %v10040_v51 = vadd.f32 %v10039_v38, %v10038_v20  ;;  %v11073_v20 = vpack.c.bf16 %v7004_v45, %v6996_v5  ;;  %v6995_v38 = vld [vmem:[%s17238_s9 + $0x190] sm:$0xff] }
 0x63a   : > { %v7067_v5 = vld [vmem:[%s17238_s9 + $0x3d0] sm:$0xff] }
 0x63b   : > { %v15077_v24 = vadd.f32 %v10040_v51, %v15029_v23  ;;  %v10041_v60 = vpop.f32.mrb[248].mxu0  ;;  %v7003_v51 = vld [vmem:[%s17238_s9 + $0x1d0] sm:$0xff] }
 0x63c   : > { %v10042_v41 = vpop.f32.mrb[249].mxu0 }
 0x63d   : > { %v10043_v46 = vadd.f32 %v10042_v41, %v10041_v60 }
 0x63f   : > { %v15080_v30 = vadd.f32 %v10043_v46, %v15032_v52  ;;  %v10044_v16 = vpop.f32.mrb[250].mxu0  ;;  %v7012_v46 = vld [vmem:[%s17238_s9 + $0x218] sm:$0xff] }
 0x640   : > { %v10045_v15 = vpop.f32.mrb[251].mxu0 }
 0x641   : > { %v10046_v21 = vadd.f32 %v10045_v15, %v10044_v16  ;;  %v7020_v16 = vld [vmem:[%s17238_s9 + $0x258] sm:$0xff] }
 0x643   : > { %v15083_v11 = vadd.f32 %v10046_v21, %v15035_v4  ;;  %v10047_v44 = vpop.f32.mrb[252].mxu0  ;;  %v6947_v4 = vld [vmem:[%s17238_s9 + $0x10] sm:$0xff] }
 0x644   : > { %v10048_v49 = vpop.f32.mrb[253].mxu0  ;;  %v11063_v9 = vpack.c.bf16 %v6955_v34, %v6947_v4 }
 0x645   : > { %v10049_v56 = vadd.f32 %v10048_v49, %v10047_v44  ;;  %v11075_v44 = vpack.c.bf16 %v7003_v51, %v6995_v38  ;;  %v11077_v49 = vpack.c.bf16 %v7020_v16, %v7012_v46 }
 0x647   : > { %v15086_v58 = vadd.f32 %v10049_v56, %v15038_v53  ;;  %v10050_v23 = vpop.f32.mrb[254].mxu0  ;;  %v7011_v56 = vld [vmem:[%s17238_s9 + $0x210] sm:$0xff] }
 0x648   : > { %v10051_v50 = vpop.f32.mrb[255].mxu0 }
 0x649   : > { %v10052_v33 = vadd.f32 %v10051_v50, %v10050_v23  ;;  %v7019_v23 = vld [vmem:[%s17238_s9 + $0x250] sm:$0xff] }
 0x64a   : > { %v11079_v34 = vpack.c.bf16 %v7019_v23, %v7011_v56 }
 0x64b   : > { %v15089_v36 = vadd.f32 %v10052_v33, %v15041_v37  ;;  %v10085_v52 = vpop.f32.mrb[0].mxu0  ;;  %v6972_v37 = vld [vmem:[%s17238_s9 + $0xd8] sm:$0xff] }
 0x64c   : > { %v10086_v54 = vpop.f32.mrb[1].mxu0  ;;  %v11065_v47 = vpack.c.bf16 %v6972_v37, %v6964_v29  ;;  %v7035_v29 = vld [vmem:[%s17238_s9 + $0x2d0] sm:$0xff] }
 0x64d   : > { %v10087_v7 = vadd.f32 %v10086_v54, %v10085_v52  ;;  %v7028_v52 = vld [vmem:[%s17238_s9 + $0x298] sm:$0xff] }
 0x64e   : > { %v7036_v54 = vld [vmem:[%s17238_s9 + $0x2d8] sm:$0xff] }
 0x64f   : > { %v6851_v53 = vadd.f32 %v10087_v7, %v15044_v35  ;;  %v10088_v3 = vpop.f32.mrb[2].mxu0  ;;  %v6971_v35 = vld [vmem:[%s17238_s9 + $0xd0] sm:$0xff] }
 0x650   : > { %v10089_v28 = vpop.f32.mrb[3].mxu0  ;;  %v11067_v63 = vpack.c.bf16 %v6971_v35, %v6963_v57 }
 0x651   : > { %v15104_v10 = vmax.f32 %v6851_v53, 0.0  ;;  %v10090_v13 = vadd.f32 %v10089_v28, %v10088_v3  ;;  %v11081_v53 = vpack.c.bf16 %v7036_v54, %v7028_v52  ;;  %v7027_v3 = vld [vmem:[%s17238_s9 + $0x290] sm:$0xff] }
 0x652   : > { %v11083_v35 = vpack.c.bf16 %v7035_v29, %v7027_v3 }
 0x653   : > { %v6856_v27 = vadd.f32 %v10090_v13, %v15047_v19  ;;  %v10091_v1 = vpop.f32.mrb[4].mxu0  ;;  %7138 = vmatmul.mubr.f32.vlgmr.msra.gmra.mrb[32].mxu0 %v15104_v10  ;;  %7460 = vmatmul.mubr.f32.vlgmr.msra.gmra.mrb[64].mxu1 %v15104_v10  ;;  %v7044_v13 = vld [vmem:[%s17238_s9 + $0x318] sm:$0xff] }
 0x654   : > { %v10092_v62 = vpop.f32.mrb[5].mxu0  ;;  %7143 = vmatprep.mubr.f32.mxu0 %v14826_v22  ;;  %7465 = vmatprep.mubr.f32.mxu1 %v14826_v22 }
 0x655   : > { %v15123_v55 = vmax.f32 %v6856_v27, 0.0  ;;  %v10093_v19 = vadd.f32 %v10092_v62, %v10091_v1  ;;  %11064 = vmatpush1.bf16.msra.mxu0 %v11063_v9  ;;  %v7052_v9 = vld [vmem:[%s17238_s9 + $0x358] sm:$0xff]  ;;  %v7043_v1 = vld [vmem:[%s17238_s9 + $0x310] sm:$0xff] }
 0x656   : > { %11066 = vmatprep.subr.bf16.mxu0 %v11065_v47  ;;  %v11085_v27 = vpack.c.bf16 %v7052_v9, %v7044_v13  ;;  %v11087_v12 = vpack.c.bf16 %v7051_v31, %v7043_v1  ;;  %v15277_v13 = vld [vmem:[%s17238_s9 + $0x30] sm:$0xff] }
 0x657   : > { %v6861_v39 = vadd.f32 %v10093_v19, %v15050_v25  ;;  %v10094_v2 = vpop.f32.mrb[6].mxu0  ;;  %7144 = vmatmul.mubr.f32.gmra.mrb[34].mxu0 %v15123_v55  ;;  %7466 = vmatmul.mubr.f32.gmra.mrb[66].mxu1 %v15123_v55  ;;  %v7060_v19 = vld [vmem:[%s17238_s9 + $0x398] sm:$0xff] }
 0x658   : > { %v10095_v0 = vpop.f32.mrb[7].mxu0  ;;  %7149 = vmatprep.mubr.f32.mxu0 %v14826_v22  ;;  %7471 = vmatprep.mubr.f32.mxu1 %v14826_v22 }
 0x659   : > { %v15142_v42 = vmax.f32 %v6861_v39, 0.0  ;;  %v10096_v25 = vadd.f32 %v10095_v0, %v10094_v2  ;;  %11068 = vmatpush1.bf16.msra.mxu0 %v11067_v63  ;;  %v7068_v63 = vld [vmem:[%s17238_s9 + $0x3d8] sm:$0xff]  ;;  %v7059_v2 = vld [vmem:[%s17238_s9 + $0x390] sm:$0xff] }
 0x65a   : > { %11070 = vmatprep.subr.bf16.mxu0 %v11069_v8  ;;  %v11089_v39 = vpack.c.bf16 %v7068_v63, %v7060_v19  ;;  %v11091_v51 = vpack.c.bf16 %v7067_v5, %v7059_v2  ;;  %v15319_v19 = vld [vmem:[%s17238_s9 + $0x178] sm:$0xff]  ;;  %v15336_v2 = vld [vmem:[%s17238_s9 + $0x170] sm:$0xff]  ;;  %v17378_v5 = vlaneseq }
 0x65b   : > { %v6866_v60 = vadd.f32 %v10096_v25, %v15053_v40  ;;  %v10097_v41 = vpop.f32.mrb[8].mxu0  ;;  %7150 = vmatmul.mubr.f32.gmra.mrb[36].mxu0 %v15142_v42  ;;  %7472 = vmatmul.mubr.f32.gmra.mrb[68].mxu1 %v15142_v42  ;;  %v6952_v25 = vld [vmem:[%s17238_s9 + $0x38] sm:$0xff] }
 0x65c   : > { %v10098_v15 = vpop.f32.mrb[9].mxu0  ;;  %7155 = vmatprep.mubr.f32.mxu0 %v14826_v22  ;;  %7477 = vmatprep.mubr.f32.mxu1 %v14826_v22 }
 0x65d   : > { %v15161_v21 = vmax.f32 %v6866_v60, 0.0  ;;  %v10099_v40 = vadd.f32 %v10098_v15, %v10097_v41  ;;  %11072 = vmatpush1.bf16.msra.mxu0 %v11071_v26  ;;  %v6960_v26 = vld [vmem:[%s17238_s9 + $0x78] sm:$0xff] }
 0x65e   : > { %11074 = vmatprep.subr.bf16.mxu0 %v11073_v20  ;;  %v11125_v60 = vpack.c.bf16 %v6960_v26, %v6952_v25 }
 0x65f   : > { %v6871_v50 = vadd.f32 %v10099_v40, %v15056_v43  ;;  %v10100_v33 = vpop.f32.mrb[10].mxu0  ;;  %7156 = vmatmul.mubr.f32.gmra.mrb[38].mxu0 %v15161_v21  ;;  %7478 = vmatmul.mubr.f32.gmra.mrb[70].mxu1 %v15161_v21 }
 0x660   : > { %v10101_v7 = vpop.f32.mrb[11].mxu0  ;;  %7161 = vmatprep.mubr.f32.mxu0 %v14826_v22  ;;  %7483 = vmatprep.mubr.f32.mxu1 %v14826_v22 }
 0x661   : > { %v15180_v4 = vmax.f32 %v6871_v50, 0.0  ;;  %v10102_v43 = vadd.f32 %v10101_v7, %v10100_v33  ;;  %11076 = vmatpush1.bf16.msra.mxu0 %v11075_v44 }
 0x662   : > { %11078 = vmatprep.subr.bf16.mxu0 %v11077_v49 }
 0x663   : > { %v6876_v37 = vadd.f32 %v10102_v43, %v15059_v59  ;;  %v10103_v28 = vpop.f32.mrb[12].mxu0  ;;  %7162 = vmatmul.mubr.f32.gmra.mrb[40].mxu0 %v15180_v4  ;;  %7484 = vmatmul.mubr.f32.gmra.mrb[72].mxu1 %v15180_v4 }
 0x664   : > { %v10104_v47 = vpop.f32.mrb[13].mxu0  ;;  %7167 = vmatprep.mubr.f32.mxu0 %v14826_v22  ;;  %7489 = vmatprep.mubr.f32.mxu1 %v14826_v22 }
 0x665   : > { %v15199_v57 = vmax.f32 %v6876_v37, 0.0  ;;  %v10105_v59 = vadd.f32 %v10104_v47, %v10103_v28  ;;  %11080 = vmatpush1.bf16.msra.mxu0 %v11079_v34  ;;  %v15285_v47 = vld [vmem:[%s17238_s9 + $0x70] sm:$0xff] }
 0x666   : > { %11082 = vmatprep.subr.bf16.mxu0 %v11081_v53  ;;  %v11127_v63 = vpack.c.bf16 %v15285_v47, %v15277_v13 }
 0x667   : > { %v6881_v61 = vadd.f32 %v10105_v59, %v15062_v17  ;;  %v10106_v62 = vpop.f32.mrb[14].mxu0  ;;  %7168 = vmatmul.mubr.f32.gmra.mrb[42].mxu0 %v15199_v57  ;;  %7490 = vmatmul.mubr.f32.gmra.mrb[74].mxu1 %v15199_v57  ;;  %v15290_v59 = vld [vmem:[%s17238_s9 + $0xb8] sm:$0xff] }
 0x668   : > { %v10107_v8 = vpop.f32.mrb[15].mxu0  ;;  %7173 = vmatprep.mubr.f32.mxu0 %v14826_v22  ;;  %7495 = vmatprep.mubr.f32.mxu1 %v14826_v22 }
 0x669   : > { %v15218_v48 = vmax.f32 %v6881_v61, 0.0  ;;  %v10108_v17 = vadd.f32 %v10107_v8, %v10106_v62  ;;  %11084 = vmatpush1.bf16.msra.mxu0 %v11083_v35  ;;  %v15295_v35 = vld [vmem:[%s17238_s9 + $0xf8] sm:$0xff]  ;;  %v15309_v61 = vld [vmem:[%s17238_s9 + $0xf0] sm:$0xff] }
 0x66a   : > { %11086 = vmatprep.subr.bf16.mxu0 %v11085_v27  ;;  %v15302_v27 = vld [vmem:[%s17238_s9 + $0xb0] sm:$0xff]  ;;  %v15314_v62 = vld [vmem:[%s17238_s9 + $0x138] sm:$0xff]  ;;  %v11129_v8 = vpack.c.bf16 %v15295_v35, %v15290_v59 }
 0x66b   : > { %v6886_v45 = vadd.f32 %v10108_v17, %v15065_v14  ;;  %v10109_v0 = vpop.f32.mrb[16].mxu0  ;;  %7174 = vmatmul.mubr.f32.gmra.mrb[44].mxu0 %v15218_v48  ;;  %7496 = vmatmul.mubr.f32.gmra.mrb[76].mxu1 %v15218_v48 }
 0x66c   : > { %v10110_v20 = vpop.f32.mrb[17].mxu0  ;;  %7179 = vmatprep.mubr.f32.mxu0 %v14826_v22  ;;  %7501 = vmatprep.mubr.f32.mxu1 %v14826_v22 }
 0x66d   : > { %v15237_v38 = vmax.f32 %v6886_v45, 0.0  ;;  %v10111_v14 = vadd.f32 %v10110_v20, %v10109_v0  ;;  %11088 = vmatpush1.bf16.msra.mxu0 %v11087_v12  ;;  %v15339_v45 = vand.u32 127, %v17378_v5  ;;  %v17379_v0 = vld [vmem:[#allocation6_spill] sm:$0xff]  ;;  %v11131_v20 = vpack.c.bf16 %v15309_v61, %v15302_v27  ;;  %v7031_v61 = vld [vmem:[%s17238_s9 + $0x2b0] sm:$0xff] }
 0x66e   : > { %11090 = vmatprep.subr.bf16.mxu0 %v11089_v39  ;;  %v15331_v39 = vld [vmem:[%s17238_s9 + $0x130] sm:$0xff]  ;;  %v8024_v25 = vadd.s32 136, %v17379_v0  ;;  %v8028_v5 = vadd.s32 168, %v17379_v0  ;;  %v8031_v47 = vadd.s32 192, %v17379_v0  ;;  %v7727_v59 = vadd.s32 72, %v17379_v0 }
 0x66f   : > { %v6891_v41 = vadd.f32 %v10111_v14, %v15068_v6  ;;  %v10112_v46 = vpop.f32.mrb[18].mxu0  ;;  %7180 = vmatmul.mubr.f32.gmra.mrb[46].mxu0 %v15237_v38  ;;  %7502 = vmatmul.mubr.f32.gmra.mrb[78].mxu1 %v15237_v38  ;;  %v11133_v14 = vpack.c.bf16 %v15319_v19, %v15314_v62  ;;  %v7730_v13 = vadd.s32 96, %v17379_v0 }
 0x670   : > { %v10113_v16 = vpop.f32.mrb[19].mxu0  ;;  %7185 = vmatprep.mubr.f32.mxu0 %v14826_v22  ;;  %7507 = vmatprep.mubr.f32.mxu1 %v14826_v22  ;;  %v8143_v35 = vand.u32 31, %v8031_v47  ;;  %v7733_v47 = vadd.s32 120, %v17379_v0 }
 0x671   : > { %v15244_v15 = vmax.f32 %v6891_v41, 0.0  ;;  %v10114_v40 = vadd.f32 %v10113_v16, %v10112_v46  ;;  %11092 = vmatpush1.bf16.msra.mxu0 %v11091_v51  ;;  %v7719_v51 = vadd.s32 8, %v17379_v0  ;;  %v15358_v16 = vld [vmem:[%s17238_s9 + $0x1b8] sm:$0xff] }
 0x672   : > { %11126 = vmatprep.subr.bf16.mxu0 %v11125_v60  ;;  %v15351_v60 = vand.u32 31, %v17379_v0 }
 0x673   : > { %v6896_v44 = vadd.f32 %v10114_v40, %v15071_v32  ;;  %v10115_v49 = vpop.f32.mrb[20].mxu0  ;;  %7186 = vmatmul.mubr.f32.gmra.mrb[48].mxu0 %v15244_v15  ;;  %7508 = vmatmul.mubr.f32.gmra.mrb[80].mxu1 %v15244_v15 }
 0x674   : > { %v10116_v6 = vpop.f32.mrb[21].mxu0  ;;  %7191 = vmatprep.mubr.f32.mxu0 %v14826_v22  ;;  %7513 = vmatprep.mubr.f32.mxu1 %v14826_v22  ;;  %vm8247_vm6 = vcmp.eq.s32.totalorder %v15351_v60, %v15339_v45 }
 0x675   : > { %v15251_v56 = vmax.f32 %v6896_v44, 0.0  ;;  %v10117_v23 = vadd.f32 %v10116_v6, %v10115_v49  ;;  %v8136_v44 = vand.u32 31, %v8024_v25  ;;  %v11135_v49 = vpack.c.bf16 %v15336_v2, %v15331_v39  ;;  %v15365_v6 = vld [vmem:[%s17238_s9 + $0x1f8] sm:$0xff]  ;;  %v15431_v25 = vld [vmem:[#allocation4 + $0x80] sm:$0xff]  ;;  %v7015_v2 = vld [vmem:[%s17238_s9 + $0x230] sm:$0xff] }
 0x676   : > { %v7731_v39 = vadd.s32 104, %v17379_v0 }
 0x677   : > { %v6901_v50 = vadd.f32 %v10117_v23, %v15074_v18  ;;  %v10118_v33 = vpop.f32.mrb[22].mxu0  ;;  %7192 = vmatmul.mubr.f32.gmra.mrb[50].mxu0 %v15251_v56  ;;  %7514 = vmatmul.mubr.f32.gmra.mrb[82].mxu1 %v15251_v56  ;;  %v15370_v23 = vld [vmem:[%s17238_s9 + $0x1b0] sm:$0xff]  ;;  %vm8264_vm8 = vcmp.eq.s32.totalorder %v8136_v44, %v15339_v45  ;;  %v8029_v44 = vadd.s32 176, %v17379_v0 }
 0x678   : > { %v10119_v32 = vpop.f32.mrb[23].mxu0  ;;  %7197 = vmatprep.mubr.f32.mxu0 %v14826_v22  ;;  %7519 = vmatprep.mubr.f32.mxu1 %v14826_v22 }
 0x679   : > { %v15258_v52 = vmax.f32 %v6901_v50, 0.0  ;;  %v10120_v54 = vadd.f32 %v10119_v32, %v10118_v33  ;;  %v15375_v50 = vld [vmem:[%s17238_s9 + $0x1f0] sm:$0xff]  ;;  %v15377_v33 = vand.u32 31, %v7719_v51 }
 0x67b   : > { %v6906_v7 = vadd.f32 %v10120_v54, %v15077_v24  ;;  %v10121_v43 = vpop.f32.mrb[24].mxu0  ;;  %7198 = vmatmul.mubr.f32.gmra.mrb[52].mxu0 %v15258_v52  ;;  %7520 = vmatmul.mubr.f32.gmra.mrb[84].mxu1 %v15258_v52  ;;  %v15387_v54 = vld [vmem:[%s17238_s9 + $0x238] sm:$0xff]  ;;  %vm8248_vm10 = vcmp.eq.s32.totalorder %v15377_v33, %v15339_v45 }
 0x67c   : > { %v10122_v18 = vpop.f32.mrb[25].mxu0  ;;  %7203 = vmatprep.mubr.f32.mxu0 %v14826_v22  ;;  %7525 = vmatprep.mubr.f32.mxu1 %v14826_v22  ;;  %vm11159_vm11 = vmpackc.low %vm8248_vm10, %vm8247_vm6 }
 0x67d   : > { %v15265_v34 = vmax.f32 %v6906_v7, 0.0  ;;  %v10123_v53 = vadd.f32 %v10122_v18, %v10121_v43  ;;  %v15392_v7 = vld [vmem:[%s17238_s9 + $0x278] sm:$0xff]  ;;  %v8026_v43 = vadd.s32 152, %v17379_v0  ;;  %v7720_v18 = vadd.s32 16, %v17379_v0 }
 0x67f   : > { %v6911_v3 = vadd.f32 %v10123_v53, %v15080_v30  ;;  %v10124_v29 = vpop.f32.mrb[26].mxu0  ;;  %7204 = vmatmul.mubr.f32.gmra.mrb[54].mxu0 %v15265_v34  ;;  %7526 = vmatmul.mubr.f32.gmra.mrb[86].mxu1 %v15265_v34  ;;  %v7721_v53 = vadd.s32 24, %v17379_v0 }
 0x680   : > { %v10125_v24 = vpop.f32.mrb[27].mxu0  ;;  %7209 = vmatprep.mubr.f32.mxu0 %v14826_v22  ;;  %7531 = vmatprep.mubr.f32.mxu1 %v14826_v22 }
 0x681   : > { %v15272_v37 = vmax.f32 %v6911_v3, 0.0  ;;  %v10126_v28 = vadd.f32 %v10125_v24, %v10124_v29  ;;  %v11137_v29 = vpack.c.bf16 %v15365_v6, %v15358_v16  ;;  %v11139_v24 = vpack.c.bf16 %v15375_v50, %v15370_v23  ;;  %v7032_v6 = vld [vmem:[%s17238_s9 + $0x2b8] sm:$0xff]  ;;  %v7039_v23 = vld [vmem:[%s17238_s9 + $0x2f0] sm:$0xff] }
 0x682   : > { %v8037_v16 = vadd.s32 240, %v17379_v0  ;;  %v7048_v50 = vld [vmem:[%s17238_s9 + $0x338] sm:$0xff] }
 0x683   : > { %v6916_v30 = vadd.f32 %v10126_v28, %v15083_v11  ;;  %v10127_v9 = vpop.f32.mrb[28].mxu0  ;;  %7210 = vmatmul.mubr.f32.gmra.mrb[56].mxu0 %v15272_v37  ;;  %7532 = vmatmul.mubr.f32.gmra.mrb[88].mxu1 %v15272_v37  ;;  %v17297_v28 = vmov 1.0|1.0  }
 0x684   : > { %v10128_v11 = vpop.f32.mrb[29].mxu0  ;;  %7215 = vmatprep.mubr.f32.mxu0 %v14826_v22  ;;  %7537 = vmatprep.mubr.f32.mxu1 %v14826_v22 }
 0x685   : > { %v15304_v1 = vmax.f32 %v6916_v30, 0.0  ;;  %v10129_v31 = vadd.f32 %v10128_v11, %v10127_v9  ;;  %v11141_v30 = vpack.c.bf16 %v15392_v7, %v15387_v54  ;;  %v8138_v9 = vand.u32 31, %v8026_v43  ;;  %v7056_v54 = vld [vmem:[%s17238_s9 + $0x378] sm:$0xff] }
 0x686   : > { %v15417_v11 = vand.u32 31, %v7720_v18  ;;  %v7724_v43 = vadd.s32 48, %v17379_v0  ;;  %v7725_v18 = vadd.s32 56, %v17379_v0 }
 0x687   : > { %v6921_v17 = vadd.f32 %v10129_v31, %v15086_v58  ;;  %v10130_v12 = vpop.f32.mrb[30].mxu0  ;;  %7216 = vmatmul.mubr.f32.gmra.mrb[58].mxu0 %v15304_v1  ;;  %7538 = vmatmul.mubr.f32.gmra.mrb[90].mxu1 %v15304_v1  ;;  %v8023_v58 = vadd.s32 128, %v17379_v0  ;;  %v15419_v31 = vand.u32 31, %v7721_v53  ;;  %vm8266_vm13 = vcmp.eq.s32.totalorder %v8138_v9, %v15339_v45 }
 0x688   : > { %v10131_v26 = vpop.f32.mrb[31].mxu0  ;;  %7221 = vmatprep.mubr.f32.mxu0 %v14826_v22  ;;  %7543 = vmatprep.mubr.f32.mxu1 %v14826_v22  ;;  %vm8249_vm14 = vcmp.eq.s32.totalorder %v15417_v11, %v15339_v45  ;;  %v8141_v53 = vand.u32 31, %v8029_v44  ;;  %v15463_v9 = vand.u32 31, %v7724_v43  ;;  %v8034_v44 = vadd.s32 216, %v17379_v0 }
 0x689   : > { %v15353_v41 = vmax.f32 %v6921_v17, 0.0  ;;  %v10132_v46 = vadd.f32 %v10131_v26, %v10130_v12  ;;  %v8135_v40 = vand.u32 31, %v8023_v58  ;;  %v8027_v12 = vadd.s32 160, %v17379_v0 }
 0x68a   : > { %v7722_v58 = vadd.s32 32, %v17379_v0  ;;  %vm8250_vm15 = vcmp.eq.s32.totalorder %v15419_v31, %v15339_v45  ;;  %v7723_v26 = vadd.s32 40, %v17379_v0  ;;  %v15465_v17 = vand.u32 31, %v7725_v18  ;;  %v7055_v18 = vld [vmem:[%s17238_s9 + $0x370] sm:$0xff] }
 0x68b   : > { %v6926_v32 = vadd.f32 %v10132_v46, %v15089_v36  ;;  %7222 = vmatmul.mubr.f32.gmra.mrb[60].mxu0 %v15353_v41  ;;  %7544 = vmatmul.mubr.f32.gmra.mrb[92].mxu1 %v15353_v41  ;;  %vm8263_vm7 = vcmp.eq.s32.totalorder %v8135_v40, %v15339_v45  ;;  %v8025_v36 = vadd.s32 144, %v17379_v0  ;;  %v8139_v51 = vand.u32 31, %v8027_v12  ;;  %vm11163_vm1 = vmpackc.low %vm8250_vm15, %vm8249_vm14 }
 0x68c   : > { %7227 = vmatprep.mubr.f32.mxu0 %v14826_v22  ;;  %7549 = vmatprep.mubr.f32.mxu1 %v14826_v22  ;;  %vm11157_vm9 = vmpackc.low %vm8264_vm8, %vm8263_vm7  ;;  %v8140_v46 = vand.u32 31, %v8028_v5  ;;  %v15442_v40 = vand.u32 31, %v7722_v58  ;;  %vm15472_vm8 = vcmp.eq.s32.totalorder %v8141_v53, %v15339_v45  ;;  %v7726_v12 = vadd.s32 64, %v17379_v0 }
 0x68d   : > { %v15404_v3 = vmax.f32 %v6926_v32, 0.0  ;;  %11158 = vmatprep.subr.msk.bf16.mxu1 %vm11157_vm9, %v17297_v28  ;;  %v8137_v22 = vand.u32 31, %v8025_v36  ;;  %v15446_v32 = vand.u32 31, %v7723_v26  ;;  %v8030_v36 = vadd.s32 184, %v17379_v0 }
 0x68e   : > { %11160 = vmatpush3.bf16.msk.msra.mxu1 %vm11159_vm11, %v17297_v28  ;;  %vm8267_vm2 = vcmp.eq.s32.totalorder %v8139_v51, %v15339_v45  ;;  %vm8268_vm3 = vcmp.eq.s32.totalorder %v8140_v46, %v15339_v45  ;;  %vm8251_vm4 = vcmp.eq.s32.totalorder %v15442_v40, %v15339_v45  ;;  %vm8253_vm10 = vcmp.eq.s32.totalorder %v15463_v9, %v15339_v45 }
 0x68f   : > { %7228 = vmatmul.mubr.f32.gmra.mrb[62].mxu0 %v15404_v3  ;;  %7550 = vmatmul.mubr.f32.gmra.mrb[94].mxu1 %v15404_v3  ;;  %vm15424_vm12 = vcmp.eq.s32.totalorder %v8137_v22, %v15339_v45  ;;  %vm11165_vm5 = vmpackc.low %vm8268_vm3, %vm8267_vm2  ;;  %vm8252_vm6 = vcmp.eq.s32.totalorder %v15446_v32, %v15339_v45  ;;  %v8142_v22 = vand.u32 31, %v8030_v36  ;;  %vm8254_vm11 = vcmp.eq.s32.totalorder %v15465_v17, %v15339_v45 }
 0x690   : > { %7298 = vmatprep.mubr.f32.mxu0 %v15431_v25  ;;  %vm11161_vm0 = vmpackc.low %vm8266_vm13, %vm15424_vm12  ;;  %v15495_v58 = vand.u32 31, %v7726_v12  ;;  %v8033_v26 = vadd.s32 208, %v17379_v0  ;;  %v15506_v46 = vand.u32 31, %v7727_v59  ;;  %v7728_v36 = vadd.s32 80, %v17379_v0 }
 0x691   : > { %11162 = vmatprep.subr.msk.bf16.mxu1 %vm11161_vm0, %v17297_v28  ;;  %vm11167_vm7 = vmpackc.low %vm8252_vm6, %vm8251_vm4  ;;  %vm15480_vm9 = vcmp.eq.s32.totalorder %v8142_v22, %v15339_v45  ;;  %v7729_v43 = vadd.s32 88, %v17379_v0  ;;  %vm15516_vm14 = vcmp.eq.s32.totalorder %v8143_v35, %v15339_v45  ;;  %v8146_v62 = vand.u32 31, %v8034_v44 }
 0x692   : > { %11164 = vmatpush3.bf16.msk.msra.mxu1 %vm11163_vm1, %v17297_v28  ;;  %vm11169_vm12 = vmpackc.low %vm15480_vm9, %vm15472_vm8  ;;  %vm8255_vm0 = vcmp.eq.s32.totalorder %v15495_v58, %v15339_v45  ;;  %vm8256_vm2 = vcmp.eq.s32.totalorder %v15506_v46, %v15339_v45  ;;  %v15533_v19 = vand.u32 31, %v7728_v36  ;;  %v8035_v53 = vadd.s32 224, %v17379_v0 }
 0x693   : > { %7299 = vmatmul.mubr.f32.vlgmr.msra.gmra.mrb[64].mxu0 %v15104_v10  ;;  %11166 = vmatprep.subr.msk.bf16.mxu1 %vm11165_vm5, %v17297_v28  ;;  %vm15502_vm13 = vmpackc.low %vm8254_vm11, %vm8253_vm10  ;;  %v8036_v22 = vadd.s32 232, %v17379_v0  ;;  %vm15561_vm5 = vcmp.eq.s32.totalorder %v8146_v62, %v15339_v45  ;;  %v15585_v59 = vand.u32 31, %v7730_v13  ;;  %v15598_v35 = vand.u32 31, %v7731_v39  ;;  %v7047_v62 = vld [vmem:[%s17238_s9 + $0x330] sm:$0xff] }
 0x694   : > { %7304 = vmatprep.mubr.f32.mxu0 %v15431_v25  ;;  %11128 = vmatpush1.bf16.msra.mxu0 %v11127_v63  ;;  %v8032_v63 = vadd.s32 200, %v17379_v0  ;;  %vm15556_vm4 = vmpackc.low %vm8256_vm2, %vm8255_vm0  ;;  %vm8257_vm6 = vcmp.eq.s32.totalorder %v15533_v19, %v15339_v45  ;;  %v8147_v12 = vand.u32 31, %v8035_v53  ;;  %v8149_v44 = vand.u32 31, %v8037_v16  ;;  %v7064_v53 = vld [vmem:[%s17238_s9 + $0x3b8] sm:$0xff] }
 0x695   : > { %11130 = vmatprep.subr.bf16.mxu0 %v11129_v8  ;;  %v8148_v5 = vand.u32 31, %v8036_v22  ;;  %17398 = vst [vmem:[#allocation12_spill] sm:$0xff] %v15598_v35  ;;  %v7072_v22 = vld [vmem:[%s17238_s9 + $0x3f8] sm:$0xff]  ;;  %v7732_v13 = vadd.s32 112, %v17379_v0  ;;  %v8039_v51 = vadd.s32 256, %v17379_v0 }
 0x696   : > { %11168 = vmatpush3.bf16.msk.msra.mxu1 %vm11167_vm7, %v17297_v28  ;;  %v8144_v8 = vand.u32 31, %v8032_v63  ;;  %vm15606_vm9 = vcmp.eq.s32.totalorder %v8147_v12, %v15339_v45  ;;  %v11151_v63 = vpack.c.bf16 %v7055_v18, %v7047_v62  ;;  %v7063_v12 = vld [vmem:[%s17238_s9 + $0x3b0] sm:$0xff]  ;;  %v8060_v62 = vadd.s32 424, %v17379_v0 }
 0x697   : > { %7305 = vmatmul.mubr.f32.gmra.mrb[66].mxu0 %v15123_v55  ;;  %11170 = vmatprep.subr.msk.bf16.mxu1 %vm11169_vm12, %v17297_v28  ;;  %vm15611_vm10 = vcmp.eq.s32.totalorder %v8148_v5, %v15339_v45  ;;  %vm8259_vm12 = vcmp.eq.s32.totalorder %v15585_v59, %v15339_v45  ;;  %v15689_v39 = vand.u32 31, %v7732_v13  ;;  %v7071_v5 = vld [vmem:[%s17238_s9 + $0x3f0] sm:$0xff]  ;;  %v8047_v13 = vadd.s32 320, %v17379_v0 }
 0x698   : > { %7310 = vmatprep.mubr.f32.mxu0 %v15431_v25  ;;  %11132 = vmatpush1.bf16.msra.mxu0 %v11131_v20  ;;  %vm15521_vm15 = vcmp.eq.s32.totalorder %v8144_v8, %v15339_v45  ;;  %v8145_v20 = vand.u32 31, %v8033_v26  ;;  %v8038_v8 = vadd.s32 248, %v17379_v0  ;;  %v11155_v16 = vpack.c.bf16 %v7071_v5, %v7063_v12 }
 0x699   : > { %11134 = vmatprep.subr.bf16.mxu0 %v11133_v14  ;;  %vm11173_vm1 = vmpackc.low %vm15521_vm15, %vm15516_vm14  ;;  %v15535_v14 = vand.u32 31, %v7729_v43  ;;  %vm15657_vm15 = vcmp.eq.s32.totalorder %v8149_v44, %v15339_v45  ;;  %17407 = vst [vmem:[#allocation11_spill] sm:$0xff] %v15689_v39  ;;  %v8040_v44 = vadd.s32 264, %v17379_v0  ;;  %v8061_v5 = vadd.s32 432, %v17379_v0 }
 0x69a   : > { %11172 = vmatpush3.bf16.msk.msra.mxu1 %vm15502_vm13, %v17297_v28  ;;  %vm15542_vm3 = vcmp.eq.s32.totalorder %v8145_v20, %v15339_v45  ;;  %v8150_v43 = vand.u32 31, %v8038_v8  ;;  %vm8260_vm13 = vcmp.eq.s32.totalorder %v15598_v35, %v15339_v45  ;;  %vm11181_vm14 = vmpackc.low %vm15611_vm10, %vm15606_vm9  ;;  %v11149_v20 = vpack.c.bf16 %v7056_v54, %v7048_v50 }
 0x69b   : > { %7311 = vmatmul.mubr.f32.gmra.mrb[68].mxu0 %v15142_v42  ;;  %vm8258_vm7 = vcmp.eq.s32.totalorder %v15535_v14, %v15339_v45  ;;  %11174 = vmatprep.subr.msk.bf16.mxu1 %vm11173_vm1, %v17297_v28  ;;  %vm11177_vm8 = vmpackc.low %vm15561_vm5, %vm15542_vm3  ;;  %vm8261_vm3 = vcmp.eq.s32.totalorder %v15689_v39, %v15339_v45  ;;  %v8088_v50 = vadd.s32 648, %v17379_v0 }
 0x69c   : > { %7316 = vmatprep.mubr.f32.mxu0 %v15431_v25  ;;  %11136 = vmatpush1.bf16.msra.mxu0 %v11135_v49  ;;  %v7023_v49 = vld [vmem:[%s17238_s9 + $0x270] sm:$0xff]  ;;  %vm11179_vm11 = vmpackc.low %vm8258_vm7, %vm8257_vm6  ;;  %vm15662_vm0 = vcmp.eq.s32.totalorder %v8150_v43, %v15339_v45  ;;  %v8058_v43 = vadd.s32 408, %v17379_v0 }
 0x69d   : > { %11138 = vmatprep.subr.bf16.mxu0 %v11137_v29  ;;  %v7040_v29 = vld [vmem:[%s17238_s9 + $0x2f8] sm:$0xff]  ;;  %v11143_v36 = vpack.c.bf16 %v7023_v49, %v7015_v2  ;;  %vm11183_vm1 = vmpackc.low %vm8260_vm13, %vm8259_vm12  ;;  %v15691_v2 = vand.u32 31, %v7733_v47  ;;  %v11153_v49 = vpack.c.bf16 %v7072_v22, %v7064_v53  ;;  %v8200_v53 = vand.u32 31, %v8088_v50 }
 0x69e   : > { %11176 = vmatpush3.bf16.msk.msra.mxu1 %vm15556_vm4, %v17297_v28  ;;  %v11145_v27 = vpack.c.bf16 %v7040_v29, %v7032_v6  ;;  %vm11185_vm2 = vmpackc.low %vm15662_vm0, %vm15657_vm15  ;;  %v8055_v6 = vadd.s32 384, %v17379_v0  ;;  %v8056_v29 = vadd.s32 392, %v17379_v0  ;;  %v8170_v7 = vand.u32 31, %v8058_v43 }
 0x69f   : > { %7317 = vmatmul.mubr.f32.gmra.mrb[70].mxu0 %v15161_v21  ;;  %11178 = vmatprep.subr.msk.bf16.mxu1 %vm11177_vm8, %v17297_v28  ;;  %17408 = vst [vmem:[#allocation10_spill] sm:$0xff] %v15691_v2  ;;  %vm8262_vm4 = vcmp.eq.s32.totalorder %v15691_v2, %v15339_v45  ;;  %v8043_v47 = vadd.s32 288, %v17379_v0  ;;  %vm8328_vm12 = vcmp.eq.s32.totalorder %v8200_v53, %v15339_v45  ;;  %v8046_v43 = vadd.s32 312, %v17379_v0 }
 0x6a0   : > { %7322 = vmatprep.mubr.f32.mxu0 %v15431_v25  ;;  %11140 = vmatpush1.bf16.msra.mxu0 %v11139_v24  ;;  %vm11187_vm5 = vmpackc.low %vm8262_vm4, %vm8261_vm3  ;;  %v8167_v8 = vand.u32 31, %v8055_v6  ;;  %v8168_v26 = vand.u32 31, %v8056_v29  ;;  %v8041_v24 = vadd.s32 272, %v17379_v0  ;;  %vm15761_vm15 = vcmp.eq.s32.totalorder %v8170_v7, %v15339_v45 }
 0x6a1   : > { %11142 = vmatprep.subr.bf16.mxu0 %v11141_v30  ;;  %v11147_v30 = vpack.c.bf16 %v7039_v23, %v7031_v61  ;;  %v8152_v61 = vand.u32 31, %v8040_v44  ;;  %v8087_v23 = vadd.s32 640, %v17379_v0  ;;  %v8159_v6 = vand.u32 31, %v8047_v13 }
 0x6a2   : > { %11180 = vmatpush3.bf16.msk.msra.mxu1 %vm11179_vm11, %v17297_v28  ;;  %vm8295_vm6 = vcmp.eq.s32.totalorder %v8167_v8, %v15339_v45  ;;  %vm8296_vm7 = vcmp.eq.s32.totalorder %v8168_v26, %v15339_v45  ;;  %v8172_v26 = vand.u32 31, %v8060_v62  ;;  %v8068_v7 = vadd.s32 488, %v17379_v0 }
 0x6a3   : > { %7323 = vmatmul.mubr.f32.gmra.mrb[72].mxu0 %v15180_v4  ;;  %11182 = vmatprep.subr.msk.bf16.mxu1 %vm11181_vm14, %v17297_v28  ;;  %vm11189_vm8 = vmpackc.low %vm8296_vm7, %vm8295_vm6  ;;  %v8199_v18 = vand.u32 31, %v8087_v23  ;;  %vm15744_vm10 = vcmp.eq.s32.totalorder %v8152_v61, %v15339_v45  ;;  %v8173_v23 = vand.u32 31, %v8061_v5  ;;  %v8066_v5 = vadd.s32 472, %v17379_v0 }
 0x6a4   : > { %7328 = vmatprep.mubr.f32.mxu0 %v15431_v25  ;;  %11144 = vmatpush1.bf16.msra.mxu0 %v11143_v36  ;;  %v8057_v36 = vadd.s32 400, %v17379_v0  ;;  %v8069_v22 = vadd.s32 496, %v17379_v0  ;;  %v8070_v13 = vadd.s32 504, %v17379_v0 }
 0x6a5   : > { %11146 = vmatprep.subr.bf16.mxu0 %v11145_v27  ;;  %v8151_v27 = vand.u32 31, %v8039_v51  ;;  %vm8327_vm11 = vcmp.eq.s32.totalorder %v8199_v18, %v15339_v45  ;;  %v8155_v51 = vand.u32 31, %v8043_v47  ;;  %v8158_v18 = vand.u32 31, %v8046_v43 }
 0x6a6   : > { %11184 = vmatpush3.bf16.msk.msra.mxu1 %vm11183_vm1, %v17297_v28  ;;  %v8169_v54 = vand.u32 31, %v8057_v36  ;;  %vm11221_vm13 = vmpackc.low %vm8328_vm12, %vm8327_vm11  ;;  %v8045_v36 = vadd.s32 304, %v17379_v0  ;;  %v8048_v47 = vadd.s32 328, %v17379_v0  ;;  %v8178_v43 = vand.u32 31, %v8066_v5 }
 0x6a7   : > { %7329 = vmatmul.mubr.f32.gmra.mrb[74].mxu0 %v15199_v57  ;;  %11186 = vmatprep.subr.msk.bf16.mxu1 %vm11185_vm2, %v17297_v28  ;;  %vm15739_vm9 = vcmp.eq.s32.totalorder %v8151_v27, %v15339_v45  ;;  %vm15813_vm7 = vcmp.eq.s32.totalorder %v8155_v51, %v15339_v45  ;;  %v8120_v5 = vadd.s32 904, %v17379_v0  ;;  %v8076_v27 = vadd.s32 552, %v17379_v0 }
 0x6a8   : > { %7334 = vmatprep.mubr.f32.mxu0 %v15431_v25  ;;  %11148 = vmatpush1.bf16.msra.mxu0 %v11147_v30  ;;  %v8042_v30 = vadd.s32 280, %v17379_v0  ;;  %vm15756_vm14 = vcmp.eq.s32.totalorder %v8169_v54, %v15339_v45  ;;  %vm11191_vm0 = vmpackc.low %vm15744_vm10, %vm15739_vm9  ;;  %v8157_v62 = vand.u32 31, %v8045_v36  ;;  %vm15827_vm10 = vcmp.eq.s32.totalorder %v8173_v23, %v15339_v45 }
 0x6a9   : > { %11150 = vmatprep.subr.bf16.mxu0 %v11149_v20  ;;  %v8059_v20 = vadd.s32 416, %v17379_v0  ;;  %vm11193_vm1 = vmpackc.low %vm15761_vm15, %vm15756_vm14  ;;  %vm15859_vm14 = vcmp.eq.s32.totalorder %v8158_v18, %v15339_v45  ;;  %v8160_v29 = vand.u32 31, %v8048_v47  ;;  %v8052_v18 = vadd.s32 360, %v17379_v0 }
 0x6aa   : > { %11188 = vmatpush3.bf16.msk.msra.mxu1 %vm11187_vm5, %v17297_v28  ;;  %v8154_v12 = vand.u32 31, %v8042_v30  ;;  %vm15794_vm5 = vcmp.eq.s32.totalorder %v8172_v26, %v15339_v45  ;;  %v8064_v30 = vadd.s32 456, %v17379_v0  ;;  %v8050_v26 = vadd.s32 344, %v17379_v0 }
 0x6ab   : > { %7335 = vmatmul.mubr.f32.gmra.mrb[76].mxu0 %v15218_v48  ;;  %v8171_v8 = vand.u32 31, %v8059_v20  ;;  %11222 = vmatprep.subr.msk.bf16.mxu1 %vm11221_vm13, %v17297_v28  ;;  %vm15854_vm13 = vcmp.eq.s32.totalorder %v8157_v62, %v15339_v45  ;;  %v8180_v20 = vand.u32 31, %v8068_v7  ;;  %v8051_v62 = vadd.s32 352, %v17379_v0 }
 0x6ac   : > { %7340 = vmatprep.mubr.f32.mxu0 %v15431_v25  ;;  %11152 = vmatpush1.bf16.msra.mxu0 %v11151_v63  ;;  %v8044_v63 = vadd.s32 296, %v17379_v0  ;;  %vm15783_vm3 = vcmp.eq.s32.totalorder %v8154_v12, %v15339_v45  ;;  %v8065_v12 = vadd.s32 464, %v17379_v0  ;;  %v8162_v23 = vand.u32 31, %v8050_v26 }
 0x6ad   : > { %11154 = vmatprep.subr.bf16.mxu0 %v11153_v49  ;;  %v8153_v49 = vand.u32 31, %v8041_v24  ;;  %vm15789_vm4 = vcmp.eq.s32.totalorder %v8171_v8, %v15339_v45  ;;  %v8063_v24 = vadd.s32 448, %v17379_v0  ;;  %v8049_v8 = vadd.s32 336, %v17379_v0 }
 0x6ae   : > { %v8156_v44 = vand.u32 31, %v8044_v63  ;;  %vm11197_vm9 = vmpackc.low %vm15794_vm5, %vm15789_vm4  ;;  %v8177_v36 = vand.u32 31, %v8065_v12  ;;  %vm15892_vm4 = vcmp.eq.s32.totalorder %v8159_v6, %v15339_v45  ;;  %vm15897_vm5 = vcmp.eq.s32.totalorder %v8160_v29, %v15339_v45 }
 0x6af   : > { %7341 = vmatmul.mubr.f32.gmra.mrb[78].mxu0 %v15237_v38  ;;  %vm15778_vm2 = vcmp.eq.s32.totalorder %v8153_v49, %v15339_v45  ;;  %v8175_v63 = vand.u32 31, %v8063_v24  ;;  %v8176_v49 = vand.u32 31, %v8064_v30  ;;  %v8161_v61 = vand.u32 31, %v8049_v8 }
 0x6b0   : > { %7346 = vmatprep.mubr.f32.mxu0 %v15431_v25  ;;  %11156 = vmatpush1.bf16.msra.mxu0 %v11155_v16  ;;  %v8062_v16 = vadd.s32 440, %v17379_v0  ;;  %vm11195_vm6 = vmpackc.low %vm15783_vm3, %vm15778_vm2  ;;  %v8164_v53 = vand.u32 31, %v8052_v18  ;;  %v8182_v47 = vand.u32 31, %v8070_v13  ;;  %v8092_v8 = vadd.s32 680, %v17379_v0 }
 0x6b1   : > { %11190 = vmatprep.subr.msk.bf16.mxu0 %vm11189_vm8, %v17297_v28  ;;  %vm15818_vm8 = vcmp.eq.s32.totalorder %v8156_v44, %v15339_v45  ;;  %vm11203_vm2 = vmpackc.low %vm15859_vm14, %vm15854_vm13  ;;  %vm8308_vm14 = vcmp.eq.s32.totalorder %v8180_v20, %v15339_v45  ;;  %v16002_v44 = vshra.s32 %v15339_v45, 5  ;;  %v8093_v24 = vadd.s32 688, %v17379_v0 }
 0x6b2   : > { %v8174_v50 = vand.u32 31, %v8062_v16  ;;  %vm11199_vm12 = vmpackc.low %vm15818_vm8, %vm15813_vm7  ;;  %vm15908_vm7 = vcmp.eq.s32.totalorder %v8178_v43, %v15339_v45  ;;  %v8232_v16 = vand.u32 31, %v8120_v5  ;;  %v8204_v54 = vand.u32 31, %v8092_v8 }
 0x6b3   : > { %7347 = vmatmul.mubr.f32.gmra.mrb[80].mxu0 %v15244_v15  ;;  %vm11207_vm8 = vmpackc.low %vm15897_vm5, %vm15892_vm4  ;;  %vm8310_vm4 = vcmp.eq.s32.totalorder %v8182_v47, %v15339_v45  ;;  %17453 = vst [vmem:[#allocation9_spill] sm:$0xff] %v16002_v44  ;;  %v8094_v30 = vadd.s32 696, %v17379_v0  ;;  %v8188_v13 = vand.u32 31, %v8076_v27  ;;  %v8096_v5 = vadd.s32 712, %v17379_v0 }
 0x6b4   : > { %7352 = vmatprep.mubr.f32.mxu0 %v15431_v25  ;;  %vm15832_vm11 = vcmp.eq.s32.totalorder %v8174_v50, %v15339_v45 }
 0x6b5   : > { %vm11201_vm15 = vmpackc.low %vm15832_vm11, %vm15827_vm10  ;;  %vm15926_vm10 = vcmp.eq.s32.totalorder %v8161_v61, %v15339_v45  ;;  %vm15931_vm11 = vcmp.eq.s32.totalorder %v8162_v23, %v15339_v45 }
 0x6b7   : > { %7353 = vmatmul.mubr.f32.gmra.mrb[82].mxu0 %v15251_v56 }
 0x6b8   : > { %7358 = vmatprep.mubr.f32.mxu0 %v15431_v25 }
 0x6bb   : > { %7359 = vmatmul.mubr.f32.gmra.mrb[84].mxu0 %v15258_v52 }
 0x6bc   : > { %7364 = vmatprep.mubr.f32.mxu0 %v15431_v25 }
 0x6bf   : > { %7365 = vmatmul.mubr.f32.gmra.mrb[86].mxu0 %v15265_v34 }
 0x6c0   : > { %7370 = vmatprep.mubr.f32.mxu0 %v15431_v25 }
 0x6c3   : > { %7371 = vmatmul.mubr.f32.gmra.mrb[88].mxu0 %v15272_v37 }
 0x6c4   : > { %7376 = vmatprep.mubr.f32.mxu0 %v15431_v25 }
 0x6c7   : > { %7377 = vmatmul.mubr.f32.gmra.mrb[90].mxu0 %v15304_v1 }
 0x6c8   : > { %7382 = vmatprep.mubr.f32.mxu0 %v15431_v25 }
 0x6cb   : > { %7383 = vmatmul.mubr.f32.gmra.mrb[92].mxu0 %v15353_v41 }
 0x6cc   : > { %7388 = vmatprep.mubr.f32.mxu0 %v15431_v25 }
 0x6cf   : > { %7389 = vmatmul.mubr.f32.gmra.mrb[94].mxu0 %v15404_v3 }
 0x6d0   : > { %7620 = vmatprep.mubr.f32.mxu0 %v15431_v25 }
 0x6d3   : > { %7621 = vmatmul.mubr.f32.vlgmr.msra.gmra.mrb[96].mxu0 %v15104_v10 }
 0x6d4   : > { %7626 = vmatprep.mubr.f32.mxu0 %v15431_v25  ;;  %11192 = vmatpush3.bf16.msk.msra.mxu0 %vm11191_vm0, %v17297_v28  ;;  %vm15871_vm0 = vcmp.eq.s32.totalorder %v8175_v63, %v15339_v45  ;;  %v8053_v63 = vadd.s32 368, %v17379_v0 }
 0x6d5   : > { %11194 = vmatprep.subr.msk.bf16.mxu0 %vm11193_vm1, %v17297_v28  ;;  %vm15876_vm1 = vcmp.eq.s32.totalorder %v8176_v49, %v15339_v45  ;;  %v8054_v49 = vadd.s32 376, %v17379_v0 }
 0x6d6   : > { %vm11205_vm3 = vmpackc.low %vm15876_vm1, %vm15871_vm0  ;;  %vm8292_vm1 = vcmp.eq.s32.totalorder %v8164_v53, %v15339_v45  ;;  %v8099_v53 = vadd.s32 736, %v17379_v0 }
 0x6d7   : > { %7627 = vmatmul.mubr.f32.gmra.mrb[98].mxu0 %v15123_v55  ;;  %v8166_v12 = vand.u32 31, %v8054_v49  ;;  %v8078_v49 = vadd.s32 568, %v17379_v0 }
 0x6d8   : > { %7632 = vmatprep.mubr.f32.mxu0 %v15431_v25  ;;  %11196 = vmatpush3.bf16.msk.msra.mxu0 %vm11195_vm6, %v17297_v28  ;;  %vm15903_vm6 = vcmp.eq.s32.totalorder %v8177_v36, %v15339_v45 }
 0x6d9   : > { %11198 = vmatprep.subr.msk.bf16.mxu0 %vm11197_vm9, %v17297_v28  ;;  %vm11209_vm9 = vmpackc.low %vm15908_vm7, %vm15903_vm6  ;;  %vm8294_vm7 = vcmp.eq.s32.totalorder %v8166_v12, %v15339_v45  ;;  %v8206_v12 = vand.u32 31, %v8094_v30 }
 0x6db   : > { %7633 = vmatmul.mubr.f32.gmra.mrb[100].mxu0 %v15142_v42  ;;  %v8075_v42 = vadd.s32 544, %v17379_v0 }
 0x6dc   : > { %7638 = vmatprep.mubr.f32.mxu0 %v15431_v25  ;;  %11200 = vmatpush3.bf16.msk.msra.mxu0 %vm11199_vm12, %v17297_v28  ;;  %vm11211_vm12 = vmpackc.low %vm15931_vm11, %vm15926_vm10  ;;  %vm8360_vm10 = vcmp.eq.s32.totalorder %v8232_v16, %v15339_v45 }
 0x6dd   : > { %11202 = vmatprep.subr.msk.bf16.mxu0 %vm11201_vm15, %v17297_v28 }
 0x6df   : > { %7639 = vmatmul.mubr.f32.gmra.mrb[102].mxu0 %v15161_v21  ;;  %v8067_v21 = vadd.s32 480, %v17379_v0 }
 0x6e0   : > { %7644 = vmatprep.mubr.f32.mxu0 %v15431_v25  ;;  %11204 = vmatpush3.bf16.msk.msra.mxu0 %vm11203_vm2, %v17297_v28 }
 0x6e1   : > { %11206 = vmatprep.subr.msk.bf16.mxu0 %vm11205_vm3, %v17297_v28  ;;  %v8179_v10 = vand.u32 31, %v8067_v21  ;;  %v8082_v21 = vadd.s32 600, %v17379_v0 }
 0x6e3   : > { %7645 = vmatmul.mubr.f32.gmra.mrb[104].mxu0 %v15180_v4  ;;  %vm8307_vm13 = vcmp.eq.s32.totalorder %v8179_v10, %v15339_v45  ;;  %v8163_v4 = vand.u32 31, %v8051_v62 }
 0x6e4   : > { %7650 = vmatprep.mubr.f32.mxu0 %v15431_v25  ;;  %11208 = vmatpush3.bf16.msk.msra.mxu0 %vm11207_vm8, %v17297_v28  ;;  %vm11213_vm15 = vmpackc.low %vm8308_vm14, %vm8307_vm13 }
 0x6e5   : > { %11210 = vmatprep.subr.msk.bf16.mxu0 %vm11209_vm9, %v17297_v28  ;;  %vm8291_vm0 = vcmp.eq.s32.totalorder %v8163_v4, %v15339_v45 }
 0x6e6   : > { %vm11215_vm2 = vmpackc.low %vm8292_vm1, %vm8291_vm0  ;;  %vm7767_vm1 = vcmp.eq.s32.totalorder %v15351_v60, %v16002_v44 }
 0x6e7   : > { %7651 = vmatmul.mubr.f32.gmra.mrb[106].mxu0 %v15199_v57  ;;  %v8181_v57 = vand.u32 31, %v8069_v22  ;;  %v8187_v22 = vand.u32 31, %v8075_v42 }
 0x6e8   : > { %7656 = vmatprep.mubr.f32.mxu0 %v15431_v25  ;;  %11212 = vmatpush3.bf16.msk.msra.mxu0 %vm11211_vm12, %v17297_v28 }
 0x6e9   : > { %11214 = vmatprep.subr.msk.bf16.mxu0 %vm11213_vm15, %v17297_v28  ;;  %vm8309_vm3 = vcmp.eq.s32.totalorder %v8181_v57, %v15339_v45 }
 0x6ea   : > { %vm11217_vm5 = vmpackc.low %vm8310_vm4, %vm8309_vm3 }
 0x6eb   : > { %7657 = vmatmul.mubr.f32.gmra.mrb[108].mxu0 %v15218_v48  ;;  %v8165_v48 = vand.u32 31, %v8053_v63  ;;  %v8077_v63 = vadd.s32 560, %v17379_v0 }
 0x6ec   : > { %7662 = vmatprep.mubr.f32.mxu0 %v15431_v25  ;;  %11216 = vmatpush3.bf16.msk.msra.mxu0 %vm11215_vm2, %v17297_v28 }
 0x6ed   : > { %11218 = vmatprep.subr.msk.bf16.mxu0 %vm11217_vm5, %v17297_v28  ;;  %vm8293_vm6 = vcmp.eq.s32.totalorder %v8165_v48, %v15339_v45  ;;  %v8205_v48 = vand.u32 31, %v8093_v24 }
 0x6ee   : > { %vm11219_vm8 = vmpackc.low %vm8294_vm7, %vm8293_vm6 }
 0x6ef   : > { %7663 = vmatmul.mubr.f32.gmra.mrb[110].mxu0 %v15237_v38  ;;  %v8119_v38 = vadd.s32 896, %v17379_v0 }
 0x6f0   : > { %7668 = vmatprep.mubr.f32.mxu0 %v15431_v25  ;;  %11220 = vmatpush3.bf16.msk.msra.mxu0 %vm11219_vm8, %v17297_v28  ;;  %vm16063_vm8 = vcmp.eq.s32.totalorder %v8204_v54, %v15339_v45  ;;  %v8081_v54 = vadd.s32 592, %v17379_v0 }
 0x6f1   : > { %v8231_v55 = vand.u32 31, %v8119_v38  ;;  %v8095_v38 = vadd.s32 704, %v17379_v0 }
 0x6f3   : > { %7669 = vmatmul.mubr.f32.gmra.mrb[112].mxu0 %v15244_v15  ;;  %vm8359_vm9 = vcmp.eq.s32.totalorder %v8231_v55, %v15339_v45  ;;  %v7752_v15 = vadd.s32 128, %v15339_v45 }
 0x6f4   : > { %7674 = vmatprep.mubr.f32.mxu0 %v15431_v25  ;;  %vm11253_vm11 = vmpackc.low %vm8360_vm10, %vm8359_vm9  ;;  %vm7775_vm9 = vcmp.eq.s32.totalorder %v15377_v33, %v16002_v44 }
 0x6f5   : > { %11254 = vmatprep.subr.msk.bf16.mxu0 %vm11253_vm11, %v17297_v28  ;;  %v15993_v6 = vshra.s32 %v7752_v15, 5 }
 0x6f7   : > { %7675 = vmatmul.mubr.f32.gmra.mrb[114].mxu0 %v15251_v56  ;;  %v8071_v56 = vadd.s32 512, %v17379_v0  ;;  %vm7768_vm12 = vcmp.eq.s32.totalorder %v15351_v60, %v15993_v6  ;;  %vm7776_vm2 = vcmp.eq.s32.totalorder %v15377_v33, %v15993_v6  ;;  %vm7784_vm10 = vcmp.eq.s32.totalorder %v15417_v11, %v15993_v6 }
 0x6f8   : > { %7680 = vmatprep.mubr.f32.mxu0 %v15431_v25 }
 0x6f9   : > { %v8183_v29 = vand.u32 31, %v8071_v56 }
 0x6fb   : > { %7681 = vmatmul.mubr.f32.gmra.mrb[116].mxu0 %v15258_v52  ;;  %v8072_v52 = vadd.s32 520, %v17379_v0  ;;  %vm16007_vm13 = vcmp.eq.s32.totalorder %v8183_v29, %v15339_v45  ;;  %v8190_v29 = vand.u32 31, %v8078_v49  ;;  %v7756_v49 = vadd.s32 640, %v15339_v45 }
 0x6fc   : > { %7686 = vmatprep.mubr.f32.mxu0 %v15431_v25 }
 0x6ff   : > { %7687 = vmatmul.mubr.f32.gmra.mrb[118].mxu0 %v15265_v34  ;;  %v8089_v34 = vadd.s32 656, %v17379_v0 }
 0x700   : > { %7692 = vmatprep.mubr.f32.mxu0 %v15431_v25 }
 0x701   : > { %v8201_v26 = vand.u32 31, %v8089_v34  ;;  %v8211_v34 = vand.u32 31, %v8099_v53 }
 0x703   : > { %7693 = vmatmul.mubr.f32.gmra.mrb[120].mxu0 %v15272_v37  ;;  %v8090_v37 = vadd.s32 664, %v17379_v0  ;;  %vm16017_vm15 = vcmp.eq.s32.totalorder %v8201_v26, %v15339_v45 }
 0x704   : > { %7698 = vmatprep.mubr.f32.mxu0 %v15431_v25 }
 0x705   : > { %v8202_v51 = vand.u32 31, %v8090_v37  ;;  %v8079_v37 = vadd.s32 576, %v17379_v0 }
 0x707   : > { %7699 = vmatmul.mubr.f32.gmra.mrb[122].mxu0 %v15304_v1  ;;  %v8073_v1 = vadd.s32 528, %v17379_v0  ;;  %vm16022_vm0 = vcmp.eq.s32.totalorder %v8202_v51, %v15339_v45  ;;  %v8207_v51 = vand.u32 31, %v8095_v38  ;;  %v8191_v23 = vand.u32 31, %v8079_v37 }
 0x708   : > { %7704 = vmatprep.mubr.f32.mxu0 %v15431_v25  ;;  %vm11225_vm6 = vmpackc.low %vm16022_vm0, %vm16017_vm15  ;;  %vm16120_vm15 = vcmp.eq.s32.totalorder %v8205_v48, %v15339_v45  ;;  %vm16125_vm0 = vcmp.eq.s32.totalorder %v8206_v12, %v15339_v45  ;;  %v8193_v12 = vand.u32 31, %v8081_v54  ;;  %v8194_v38 = vand.u32 31, %v8082_v21 }
 0x709   : > { %v8185_v36 = vand.u32 31, %v8073_v1  ;;  %v8080_v1 = vadd.s32 584, %v17379_v0 }
 0x70b   : > { %7705 = vmatmul.mubr.f32.gmra.mrb[124].mxu0 %v15353_v41  ;;  %v8074_v41 = vadd.s32 536, %v17379_v0  ;;  %vm16041_vm4 = vcmp.eq.s32.totalorder %v8185_v36, %v15339_v45  ;;  %v8208_v36 = vand.u32 31, %v8096_v5 }
 0x70c   : > { %7710 = vmatprep.mubr.f32.mxu0 %v15431_v25  ;;  %v8184_v25 = vand.u32 31, %v8072_v52  ;;  %v8084_v52 = vadd.s32 616, %v17379_v0 }
 0x70d   : > { %v8186_v43 = vand.u32 31, %v8074_v41  ;;  %v8189_v41 = vand.u32 31, %v8077_v63 }
 0x70e   : > { %vm16012_vm14 = vcmp.eq.s32.totalorder %v8184_v25, %v15339_v45  ;;  %v8097_v25 = vadd.s32 720, %v17379_v0 }
 0x70f   : > { %7711 = vmatmul.mubr.f32.gmra.mrb[126].mxu0 %v15404_v3  ;;  %v8091_v3 = vadd.s32 672, %v17379_v0  ;;  %vm11223_vm3 = vmpackc.low %vm16012_vm14, %vm16007_vm13  ;;  %vm16046_vm5 = vcmp.eq.s32.totalorder %v8186_v43, %v15339_v45  ;;  %vm16101_vm13 = vcmp.eq.s32.totalorder %v8188_v13, %v15339_v45 }
 0x710   : > { %vm11227_vm11 = vmpackc.low %vm16046_vm5, %vm16041_vm4  ;;  %vm16163_vm5 = vcmp.eq.s32.totalorder %v8189_v41, %v15339_v45  ;;  %v8209_v30 = vand.u32 31, %v8097_v25  ;;  %v8102_v41 = vadd.s32 760, %v17379_v0 }
 0x711   : > { %v8203_v50 = vand.u32 31, %v8091_v3  ;;  %v8098_v3 = vadd.s32 728, %v17379_v0  ;;  %vm11233_vm4 = vmpackc.low %vm16125_vm0, %vm16120_vm15 }
 0x712   : > { %vm16229_vm15 = vcmp.eq.s32.totalorder %v8209_v30, %v15339_v45  ;;  %v8214_v7 = vand.u32 31, %v8102_v41 }
 0x713   : > { %vm16058_vm7 = vcmp.eq.s32.totalorder %v8203_v50, %v15339_v45  ;;  %v8192_v50 = vand.u32 31, %v8080_v1  ;;  %v8101_v1 = vadd.s32 752, %v17379_v0 }
 0x714   : > { %vm11229_vm14 = vmpackc.low %vm16063_vm8, %vm16058_vm7  ;;  %vm16176_vm7 = vcmp.eq.s32.totalorder %v8207_v51, %v15339_v45  ;;  %vm16181_vm8 = vcmp.eq.s32.totalorder %v8208_v36, %v15339_v45 }
 0x715   : > { %v8213_v21 = vand.u32 31, %v8101_v1 }
 0x726   : > { %v7139_v10 = vpop.f32.mrb[32].mxu0  ;;  %v16028_v20 = vpop.f32.mrb[64].mxu1 }
 0x727   : > { %v7141_v62 = vpop.f32.mrb[33].mxu0  ;;  %v16034_v18 = vpop.f32.mrb[65].mxu1 }
 0x728   : > { %9500 = vmatprep.mubr.msk.f32.mxu1 %vm7768_vm12, %v7141_v62  ;;  %vm16096_vm12 = vcmp.eq.s32.totalorder %v8187_v22, %v15339_v45  ;;  %v8100_v22 = vadd.s32 744, %v17379_v0 }
 0x729   : > { %9501 = vmatmul.mubr.msk.f32.vlgmr.msra.gmra.mrb[96].mxu1 %vm7767_vm1, %v7139_v10  ;;  %vm7783_vm1 = vcmp.eq.s32.totalorder %v15417_v11, %v16002_v44  ;;  %v8210_v10 = vand.u32 31, %v8098_v3 }
 0x72a   : > { %v7145_v55 = vpop.f32.mrb[34].mxu0  ;;  %v16071_v16 = vpop.f32.mrb[66].mxu1  ;;  %11224 = vmatpush3.bf16.msk.msra.mxu1 %vm11223_vm3, %v17297_v28  ;;  %vm11231_vm3 = vmpackc.low %vm16101_vm13, %vm16096_vm12  ;;  %vm16217_vm12 = vcmp.eq.s32.totalorder %v8192_v50, %v15339_v45  ;;  %v8212_v37 = vand.u32 31, %v8100_v22 }
 0x72b   : > { %v7147_v15 = vpop.f32.mrb[35].mxu0  ;;  %v16083_v56 = vpop.f32.mrb[67].mxu1  ;;  %11226 = vmatprep.subr.msk.bf16.mxu1 %vm11225_vm6, %v17297_v28  ;;  %vm16168_vm6 = vcmp.eq.s32.totalorder %v8190_v29, %v15339_v45  ;;  %vm11237_vm13 = vmpackc.low %vm16181_vm8, %vm16176_vm7  ;;  %vm16234_vm0 = vcmp.eq.s32.totalorder %v8210_v10, %v15339_v45  ;;  %vm16289_vm7 = vcmp.eq.s32.totalorder %v8211_v34, %v15339_v45 }
 0x72c   : > { %9502 = vmatprep.mubr.msk.f32.mxu1 %vm7776_vm2, %v7147_v15  ;;  %vm7792_vm2 = vcmp.eq.s32.totalorder %v15419_v31, %v15993_v6  ;;  %v8083_v15 = vadd.s32 608, %v17379_v0  ;;  %vm16294_vm8 = vcmp.eq.s32.totalorder %v8212_v37, %v15339_v45 }
 0x72d   : > { %9503 = vmatmul.mubr.msk.f32.gmra.mrb[98].mxu1 %vm7775_vm9, %v7145_v55  ;;  %vm7791_vm9 = vcmp.eq.s32.totalorder %v15419_v31, %v16002_v44  ;;  %v7754_v55 = vadd.s32 384, %v15339_v45 }
 0x72e   : > { %v7151_v43 = vpop.f32.mrb[36].mxu0  ;;  %v16129_v42 = vpop.f32.mrb[68].mxu1  ;;  %11228 = vmatpush3.bf16.msk.msra.mxu1 %vm11227_vm11, %v17297_v28  ;;  %vm11235_vm11 = vmpackc.low %vm16168_vm6, %vm16163_vm5  ;;  %vm16275_vm5 = vcmp.eq.s32.totalorder %v8194_v38, %v15339_v45  ;;  %v8195_v36 = vand.u32 31, %v8083_v15  ;;  %v7753_v15 = vadd.s32 256, %v15339_v45 }
 0x72f   : > { %v7153_v27 = vpop.f32.mrb[37].mxu0  ;;  %v16141_v61 = vpop.f32.mrb[69].mxu1  ;;  %11230 = vmatprep.subr.msk.bf16.mxu1 %vm11229_vm14, %v17297_v28  ;;  %vm16212_vm14 = vcmp.eq.s32.totalorder %v8191_v23, %v15339_v45  ;;  %vm11241_vm6 = vmpackc.low %vm16234_vm0, %vm16229_vm15  ;;  %v8086_v23 = vadd.s32 632, %v17379_v0  ;;  %vm16340_vm15 = vcmp.eq.s32.totalorder %v8213_v21, %v15339_v45  ;;  %vm16345_vm0 = vcmp.eq.s32.totalorder %v8214_v7, %v15339_v45 }
 0x730   : > { %9504 = vmatprep.mubr.msk.f32.mxu1 %vm7784_vm10, %v7153_v27  ;;  %vm7800_vm10 = vcmp.eq.s32.totalorder %v15442_v40, %v15993_v6  ;;  %v8085_v27 = vadd.s32 624, %v17379_v0 }
 0x731   : > { %9505 = vmatmul.mubr.msk.f32.gmra.mrb[100].mxu1 %vm7783_vm1, %v7151_v43  ;;  %vm7799_vm1 = vcmp.eq.s32.totalorder %v15442_v40, %v16002_v44  ;;  %v8196_v43 = vand.u32 31, %v8084_v52 }
 0x732   : > { %v7157_v13 = vpop.f32.mrb[38].mxu0  ;;  %v16187_v57 = vpop.f32.mrb[70].mxu1  ;;  %11232 = vmatpush3.bf16.msk.msra.mxu1 %vm11231_vm3, %v17297_v28  ;;  %vm11239_vm3 = vmpackc.low %vm16217_vm12, %vm16212_vm14  ;;  %vm16328_vm14 = vcmp.eq.s32.totalorder %v8195_v36, %v15339_v45  ;;  %v8197_v22 = vand.u32 31, %v8085_v27 }
 0x733   : > { %v7159_v47 = vpop.f32.mrb[39].mxu0  ;;  %v16199_v63 = vpop.f32.mrb[71].mxu1  ;;  %11234 = vmatprep.subr.msk.bf16.mxu1 %vm11233_vm4, %v17297_v28  ;;  %vm16270_vm4 = vcmp.eq.s32.totalorder %v8193_v12, %v15339_v45  ;;  %vm16333_vm12 = vcmp.eq.s32.totalorder %v8196_v43, %v15339_v45 }
 0x734   : > { %9506 = vmatprep.mubr.msk.f32.mxu1 %vm7792_vm2, %v7159_v47  ;;  %vm7808_vm2 = vcmp.eq.s32.totalorder %v15446_v32, %v15993_v6 }
 0x735   : > { %9507 = vmatmul.mubr.msk.f32.gmra.mrb[102].mxu1 %vm7791_vm9, %v7157_v13  ;;  %vm7807_vm9 = vcmp.eq.s32.totalorder %v15446_v32, %v16002_v44  ;;  %v8198_v13 = vand.u32 31, %v8086_v23 }
 0x736   : > { %v7163_v29 = vpop.f32.mrb[40].mxu0  ;;  %v16245_v25 = vpop.f32.mrb[72].mxu1  ;;  %11236 = vmatpush3.bf16.msk.msra.mxu1 %vm11235_vm11, %v17297_v28  ;;  %vm11245_vm11 = vmpackc.low %vm16294_vm8, %vm16289_vm7  ;;  %vm7823_vm7 = vcmp.eq.s32.totalorder %v15465_v17, %v16002_v44 }
 0x737   : > { %v7165_v3 = vpop.f32.mrb[41].mxu0  ;;  %v16255_v8 = vpop.f32.mrb[73].mxu1  ;;  %11238 = vmatprep.subr.msk.bf16.mxu1 %vm11237_vm13, %v17297_v28  ;;  %vm7816_vm13 = vcmp.eq.s32.totalorder %v15463_v9, %v15993_v6 }
 0x738   : > { %9508 = vmatprep.mubr.msk.f32.mxu1 %vm7800_vm10, %v7165_v3  ;;  %vm11243_vm10 = vmpackc.low %vm16275_vm5, %vm16270_vm4  ;;  %vm16366_vm4 = vcmp.eq.s32.totalorder %v8197_v22, %v15339_v45  ;;  %vm16371_vm5 = vcmp.eq.s32.totalorder %v8198_v13, %v15339_v45 }
 0x739   : > { %9509 = vmatmul.mubr.msk.f32.gmra.mrb[104].mxu1 %vm7799_vm1, %v7163_v29  ;;  %vm7815_vm1 = vcmp.eq.s32.totalorder %v15463_v9, %v16002_v44  ;;  %vm11251_vm8 = vmpackc.low %vm16371_vm5, %vm16366_vm4  ;;  %vm7871_vm4 = vcmp.eq.s32.totalorder %v15598_v35, %v16002_v44  ;;  %vm7880_vm5 = vcmp.eq.s32.totalorder %v15689_v39, %v15993_v6 }
 0x73a   : > { %v7169_v24 = vpop.f32.mrb[42].mxu0  ;;  %v16298_v30 = vpop.f32.mrb[74].mxu1  ;;  %11240 = vmatpush3.bf16.msk.msra.mxu1 %vm11239_vm3, %v17297_v28  ;;  %vm11249_vm3 = vmpackc.low %vm16345_vm0, %vm16340_vm15  ;;  %vm7856_vm15 = vcmp.eq.s32.totalorder %v15535_v14, %v15993_v6  ;;  %vm7855_vm0 = vcmp.eq.s32.totalorder %v15535_v14, %v16002_v44 }
 0x73b   : > { %v7171_v10 = vpop.f32.mrb[43].mxu0  ;;  %v16308_v62 = vpop.f32.mrb[75].mxu1  ;;  %11242 = vmatprep.subr.msk.bf16.mxu1 %vm11241_vm6, %v17297_v28  ;;  %vm7824_vm6 = vcmp.eq.s32.totalorder %v15465_v17, %v15993_v6 }
 0x73c   : > { %9510 = vmatprep.mubr.msk.f32.mxu1 %vm7808_vm2, %v7171_v10  ;;  %vm11247_vm2 = vmpackc.low %vm16333_vm12, %vm16328_vm14  ;;  %vm7839_vm14 = vcmp.eq.s32.totalorder %v15506_v46, %v16002_v44  ;;  %vm7848_vm12 = vcmp.eq.s32.totalorder %v15533_v19, %v15993_v6 }
 0x73d   : > { %9511 = vmatmul.mubr.msk.f32.gmra.mrb[106].mxu1 %vm7807_vm9, %v7169_v24  ;;  %vm7832_vm9 = vcmp.eq.s32.totalorder %v15495_v58, %v15993_v6 }
 0x73e   : > { %v7175_v48 = vpop.f32.mrb[44].mxu0  ;;  %v16349_v12 = vpop.f32.mrb[76].mxu1  ;;  %11244 = vmatpush3.bf16.msk.msra.mxu1 %vm11243_vm10, %v17297_v28  ;;  %vm7831_vm10 = vcmp.eq.s32.totalorder %v15495_v58, %v16002_v44 }
 0x73f   : > { %v7177_v38 = vpop.f32.mrb[45].mxu0  ;;  %v16354_v5 = vpop.f32.mrb[77].mxu1  ;;  %11246 = vmatprep.subr.msk.bf16.mxu1 %vm11245_vm11, %v17297_v28  ;;  %vm7840_vm11 = vcmp.eq.s32.totalorder %v15506_v46, %v15993_v6 }
 0x740   : > { %9512 = vmatprep.mubr.msk.f32.mxu1 %vm7816_vm13, %v7177_v38  ;;  %vm7847_vm13 = vcmp.eq.s32.totalorder %v15533_v19, %v16002_v44 }
 0x741   : > { %9513 = vmatmul.mubr.msk.f32.gmra.mrb[108].mxu1 %vm7815_vm1, %v7175_v48  ;;  %vm7864_vm1 = vcmp.eq.s32.totalorder %v15585_v59, %v15993_v6 }
 0x742   : > { %v7181_v52 = vpop.f32.mrb[46].mxu0  ;;  %v16377_v34 = vpop.f32.mrb[78].mxu1  ;;  %11248 = vmatpush3.bf16.msk.msra.mxu1 %vm11247_vm2, %v17297_v28  ;;  %vm7863_vm2 = vcmp.eq.s32.totalorder %v15585_v59, %v16002_v44 }
 0x743   : > { %v7183_v37 = vpop.f32.mrb[47].mxu0  ;;  %v16382_v1 = vpop.f32.mrb[79].mxu1  ;;  %11250 = vmatprep.subr.msk.bf16.mxu1 %vm11249_vm3, %v17297_v28  ;;  %vm7872_vm3 = vcmp.eq.s32.totalorder %v15598_v35, %v15993_v6 }
 0x744   : > { %9514 = vmatprep.mubr.msk.f32.mxu1 %vm7824_vm6, %v7183_v37  ;;  %vm7879_vm6 = vcmp.eq.s32.totalorder %v15689_v39, %v16002_v44 }
 0x745   : > { %9515 = vmatmul.mubr.msk.f32.gmra.mrb[110].mxu1 %vm7823_vm7, %v7181_v52  ;;  %v7755_v52 = vadd.s32 512, %v15339_v45  ;;  %vm7888_vm7 = vcmp.eq.s32.totalorder %v15691_v2, %v15993_v6  ;;  %v8112_v6 = vadd.s32 840, %v17379_v0 }
 0x746   : > { %v7187_v41 = vpop.f32.mrb[48].mxu0  ;;  %v16391_v29 = vpop.f32.mrb[80].mxu1  ;;  %11252 = vmatpush3.bf16.msk.msra.mxu1 %vm11251_vm8, %v17297_v28  ;;  %vm7887_vm8 = vcmp.eq.s32.totalorder %v15691_v2, %v16002_v44  ;;  %v8128_v44 = vadd.s32 968, %v17379_v0  ;;  %v17537_v2 = vmov 1.0|1.0  }
 0x747   : > { %v7189_v3 = vpop.f32.mrb[49].mxu0  ;;  %v16396_v26 = vpop.f32.mrb[81].mxu1 }
 0x748   : > { %9516 = vmatprep.mubr.msk.f32.mxu1 %vm7832_vm9, %v7189_v3  ;;  %v8103_v3 = vadd.s32 768, %v17379_v0 }
 0x749   : > { %9517 = vmatmul.mubr.msk.f32.gmra.mrb[112].mxu1 %vm7831_vm10, %v7187_v41 }
 0x74a   : > { %v7193_v51 = vpop.f32.mrb[50].mxu0  ;;  %v16400_v36 = vpop.f32.mrb[82].mxu1 }
 0x74b   : > { %v7195_v43 = vpop.f32.mrb[51].mxu0  ;;  %v16404_v27 = vpop.f32.mrb[83].mxu1 }
 0x74c   : > { %9518 = vmatprep.mubr.msk.f32.mxu1 %vm7840_vm11, %v7195_v43  ;;  %v16446_v43 = vshra.s32 %v7756_v49, 5  ;;  %v8105_v49 = vadd.s32 784, %v17379_v0 }
 0x74d   : > { %9519 = vmatmul.mubr.msk.f32.gmra.mrb[114].mxu1 %vm7839_vm14, %v7193_v51  ;;  %v8104_v51 = vadd.s32 776, %v17379_v0 }
 0x74e   : > { %v7199_v23 = vpop.f32.mrb[52].mxu0  ;;  %v16408_v50 = vpop.f32.mrb[84].mxu1  ;;  %vm7772_vm9 = vcmp.eq.s32.totalorder %v15351_v60, %v16446_v43 }
 0x74f   : > { %v7201_v54 = vpop.f32.mrb[53].mxu0  ;;  %v16412_v21 = vpop.f32.mrb[85].mxu1 }
 0x750   : > { %9520 = vmatprep.mubr.msk.f32.mxu1 %vm7848_vm12, %v7201_v54  ;;  %v8122_v54 = vadd.s32 920, %v17379_v0  ;;  %vm7780_vm12 = vcmp.eq.s32.totalorder %v15377_v33, %v16446_v43 }
 0x751   : > { %9521 = vmatmul.mubr.msk.f32.gmra.mrb[116].mxu1 %vm7847_vm13, %v7199_v23  ;;  %v8121_v23 = vadd.s32 912, %v17379_v0 }
 0x752   : > { %v7205_v7 = vpop.f32.mrb[54].mxu0  ;;  %v16416_v24 = vpop.f32.mrb[86].mxu1 }
 0x753   : > { %v7207_v10 = vpop.f32.mrb[55].mxu0  ;;  %v16420_v4 = vpop.f32.mrb[87].mxu1 }
 0x754   : > { %9522 = vmatprep.mubr.msk.f32.mxu1 %vm7856_vm15, %v7207_v10 }
 0x755   : > { %9523 = vmatmul.mubr.msk.f32.gmra.mrb[118].mxu1 %vm7855_vm0, %v7205_v7 }
 0x756   : > { %v7211_v53 = vpop.f32.mrb[56].mxu0  ;;  %v16424_v22 = vpop.f32.mrb[88].mxu1 }
 0x757   : > { %17514 = vst [vmem:[#allocation14_spill] sm:$0xff] %v16424_v22  ;;  %v7213_v13 = vpop.f32.mrb[57].mxu0  ;;  %v16428_v47 = vpop.f32.mrb[89].mxu1 }
 0x758   : > { %9524 = vmatprep.mubr.msk.f32.mxu1 %vm7864_vm1, %v7213_v13  ;;  %v16456_v13 = vshra.s32 %v7753_v15, 5  ;;  %v8124_v15 = vadd.s32 936, %v17379_v0 }
 0x759   : > { %9525 = vmatmul.mubr.msk.f32.gmra.mrb[120].mxu1 %vm7863_vm2, %v7211_v53  ;;  %v16454_v53 = vshra.s32 %v7754_v55, 5  ;;  %v8123_v55 = vadd.s32 928, %v17379_v0 }
 0x75a   : > { %v7217_v48 = vpop.f32.mrb[58].mxu0  ;;  %v16433_v38 = vpop.f32.mrb[90].mxu1  ;;  %vm7769_vm11 = vcmp.eq.s32.totalorder %v15351_v60, %v16456_v13 }
 0x75b   : > { %17515 = vst [vmem:[#allocation13_spill] sm:$0xff] %v16433_v38  ;;  %v7219_v37 = vpop.f32.mrb[59].mxu0  ;;  %v16440_v41 = vpop.f32.mrb[91].mxu1  ;;  %v8106_v38 = vadd.s32 792, %v17379_v0  ;;  %vm7770_vm10 = vcmp.eq.s32.totalorder %v15351_v60, %v16454_v53  ;;  %vm7778_vm2 = vcmp.eq.s32.totalorder %v15377_v33, %v16454_v53 }
 0x75c   : > { %17516 = vst [vmem:[#allocation18_spill] sm:$0xff] %v16440_v41  ;;  %9526 = vmatprep.mubr.msk.f32.mxu1 %vm7872_vm3, %v7219_v37  ;;  %v8216_v41 = vand.u32 31, %v8104_v51  ;;  %vm7777_vm3 = vcmp.eq.s32.totalorder %v15377_v33, %v16456_v13 }
 0x75d   : > { %9527 = vmatmul.mubr.msk.f32.gmra.mrb[122].mxu1 %vm7871_vm4, %v7217_v48  ;;  %v16458_v48 = vshra.s32 %v7755_v52, 5  ;;  %v8233_v52 = vand.u32 31, %v8121_v23  ;;  %v8217_v23 = vand.u32 31, %v8105_v49  ;;  %v8235_v49 = vand.u32 31, %v8123_v55 }
 0x75e   : > { %v7223_v7 = vpop.f32.mrb[60].mxu0  ;;  %v16450_v10 = vpop.f32.mrb[92].mxu1  ;;  %vm16495_vm15 = vcmp.eq.s32.totalorder %v8216_v41, %v15339_v45  ;;  %v8125_v41 = vadd.s32 944, %v17379_v0 }
 0x75f   : > { %17517 = vst [vmem:[#allocation16_spill] sm:$0xff] %v16450_v10  ;;  %v7225_v37 = vpop.f32.mrb[61].mxu0  ;;  %v16460_v28 = vpop.f32.mrb[93].mxu1  ;;  %v8215_v10 = vand.u32 31, %v8103_v3  ;;  %vm7771_vm14 = vcmp.eq.s32.totalorder %v15351_v60, %v16458_v48  ;;  %vm16503_vm0 = vcmp.eq.s32.totalorder %v8233_v52, %v15339_v45 }
 0x760   : > { %17518 = vst [vmem:[#allocation19_spill] sm:$0xff] %v16460_v28  ;;  %9528 = vmatprep.mubr.msk.f32.mxu1 %vm7880_vm5, %v7225_v37  ;;  %v8234_v28 = vand.u32 31, %v8122_v54  ;;  %v8218_v54 = vand.u32 31, %v8106_v38  ;;  %v8108_v37 = vadd.s32 808, %v17379_v0  ;;  %v8236_v38 = vand.u32 31, %v8124_v15 }
 0x761   : > { %9529 = vmatmul.mubr.msk.f32.gmra.mrb[124].mxu1 %vm7879_vm6, %v7223_v7  ;;  %v8107_v7 = vadd.s32 800, %v17379_v0  ;;  %vm16490_vm13 = vcmp.eq.s32.totalorder %v8215_v10, %v15339_v45  ;;  %vm16548_vm5 = vcmp.eq.s32.totalorder %v8235_v49, %v15339_v45  ;;  %v8237_v49 = vand.u32 31, %v8125_v41 }
 0x762   : > { %v7229_v39 = vpop.f32.mrb[62].mxu0  ;;  %v16472_v22 = vpop.f32.mrb[94].mxu1  ;;  %vm16508_vm1 = vcmp.eq.s32.totalorder %v8234_v28, %v15339_v45  ;;  %vm11255_vm6 = vmpackc.low %vm16495_vm15, %vm16490_vm13  ;;  %v8220_v52 = vand.u32 31, %v8108_v37  ;;  %vm16553_vm4 = vcmp.eq.s32.totalorder %v8236_v38, %v15339_v45  ;;  %v8110_v37 = vadd.s32 824, %v17379_v0 }
 0x763   : > { %17519 = vst [vmem:[#allocation17_spill] sm:$0xff] %v16472_v22  ;;  %v7231_v3 = vpop.f32.mrb[63].mxu0  ;;  %v16482_v51 = vpop.f32.mrb[95].mxu1  ;;  %v8219_v15 = vand.u32 31, %v8107_v7  ;;  %v8109_v7 = vadd.s32 816, %v17379_v0  ;;  %v8127_v38 = vadd.s32 960, %v17379_v0 }
 0x764   : > { %17520 = vst [vmem:[#allocation15_spill] sm:$0xff] %v16482_v51  ;;  %9530 = vmatprep.mubr.msk.f32.mxu1 %vm7888_vm7, %v7231_v3  ;;  %v8126_v3 = vadd.s32 952, %v17379_v0  ;;  %vm16531_vm7 = vcmp.eq.s32.totalorder %v8217_v23, %v15339_v45  ;;  %vm16600_vm15 = vcmp.eq.s32.totalorder %v8220_v52, %v15339_v45  ;;  %v8111_v22 = vadd.s32 832, %v17379_v0 }
 0x765   : > { %9531 = vmatmul.mubr.msk.f32.gmra.mrb[126].mxu1 %vm7887_vm8, %v7229_v39  ;;  %vm16536_vm8 = vcmp.eq.s32.totalorder %v8218_v54, %v15339_v45  ;;  %vm16595_vm13 = vcmp.eq.s32.totalorder %v8219_v15, %v15339_v45  ;;  %v8221_v10 = vand.u32 31, %v8109_v7  ;;  %v8222_v41 = vand.u32 31, %v8110_v37 }
 0x766   : > { %v7300_v55 = vpop.f32.mrb[64].mxu0  ;;  %9628 = vmatprep.mubr.msk.f32.mxu1 %vm7772_vm9, %v16034_v18  ;;  %vm11257_vm9 = vmpackc.low %vm16508_vm1, %vm16503_vm0  ;;  %vm17542_vm1 = vcmp.eq.s32.totalorder %v15377_v33, %v16458_v48  ;;  %v8239_v7 = vand.u32 31, %v8127_v38  ;;  %v8240_v37 = vand.u32 31, %v8128_v44  ;;  %v8114_v39 = vadd.s32 856, %v17379_v0 }
 0x767   : > { %v7302_v28 = vpop.f32.mrb[65].mxu0  ;;  %vm11261_vm0 = vmpackc.low %vm16553_vm4, %vm16548_vm5  ;;  %vm16668_vm5 = vcmp.eq.s32.totalorder %v8221_v10, %v15339_v45  ;;  %v8115_v15 = vadd.s32 864, %v17379_v0  ;;  %v8116_v52 = vadd.s32 872, %v17379_v0  ;;  %v8117_v18 = vadd.s32 880, %v17379_v0 }
 0x768   : > { %9564 = vmatprep.mubr.msk.f32.mxu0 %vm7770_vm10, %v7302_v28  ;;  %v8238_v28 = vand.u32 31, %v8126_v3  ;;  %vm7786_vm10 = vcmp.eq.s32.totalorder %v15417_v11, %v16454_v53  ;;  %v8129_v3 = vadd.s32 976, %v17379_v0  ;;  %v8118_v23 = vadd.s32 888, %v17379_v0 }
 0x769   : > { %9565 = vmatmul.mubr.msk.f32.vlgmr.msra.gmra.mrb[128].mxu0 %vm7769_vm11, %v7300_v55  ;;  %9629 = vmatmul.mubr.msk.f32.vlgmr.msra.gmra.mrb[128].mxu1 %vm7771_vm14, %v16028_v20  ;;  %vm7785_vm11 = vcmp.eq.s32.totalorder %v15417_v11, %v16456_v13  ;;  %v8130_v55 = vadd.s32 984, %v17379_v0  ;;  %vm7793_vm14 = vcmp.eq.s32.totalorder %v15419_v31, %v16456_v13 }
 0x76a   : > { %v7306_v51 = vpop.f32.mrb[66].mxu0  ;;  %9630 = vmatprep.mubr.msk.f32.mxu1 %vm7780_vm12, %v16083_v56  ;;  %11256 = vmatpush3.bf16.msk.msra.mxu0 %vm11255_vm6, %v17537_v2  ;;  %vm11259_vm12 = vmpackc.low %vm16536_vm8, %vm16531_vm7  ;;  %vm16628_vm6 = vcmp.eq.s32.totalorder %v8238_v28, %v15339_v45  ;;  %vm16673_vm7 = vcmp.eq.s32.totalorder %v8222_v41, %v15339_v45  ;;  %v8241_v54 = vand.u32 31, %v8129_v3  ;;  %vm17552_vm8 = vcmp.eq.s32.totalorder %v15417_v11, %v16458_v48 }
 0x76b   : > { %v7308_v20 = vpop.f32.mrb[67].mxu0  ;;  %11258 = vmatprep.subr.msk.bf16.mxu0 %vm11257_vm9, %v17537_v2  ;;  %vm7796_vm9 = vcmp.eq.s32.totalorder %v15419_v31, %v16446_v43  ;;  %v8226_v41 = vand.u32 31, %v8114_v39  ;;  %v8228_v39 = vand.u32 31, %v8116_v52  ;;  %v17588_v52 = vld [vmem:[#allocation18_spill] sm:$0xff] }
 0x76c   : > { %9566 = vmatprep.mubr.msk.f32.mxu0 %vm7778_vm2, %v7308_v20  ;;  %vm16623_vm2 = vcmp.eq.s32.totalorder %v8237_v49, %v15339_v45  ;;  %v8242_v49 = vand.u32 31, %v8130_v55 }
 0x76d   : > { %9567 = vmatmul.mubr.msk.f32.gmra.mrb[130].mxu0 %vm7777_vm3, %v7306_v51  ;;  %9631 = vmatmul.mubr.msk.f32.gmra.mrb[130].mxu1 %vm17542_vm1, %v16071_v16  ;;  %vm17547_vm3 = vcmp.eq.s32.totalorder %v15417_v11, %v16446_v43  ;;  %vm7794_vm1 = vcmp.eq.s32.totalorder %v15419_v31, %v16454_v53  ;;  %v8223_v16 = vand.u32 31, %v8111_v22  ;;  %v8113_v51 = vadd.s32 848, %v17379_v0  ;;  %vm11265_vm4 = vmpackc.low %vm16628_vm6, %vm16623_vm2 }
 0x76e   : > { %v7312_v20 = vpop.f32.mrb[68].mxu0  ;;  %9632 = vmatprep.mubr.msk.f32.mxu1 %vm17547_vm3, %v16141_v61  ;;  %11260 = vmatpush3.bf16.msk.msra.mxu0 %vm11259_vm12, %v17537_v2  ;;  %vm11263_vm3 = vmpackc.low %vm16600_vm15, %vm16595_vm13  ;;  %v8224_v61 = vand.u32 31, %v8112_v6  ;;  %vm16690_vm12 = vcmp.eq.s32.totalorder %v8240_v37, %v15339_v45  ;;  %v8131_v22 = vadd.s32 992, %v17379_v0  ;;  %v8132_v6 = vadd.s32 1000, %v17379_v0 }
 0x76f   : > { %v7314_v44 = vpop.f32.mrb[69].mxu0  ;;  %11262 = vmatprep.subr.msk.bf16.mxu0 %vm11261_vm0, %v17537_v2  ;;  %vm7804_vm0 = vcmp.eq.s32.totalorder %v15442_v40, %v16446_v43  ;;  %v8225_v56 = vand.u32 31, %v8113_v51  ;;  %vm16740_vm2 = vcmp.eq.s32.totalorder %v8241_v54, %v15339_v45  ;;  %vm16745_vm6 = vcmp.eq.s32.totalorder %v8242_v49, %v15339_v45  ;;  %v17595_v54 = vld [vmem:[#allocation17_spill] sm:$0xff] }
 0x770   : > { %9568 = vmatprep.mubr.msk.f32.mxu0 %vm7786_vm10, %v7314_v44  ;;  %vm16685_vm10 = vcmp.eq.s32.totalorder %v8239_v7, %v15339_v45  ;;  %vm16728_vm13 = vcmp.eq.s32.totalorder %v8224_v61, %v15339_v45  ;;  %v8243_v7 = vand.u32 31, %v8131_v22  ;;  %v8244_v37 = vand.u32 31, %v8132_v6  ;;  %v17592_v61 = vld [vmem:[#allocation10_spill] sm:$0xff] }
 0x771   : > { %9569 = vmatmul.mubr.msk.f32.gmra.mrb[132].mxu0 %vm7785_vm11, %v7312_v20  ;;  %9633 = vmatmul.mubr.msk.f32.gmra.mrb[132].mxu1 %vm17552_vm8, %v16129_v42  ;;  %vm7795_vm11 = vcmp.eq.s32.totalorder %v15419_v31, %v16458_v48  ;;  %vm16723_vm8 = vcmp.eq.s32.totalorder %v8223_v16, %v15339_v45  ;;  %vm11269_vm15 = vmpackc.low %vm16690_vm12, %vm16685_vm10  ;;  %v8133_v20 = vadd.s32 1008, %v17379_v0  ;;  %v8134_v44 = vadd.s32 1016, %v17379_v0 }
 0x772   : > { %v7318_v10 = vpop.f32.mrb[70].mxu0  ;;  %9634 = vmatprep.mubr.msk.f32.mxu1 %vm7796_vm9, %v16199_v63  ;;  %11264 = vmatpush3.bf16.msk.msra.mxu0 %vm11263_vm3, %v17537_v2  ;;  %vm11267_vm9 = vmpackc.low %vm16673_vm7, %vm16668_vm5  ;;  %vm7812_vm3 = vcmp.eq.s32.totalorder %v15446_v32, %v16446_v43  ;;  %vm16789_vm7 = vcmp.eq.s32.totalorder %v8225_v56, %v15339_v45  ;;  %v8227_v51 = vand.u32 31, %v8115_v15  ;;  %vm16815_vm12 = vcmp.eq.s32.totalorder %v8243_v7, %v15339_v45  ;;  %v17587_v15 = vld [vmem:[#allocation14_spill] sm:$0xff]  ;;  %v17589_v7 = vld [vmem:[#allocation11_spill] sm:$0xff] }
 0x773   : > { %v7320_v42 = vpop.f32.mrb[71].mxu0  ;;  %11266 = vmatprep.subr.msk.bf16.mxu0 %vm11265_vm4, %v17537_v2  ;;  %vm7810_vm4 = vcmp.eq.s32.totalorder %v15446_v32, %v16454_v53  ;;  %vm11271_vm5 = vmpackc.low %vm16728_vm13, %vm16723_vm8  ;;  %v8245_v28 = vand.u32 31, %v8133_v20  ;;  %v8246_v38 = vand.u32 31, %v8134_v44  ;;  %v7758_v20 = vadd.s32 896, %v15339_v45 }
 0x774   : > { %9570 = vmatprep.mubr.msk.f32.mxu0 %vm7794_vm1, %v7320_v42  ;;  %vm7803_vm1 = vcmp.eq.s32.totalorder %v15442_v40, %v16458_v48  ;;  %vm11273_vm10 = vmpackc.low %vm16745_vm6, %vm16740_vm2  ;;  %vm16858_vm13 = vcmp.eq.s32.totalorder %v8227_v51, %v15339_v45  ;;  %vm16863_vm2 = vcmp.eq.s32.totalorder %v8228_v39, %v15339_v45  ;;  %v8230_v42 = vand.u32 31, %v8118_v23  ;;  %v17593_v51 = vld [vmem:[#allocation16_spill] sm:$0xff]  ;;  %v17594_v23 = vld [vmem:[#allocation15_spill] sm:$0xff] }
 0x775   : > { %9571 = vmatmul.mubr.msk.f32.gmra.mrb[134].mxu0 %vm7793_vm14, %v7318_v10  ;;  %9635 = vmatmul.mubr.msk.f32.gmra.mrb[134].mxu1 %vm7795_vm11, %v16187_v57  ;;  %vm7801_vm14 = vcmp.eq.s32.totalorder %v15442_v40, %v16456_v13  ;;  %vm16794_vm11 = vcmp.eq.s32.totalorder %v8226_v41, %v15339_v45  ;;  %v8229_v10 = vand.u32 31, %v8117_v18  ;;  %vm7818_vm6 = vcmp.eq.s32.totalorder %v15463_v9, %v16454_v53 }
 0x776   : > { %v7324_v16 = vpop.f32.mrb[72].mxu0  ;;  %9636 = vmatprep.mubr.msk.f32.mxu1 %vm7804_vm0, %v16255_v8  ;;  %11268 = vmatpush3.bf16.msk.msra.mxu0 %vm11267_vm9, %v17537_v2  ;;  %vm17569_vm0 = vcmp.eq.s32.totalorder %v15442_v40, %v16454_v53  ;;  %vm16820_vm9 = vcmp.eq.s32.totalorder %v8244_v37, %v15339_v45  ;;  %v17590_v37 = vld [vmem:[#allocation13_spill] sm:$0xff]  ;;  %v17009_v39 = vshra.s32 %v7758_v20, 5 }
 0x777   : > { %v7326_v57 = vpop.f32.mrb[73].mxu0  ;;  %11270 = vmatprep.subr.msk.bf16.mxu0 %vm11269_vm15, %v17537_v2  ;;  %vm7809_vm15 = vcmp.eq.s32.totalorder %v15446_v32, %v16456_v13  ;;  %vm11277_vm8 = vmpackc.low %vm16820_vm9, %vm16815_vm12  ;;  %vm7826_vm12 = vcmp.eq.s32.totalorder %v15465_v17, %v16454_v53  ;;  %vm7825_vm9 = vcmp.eq.s32.totalorder %v15465_v17, %v16456_v13 }
 0x778   : > { %9572 = vmatprep.mubr.msk.f32.mxu0 %vm17569_vm0, %v7326_v57  ;;  %vm7817_vm0 = vcmp.eq.s32.totalorder %v15463_v9, %v16456_v13  ;;  %v7757_v57 = vadd.s32 768, %v15339_v45 }
 0x779   : > { %9573 = vmatmul.mubr.msk.f32.gmra.mrb[136].mxu0 %vm7801_vm14, %v7324_v16  ;;  %9637 = vmatmul.mubr.msk.f32.gmra.mrb[136].mxu1 %vm7803_vm1, %v16245_v25  ;;  %vm7811_vm14 = vcmp.eq.s32.totalorder %v15446_v32, %v16458_v48  ;;  %vm7820_vm1 = vcmp.eq.s32.totalorder %v15463_v9, %v16446_v43  ;;  %v17591_v16 = vld [vmem:[#allocation19_spill] sm:$0xff] }
 0x77a   : > { %v7330_v22 = vpop.f32.mrb[74].mxu0  ;;  %9638 = vmatprep.mubr.msk.f32.mxu1 %vm7812_vm3, %v16308_v62  ;;  %11272 = vmatpush3.bf16.msk.msra.mxu0 %vm11271_vm5, %v17537_v2  ;;  %vm11275_vm3 = vmpackc.low %vm16794_vm11, %vm16789_vm7  ;;  %vm16876_vm5 = vcmp.eq.s32.totalorder %v8246_v38, %v15339_v45  ;;  %vm16908_vm11 = vcmp.eq.s32.totalorder %v8229_v10, %v15339_v45 }
 0x77b   : > { %v7332_v25 = vpop.f32.mrb[75].mxu0  ;;  %11274 = vmatprep.subr.msk.bf16.mxu0 %vm11273_vm10, %v17537_v2  ;;  %vm7819_vm10 = vcmp.eq.s32.totalorder %v15463_v9, %v16458_v48 }
 0x77c   : > { %9574 = vmatprep.mubr.msk.f32.mxu0 %vm7810_vm4, %v7332_v25  ;;  %vm16871_vm4 = vcmp.eq.s32.totalorder %v8245_v28, %v15339_v45 }
 0x77d   : > { %9575 = vmatmul.mubr.msk.f32.gmra.mrb[138].mxu0 %vm7809_vm15, %v7330_v22  ;;  %9639 = vmatmul.mubr.msk.f32.gmra.mrb[138].mxu1 %vm7811_vm14, %v16298_v30  ;;  %vm7828_vm15 = vcmp.eq.s32.totalorder %v15465_v17, %v16446_v43  ;;  %vm11279_vm14 = vmpackc.low %vm16863_vm2, %vm16858_vm13  ;;  %vm7834_vm2 = vcmp.eq.s32.totalorder %v15495_v58, %v16454_v53 }
 0x77e   : > { %v7336_v56 = vpop.f32.mrb[76].mxu0  ;;  %9640 = vmatprep.mubr.msk.f32.mxu1 %vm7820_vm1, %v16354_v5  ;;  %11276 = vmatpush3.bf16.msk.msra.mxu0 %vm11275_vm3, %v17537_v2  ;;  %vm11281_vm7 = vmpackc.low %vm16876_vm5, %vm16871_vm4  ;;  %vm16913_vm1 = vcmp.eq.s32.totalorder %v8230_v42, %v15339_v45  ;;  %vm7827_vm3 = vcmp.eq.s32.totalorder %v15465_v17, %v16458_v48  ;;  %vm7835_vm4 = vcmp.eq.s32.totalorder %v15495_v58, %v16458_v48  ;;  %v17016_v45 = vshra.s32 %v7757_v57, 5 }
 0x77f   : > { %v7338_v30 = vpop.f32.mrb[77].mxu0  ;;  %11278 = vmatprep.subr.msk.bf16.mxu0 %vm11277_vm8, %v17537_v2  ;;  %vm7836_vm8 = vcmp.eq.s32.totalorder %v15495_v58, %v16446_v43  ;;  %vm11283_vm13 = vmpackc.low %vm16913_vm1, %vm16908_vm11  ;;  %vm7844_vm5 = vcmp.eq.s32.totalorder %v15506_v46, %v16446_v43  ;;  %vm7849_vm11 = vcmp.eq.s32.totalorder %v15533_v19, %v16456_v13  ;;  %vm7851_vm1 = vcmp.eq.s32.totalorder %v15533_v19, %v16458_v48 }
 0x780   : > { %9576 = vmatprep.mubr.msk.f32.mxu0 %vm7818_vm6, %v7338_v30  ;;  %vm7833_vm6 = vcmp.eq.s32.totalorder %v15495_v58, %v16456_v13 }
 0x781   : > { %9577 = vmatmul.mubr.msk.f32.gmra.mrb[140].mxu0 %vm7817_vm0, %v7336_v56  ;;  %9641 = vmatmul.mubr.msk.f32.gmra.mrb[140].mxu1 %vm7819_vm10, %v16349_v12  ;;  %vm7842_vm0 = vcmp.eq.s32.totalorder %v15506_v46, %v16454_v53  ;;  %vm7841_vm10 = vcmp.eq.s32.totalorder %v15506_v46, %v16456_v13 }
 0x782   : > { %v7342_v3 = vpop.f32.mrb[78].mxu0  ;;  %9642 = vmatprep.mubr.msk.f32.mxu1 %vm7828_vm15, %v16382_v1  ;;  %11280 = vmatpush3.bf16.msk.msra.mxu0 %vm11279_vm14, %v17537_v2  ;;  %vm7843_vm15 = vcmp.eq.s32.totalorder %v15506_v46, %v16458_v48  ;;  %vm7852_vm14 = vcmp.eq.s32.totalorder %v15533_v19, %v16446_v43 }
 0x783   : > { %v7344_v55 = vpop.f32.mrb[79].mxu0  ;;  %11282 = vmatprep.subr.msk.bf16.mxu0 %vm11281_vm7, %v17537_v2  ;;  %vm7850_vm7 = vcmp.eq.s32.totalorder %v15533_v19, %v16454_v53 }
 0x784   : > { %9578 = vmatprep.mubr.msk.f32.mxu0 %vm7826_vm12, %v7344_v55  ;;  %vm7860_vm12 = vcmp.eq.s32.totalorder %v15535_v14, %v16446_v43 }
 0x785   : > { %9579 = vmatmul.mubr.msk.f32.gmra.mrb[142].mxu0 %vm7825_vm9, %v7342_v3  ;;  %9643 = vmatmul.mubr.msk.f32.gmra.mrb[142].mxu1 %vm7827_vm3, %v16377_v34  ;;  %vm7858_vm9 = vcmp.eq.s32.totalorder %v15535_v14, %v16454_v53  ;;  %vm7857_vm3 = vcmp.eq.s32.totalorder %v15535_v14, %v16456_v13 }
 0x786   : > { %v7348_v12 = vpop.f32.mrb[80].mxu0  ;;  %9644 = vmatprep.mubr.msk.f32.mxu1 %vm7836_vm8, %v16396_v26  ;;  %11284 = vmatpush3.bf16.msk.msra.mxu0 %vm11283_vm13, %v17537_v2  ;;  %vm7859_vm8 = vcmp.eq.s32.totalorder %v15535_v14, %v16458_v48  ;;  %vm7868_vm13 = vcmp.eq.s32.totalorder %v15585_v59, %v16446_v43 }
 0x787   : > { %v7350_v1 = vpop.f32.mrb[81].mxu0 }
 0x788   : > { %9580 = vmatprep.mubr.msk.f32.mxu0 %vm7834_vm2, %v7350_v1  ;;  %vm7866_vm2 = vcmp.eq.s32.totalorder %v15585_v59, %v16454_v53 }
 0x789   : > { %9581 = vmatmul.mubr.msk.f32.gmra.mrb[144].mxu0 %vm7833_vm6, %v7348_v12  ;;  %9645 = vmatmul.mubr.msk.f32.gmra.mrb[144].mxu1 %vm7835_vm4, %v16391_v29  ;;  %vm7865_vm6 = vcmp.eq.s32.totalorder %v15585_v59, %v16456_v13  ;;  %vm7867_vm4 = vcmp.eq.s32.totalorder %v15585_v59, %v16458_v48 }
 0x78a   : > { %v7354_v34 = vpop.f32.mrb[82].mxu0  ;;  %9646 = vmatprep.mubr.msk.f32.mxu1 %vm7844_vm5, %v16404_v27 }
 0x78b   : > { %v7356_v2 = vpop.f32.mrb[83].mxu0 }
 0x78c   : > { %9582 = vmatprep.mubr.msk.f32.mxu0 %vm7842_vm0, %v7356_v2 }
 0x78d   : > { %9583 = vmatmul.mubr.msk.f32.gmra.mrb[146].mxu0 %vm7841_vm10, %v7354_v34  ;;  %9647 = vmatmul.mubr.msk.f32.gmra.mrb[146].mxu1 %vm7843_vm15, %v16400_v36 }
 0x78e   : > { %v7360_v29 = vpop.f32.mrb[84].mxu0  ;;  %9648 = vmatprep.mubr.msk.f32.mxu1 %vm7852_vm14, %v16412_v21  ;;  %vm7884_vm14 = vcmp.eq.s32.totalorder %v17589_v7, %v16446_v43 }
 0x78f   : > { %v7362_v26 = vpop.f32.mrb[85].mxu0 }
 0x790   : > { %9584 = vmatprep.mubr.msk.f32.mxu0 %vm7850_vm7, %v7362_v26  ;;  %vm7882_vm7 = vcmp.eq.s32.totalorder %v17589_v7, %v16454_v53 }
 0x791   : > { %9585 = vmatmul.mubr.msk.f32.gmra.mrb[148].mxu0 %vm7849_vm11, %v7360_v29  ;;  %9649 = vmatmul.mubr.msk.f32.gmra.mrb[148].mxu1 %vm7851_vm1, %v16408_v50  ;;  %vm7881_vm11 = vcmp.eq.s32.totalorder %v17589_v7, %v16456_v13  ;;  %vm7883_vm1 = vcmp.eq.s32.totalorder %v17589_v7, %v16458_v48 }
 0x792   : > { %v7366_v36 = vpop.f32.mrb[86].mxu0  ;;  %9650 = vmatprep.mubr.msk.f32.mxu1 %vm7860_vm12, %v16420_v4  ;;  %v17586_v4 = vld [vmem:[#allocation12_spill] sm:$0xff]  ;;  %vm7892_vm12 = vcmp.eq.s32.totalorder %v17592_v61, %v16446_v43 }
 0x793   : > { %v7368_v27 = vpop.f32.mrb[87].mxu0  ;;  %vm7876_vm5 = vcmp.eq.s32.totalorder %v17586_v4, %v16446_v43  ;;  %vm7874_vm0 = vcmp.eq.s32.totalorder %v17586_v4, %v16454_v53  ;;  %vm7873_vm10 = vcmp.eq.s32.totalorder %v17586_v4, %v16456_v13  ;;  %vm7875_vm15 = vcmp.eq.s32.totalorder %v17586_v4, %v16458_v48 }
 0x794   : > { %9586 = vmatprep.mubr.msk.f32.mxu0 %vm7858_vm9, %v7368_v27  ;;  %vm7890_vm9 = vcmp.eq.s32.totalorder %v17592_v61, %v16454_v53 }
 0x795   : > { %9587 = vmatmul.mubr.msk.f32.gmra.mrb[150].mxu0 %vm7857_vm3, %v7366_v36  ;;  %9651 = vmatmul.mubr.msk.f32.gmra.mrb[150].mxu1 %vm7859_vm8, %v16416_v24  ;;  %vm7889_vm3 = vcmp.eq.s32.totalorder %v17592_v61, %v16456_v13  ;;  %vm7891_vm8 = vcmp.eq.s32.totalorder %v17592_v61, %v16458_v48 }
 0x796   : > { %v7372_v50 = vpop.f32.mrb[88].mxu0  ;;  %9652 = vmatprep.mubr.msk.f32.mxu1 %vm7868_vm13, %v16428_v47  ;;  %vm7774_vm13 = vcmp.eq.s32.totalorder %v15351_v60, %v17009_v39 }
 0x797   : > { %v7374_v21 = vpop.f32.mrb[89].mxu0 }
 0x798   : > { %9588 = vmatprep.mubr.msk.f32.mxu0 %vm7866_vm2, %v7374_v21  ;;  %vm7773_vm2 = vcmp.eq.s32.totalorder %v15351_v60, %v17016_v45 }
 0x799   : > { %9589 = vmatmul.mubr.msk.f32.gmra.mrb[152].mxu0 %vm7865_vm6, %v7372_v50  ;;  %9653 = vmatmul.mubr.msk.f32.gmra.mrb[152].mxu1 %vm7867_vm4, %v17587_v15  ;;  %vm7782_vm6 = vcmp.eq.s32.totalorder %v15377_v33, %v17009_v39  ;;  %vm7781_vm4 = vcmp.eq.s32.totalorder %v15377_v33, %v17016_v45 }
 0x79a   : > { %v7378_v24 = vpop.f32.mrb[90].mxu0  ;;  %9654 = vmatprep.mubr.msk.f32.mxu1 %vm7876_vm5, %v17588_v52  ;;  %vm7790_vm5 = vcmp.eq.s32.totalorder %v15417_v11, %v17009_v39 }
 0x79b   : > { %v7380_v47 = vpop.f32.mrb[91].mxu0 }
 0x79c   : > { %9590 = vmatprep.mubr.msk.f32.mxu0 %vm7874_vm0, %v7380_v47  ;;  %vm7789_vm0 = vcmp.eq.s32.totalorder %v15417_v11, %v17016_v45 }
 0x79d   : > { %9591 = vmatmul.mubr.msk.f32.gmra.mrb[154].mxu0 %vm7873_vm10, %v7378_v24  ;;  %9655 = vmatmul.mubr.msk.f32.gmra.mrb[154].mxu1 %vm7875_vm15, %v17590_v37  ;;  %vm7798_vm10 = vcmp.eq.s32.totalorder %v15419_v31, %v17009_v39  ;;  %vm7797_vm15 = vcmp.eq.s32.totalorder %v15419_v31, %v17016_v45 }
 0x79e   : > { %v7384_v44 = vpop.f32.mrb[92].mxu0  ;;  %9656 = vmatprep.mubr.msk.f32.mxu1 %vm7884_vm14, %v17591_v16  ;;  %vm7806_vm14 = vcmp.eq.s32.totalorder %v15442_v40, %v17009_v39 }
 0x79f   : > { %v7386_v8 = vpop.f32.mrb[93].mxu0 }
 0x7a0   : > { %9592 = vmatprep.mubr.msk.f32.mxu0 %vm7882_vm7, %v7386_v8  ;;  %vm7805_vm7 = vcmp.eq.s32.totalorder %v15442_v40, %v17016_v45 }
 0x7a1   : > { %9593 = vmatmul.mubr.msk.f32.gmra.mrb[156].mxu0 %vm7881_vm11, %v7384_v44  ;;  %9657 = vmatmul.mubr.msk.f32.gmra.mrb[156].mxu1 %vm7883_vm1, %v17593_v51  ;;  %vm7814_vm11 = vcmp.eq.s32.totalorder %v15446_v32, %v17009_v39  ;;  %vm7813_vm1 = vcmp.eq.s32.totalorder %v15446_v32, %v17016_v45 }
 0x7a2   : > { %v7390_v18 = vpop.f32.mrb[94].mxu0  ;;  %9658 = vmatprep.mubr.msk.f32.mxu1 %vm7892_vm12, %v17594_v23  ;;  %vm7822_vm12 = vcmp.eq.s32.totalorder %v15463_v9, %v17009_v39 }
 0x7a3   : > { %v7392_v43 = vpop.f32.mrb[95].mxu0 }
 0x7a4   : > { %9594 = vmatprep.mubr.msk.f32.mxu0 %vm7890_vm9, %v7392_v43  ;;  %vm7821_vm9 = vcmp.eq.s32.totalorder %v15463_v9, %v17016_v45 }
 0x7a5   : > { %9595 = vmatmul.mubr.msk.f32.gmra.mrb[158].mxu0 %vm7889_vm3, %v7390_v18  ;;  %9659 = vmatmul.mubr.msk.f32.gmra.mrb[158].mxu1 %vm7891_vm8, %v17595_v54  ;;  %vm7830_vm3 = vcmp.eq.s32.totalorder %v15465_v17, %v17009_v39  ;;  %vm7829_vm8 = vcmp.eq.s32.totalorder %v15465_v17, %v17016_v45 }
 0x7a6   : > { %v7622_v53 = vpop.f32.mrb[96].mxu0 }
 0x7a7   : > { %v7624_v49 = vpop.f32.mrb[97].mxu0 }
 0x7a8   : > { %9692 = vmatprep.mubr.msk.f32.mxu0 %vm7774_vm13, %v7624_v49  ;;  %vm7838_vm13 = vcmp.eq.s32.totalorder %v15495_v58, %v17009_v39 }
 0x7a9   : > { %9693 = vmatmul.mubr.msk.f32.vlgmr.msra.gmra.mrb[160].mxu0 %vm7773_vm2, %v7622_v53  ;;  %vm7837_vm2 = vcmp.eq.s32.totalorder %v15495_v58, %v17016_v45 }
 0x7aa   : > { %v7628_v13 = vpop.f32.mrb[98].mxu0 }
 0x7ab   : > { %v7630_v48 = vpop.f32.mrb[99].mxu0 }
 0x7ac   : > { %9694 = vmatprep.mubr.msk.f32.mxu0 %vm7782_vm6, %v7630_v48  ;;  %vm7846_vm6 = vcmp.eq.s32.totalorder %v15506_v46, %v17009_v39 }
 0x7ad   : > { %9695 = vmatmul.mubr.msk.f32.gmra.mrb[162].mxu0 %vm7781_vm4, %v7628_v13  ;;  %vm7845_vm4 = vcmp.eq.s32.totalorder %v15506_v46, %v17016_v45 }
 0x7ae   : > { %v7634_v28 = vpop.f32.mrb[100].mxu0 }
 0x7af   : > { %v7636_v60 = vpop.f32.mrb[101].mxu0 }
 0x7b0   : > { %9696 = vmatprep.mubr.msk.f32.mxu0 %vm7790_vm5, %v7636_v60  ;;  %vm7854_vm5 = vcmp.eq.s32.totalorder %v15533_v19, %v17009_v39 }
 0x7b1   : > { %9697 = vmatmul.mubr.msk.f32.gmra.mrb[164].mxu0 %vm7789_vm0, %v7634_v28  ;;  %vm7853_vm0 = vcmp.eq.s32.totalorder %v15533_v19, %v17016_v45 }
 0x7b2   : > { %v7640_v38 = vpop.f32.mrb[102].mxu0 }
 0x7b3   : > { %v7642_v33 = vpop.f32.mrb[103].mxu0 }
 0x7b4   : > { %9698 = vmatprep.mubr.msk.f32.mxu0 %vm7798_vm10, %v7642_v33  ;;  %vm7862_vm10 = vcmp.eq.s32.totalorder %v15535_v14, %v17009_v39 }
 0x7b5   : > { %9699 = vmatmul.mubr.msk.f32.gmra.mrb[166].mxu0 %vm7797_vm15, %v7640_v38  ;;  %vm7861_vm15 = vcmp.eq.s32.totalorder %v15535_v14, %v17016_v45 }
 0x7b6   : > { %v7646_v22 = vpop.f32.mrb[104].mxu0 }
 0x7b7   : > { %v7648_v11 = vpop.f32.mrb[105].mxu0 }
 0x7b8   : > { %9700 = vmatprep.mubr.msk.f32.mxu0 %vm7806_vm14, %v7648_v11  ;;  %vm7870_vm14 = vcmp.eq.s32.totalorder %v15585_v59, %v17009_v39 }
 0x7b9   : > { %9701 = vmatmul.mubr.msk.f32.gmra.mrb[168].mxu0 %vm7805_vm7, %v7646_v22  ;;  %vm7869_vm7 = vcmp.eq.s32.totalorder %v15585_v59, %v17016_v45 }
 0x7ba   : > { %v7652_v25 = vpop.f32.mrb[106].mxu0 }
 0x7bb   : > { %v7654_v31 = vpop.f32.mrb[107].mxu0 }
 0x7bc   : > { %9702 = vmatprep.mubr.msk.f32.mxu0 %vm7814_vm11, %v7654_v31  ;;  %vm7878_vm11 = vcmp.eq.s32.totalorder %v17586_v4, %v17009_v39 }
 0x7bd   : > { %9703 = vmatmul.mubr.msk.f32.gmra.mrb[170].mxu0 %vm7813_vm1, %v7652_v25  ;;  %vm7877_vm1 = vcmp.eq.s32.totalorder %v17586_v4, %v17016_v45  ;;  %v11675_v4 = vmov 0.0|0.0  }
 0x7be   : > { %v7658_v62 = vpop.f32.mrb[108].mxu0  ;;  %11285 = vmatprep.subr.bf16.mxu1 %v11675_v4 }
 0x7bf   : > { %v7660_v40 = vpop.f32.mrb[109].mxu0 }
 0x7c0   : > { %9704 = vmatprep.mubr.msk.f32.mxu0 %vm7822_vm12, %v7660_v40  ;;  %vm7886_vm12 = vcmp.eq.s32.totalorder %v17589_v7, %v17009_v39 }
 0x7c1   : > { %9705 = vmatmul.mubr.msk.f32.gmra.mrb[172].mxu0 %vm7821_vm9, %v7658_v62  ;;  %vm7885_vm9 = vcmp.eq.s32.totalorder %v17589_v7, %v17016_v45 }
 0x7c2   : > { %v7664_v6 = vpop.f32.mrb[110].mxu0 }
 0x7c3   : > { %v7666_v32 = vpop.f32.mrb[111].mxu0 }
 0x7c4   : > { %9706 = vmatprep.mubr.msk.f32.mxu0 %vm7830_vm3, %v7666_v32  ;;  %vm7894_vm3 = vcmp.eq.s32.totalorder %v17592_v61, %v17009_v39 }
 0x7c5   : > { %9707 = vmatmul.mubr.msk.f32.gmra.mrb[174].mxu0 %vm7829_vm8, %v7664_v6  ;;  %vm7893_vm8 = vcmp.eq.s32.totalorder %v17592_v61, %v17016_v45 }
 0x7c6   : > { %v7670_v10 = vpop.f32.mrb[112].mxu0 }
 0x7c7   : > { %v7672_v9 = vpop.f32.mrb[113].mxu0 }
 0x7c8   : > { %9708 = vmatprep.mubr.msk.f32.mxu0 %vm7838_vm13, %v7672_v9  ;;  %vm11676_vm13 = vmmov 0  }
 0x7c9   : > { %9709 = vmatmul.mubr.msk.f32.gmra.mrb[176].mxu0 %vm7837_vm2, %v7670_v10 }
 0x7ca   : > { %v7676_v42 = vpop.f32.mrb[114].mxu0 }
 0x7cb   : > { %v7678_v17 = vpop.f32.mrb[115].mxu0 }
 0x7cc   : > { %9710 = vmatprep.mubr.msk.f32.mxu0 %vm7846_vm6, %v7678_v17  ;;  %vm9174_vm6 = vcmask 261120  }
 0x7cd   : > { %9711 = vmatmul.mubr.msk.f32.gmra.mrb[178].mxu0 %vm7845_vm4, %v7676_v42  ;;  %vm9258_vm4 = vcmask 130048  }
 0x7ce   : > { %v7682_v63 = vpop.f32.mrb[116].mxu0 }
 0x7cf   : > { %v7684_v58 = vpop.f32.mrb[117].mxu0 }
 0x7d0   : > { %9712 = vmatprep.mubr.msk.f32.mxu0 %vm7854_vm5, %v7684_v58  ;;  %vm9338_vm5 = vcmask 27648  }
 0x7d1   : > { %9713 = vmatmul.mubr.msk.f32.gmra.mrb[180].mxu0 %vm7853_vm0, %v7682_v63 }
 0x7d2   : > { %v7688_v35 = vpop.f32.mrb[118].mxu0 }
 0x7d3   : > { %v7690_v46 = vpop.f32.mrb[119].mxu0 }
 0x7d4   : > { %9714 = vmatprep.mubr.msk.f32.mxu0 %vm7862_vm10, %v7690_v46 }
 0x7d5   : > { %9715 = vmatmul.mubr.msk.f32.gmra.mrb[182].mxu0 %vm7861_vm15, %v7688_v35 }
 0x7d6   : > { %v7694_v56 = vpop.f32.mrb[120].mxu0 }
 0x7d7   : > { %v7696_v19 = vpop.f32.mrb[121].mxu0 }
 0x7d8   : > { %9716 = vmatprep.mubr.msk.f32.mxu0 %vm7870_vm14, %v7696_v19 }
 0x7d9   : > { %9717 = vmatmul.mubr.msk.f32.gmra.mrb[184].mxu0 %vm7869_vm7, %v7694_v56 }
 0x7da   : > { %v7700_v30 = vpop.f32.mrb[122].mxu0 }
 0x7db   : > { %v7702_v14 = vpop.f32.mrb[123].mxu0 }
 0x7dc   : > { %9718 = vmatprep.mubr.msk.f32.mxu0 %vm7878_vm11, %v7702_v14 }
 0x7dd   : > { %9719 = vmatmul.mubr.msk.f32.gmra.mrb[186].mxu0 %vm7877_vm1, %v7700_v30 }
 0x7de   : > { %v7706_v5 = vpop.f32.mrb[124].mxu0 }
 0x7df   : > { %v7708_v59 = vpop.f32.mrb[125].mxu0 }
 0x7e0   : > { %9720 = vmatprep.mubr.msk.f32.mxu0 %vm7886_vm12, %v7708_v59  ;;  %v17112_v59 = vld [vmem:[#allocation4 + $0x80] sm:$0xff] }
 0x7e1   : > { %9721 = vmatmul.mubr.msk.f32.gmra.mrb[188].mxu0 %vm7885_vm9, %v7706_v5  ;;  %10510 = vmatprep.mubr.msk.f32.mxu1 %vm11676_vm13, %v17112_v59 }
 0x7e2   : > { %v7712_v41 = vpop.f32.mrb[126].mxu0 }
 0x7e3   : > { %v7714_v3 = vpop.f32.mrb[127].mxu0 }
 0x7e4   : > { %9722 = vmatprep.mubr.msk.f32.mxu0 %vm7894_vm3, %v7714_v3 }
 0x7e5   : > { %9723 = vmatmul.mubr.msk.f32.gmra.mrb[190].mxu0 %vm7893_vm8, %v7712_v41 }
 0x7fc   : > { %v10165_v55 = vpop.f32.mrb[96].mxu1 }
 0x7fd   : > { %v10166_v12 = vpop.f32.mrb[97].mxu1 }
 0x7fe   : > { %v10167_v1 = vadd.f32 %v10166_v12, %v10165_v55 }
 0x800   : > { %v10168_v34 = vpop.f32.mrb[98].mxu1 }
 0x801   : > { %v10169_v2 = vpop.f32.mrb[99].mxu1 }
 0x802   : > { %v10170_v29 = vadd.f32 %v10169_v2, %v10168_v34 }
 0x804   : > { %v10171_v26 = vpop.f32.mrb[100].mxu1 }
 0x805   : > { %v10172_v36 = vpop.f32.mrb[101].mxu1 }
 0x806   : > { %v17083_v27 = vadd.f32 %v10172_v36, %v10171_v26 }
 0x808   : > { %v10174_v50 = vpop.f32.mrb[102].mxu1 }
 0x809   : > { %v10175_v21 = vpop.f32.mrb[103].mxu1 }
 0x80a   : > { %v17086_v15 = vadd.f32 %v10175_v21, %v10174_v50 }
 0x80c   : > { %v10177_v24 = vpop.f32.mrb[104].mxu1 }
 0x80d   : > { %v10178_v52 = vpop.f32.mrb[105].mxu1 }
 0x80e   : > { %v17088_v47 = vadd.f32 %v10178_v52, %v10177_v24 }
 0x810   : > { %v10180_v7 = vpop.f32.mrb[106].mxu1 }
 0x811   : > { %v10181_v37 = vpop.f32.mrb[107].mxu1 }
 0x812   : > { %v17090_v20 = vadd.f32 %v10181_v37, %v10180_v7 }
 0x814   : > { %v10183_v44 = vpop.f32.mrb[108].mxu1 }
 0x815   : > { %v10184_v16 = vpop.f32.mrb[109].mxu1 }
 0x816   : > { %v17092_v57 = vadd.f32 %v10184_v16, %v10183_v44 }
 0x818   : > { %v10186_v8 = vpop.f32.mrb[110].mxu1 }
 0x819   : > { %v10187_v61 = vpop.f32.mrb[111].mxu1 }
 0x81a   : > { %v17094_v51 = vadd.f32 %v10187_v61, %v10186_v8 }
 0x81c   : > { %v10189_v39 = vpop.f32.mrb[112].mxu1 }
 0x81d   : > { %v10190_v18 = vpop.f32.mrb[113].mxu1 }
 0x81e   : > { %v17096_v23 = vadd.f32 %v10190_v18, %v10189_v39 }
 0x820   : > { %v10192_v45 = vpop.f32.mrb[114].mxu1 }
 0x821   : > { %v10193_v43 = vpop.f32.mrb[115].mxu1 }
 0x822   : > { %v17098_v54 = vadd.f32 %v10193_v43, %v10192_v45 }
 0x824   : > { %v10195_v53 = vpop.f32.mrb[116].mxu1 }
 0x825   : > { %v10196_v49 = vpop.f32.mrb[117].mxu1 }
 0x826   : > { %v17100_v13 = vadd.f32 %v10196_v49, %v10195_v53 }
 0x828   : > { %v10198_v48 = vpop.f32.mrb[118].mxu1 }
 0x829   : > { %v10199_v28 = vpop.f32.mrb[119].mxu1 }
 0x82a   : > { %v17102_v60 = vadd.f32 %v10199_v28, %v10198_v48 }
 0x82c   : > { %v10201_v38 = vpop.f32.mrb[120].mxu1 }
 0x82d   : > { %v10202_v33 = vpop.f32.mrb[121].mxu1 }
 0x82e   : > { %v17104_v22 = vadd.f32 %v10202_v33, %v10201_v38 }
 0x830   : > { %v10204_v11 = vpop.f32.mrb[122].mxu1 }
 0x831   : > { %v10205_v25 = vpop.f32.mrb[123].mxu1 }
 0x832   : > { %v17106_v31 = vadd.f32 %v10205_v25, %v10204_v11 }
 0x834   : > { %v10207_v62 = vpop.f32.mrb[124].mxu1 }
 0x835   : > { %v10208_v40 = vpop.f32.mrb[125].mxu1 }
 0x836   : > { %v17108_v6 = vadd.f32 %v10208_v40, %v10207_v62 }
 0x838   : > { %v10210_v32 = vpop.f32.mrb[126].mxu1 }
 0x839   : > { %v10211_v10 = vpop.f32.mrb[127].mxu1 }
 0x83a   : > { %v17110_v9 = vadd.f32 %v10211_v10, %v10210_v32 }
 0x83c   : > { %v10245_v42 = vpop.f32.mrb[128].mxu0  ;;  %v10325_v17 = vpop.f32.mrb[128].mxu1 }
 0x83d   : > { %v10246_v63 = vpop.f32.mrb[129].mxu0  ;;  %v10326_v58 = vpop.f32.mrb[129].mxu1 }
 0x83e   : > { %v10247_v35 = vadd.f32 %v10246_v63, %v10245_v42  ;;  %v10327_v46 = vadd.f32 %v10326_v58, %v10325_v17 }
 0x840   : > { %v8715_v56 = vadd.f32 %v10247_v35, %v10167_v1  ;;  %v10248_v19 = vpop.f32.mrb[130].mxu0  ;;  %v10328_v30 = vpop.f32.mrb[130].mxu1 }
 0x841   : > { %v10249_v14 = vpop.f32.mrb[131].mxu0  ;;  %v10329_v5 = vpop.f32.mrb[131].mxu1 }
 0x842   : > { %v17116_v41 = vadd.f32 %v10327_v46, %v8715_v56  ;;  %v10250_v3 = vadd.f32 %v10249_v14, %v10248_v19  ;;  %v10330_v55 = vadd.f32 %v10329_v5, %v10328_v30 }
 0x844   : > { %v8720_v12 = vadd.f32 %v10250_v3, %v10170_v29  ;;  %v10251_v34 = vpop.f32.mrb[132].mxu0  ;;  %v10331_v2 = vpop.f32.mrb[132].mxu1 }
 0x845   : > { %v10252_v26 = vpop.f32.mrb[133].mxu0  ;;  %v10332_v36 = vpop.f32.mrb[133].mxu1 }
 0x846   : > { %v17118_v1 = vadd.f32 %v10330_v55, %v8720_v12  ;;  %v10253_v50 = vadd.f32 %v10252_v26, %v10251_v34  ;;  %v10333_v21 = vadd.f32 %v10332_v36, %v10331_v2 }
 0x848   : > { %v8725_v24 = vadd.f32 %v10253_v50, %v17083_v27  ;;  %v10254_v52 = vpop.f32.mrb[134].mxu0  ;;  %v10334_v7 = vpop.f32.mrb[134].mxu1 }
 0x849   : > { %v10255_v37 = vpop.f32.mrb[135].mxu0  ;;  %v10335_v44 = vpop.f32.mrb[135].mxu1 }
 0x84a   : > { %v17121_v16 = vadd.f32 %v10333_v21, %v8725_v24  ;;  %v10256_v8 = vadd.f32 %v10255_v37, %v10254_v52  ;;  %v10336_v61 = vadd.f32 %v10335_v44, %v10334_v7 }
 0x84c   : > { %v8730_v29 = vadd.f32 %v10256_v8, %v17086_v15  ;;  %v10257_v39 = vpop.f32.mrb[136].mxu0  ;;  %v10337_v18 = vpop.f32.mrb[136].mxu1 }
 0x84d   : > { %v10258_v45 = vpop.f32.mrb[137].mxu0  ;;  %v10338_v43 = vpop.f32.mrb[137].mxu1 }
 0x84e   : > { %v17124_v53 = vadd.f32 %v10336_v61, %v8730_v29  ;;  %v10259_v49 = vadd.f32 %v10258_v45, %v10257_v39  ;;  %v10339_v48 = vadd.f32 %v10338_v43, %v10337_v18 }
 0x850   : > { %v8735_v27 = vadd.f32 %v10259_v49, %v17088_v47  ;;  %v10260_v28 = vpop.f32.mrb[138].mxu0  ;;  %v10340_v38 = vpop.f32.mrb[138].mxu1 }
 0x851   : > { %v10261_v33 = vpop.f32.mrb[139].mxu0  ;;  %v10341_v11 = vpop.f32.mrb[139].mxu1 }
 0x852   : > { %v17127_v25 = vadd.f32 %v10339_v48, %v8735_v27  ;;  %v10262_v62 = vadd.f32 %v10261_v33, %v10260_v28  ;;  %v10342_v40 = vadd.f32 %v10341_v11, %v10340_v38 }
 0x854   : > { %v8740_v15 = vadd.f32 %v10262_v62, %v17090_v20  ;;  %v10263_v32 = vpop.f32.mrb[140].mxu0  ;;  %v10343_v10 = vpop.f32.mrb[140].mxu1 }
 0x855   : > { %v10264_v42 = vpop.f32.mrb[141].mxu0  ;;  %v10344_v17 = vpop.f32.mrb[141].mxu1 }
 0x856   : > { %v17130_v63 = vadd.f32 %v10342_v40, %v8740_v15  ;;  %v10265_v58 = vadd.f32 %v10264_v42, %v10263_v32  ;;  %v10345_v35 = vadd.f32 %v10344_v17, %v10343_v10 }
 0x858   : > { %v8745_v47 = vadd.f32 %v10265_v58, %v17092_v57  ;;  %v10266_v46 = vpop.f32.mrb[142].mxu0  ;;  %v10346_v56 = vpop.f32.mrb[142].mxu1 }
 0x859   : > { %v10267_v19 = vpop.f32.mrb[143].mxu0  ;;  %v10347_v30 = vpop.f32.mrb[143].mxu1 }
 0x85a   : > { %v17133_v14 = vadd.f32 %v10345_v35, %v8745_v47  ;;  %v10268_v5 = vadd.f32 %v10267_v19, %v10266_v46  ;;  %v10348_v3 = vadd.f32 %v10347_v30, %v10346_v56 }
 0x85c   : > { %v8750_v20 = vadd.f32 %v10268_v5, %v17094_v51  ;;  %v10269_v55 = vpop.f32.mrb[144].mxu0  ;;  %v10349_v12 = vpop.f32.mrb[144].mxu1 }
 0x85d   : > { %v10270_v34 = vpop.f32.mrb[145].mxu0  ;;  %v10350_v2 = vpop.f32.mrb[145].mxu1 }
 0x85e   : > { %v17136_v26 = vadd.f32 %v10348_v3, %v8750_v20  ;;  %v10271_v36 = vadd.f32 %v10270_v34, %v10269_v55  ;;  %v10351_v50 = vadd.f32 %v10350_v2, %v10349_v12 }
 0x860   : > { %v8755_v57 = vadd.f32 %v10271_v36, %v17096_v23  ;;  %v10272_v21 = vpop.f32.mrb[146].mxu0  ;;  %v10352_v24 = vpop.f32.mrb[146].mxu1 }
 0x861   : > { %v10273_v52 = vpop.f32.mrb[147].mxu0  ;;  %v10353_v7 = vpop.f32.mrb[147].mxu1 }
 0x862   : > { %v17139_v37 = vadd.f32 %v10351_v50, %v8755_v57  ;;  %v10274_v44 = vadd.f32 %v10273_v52, %v10272_v21  ;;  %v10354_v8 = vadd.f32 %v10353_v7, %v10352_v24 }
 0x864   : > { %v8760_v51 = vadd.f32 %v10274_v44, %v17098_v54  ;;  %v10275_v61 = vpop.f32.mrb[148].mxu0  ;;  %v10355_v29 = vpop.f32.mrb[148].mxu1 }
 0x865   : > { %v10276_v39 = vpop.f32.mrb[149].mxu0  ;;  %v10356_v18 = vpop.f32.mrb[149].mxu1 }
 0x866   : > { %v17142_v45 = vadd.f32 %v10354_v8, %v8760_v51  ;;  %v10277_v43 = vadd.f32 %v10276_v39, %v10275_v61  ;;  %v10357_v49 = vadd.f32 %v10356_v18, %v10355_v29 }
 0x868   : > { %v8765_v23 = vadd.f32 %v10277_v43, %v17100_v13  ;;  %v10278_v48 = vpop.f32.mrb[150].mxu0  ;;  %v10358_v27 = vpop.f32.mrb[150].mxu1 }
 0x869   : > { %v10279_v28 = vpop.f32.mrb[151].mxu0  ;;  %v10359_v38 = vpop.f32.mrb[151].mxu1 }
 0x86a   : > { %v17145_v33 = vadd.f32 %v10357_v49, %v8765_v23  ;;  %v10280_v11 = vadd.f32 %v10279_v28, %v10278_v48  ;;  %v10360_v62 = vadd.f32 %v10359_v38, %v10358_v27 }
 0x86c   : > { %v8770_v54 = vadd.f32 %v10280_v11, %v17102_v60  ;;  %v10281_v40 = vpop.f32.mrb[152].mxu0  ;;  %v10361_v15 = vpop.f32.mrb[152].mxu1 }
 0x86d   : > { %v10282_v32 = vpop.f32.mrb[153].mxu0  ;;  %v10362_v10 = vpop.f32.mrb[153].mxu1 }
 0x86e   : > { %v17148_v42 = vadd.f32 %v10360_v62, %v8770_v54  ;;  %v10283_v17 = vadd.f32 %v10282_v32, %v10281_v40  ;;  %v10363_v58 = vadd.f32 %v10362_v10, %v10361_v15 }
 0x870   : > { %v8775_v13 = vadd.f32 %v10283_v17, %v17104_v22  ;;  %v10284_v35 = vpop.f32.mrb[154].mxu0  ;;  %v10364_v47 = vpop.f32.mrb[154].mxu1 }
 0x871   : > { %v10285_v46 = vpop.f32.mrb[155].mxu0  ;;  %v10365_v56 = vpop.f32.mrb[155].mxu1 }
 0x872   : > { %v17151_v19 = vadd.f32 %v10363_v58, %v8775_v13  ;;  %v10286_v30 = vadd.f32 %v10285_v46, %v10284_v35  ;;  %v10366_v5 = vadd.f32 %v10365_v56, %v10364_v47 }
 0x874   : > { %v8780_v60 = vadd.f32 %v10286_v30, %v17106_v31  ;;  %v10287_v3 = vpop.f32.mrb[156].mxu0  ;;  %v10367_v20 = vpop.f32.mrb[156].mxu1 }
 0x875   : > { %v10288_v55 = vpop.f32.mrb[157].mxu0  ;;  %v10368_v12 = vpop.f32.mrb[157].mxu1 }
 0x876   : > { %v17154_v34 = vadd.f32 %v10366_v5, %v8780_v60  ;;  %v10289_v2 = vadd.f32 %v10288_v55, %v10287_v3  ;;  %v10369_v36 = vadd.f32 %v10368_v12, %v10367_v20 }
 0x878   : > { %v8785_v22 = vadd.f32 %v10289_v2, %v17108_v6  ;;  %v10290_v50 = vpop.f32.mrb[158].mxu0  ;;  %v10370_v57 = vpop.f32.mrb[158].mxu1 }
 0x879   : > { %v10291_v21 = vpop.f32.mrb[159].mxu0  ;;  %v10371_v24 = vpop.f32.mrb[159].mxu1 }
 0x87a   : > { %v17157_v52 = vadd.f32 %v10369_v36, %v8785_v22  ;;  %v10292_v7 = vadd.f32 %v10291_v21, %v10290_v50  ;;  %v10372_v44 = vadd.f32 %v10371_v24, %v10370_v57 }
 0x87c   : > { %v8790_v31 = vadd.f32 %v10292_v7, %v17110_v9  ;;  %v10405_v8 = vpop.f32.mrb[160].mxu0 }
 0x87d   : > { %v10406_v51 = vpop.f32.mrb[161].mxu0 }
 0x87e   : > { %v17160_v61 = vadd.f32 %v10372_v44, %v8790_v31  ;;  %v10407_v29 = vadd.f32 %v10406_v51, %v10405_v8 }
 0x880   : > { %v9005_v39 = vadd.f32 %v10407_v29, %v17116_v41  ;;  %v10408_v18 = vpop.f32.mrb[162].mxu0 }
 0x881   : > { %v10409_v43 = vpop.f32.mrb[163].mxu0 }
 0x882   : > { %v10410_v6 = vadd.f32 %v10409_v43, %v10408_v18 }
 0x884   : > { %v9010_v49 = vadd.f32 %v10410_v6, %v17118_v1  ;;  %v10411_v23 = vpop.f32.mrb[164].mxu0 }
 0x885   : > { %v10412_v48 = vpop.f32.mrb[165].mxu0 }
 0x886   : > { %v11286_v27 = vpack.c.bf16 %v9010_v49, %v9005_v39  ;;  %v10413_v28 = vadd.f32 %v10412_v48, %v10411_v23 }
 0x888   : > { %v9015_v38 = vadd.f32 %v10413_v28, %v17121_v16  ;;  %v10414_v11 = vpop.f32.mrb[166].mxu0  ;;  %11287 = vmatpush3.bf16.msra.mxu1 %v11286_v27 }
 0x889   : > { %v10415_v9 = vpop.f32.mrb[167].mxu0  ;;  %11288 = vmatprep.subr.bf16.mxu1 %v11675_v4 }
 0x88a   : > { %v10416_v62 = vadd.f32 %v10415_v9, %v10414_v11  ;;  %v17596_v9 = vld [vmem:[#allocation9_spill] sm:$0xff] }
 0x88b   : > { %vm9083_vm2 = vcmp.eq.s32.totalorder %v17596_v9, %v17379_v0 }
 0x88c   : > { %v9020_v54 = vadd.f32 %v10416_v62, %v17124_v53  ;;  %v10417_v41 = vpop.f32.mrb[168].mxu0  ;;  %v9165_v62 = vld [vmem:[%s17240_s11 + $0x10] sm:$0xff] }
 0x88d   : > { %v10418_v40 = vpop.f32.mrb[169].mxu0 }
 0x88e   : > { %v11289_v15 = vpack.c.bf16 %v9020_v54, %v9015_v38  ;;  %v10419_v32 = vadd.f32 %v10418_v40, %v10417_v41  ;;  %v9166_v54 = vld [vmem:[%s17240_s11 + $0x18] sm:$0xff]  ;;  %v9724_v40 = vld [vmem:[%s17239_s10] ss:$0 sm:$0xff] }
 0x88f   : > { %v11313_v41 = vpack.c.bf16 %v9166_v54, %v9165_v62 }
 0x890   : > { %v9025_v1 = vadd.f32 %v10419_v32, %v17127_v25  ;;  %v10420_v10 = vpop.f32.mrb[170].mxu0  ;;  %11290 = vmatpush3.bf16.msra.mxu1 %v11289_v15 }
 0x891   : > { %v10421_v17 = vpop.f32.mrb[171].mxu0  ;;  %11291 = vmatprep.subr.bf16.mxu1 %v11675_v4 }
 0x892   : > { %v10422_v16 = vadd.f32 %v10421_v17, %v10420_v10  ;;  %v9249_v17 = vld [vmem:[%s17242_s13] sm:$0xff] }
 0x894   : > { %v9030_v58 = vadd.f32 %v10422_v16, %v17130_v63  ;;  %v10423_v13 = vpop.f32.mrb[172].mxu0 }
 0x895   : > { %v10424_v35 = vpop.f32.mrb[173].mxu0 }
 0x896   : > { %v11292_v47 = vpack.c.bf16 %v9030_v58, %v9025_v1  ;;  %v10425_v46 = vadd.f32 %v10424_v35, %v10423_v13  ;;  %v9726_v58 = vld [vmem:[%s17241_s12] ss:$0 sm:$0xff] }
 0x898   : > { %v9035_v53 = vadd.f32 %v10425_v46, %v17133_v14  ;;  %v10426_v56 = vpop.f32.mrb[174].mxu0  ;;  %11293 = vmatpush3.bf16.msra.mxu1 %v11292_v47  ;;  %v9728_v46 = vld [vmem:[%s17243_s14] ss:$0 sm:$0xff] }
 0x899   : > { %v10427_v30 = vpop.f32.mrb[175].mxu0  ;;  %11294 = vmatprep.subr.bf16.mxu1 %v11675_v4 }
 0x89a   : > { %v10428_v25 = vadd.f32 %v10427_v30, %v10426_v56 }
 0x89c   : > { %v9040_v5 = vadd.f32 %v10428_v25, %v17136_v26  ;;  %v10429_v60 = vpop.f32.mrb[176].mxu0 }
 0x89d   : > { %v10430_v3 = vpop.f32.mrb[177].mxu0 }
 0x89e   : > { %v11295_v20 = vpack.c.bf16 %v9040_v5, %v9035_v53  ;;  %v10431_v55 = vadd.f32 %v10430_v3, %v10429_v60 }
 0x8a0   : > { %v9045_v63 = vadd.f32 %v10431_v55, %v17139_v37  ;;  %v10432_v12 = vpop.f32.mrb[178].mxu0  ;;  %11296 = vmatpush3.bf16.msra.mxu1 %v11295_v20 }
 0x8a1   : > { %v10433_v2 = vpop.f32.mrb[179].mxu0  ;;  %11297 = vmatprep.subr.bf16.mxu1 %v11675_v4 }
 0x8a2   : > { %v10434_v14 = vadd.f32 %v10433_v2, %v10432_v12 }
 0x8a4   : > { %v9050_v36 = vadd.f32 %v10434_v14, %v17142_v45  ;;  %v10435_v22 = vpop.f32.mrb[180].mxu0 }
 0x8a5   : > { %v10436_v50 = vpop.f32.mrb[181].mxu0 }
 0x8a6   : > { %v11298_v57 = vpack.c.bf16 %v9050_v36, %v9045_v63  ;;  %v10437_v21 = vadd.f32 %v10436_v50, %v10435_v22 }
 0x8a8   : > { %v9055_v26 = vadd.f32 %v10437_v21, %v17145_v33  ;;  %v10438_v24 = vpop.f32.mrb[182].mxu0  ;;  %11299 = vmatpush3.bf16.msra.mxu1 %v11298_v57 }
 0x8a9   : > { %v10439_v7 = vpop.f32.mrb[183].mxu0  ;;  %11300 = vmatprep.subr.bf16.mxu1 %v11675_v4 }
 0x8aa   : > { %v10440_v37 = vadd.f32 %v10439_v7, %v10438_v24 }
 0x8ac   : > { %v9060_v44 = vadd.f32 %v10440_v37, %v17148_v42  ;;  %v10441_v31 = vpop.f32.mrb[184].mxu0 }
 0x8ad   : > { %v10442_v8 = vpop.f32.mrb[185].mxu0 }
 0x8ae   : > { %v11301_v51 = vpack.c.bf16 %v9060_v44, %v9055_v26  ;;  %v10443_v29 = vadd.f32 %v10442_v8, %v10441_v31 }
 0x8b0   : > { %v9065_v45 = vadd.f32 %v10443_v29, %v17151_v19  ;;  %v10444_v39 = vpop.f32.mrb[186].mxu0  ;;  %11302 = vmatpush3.bf16.msra.mxu1 %v11301_v51 }
 0x8b1   : > { %v10445_v18 = vpop.f32.mrb[187].mxu0  ;;  %11303 = vmatprep.subr.bf16.mxu1 %v11675_v4 }
 0x8b2   : > { %v10446_v33 = vadd.f32 %v10445_v18, %v10444_v39 }
 0x8b4   : > { %v9070_v43 = vadd.f32 %v10446_v33, %v17154_v34  ;;  %v10447_v6 = vpop.f32.mrb[188].mxu0  ;;  %v11677_v34 = vmov 1.0  }
 0x8b5   : > { %v10448_v49 = vpop.f32.mrb[189].mxu0 }
 0x8b6   : > { %v11304_v23 = vpack.c.bf16 %v9070_v43, %v9065_v45  ;;  %v10449_v48 = vadd.f32 %v10448_v49, %v10447_v6 }
 0x8b8   : > { %v9075_v42 = vadd.f32 %v10449_v48, %v17157_v52  ;;  %v10450_v27 = vpop.f32.mrb[190].mxu0  ;;  %11305 = vmatpush3.bf16.msra.mxu1 %v11304_v23  ;;  %v9163_v52 = vld [vmem:[%s17240_s11] sm:$0xff] }
 0x8b9   : > { %v10451_v28 = vpop.f32.mrb[191].mxu0  ;;  %11306 = vmatprep.subr.bf16.mxu1 %v11675_v4 }
 0x8ba   : > { %v10452_v19 = vadd.f32 %v10451_v28, %v10450_v27 }
 0x8bc   : > { %v9080_v38 = vadd.f32 %v10452_v19, %v17160_v61  ;;  %v9164_v61 = vld [vmem:[%s17240_s11 + $0x8] sm:$0xff] }
 0x8bd   : > { %v11310_v0 = vpack.c.bf16 %v9164_v61, %v9163_v52 }
 0x8be   : > { %v11307_v11 = vpack.c.bf16 %v9080_v38, %v9075_v42 }
 0x8c0   : > { %11308 = vmatpush3.bf16.msra.mxu1 %v11307_v11 }
 0x8c1   : > { %11309 = vmatprep.subr.bf16.mxu1 %v11675_v4 }
 0x8c3   : > { %10511 = vmatmul.mubr.msk.f32.vlgmr.msra.gmra.mrb[160].mxu1 %vm9083_vm2, %v11677_v34 }
 0x8c4   : > { %10521 = vmatprep.mubr.msk.f32.mxu1 %vm11676_vm13, %v17112_v59  ;;  %11311 = vmatpush3.bf16.msra.mxu1 %v11310_v0 }
 0x8c5   : > { %11312 = vmatprep.subr.bf16.mxu1 %v11675_v4 }
 0x8c8   : > { %11314 = vmatpush3.bf16.msra.mxu1 %v11313_v41 }
 0x8c9   : > { %11315 = vmatprep.subr.bf16.mxu1 %v11675_v4  ;;  %v9250_v4 = vld [vmem:[%s17242_s13 + $0x8] sm:$0xff] }
 0x8ca   : > { %v11316_v16 = vpack.c.bf16 %v9250_v4, %v9249_v17 }
 0x996   : > { %v9158_v15 = vpop.f32.mrb[160].mxu1 }
 0x997   : > { %v9159_v32 = vadd.f32 %v9724_v40, %v9158_v15  ;;  %v10512_v1 = vpop.f32.mrb[161].mxu1 }
 0x999   : > { %11652 = vtanh.f32 %v9159_v32 }
 0x9a3   : > { %v11653_v10 = vpop.eup %11652 }
 0x9a4   : > { %10522 = vmatmul.mubr.msk.f32.vlgmr.msra.gmra.mrb[162].mxu1 %vm9174_vm6, %v11653_v10 }
 0x9a5   : > { %10528 = vmatprep.mubr.msk.f32.mxu1 %vm11676_vm13, %v17112_v59  ;;  %11317 = vmatpush3.bf16.msra.mxu1 %v11316_v16 }
 0xa77   : > { %v9244_v13 = vpop.f32.mrb[162].mxu1 }
 0xa78   : > { %v9245_v35 = vadd.f32 %v9726_v58, %v9244_v13  ;;  %v10523_v47 = vpop.f32.mrb[163].mxu1 }
 0xa7a   : > { %11654 = vtanh.f32 %v9245_v35 }
 0xa84   : > { %v11655_v59 = vpop.eup %11654 }
 0xa85   : > { %10529 = vmatmul.mubr.msk.f32.vlgmr.msra.gmra.mrb[164].mxu1 %vm9258_vm4, %v11655_v59 }
 0xb58   : > { %v9328_v53 = vpop.f32.mrb[164].mxu1 }
 0xb59   : > { %v9329_v56 = vadd.f32 %v9728_v46, %v9328_v53  ;;  %v10530_v30 = vpop.f32.mrb[165].mxu1 }
 0xb5b   : > { %v9730_v25 = vmul.f32 -1.442695, %v9329_v56 }
 0xb5d   : > { %11656 = vpow2.f32 %v9730_v25 }
 0xb67   : > { %v11657_v5 = vpop.eup %11656 }
 0xb68   : > { %v9335_v60 = vadd.f32 1.0, %v11657_v5 }
 0xb6a   : > { %11658 = vrcp.f32 %v9335_v60 }
 0xb74   : > { %v11659_v3 = vpop.eup %11658 }
 0xb75   : > { %9339 = vst.msk [vmem:[%s494_s30] sm:$0xf] %vm9338_vm5, %v11659_v3 }
 0xb76 PF: > { %s25_s18 = sadd.s32 1, %s11670_s18  }
 0xb77   : > { %p22_p5 = scmp.ge.s32.totalorder %s25_s18, 4  }
 0xb79   :  { %24 = sbr.rel (!%p22_p5) target bundleno = 1 (0x1), region = 116 }

</bundles_post_ra>
